<compile_context>
chip_gen: v5e
topology: v5e:2x2
jax: 0.10.0
libtpu: 0.0.40
codegen_flags: <defaults>
</compile_context>

<pallas_src>
import functools
import math

import jax
import jax.numpy as jnp
from jax import lax
from jax.experimental import pallas as pl
from jax.experimental.pallas import tpu as pltpu

# ----------------------- configuration (mirrors TransAm.__init__) ----------
MAX_LENGTH = 10
H = 32
W = 32
OUTPUTS = 4
D_MODEL = H * W                    # assert d_model == h * w
FEATURE_SIZE = 32
NUM_LAYERS = 4
NHEAD = 4
HEAD_DIM = FEATURE_SIZE // NHEAD
DIM_FF = 2048                      # nn.TransformerEncoderLayer default
LN_EPS = 1e-5
BN_EPS = 1e-5
KSIZE = 5
STRIDE = 2


def conv2d_size_out(size, kernel_size=5, stride=2):
    return (size - (kernel_size - 1) - 1) // stride + 1


CONVW = conv2d_size_out(conv2d_size_out(conv2d_size_out(W)))
CONVH = conv2d_size_out(conv2d_size_out(conv2d_size_out(H)))
LINEAR_IN = CONVW * CONVH * 32     # == 32 (convh == convw == 1)


# ----------------------------- Pallas kernels ------------------------------
def _linear_kernel(x_ref, w_ref, scale_ref, shift_ref, o_ref, *, relu):
    # out = maybe_relu((x @ w) * scale + shift), scale/shift shape (1, N)
    y = jnp.dot(x_ref[...], w_ref[...], preferred_element_type=jnp.float32)
    y = y * scale_ref[...] + shift_ref[...]
    if relu:
        y = jnp.maximum(y, 0.0)
    o_ref[...] = y


def pallas_linear(x, w, scale, shift, relu=False, block_m=512):
    """Fused (x @ w) * scale + shift (+ ReLU), tiled over rows of x.

    scale / shift must already be shaped (1, N) (pre-packed).  The M axis is
    gridded and marked 'parallel' so v7x megacore can split it; blocks stay
    small so VMEM use is bounded even for large im2col matrices.
    """
    m, k = x.shape
    n = w.shape[1]
    bm = min(block_m, m)
    grid = (pl.cdiv(m, bm),)
    kern = functools.partial(_linear_kernel, relu=relu)
    return pl.pallas_call(
        kern,
        out_shape=jax.ShapeDtypeStruct((m, n), jnp.float32),
        grid=grid,
        in_specs=[
            pl.BlockSpec((bm, k), lambda i: (i, 0)),
            pl.BlockSpec((k, n), lambda i: (0, 0)),
            pl.BlockSpec((1, n), lambda i: (0, 0)),
            pl.BlockSpec((1, n), lambda i: (0, 0)),
        ],
        out_specs=pl.BlockSpec((bm, n), lambda i: (i, 0)),
        compiler_params=pltpu.CompilerParams(
            dimension_semantics=("parallel",)),
    )(x, w, scale, shift)


def _transformer_kernel(feats_ref, featw_ref, featb_ref, mask_ref,
                        winT_ref, winb_ref, woT_ref, wob_ref,
                        ln1g_ref, ln1b_ref, ln2g_ref, ln2b_ref,
                        w1T_ref, b1_ref, w2T_ref, b2_ref,
                        o_ref, state_ref, attn_ref, *, batch):
    """One grid step == one post-norm encoder layer (eval mode).

    State layout is batch-major (B*L, E) so per-batch rows are contiguous
    static slices; everything position-wise is batched over B*L.
    """
    layer = pl.program_id(0)
    L = MAX_LENGTH
    E = FEATURE_SIZE

    # prologue: to_feature projection, only once (layer 0).
    @pl.when(layer == 0)
    def _():
        state_ref[...] = (
            jnp.dot(feats_ref[...], featw_ref[...],
                    preferred_element_type=jnp.float32) + featb_ref[...])

    x = state_ref[...]                                            # (B*L, E)

    # ---- self attention -----------------------------------------------
    # fused QKV projection on the whole flattened matrix.
    qkv = (jnp.dot(x, winT_ref[0], preferred_element_type=jnp.float32)
           + winb_ref[0])                                         # (B*L, 3E)
    q = qkv[:, 0:E] * (1.0 / math.sqrt(HEAD_DIM))
    k = qkv[:, E:2 * E]
    v = qkv[:, 2 * E:3 * E]
    mask = mask_ref[...]

    # only the tiny (L, L) score blocks need per-(batch, head) handling.
    for b in range(batch):
        r0 = b * L
        qb = q[r0:r0 + L, :]
        kb = k[r0:r0 + L, :]
        vb = v[r0:r0 + L, :]
        for h in range(NHEAD):
            lo = h * HEAD_DIM
            qh = qb[:, lo:lo + HEAD_DIM]
            kh = kb[:, lo:lo + HEAD_DIM]
            vh = vb[:, lo:lo + HEAD_DIM]
            s = lax.dot_general(qh, kh, (((1,), (1,)), ((), ())),
                                preferred_element_type=jnp.float32) + mask
            s = s - jnp.max(s, axis=-1, keepdims=True)
            p = jnp.exp(s)
            p = p * pl.reciprocal(jnp.sum(p, axis=-1, keepdims=True),
                                  approx=True)
            attn_ref[r0:r0 + L, lo:lo + HEAD_DIM] = jnp.dot(
                p, vh, preferred_element_type=jnp.float32)

    # single output projection over all batches/heads + residual + LN1.
    proj = (jnp.dot(attn_ref[...], woT_ref[0],
                    preferred_element_type=jnp.float32) + wob_ref[0])
    y = x + proj
    mu = jnp.mean(y, axis=-1, keepdims=True)
    var = jnp.mean(jnp.square(y - mu), axis=-1, keepdims=True)
    y = (y - mu) * lax.rsqrt(var + LN_EPS) * ln1g_ref[0] + ln1b_ref[0]

    # ---- feed-forward (bf16 weights / activations, f32 accumulation) ----
    h1 = (jnp.dot(y.astype(jnp.bfloat16), w1T_ref[0],
                  preferred_element_type=jnp.float32) + b1_ref[0])
    h1 = jnp.maximum(h1, 0.0)
    h2 = (jnp.dot(h1.astype(jnp.bfloat16), w2T_ref[0],
                  preferred_element_type=jnp.float32) + b2_ref[0])
    z = y + h2
    mu2 = jnp.mean(z, axis=-1, keepdims=True)
    var2 = jnp.mean(jnp.square(z - mu2), axis=-1, keepdims=True)
    z = (z - mu2) * lax.rsqrt(var2 + LN_EPS) * ln2g_ref[0] + ln2b_ref[0]

    # TODO(synk): dropout layers are identity (eval mode only).
    state_ref[...] = z
    o_ref[...] = z


def pallas_transformer(feats_b, mask, pk, batch):
    """to_feature + 4 fused encoder layers in one gridded pallas_call."""
    BL = feats_b.shape[0]
    E = FEATURE_SIZE
    FF = DIM_FF
    L = MAX_LENGTH

    def full_spec(shp):
        return pl.BlockSpec(shp, lambda l: (0,) * len(shp))

    def layer_spec(d1, d2):
        return pl.BlockSpec((1, d1, d2), lambda l: (l, 0, 0))

    kern = functools.partial(_transformer_kernel, batch=batch)
    return pl.pallas_call(
        kern,
        out_shape=jax.ShapeDtypeStruct((BL, E), jnp.float32),
        grid=(NUM_LAYERS,),
        in_specs=[
            full_spec((BL, LINEAR_IN)),      # conv features (batch-major)
            full_spec((LINEAR_IN, E)),       # to_feature weight (pre-T)
            full_spec((1, E)),               # to_feature bias
            full_spec((L, L)),               # causal mask
            layer_spec(E, 3 * E),            # fused in_proj weight (pre-T)
            layer_spec(1, 3 * E),            # in_proj bias
            layer_spec(E, E),                # out_proj weight (pre-T)
            layer_spec(1, E),                # out_proj bias
            layer_spec(1, E),                # ln1 gamma
            layer_spec(1, E),                # ln1 beta
            layer_spec(1, E),                # ln2 gamma
            layer_spec(1, E),                # ln2 beta
            layer_spec(E, FF),               # ffn w1 (pre-T, bf16)
            layer_spec(1, FF),               # ffn b1
            layer_spec(FF, E),               # ffn w2 (pre-T, bf16)
            layer_spec(1, E),                # ffn b2
        ],
        out_specs=full_spec((BL, E)),
        scratch_shapes=[pltpu.VMEM((BL, E), jnp.float32),   # sequence state
                        pltpu.VMEM((BL, E), jnp.float32)],  # attention out
        compiler_params=pltpu.CompilerParams(
            dimension_semantics=("arbitrary",)),
    )(feats_b, pk['feat_wT'], pk['feat_b'], mask,
      pk['win_T'], pk['win_b'], pk['wo_T'], pk['wo_b'],
      pk['ln1_g'], pk['ln1_b'], pk['ln2_g'], pk['ln2_b'],
      pk['w1_T'], pk['b1'], pk['w2_T'], pk['b2'])


# ------------------------------ glue (plain JAX) ---------------------------
def im2col_nhwc(x, k, stride):
    # TODO(synk): patch extraction stays as XLA glue; an in-kernel pl.ds
    # gather-based im2col is not implemented here.
    n, h, w, c = x.shape
    oh = (h - k) // stride + 1
    ow = (w - k) // stride + 1
    cols = []
    for i in range(k):
        for j in range(k):
            cols.append(x[:, i:i + stride * oh:stride,
                          j:j + stride * ow:stride, :])
    p = jnp.stack(cols, axis=3)                      # (n, oh, ow, k*k, c)
    return p.reshape(n * oh * ow, k * k * c), oh, ow


def conv_bn_relu(x, blk):
    """Conv2d(k=5, s=2, valid) + BatchNorm(eval) + ReLU, NHWC, on the MXU."""
    patches, oh, ow = im2col_nhwc(x, KSIZE, STRIDE)
    y = pallas_linear(patches, blk['w2d'], blk['scale'], blk['shift'],
                      relu=True)
    n = x.shape[0]
    oc = blk['w2d'].shape[1]
    return y.reshape(n, oh, ow, oc)                  # stays NHWC


def make_positional_encoding(length, d_model):
    position = jnp.arange(length, dtype=jnp.float32)[:, None]
    div_term = jnp.exp(jnp.arange(0, d_model, 2, dtype=jnp.float32)
                       * (-math.log(10000.0) / d_model))
    pe = jnp.zeros((length, d_model), jnp.float32)
    pe = pe.at[:, 0::2].set(jnp.sin(position * div_term))
    pe = pe.at[:, 1::2].set(jnp.cos(position * div_term))
    return pe


def causal_mask(sz):
    i = jnp.arange(sz)[:, None]
    j = jnp.arange(sz)[None, :]
    return jnp.where(j <= i, 0.0, -1e30).astype(jnp.float32)


def init_params(key):
    """Parameters in the original PyTorch layouts."""
    ks = iter(jax.random.split(key, 128))

    def nrm(shape, scale=0.05):
        return scale * jax.random.normal(next(ks), shape, jnp.float32)

    def conv_block(ic, oc):
        return {
            'w': nrm((oc, ic, KSIZE, KSIZE)), 'b': nrm((oc,)),
            'bn_g': 1.0 + nrm((oc,)), 'bn_b': nrm((oc,)),
            'bn_mean': nrm((oc,)),
            'bn_var': jax.random.uniform(next(ks), (oc,), jnp.float32, 0.5, 1.5),
        }

    p = {
        'conv1': conv_block(3, 16),
        'conv2': conv_block(16, 32),
        'conv3': conv_block(32, 32),
        'feat_w': nrm((FEATURE_SIZE, LINEAR_IN)), 'feat_b': nrm((FEATURE_SIZE,)),
        'head_w': nrm((OUTPUTS, FEATURE_SIZE * MAX_LENGTH)), 'head_b': nrm((OUTPUTS,)),
    }
    layers = []
    for _ in range(NUM_LAYERS):
        layers.append({
            'in_proj_w': nrm((3 * FEATURE_SIZE, FEATURE_SIZE)),
            'in_proj_b': nrm((3 * FEATURE_SIZE,)),
            'out_proj_w': nrm((FEATURE_SIZE, FEATURE_SIZE)),
            'out_proj_b': nrm((FEATURE_SIZE,)),
            'ln1_g': 1.0 + nrm((FEATURE_SIZE,)), 'ln1_b': nrm((FEATURE_SIZE,)),
            'ln2_g': 1.0 + nrm((FEATURE_SIZE,)), 'ln2_b': nrm((FEATURE_SIZE,)),
            'lin1_w': nrm((DIM_FF, FEATURE_SIZE)), 'lin1_b': nrm((DIM_FF,)),
            'lin2_w': nrm((FEATURE_SIZE, DIM_FF)), 'lin2_b': nrm((FEATURE_SIZE,)),
        })
    p['layers'] = layers
    return p


def pack_params(p):
    """One-time repack: transpose/stack/fold everything into kernel layouts."""
    E, FF = FEATURE_SIZE, DIM_FF

    def conv_pack(blk):
        oc, ic, k, _ = blk['w'].shape
        # NHWC im2col ordering: (kh, kw, ic) x oc
        w2d = jnp.transpose(blk['w'], (2, 3, 1, 0)).reshape(k * k * ic, oc)
        scale = blk['bn_g'] / jnp.sqrt(blk['bn_var'] + BN_EPS)
        shift = (blk['b'] - blk['bn_mean']) * scale + blk['bn_b']
        return {'w2d': w2d,
                'scale': scale.reshape(1, oc),
                'shift': shift.reshape(1, oc)}

    layers = p['layers']
    return {
        'conv1': conv_pack(p['conv1']),
        'conv2': conv_pack(p['conv2']),
        'conv3': conv_pack(p['conv3']),
        'feat_wT': p['feat_w'].T,                              # (LIN_IN, F)
        'feat_b': p['feat_b'].reshape(1, FEATURE_SIZE),
        'head_wT': p['head_w'].T,                              # (F*L, OUT)
        'head_scale': jnp.ones((1, OUTPUTS), jnp.float32),
        'head_shift': p['head_b'].reshape(1, OUTPUTS),
        'win_T': jnp.stack([lp['in_proj_w'].T for lp in layers]),
        'win_b': jnp.stack([lp['in_proj_b'].reshape(1, 3 * E) for lp in layers]),
        'wo_T': jnp.stack([lp['out_proj_w'].T for lp in layers]),
        'wo_b': jnp.stack([lp['out_proj_b'].reshape(1, E) for lp in layers]),
        'ln1_g': jnp.stack([lp['ln1_g'].reshape(1, E) for lp in layers]),
        'ln1_b': jnp.stack([lp['ln1_b'].reshape(1, E) for lp in layers]),
        'ln2_g': jnp.stack([lp['ln2_g'].reshape(1, E) for lp in layers]),
        'ln2_b': jnp.stack([lp['ln2_b'].reshape(1, E) for lp in layers]),
        'w1_T': jnp.stack([lp['lin1_w'].T for lp in layers]).astype(jnp.bfloat16),
        'b1': jnp.stack([lp['lin1_b'].reshape(1, FF) for lp in layers]),
        'w2_T': jnp.stack([lp['lin2_w'].T for lp in layers]).astype(jnp.bfloat16),
        'b2': jnp.stack([lp['lin2_b'].reshape(1, E) for lp in layers]),
    }


def transam_forward(src, pk, mask, pe):
    """src: (MAX_LENGTH * B, 3, H, W) float32, NCHW like PyTorch."""
    lb = src.shape[0]
    b = lb // MAX_LENGTH
    # src.unsqueeze(1).view(max_length, -1, C, H, W) + positional encoding
    x = src.reshape(MAX_LENGTH, b, 3, H, W) + pe.reshape(MAX_LENGTH, 1, 1, H, W)
    # NHWC frame batch (frame order stays L-major, matching the PyTorch view).
    frames = x.transpose(0, 1, 3, 4, 2).reshape(MAX_LENGTH * b, H, W, 3)

    y = conv_bn_relu(frames, pk['conv1'])
    y = conv_bn_relu(y, pk['conv2'])
    y = conv_bn_relu(y, pk['conv3'])
    # x.view(x.size(0), -1): convh == convw == 1 so NHWC flatten is identical.
    feats = y.reshape(MAX_LENGTH * b, LINEAR_IN)

    # reorder L-major rows -> batch-major rows for the fused transformer
    # kernel (tiny 2.5 KB relayout).
    feats_b = feats.reshape(MAX_LENGTH, b, LINEAR_IN).transpose(1, 0, 2)
    feats_b = feats_b.reshape(b * MAX_LENGTH, LINEAR_IN)

    state = pallas_transformer(feats_b, mask, pk, batch=b)     # (b*L, F)

    # back to (L, B, F), then reproduce PyTorch's output.view(output.shape[1], -1)
    # quirk exactly (it interleaves sequence positions across batch rows) —
    # this is why the head projection is not folded into the fused kernel.
    seq = state.reshape(b, MAX_LENGTH, FEATURE_SIZE).transpose(1, 0, 2)
    flat = seq.reshape(b, MAX_LENGTH * FEATURE_SIZE)
    return pallas_linear(flat, pk['head_wT'], pk['head_scale'], pk['head_shift'])


if __name__ == "__main__":
    key = jax.random.PRNGKey(0)
    pkey, xkey = jax.random.split(key)
    params = init_params(pkey)
    packed = pack_params(params)          # one-time weight repack (outside jit)

    B = 2
    src = jax.random.normal(xkey, (MAX_LENGTH * B, 3, H, W), jnp.float32)
    mask = causal_mask(MAX_LENGTH)
    pe = make_positional_encoding(MAX_LENGTH, D_MODEL)

    fwd = jax.jit(transam_forward)
    out = jax.block_until_ready(fwd(src, packed, mask, pe))

    assert out.shape == (B, OUTPUTS), out.shape
    assert bool(jnp.all(jnp.isfinite(out)))
    print("KERNEL_OK")
</pallas_src>

<mosaic_0001>
module attributes {stable_mosaic.version = 11 : i64} {
  func.func @_linear_kernel(%arg0: i32, %arg1: memref<512x75xf32, #tpu.memory_space<vmem>>, %arg2: memref<75x16xf32, #tpu.memory_space<vmem>>, %arg3: memref<1x16xf32, #tpu.memory_space<vmem>>, %arg4: memref<1x16xf32, #tpu.memory_space<vmem>>, %arg5: memref<512x16xf32, #tpu.memory_space<vmem>>) attributes {dimension_semantics = [#tpu.dimension_semantics<parallel>], iteration_bounds = array<i64: 8>, scalar_prefetch = 0 : i64, scratch_operands = 0 : i64, tpu.core_type = #tpu.core_type<tc>, window_params = [{transform_indices = @transform_0, window_bounds = array<i64: 512, 75>}, {pipeline_mode = #tpu.pipeline_mode<synchronous>, transform_indices = @transform_1, window_bounds = array<i64: 75, 16>}, {pipeline_mode = #tpu.pipeline_mode<synchronous>, transform_indices = @transform_2, window_bounds = array<i64: 1, 16>}, {pipeline_mode = #tpu.pipeline_mode<synchronous>, transform_indices = @transform_3, window_bounds = array<i64: 1, 16>}, {transform_indices = @transform_4, window_bounds = array<i64: 512, 16>}]} {
    %c0 = arith.constant 0 : index
    %c0_0 = arith.constant 0 : index
    %0 = vector.load %arg1[%c0, %c0_0] : memref<512x75xf32, #tpu.memory_space<vmem>>, vector<512x75xf32>
    %c0_1 = arith.constant 0 : index
    %c0_2 = arith.constant 0 : index
    %1 = vector.load %arg2[%c0_1, %c0_2] : memref<75x16xf32, #tpu.memory_space<vmem>>, vector<75x16xf32>
    %cst = arith.constant dense<0.000000e+00> : vector<512x16xf32>
    %2 = tpu.matmul %0, %1, %cst {dimension_numbers = #tpu.dot_dimension_numbers<[1], [0], [0], [1], [0, 0, 1, 1], [], []>} : vector<512x75xf32>, vector<75x16xf32>, vector<512x16xf32> -> vector<512x16xf32>
    %c0_3 = arith.constant 0 : index
    %c0_4 = arith.constant 0 : index
    %3 = vector.load %arg3[%c0_3, %c0_4] : memref<1x16xf32, #tpu.memory_space<vmem>>, vector<1x16xf32>
    %4 = vector.broadcast %3 : vector<1x16xf32> to vector<512x16xf32>
    %5 = arith.mulf %2, %4 : vector<512x16xf32>
    %c0_5 = arith.constant 0 : index
    %c0_6 = arith.constant 0 : index
    %6 = vector.load %arg4[%c0_5, %c0_6] : memref<1x16xf32, #tpu.memory_space<vmem>>, vector<1x16xf32>
    %7 = vector.broadcast %6 : vector<1x16xf32> to vector<512x16xf32>
    %8 = arith.addf %5, %7 : vector<512x16xf32>
    %cst_7 = arith.constant 0.000000e+00 : f32
    %9 = vector.broadcast %cst_7 : f32 to vector<512x16xf32>
    %10 = arith.maximumf %8, %9 : vector<512x16xf32>
    %c0_8 = arith.constant 0 : index
    %c0_9 = arith.constant 0 : index
    %11 = vector.load %arg5[%c0_8, %c0_9] : memref<512x16xf32, #tpu.memory_space<vmem>>, vector<512x16xf32>
    tpu.vector_store %arg5[%c0_8, %c0_9], %10 {strides = array<i32>} : memref<512x16xf32, #tpu.memory_space<vmem>>, vector<512x16xf32>,
    return
  }
  func.func @transform_0(%arg0: i32) -> (i32, i32) {
    %c0_i32 = arith.constant 0 : i32
    %c0_i32_0 = arith.constant 0 : i32
    return %arg0, %c0_i32 : i32, i32
  }
  func.func @transform_1(%arg0: i32) -> (i32, i32) {
    %c0_i32 = arith.constant 0 : i32
    %c0_i32_0 = arith.constant 0 : i32
    %c0_i32_1 = arith.constant 0 : i32
    return %c0_i32, %c0_i32_0 : i32, i32
  }
  func.func @transform_2(%arg0: i32) -> (i32, i32) {
    %c0_i32 = arith.constant 0 : i32
    %c0_i32_0 = arith.constant 0 : i32
    %c0_i32_1 = arith.constant 0 : i32
    return %c0_i32, %c0_i32_0 : i32, i32
  }
  func.func @transform_3(%arg0: i32) -> (i32, i32) {
    %c0_i32 = arith.constant 0 : i32
    %c0_i32_0 = arith.constant 0 : i32
    %c0_i32_1 = arith.constant 0 : i32
    return %c0_i32, %c0_i32_0 : i32, i32
  }
  func.func @transform_4(%arg0: i32) -> (i32, i32) {
    %c0_i32 = arith.constant 0 : i32
    %c0_i32_0 = arith.constant 0 : i32
    return %arg0, %c0_i32 : i32, i32
  }
}

module attributes {stable_mosaic.version = 11 : i64} {
  func.func @_linear_kernel(%arg0: i32, %arg1: memref<500x400xf32, #tpu.memory_space<vmem>>, %arg2: memref<400x32xf32, #tpu.memory_space<vmem>>, %arg3: memref<1x32xf32, #tpu.memory_space<vmem>>, %arg4: memref<1x32xf32, #tpu.memory_space<vmem>>, %arg5: memref<500x32xf32, #tpu.memory_space<vmem>>) attributes {dimension_semantics = [#tpu.dimension_semantics<parallel>], iteration_bounds = array<i64: 1>, scalar_prefetch = 0 : i64, scratch_operands = 0 : i64, tpu.core_type = #tpu.core_type<tc>, window_params = [{transform_indices = @transform_0, window_bounds = array<i64: 500, 400>}, {pipeline_mode = #tpu.pipeline_mode<synchronous>, transform_indices = @transform_1, window_bounds = array<i64: 400, 32>}, {pipeline_mode = #tpu.pipeline_mode<synchronous>, transform_indices = @transform_2, window_bounds = array<i64: 1, 32>}, {pipeline_mode = #tpu.pipeline_mode<synchronous>, transform_indices = @transform_3, window_bounds = array<i64: 1, 32>}, {transform_indices = @transform_4, window_bounds = array<i64: 500, 32>}]} {
    %c0 = arith.constant 0 : index
    %c0_0 = arith.constant 0 : index
    %0 = vector.load %arg1[%c0, %c0_0] : memref<500x400xf32, #tpu.memory_space<vmem>>, vector<500x400xf32>
    %c0_1 = arith.constant 0 : index
    %c0_2 = arith.constant 0 : index
    %1 = vector.load %arg2[%c0_1, %c0_2] : memref<400x32xf32, #tpu.memory_space<vmem>>, vector<400x32xf32>
    %cst = arith.constant dense<0.000000e+00> : vector<500x32xf32>
    %2 = tpu.matmul %0, %1, %cst {dimension_numbers = #tpu.dot_dimension_numbers<[1], [0], [0], [1], [0, 0, 1, 1], [], []>} : vector<500x400xf32>, vector<400x32xf32>, vector<500x32xf32> -> vector<500x32xf32>
    %c0_3 = arith.constant 0 : index
    %c0_4 = arith.constant 0 : index
    %3 = vector.load %arg3[%c0_3, %c0_4] : memref<1x32xf32, #tpu.memory_space<vmem>>, vector<1x32xf32>
    %4 = vector.broadcast %3 : vector<1x32xf32> to vector<500x32xf32>
    %5 = arith.mulf %2, %4 : vector<500x32xf32>
    %c0_5 = arith.constant 0 : index
    %c0_6 = arith.constant 0 : index
    %6 = vector.load %arg4[%c0_5, %c0_6] : memref<1x32xf32, #tpu.memory_space<vmem>>, vector<1x32xf32>
    %7 = vector.broadcast %6 : vector<1x32xf32> to vector<500x32xf32>
    %8 = arith.addf %5, %7 : vector<500x32xf32>
    %cst_7 = arith.constant 0.000000e+00 : f32
    %9 = vector.broadcast %cst_7 : f32 to vector<500x32xf32>
    %10 = arith.maximumf %8, %9 : vector<500x32xf32>
    %c0_8 = arith.constant 0 : index
    %c0_9 = arith.constant 0 : index
    %11 = vector.load %arg5[%c0_8, %c0_9] : memref<500x32xf32, #tpu.memory_space<vmem>>, vector<500x32xf32>
    tpu.vector_store %arg5[%c0_8, %c0_9], %10 {strides = array<i32>} : memref<500x32xf32, #tpu.memory_space<vmem>>, vector<500x32xf32>,
    return
  }
  func.func @transform_0(%arg0: i32) -> (i32, i32) {
    %c0_i32 = arith.constant 0 : i32
    %c0_i32_0 = arith.constant 0 : i32
    return %arg0, %c0_i32 : i32, i32
  }
  func.func @transform_1(%arg0: i32) -> (i32, i32) {
    %c0_i32 = arith.constant 0 : i32
    %c0_i32_0 = arith.constant 0 : i32
    %c0_i32_1 = arith.constant 0 : i32
    return %c0_i32, %c0_i32_0 : i32, i32
  }
  func.func @transform_2(%arg0: i32) -> (i32, i32) {
    %c0_i32 = arith.constant 0 : i32
    %c0_i32_0 = arith.constant 0 : i32
    %c0_i32_1 = arith.constant 0 : i32
    return %c0_i32, %c0_i32_0 : i32, i32
  }
  func.func @transform_3(%arg0: i32) -> (i32, i32) {
    %c0_i32 = arith.constant 0 : i32
    %c0_i32_0 = arith.constant 0 : i32
    %c0_i32_1 = arith.constant 0 : i32
    return %c0_i32, %c0_i32_0 : i32, i32
  }
  func.func @transform_4(%arg0: i32) -> (i32, i32) {
    %c0_i32 = arith.constant 0 : i32
    %c0_i32_0 = arith.constant 0 : i32
    return %arg0, %c0_i32 : i32, i32
  }
}

module attributes {stable_mosaic.version = 11 : i64} {
  func.func @_linear_kernel(%arg0: i32, %arg1: memref<20x800xf32, #tpu.memory_space<vmem>>, %arg2: memref<800x32xf32, #tpu.memory_space<vmem>>, %arg3: memref<1x32xf32, #tpu.memory_space<vmem>>, %arg4: memref<1x32xf32, #tpu.memory_space<vmem>>, %arg5: memref<20x32xf32, #tpu.memory_space<vmem>>) attributes {dimension_semantics = [#tpu.dimension_semantics<parallel>], iteration_bounds = array<i64: 1>, scalar_prefetch = 0 : i64, scratch_operands = 0 : i64, tpu.core_type = #tpu.core_type<tc>, window_params = [{transform_indices = @transform_0, window_bounds = array<i64: 20, 800>}, {pipeline_mode = #tpu.pipeline_mode<synchronous>, transform_indices = @transform_1, window_bounds = array<i64: 800, 32>}, {pipeline_mode = #tpu.pipeline_mode<synchronous>, transform_indices = @transform_2, window_bounds = array<i64: 1, 32>}, {pipeline_mode = #tpu.pipeline_mode<synchronous>, transform_indices = @transform_3, window_bounds = array<i64: 1, 32>}, {transform_indices = @transform_4, window_bounds = array<i64: 20, 32>}]} {
    %c0 = arith.constant 0 : index
    %c0_0 = arith.constant 0 : index
    %0 = vector.load %arg1[%c0, %c0_0] : memref<20x800xf32, #tpu.memory_space<vmem>>, vector<20x800xf32>
    %c0_1 = arith.constant 0 : index
    %c0_2 = arith.constant 0 : index
    %1 = vector.load %arg2[%c0_1, %c0_2] : memref<800x32xf32, #tpu.memory_space<vmem>>, vector<800x32xf32>
    %cst = arith.constant dense<0.000000e+00> : vector<20x32xf32>
    %2 = tpu.matmul %0, %1, %cst {dimension_numbers = #tpu.dot_dimension_numbers<[1], [0], [0], [1], [0, 0, 1, 1], [], []>} : vector<20x800xf32>, vector<800x32xf32>, vector<20x32xf32> -> vector<20x32xf32>
    %c0_3 = arith.constant 0 : index
    %c0_4 = arith.constant 0 : index
    %3 = vector.load %arg3[%c0_3, %c0_4] : memref<1x32xf32, #tpu.memory_space<vmem>>, vector<1x32xf32>
    %4 = vector.broadcast %3 : vector<1x32xf32> to vector<20x32xf32>
    %5 = arith.mulf %2, %4 : vector<20x32xf32>
    %c0_5 = arith.constant 0 : index
    %c0_6 = arith.constant 0 : index
    %6 = vector.load %arg4[%c0_5, %c0_6] : memref<1x32xf32, #tpu.memory_space<vmem>>, vector<1x32xf32>
    %7 = vector.broadcast %6 : vector<1x32xf32> to vector<20x32xf32>
    %8 = arith.addf %5, %7 : vector<20x32xf32>
    %cst_7 = arith.constant 0.000000e+00 : f32
    %9 = vector.broadcast %cst_7 : f32 to vector<20x32xf32>
    %10 = arith.maximumf %8, %9 : vector<20x32xf32>
    %c0_8 = arith.constant 0 : index
    %c0_9 = arith.constant 0 : index
    %11 = vector.load %arg5[%c0_8, %c0_9] : memref<20x32xf32, #tpu.memory_space<vmem>>, vector<20x32xf32>
    tpu.vector_store %arg5[%c0_8, %c0_9], %10 {strides = array<i32>} : memref<20x32xf32, #tpu.memory_space<vmem>>, vector<20x32xf32>,
    return
  }
  func.func @transform_0(%arg0: i32) -> (i32, i32) {
    %c0_i32 = arith.constant 0 : i32
    %c0_i32_0 = arith.constant 0 : i32
    return %arg0, %c0_i32 : i32, i32
  }
  func.func @transform_1(%arg0: i32) -> (i32, i32) {
    %c0_i32 = arith.constant 0 : i32
    %c0_i32_0 = arith.constant 0 : i32
    %c0_i32_1 = arith.constant 0 : i32
    return %c0_i32, %c0_i32_0 : i32, i32
  }
  func.func @transform_2(%arg0: i32) -> (i32, i32) {
    %c0_i32 = arith.constant 0 : i32
    %c0_i32_0 = arith.constant 0 : i32
    %c0_i32_1 = arith.constant 0 : i32
    return %c0_i32, %c0_i32_0 : i32, i32
  }
  func.func @transform_3(%arg0: i32) -> (i32, i32) {
    %c0_i32 = arith.constant 0 : i32
    %c0_i32_0 = arith.constant 0 : i32
    %c0_i32_1 = arith.constant 0 : i32
    return %c0_i32, %c0_i32_0 : i32, i32
  }
  func.func @transform_4(%arg0: i32) -> (i32, i32) {
    %c0_i32 = arith.constant 0 : i32
    %c0_i32_0 = arith.constant 0 : i32
    return %arg0, %c0_i32 : i32, i32
  }
}

module attributes {stable_mosaic.version = 11 : i64} {
  func.func @_transformer_kernel(%arg0: i32, %arg1: memref<20x32xf32, #tpu.memory_space<vmem>>, %arg2: memref<32x32xf32, #tpu.memory_space<vmem>>, %arg3: memref<1x32xf32, #tpu.memory_space<vmem>>, %arg4: memref<10x10xf32, #tpu.memory_space<vmem>>, %arg5: memref<1x32x96xf32, #tpu.memory_space<vmem>>, %arg6: memref<1x1x96xf32, #tpu.memory_space<vmem>>, %arg7: memref<1x32x32xf32, #tpu.memory_space<vmem>>, %arg8: memref<1x1x32xf32, #tpu.memory_space<vmem>>, %arg9: memref<1x1x32xf32, #tpu.memory_space<vmem>>, %arg10: memref<1x1x32xf32, #tpu.memory_space<vmem>>, %arg11: memref<1x1x32xf32, #tpu.memory_space<vmem>>, %arg12: memref<1x1x32xf32, #tpu.memory_space<vmem>>, %arg13: memref<1x32x2048xbf16, #tpu.memory_space<vmem>>, %arg14: memref<1x1x2048xf32, #tpu.memory_space<vmem>>, %arg15: memref<1x2048x32xbf16, #tpu.memory_space<vmem>>, %arg16: memref<1x1x32xf32, #tpu.memory_space<vmem>>, %arg17: memref<20x32xf32, #tpu.memory_space<vmem>>, %arg18: memref<20x32xf32, #tpu.memory_space<vmem>>, %arg19: memref<20x32xf32, #tpu.memory_space<vmem>>) attributes {dimension_semantics = [#tpu.dimension_semantics<arbitrary>], iteration_bounds = array<i64: 4>, scalar_prefetch = 0 : i64, scratch_operands = 2 : i64, tpu.core_type = #tpu.core_type<tc>, window_params = [{pipeline_mode = #tpu.pipeline_mode<synchronous>, transform_indices = @transform_0, window_bounds = array<i64: 20, 32>}, {pipeline_mode = #tpu.pipeline_mode<synchronous>, transform_indices = @transform_1, window_bounds = array<i64: 32, 32>}, {pipeline_mode = #tpu.pipeline_mode<synchronous>, transform_indices = @transform_2, window_bounds = array<i64: 1, 32>}, {pipeline_mode = #tpu.pipeline_mode<synchronous>, transform_indices = @transform_3, window_bounds = array<i64: 10, 10>}, {transform_indices = @transform_4, window_bounds = array<i64: 1, 32, 96>}, {transform_indices = @transform_5, window_bounds = array<i64: 1, 1, 96>}, {transform_indices = @transform_6, window_bounds = array<i64: 1, 32, 32>}, {transform_indices = @transform_7, window_bounds = array<i64: 1, 1, 32>}, {transform_indices = @transform_8, window_bounds = array<i64: 1, 1, 32>}, {transform_indices = @transform_9, window_bounds = array<i64: 1, 1, 32>}, {transform_indices = @transform_10, window_bounds = array<i64: 1, 1, 32>}, {transform_indices = @transform_11, window_bounds = array<i64: 1, 1, 32>}, {transform_indices = @transform_12, window_bounds = array<i64: 1, 32, 2048>}, {transform_indices = @transform_13, window_bounds = array<i64: 1, 1, 2048>}, {transform_indices = @transform_14, window_bounds = array<i64: 1, 2048, 32>}, {transform_indices = @transform_15, window_bounds = array<i64: 1, 1, 32>}, {pipeline_mode = #tpu.pipeline_mode<synchronous>, transform_indices = @transform_16, window_bounds = array<i64: 20, 32>}]} {
    %c0_i32 = arith.constant 0 : i32
    %0 = arith.cmpi eq, %arg0, %c0_i32 : i32
    %1 = arith.extui %0 : i1 to i32
    %c0_i32_0 = arith.constant 0 : i32
    %2 = arith.cmpi ne, %1, %c0_i32_0 : i32
    scf.if %2 {
      %c0_105 = arith.constant 0 : index
      %c0_106 = arith.constant 0 : index
      %241 = vector.load %arg1[%c0_105, %c0_106] : memref<20x32xf32, #tpu.memory_space<vmem>>, vector<20x32xf32>
      %c0_107 = arith.constant 0 : index
      %c0_108 = arith.constant 0 : index
      %242 = vector.load %arg2[%c0_107, %c0_108] : memref<32x32xf32, #tpu.memory_space<vmem>>, vector<32x32xf32>
      %cst_109 = arith.constant dense<0.000000e+00> : vector<20x32xf32>
      %243 = tpu.matmul %241, %242, %cst_109 {dimension_numbers = #tpu.dot_dimension_numbers<[1], [0], [0], [1], [0, 0, 1, 1], [], []>} : vector<20x32xf32>, vector<32x32xf32>, vector<20x32xf32> -> vector<20x32xf32>
      %c0_110 = arith.constant 0 : index
      %c0_111 = arith.constant 0 : index
      %244 = vector.load %arg3[%c0_110, %c0_111] : memref<1x32xf32, #tpu.memory_space<vmem>>, vector<1x32xf32>
      %245 = vector.broadcast %244 : vector<1x32xf32> to vector<20x32xf32>
      %246 = arith.addf %243, %245 : vector<20x32xf32>
      %c0_112 = arith.constant 0 : index
      %c0_113 = arith.constant 0 : index
      %247 = vector.load %arg18[%c0_112, %c0_113] : memref<20x32xf32, #tpu.memory_space<vmem>>, vector<20x32xf32>
      tpu.vector_store %arg18[%c0_112, %c0_113], %246 {strides = array<i32>} : memref<20x32xf32, #tpu.memory_space<vmem>>, vector<20x32xf32>,
    } else {
    }
    %c0 = arith.constant 0 : index
    %c0_1 = arith.constant 0 : index
    %3 = vector.load %arg18[%c0, %c0_1] : memref<20x32xf32, #tpu.memory_space<vmem>>, vector<20x32xf32>
    %c0_2 = arith.constant 0 : index
    %c0_3 = arith.constant 0 : index
    %c0_4 = arith.constant 0 : index
    %4 = vector.load %arg5[%c0_2, %c0_3, %c0_4] : memref<1x32x96xf32, #tpu.memory_space<vmem>>, vector<1x32x96xf32>
    %5 = vector.shape_cast %4 : vector<1x32x96xf32> to vector<32x96xf32>
    %cst = arith.constant dense<0.000000e+00> : vector<20x96xf32>
    %6 = tpu.matmul %3, %5, %cst {dimension_numbers = #tpu.dot_dimension_numbers<[1], [0], [0], [1], [0, 0, 1, 1], [], []>} : vector<20x32xf32>, vector<32x96xf32>, vector<20x96xf32> -> vector<20x96xf32>
    %c0_5 = arith.constant 0 : index
    %c0_6 = arith.constant 0 : index
    %c0_7 = arith.constant 0 : index
    %7 = vector.load %arg6[%c0_5, %c0_6, %c0_7] : memref<1x1x96xf32, #tpu.memory_space<vmem>>, vector<1x1x96xf32>
    %8 = vector.shape_cast %7 : vector<1x1x96xf32> to vector<1x96xf32>
    %9 = vector.broadcast %8 : vector<1x96xf32> to vector<20x96xf32>
    %10 = arith.addf %6, %9 : vector<20x96xf32>
    %11 = vector.extract_strided_slice %10 {offsets = [0, 0], sizes = [20, 32], strides = [1, 1]} : vector<20x96xf32> to vector<20x32xf32>
    %cst_8 = arith.constant 0.353553385 : f32
    %12 = vector.broadcast %cst_8 : f32 to vector<20x32xf32>
    %13 = arith.mulf %11, %12 : vector<20x32xf32>
    %14 = vector.extract_strided_slice %10 {offsets = [0, 32], sizes = [20, 32], strides = [1, 1]} : vector<20x96xf32> to vector<20x32xf32>
    %15 = vector.extract_strided_slice %10 {offsets = [0, 64], sizes = [20, 32], strides = [1, 1]} : vector<20x96xf32> to vector<20x32xf32>
    %c0_9 = arith.constant 0 : index
    %c0_10 = arith.constant 0 : index
    %16 = vector.load %arg4[%c0_9, %c0_10] : memref<10x10xf32, #tpu.memory_space<vmem>>, vector<10x10xf32>
    %17 = vector.extract_strided_slice %13 {offsets = [0, 0], sizes = [10, 32], strides = [1, 1]} : vector<20x32xf32> to vector<10x32xf32>
    %18 = vector.extract_strided_slice %14 {offsets = [0, 0], sizes = [10, 32], strides = [1, 1]} : vector<20x32xf32> to vector<10x32xf32>
    %19 = vector.extract_strided_slice %15 {offsets = [0, 0], sizes = [10, 32], strides = [1, 1]} : vector<20x32xf32> to vector<10x32xf32>
    %20 = vector.extract_strided_slice %17 {offsets = [0, 0], sizes = [10, 8], strides = [1, 1]} : vector<10x32xf32> to vector<10x8xf32>
    %21 = vector.extract_strided_slice %18 {offsets = [0, 0], sizes = [10, 8], strides = [1, 1]} : vector<10x32xf32> to vector<10x8xf32>
    %22 = vector.extract_strided_slice %19 {offsets = [0, 0], sizes = [10, 8], strides = [1, 1]} : vector<10x32xf32> to vector<10x8xf32>
    %cst_11 = arith.constant dense<0.000000e+00> : vector<10x10xf32>
    %23 = tpu.matmul %20, %21, %cst_11 {dimension_numbers = #tpu.dot_dimension_numbers<[1], [1], [0], [0], [0, 0, 1, 0], [], []>} : vector<10x8xf32>, vector<10x8xf32>, vector<10x10xf32> -> vector<10x10xf32>
    %24 = arith.addf %23, %16 : vector<10x10xf32>
    %cst_12 = arith.constant dense<0xFF800000> : vector<10xf32>
    %25 = vector.multi_reduction <maximumf>, %24, %cst_12 [1] : vector<10x10xf32> to vector<10xf32>
    %26 = vector.shape_cast %25 : vector<10xf32> to vector<10x1xf32>
    %27 = vector.broadcast %26 : vector<10x1xf32> to vector<10x10xf32>
    %28 = arith.subf %24, %27 : vector<10x10xf32>
    %29 = math.exp %28 : vector<10x10xf32>
    %cst_13 = arith.constant dense<0.000000e+00> : vector<10xf32>
    %30 = vector.multi_reduction <add>, %29, %cst_13 [1] : vector<10x10xf32> to vector<10xf32>
    %31 = vector.shape_cast %30 : vector<10xf32> to vector<10x1xf32>
    %32 = tpu.reciprocal %31 {approx = true} : vector<10x1xf32> -> vector<10x1xf32>
    %33 = vector.broadcast %32 : vector<10x1xf32> to vector<10x10xf32>
    %34 = arith.mulf %29, %33 : vector<10x10xf32>
    %cst_14 = arith.constant dense<0.000000e+00> : vector<10x8xf32>
    %35 = tpu.matmul %34, %22, %cst_14 {dimension_numbers = #tpu.dot_dimension_numbers<[1], [0], [0], [1], [0, 0, 1, 1], [], []>} : vector<10x10xf32>, vector<10x8xf32>, vector<10x8xf32> -> vector<10x8xf32>
    %c0_15 = arith.constant 0 : index
    %c0_16 = arith.constant 0 : index
    %36 = vector.load %arg19[%c0_15, %c0_16] : memref<20x32xf32, #tpu.memory_space<vmem>>, vector<10x8xf32>
    tpu.vector_store %arg19[%c0_15, %c0_16], %35 {strides = array<i32>} : memref<20x32xf32, #tpu.memory_space<vmem>>, vector<10x8xf32>,
    %37 = vector.extract_strided_slice %17 {offsets = [0, 8], sizes = [10, 8], strides = [1, 1]} : vector<10x32xf32> to vector<10x8xf32>
    %38 = vector.extract_strided_slice %18 {offsets = [0, 8], sizes = [10, 8], strides = [1, 1]} : vector<10x32xf32> to vector<10x8xf32>
    %39 = vector.extract_strided_slice %19 {offsets = [0, 8], sizes = [10, 8], strides = [1, 1]} : vector<10x32xf32> to vector<10x8xf32>
    %cst_17 = arith.constant dense<0.000000e+00> : vector<10x10xf32>
    %40 = tpu.matmul %37, %38, %cst_17 {dimension_numbers = #tpu.dot_dimension_numbers<[1], [1], [0], [0], [0, 0, 1, 0], [], []>} : vector<10x8xf32>, vector<10x8xf32>, vector<10x10xf32> -> vector<10x10xf32>
    %41 = arith.addf %40, %16 : vector<10x10xf32>
    %cst_18 = arith.constant dense<0xFF800000> : vector<10xf32>
    %42 = vector.multi_reduction <maximumf>, %41, %cst_18 [1] : vector<10x10xf32> to vector<10xf32>
    %43 = vector.shape_cast %42 : vector<10xf32> to vector<10x1xf32>
    %44 = vector.broadcast %43 : vector<10x1xf32> to vector<10x10xf32>
    %45 = arith.subf %41, %44 : vector<10x10xf32>
    %46 = math.exp %45 : vector<10x10xf32>
    %cst_19 = arith.constant dense<0.000000e+00> : vector<10xf32>
    %47 = vector.multi_reduction <add>, %46, %cst_19 [1] : vector<10x10xf32> to vector<10xf32>
    %48 = vector.shape_cast %47 : vector<10xf32> to vector<10x1xf32>
    %49 = tpu.reciprocal %48 {approx = true} : vector<10x1xf32> -> vector<10x1xf32>
    %50 = vector.broadcast %49 : vector<10x1xf32> to vector<10x10xf32>
    %51 = arith.mulf %46, %50 : vector<10x10xf32>
    %cst_20 = arith.constant dense<0.000000e+00> : vector<10x8xf32>
    %52 = tpu.matmul %51, %39, %cst_20 {dimension_numbers = #tpu.dot_dimension_numbers<[1], [0], [0], [1], [0, 0, 1, 1], [], []>} : vector<10x10xf32>, vector<10x8xf32>, vector<10x8xf32> -> vector<10x8xf32>
    %c0_21 = arith.constant 0 : index
    %c8 = arith.constant 8 : index
    %53 = vector.load %arg19[%c0_21, %c8] : memref<20x32xf32, #tpu.memory_space<vmem>>, vector<10x8xf32>
    tpu.vector_store %arg19[%c0_21, %c8], %52 {strides = array<i32>} : memref<20x32xf32, #tpu.memory_space<vmem>>, vector<10x8xf32>,
    %54 = vector.extract_strided_slice %17 {offsets = [0, 16], sizes = [10, 8], strides = [1, 1]} : vector<10x32xf32> to vector<10x8xf32>
    %55 = vector.extract_strided_slice %18 {offsets = [0, 16], sizes = [10, 8], strides = [1, 1]} : vector<10x32xf32> to vector<10x8xf32>
    %56 = vector.extract_strided_slice %19 {offsets = [0, 16], sizes = [10, 8], strides = [1, 1]} : vector<10x32xf32> to vector<10x8xf32>
    %cst_22 = arith.constant dense<0.000000e+00> : vector<10x10xf32>
    %57 = tpu.matmul %54, %55, %cst_22 {dimension_numbers = #tpu.dot_dimension_numbers<[1], [1], [0], [0], [0, 0, 1, 0], [], []>} : vector<10x8xf32>, vector<10x8xf32>, vector<10x10xf32> -> vector<10x10xf32>
    %58 = arith.addf %57, %16 : vector<10x10xf32>
    %cst_23 = arith.constant dense<0xFF800000> : vector<10xf32>
    %59 = vector.multi_reduction <maximumf>, %58, %cst_23 [1] : vector<10x10xf32> to vector<10xf32>
    %60 = vector.shape_cast %59 : vector<10xf32> to vector<10x1xf32>
    %61 = vector.broadcast %60 : vector<10x1xf32> to vector<10x10xf32>
    %62 = arith.subf %58, %61 : vector<10x10xf32>
    %63 = math.exp %62 : vector<10x10xf32>
    %cst_24 = arith.constant dense<0.000000e+00> : vector<10xf32>
    %64 = vector.multi_reduction <add>, %63, %cst_24 [1] : vector<10x10xf32> to vector<10xf32>
    %65 = vector.shape_cast %64 : vector<10xf32> to vector<10x1xf32>
    %66 = tpu.reciprocal %65 {approx = true} : vector<10x1xf32> -> vector<10x1xf32>
    %67 = vector.broadcast %66 : vector<10x1xf32> to vector<10x10xf32>
    %68 = arith.mulf %63, %67 : vector<10x10xf32>
    %cst_25 = arith.constant dense<0.000000e+00> : vector<10x8xf32>
    %69 = tpu.matmul %68, %56, %cst_25 {dimension_numbers = #tpu.dot_dimension_numbers<[1], [0], [0], [1], [0, 0, 1, 1], [], []>} : vector<10x10xf32>, vector<10x8xf32>, vector<10x8xf32> -> vector<10x8xf32>
    %c0_26 = arith.constant 0 : index
    %c16 = arith.constant 16 : index
    %70 = vector.load %arg19[%c0_26, %c16] : memref<20x32xf32, #tpu.memory_space<vmem>>, vector<10x8xf32>
    tpu.vector_store %arg19[%c0_26, %c16], %69 {strides = array<i32>} : memref<20x32xf32, #tpu.memory_space<vmem>>, vector<10x8xf32>,
    %71 = vector.extract_strided_slice %17 {offsets = [0, 24], sizes = [10, 8], strides = [1, 1]} : vector<10x32xf32> to vector<10x8xf32>
    %72 = vector.extract_strided_slice %18 {offsets = [0, 24], sizes = [10, 8], strides = [1, 1]} : vector<10x32xf32> to vector<10x8xf32>
    %73 = vector.extract_strided_slice %19 {offsets = [0, 24], sizes = [10, 8], strides = [1, 1]} : vector<10x32xf32> to vector<10x8xf32>
    %cst_27 = arith.constant dense<0.000000e+00> : vector<10x10xf32>
    %74 = tpu.matmul %71, %72, %cst_27 {dimension_numbers = #tpu.dot_dimension_numbers<[1], [1], [0], [0], [0, 0, 1, 0], [], []>} : vector<10x8xf32>, vector<10x8xf32>, vector<10x10xf32> -> vector<10x10xf32>
    %75 = arith.addf %74, %16 : vector<10x10xf32>
    %cst_28 = arith.constant dense<0xFF800000> : vector<10xf32>
    %76 = vector.multi_reduction <maximumf>, %75, %cst_28 [1] : vector<10x10xf32> to vector<10xf32>
    %77 = vector.shape_cast %76 : vector<10xf32> to vector<10x1xf32>
    %78 = vector.broadcast %77 : vector<10x1xf32> to vector<10x10xf32>
    %79 = arith.subf %75, %78 : vector<10x10xf32>
    %80 = math.exp %79 : vector<10x10xf32>
    %cst_29 = arith.constant dense<0.000000e+00> : vector<10xf32>
    %81 = vector.multi_reduction <add>, %80, %cst_29 [1] : vector<10x10xf32> to vector<10xf32>
    %82 = vector.shape_cast %81 : vector<10xf32> to vector<10x1xf32>
    %83 = tpu.reciprocal %82 {approx = true} : vector<10x1xf32> -> vector<10x1xf32>
    %84 = vector.broadcast %83 : vector<10x1xf32> to vector<10x10xf32>
    %85 = arith.mulf %80, %84 : vector<10x10xf32>
    %cst_30 = arith.constant dense<0.000000e+00> : vector<10x8xf32>
    %86 = tpu.matmul %85, %73, %cst_30 {dimension_numbers = #tpu.dot_dimension_numbers<[1], [0], [0], [1], [0, 0, 1, 1], [], []>} : vector<10x10xf32>, vector<10x8xf32>, vector<10x8xf32> -> vector<10x8xf32>
    %c0_31 = arith.constant 0 : index
    %c24 = arith.constant 24 : index
    %87 = vector.load %arg19[%c0_31, %c24] : memref<20x32xf32, #tpu.memory_space<vmem>>, vector<10x8xf32>
    tpu.vector_store %arg19[%c0_31, %c24], %86 {strides = array<i32>} : memref<20x32xf32, #tpu.memory_space<vmem>>, vector<10x8xf32>,
    %88 = vector.extract_strided_slice %13 {offsets = [10, 0], sizes = [10, 32], strides = [1, 1]} : vector<20x32xf32> to vector<10x32xf32>
    %89 = vector.extract_strided_slice %14 {offsets = [10, 0], sizes = [10, 32], strides = [1, 1]} : vector<20x32xf32> to vector<10x32xf32>
    %90 = vector.extract_strided_slice %15 {offsets = [10, 0], sizes = [10, 32], strides = [1, 1]} : vector<20x32xf32> to vector<10x32xf32>
    %91 = vector.extract_strided_slice %88 {offsets = [0, 0], sizes = [10, 8], strides = [1, 1]} : vector<10x32xf32> to vector<10x8xf32>
    %92 = vector.extract_strided_slice %89 {offsets = [0, 0], sizes = [10, 8], strides = [1, 1]} : vector<10x32xf32> to vector<10x8xf32>
    %93 = vector.extract_strided_slice %90 {offsets = [0, 0], sizes = [10, 8], strides = [1, 1]} : vector<10x32xf32> to vector<10x8xf32>
    %cst_32 = arith.constant dense<0.000000e+00> : vector<10x10xf32>
    %94 = tpu.matmul %91, %92, %cst_32 {dimension_numbers = #tpu.dot_dimension_numbers<[1], [1], [0], [0], [0, 0, 1, 0], [], []>} : vector<10x8xf32>, vector<10x8xf32>, vector<10x10xf32> -> vector<10x10xf32>
    %95 = arith.addf %94, %16 : vector<10x10xf32>
    %cst_33 = arith.constant dense<0xFF800000> : vector<10xf32>
    %96 = vector.multi_reduction <maximumf>, %95, %cst_33 [1] : vector<10x10xf32> to vector<10xf32>
    %97 = vector.shape_cast %96 : vector<10xf32> to vector<10x1xf32>
    %98 = vector.broadcast %97 : vector<10x1xf32> to vector<10x10xf32>
    %99 = arith.subf %95, %98 : vector<10x10xf32>
    %100 = math.exp %99 : vector<10x10xf32>
    %cst_34 = arith.constant dense<0.000000e+00> : vector<10xf32>
    %101 = vector.multi_reduction <add>, %100, %cst_34 [1] : vector<10x10xf32> to vector<10xf32>
    %102 = vector.shape_cast %101 : vector<10xf32> to vector<10x1xf32>
    %103 = tpu.reciprocal %102 {approx = true} : vector<10x1xf32> -> vector<10x1xf32>
    %104 = vector.broadcast %103 : vector<10x1xf32> to vector<10x10xf32>
    %105 = arith.mulf %100, %104 : vector<10x10xf32>
    %cst_35 = arith.constant dense<0.000000e+00> : vector<10x8xf32>
    %106 = tpu.matmul %105, %93, %cst_35 {dimension_numbers = #tpu.dot_dimension_numbers<[1], [0], [0], [1], [0, 0, 1, 1], [], []>} : vector<10x10xf32>, vector<10x8xf32>, vector<10x8xf32> -> vector<10x8xf32>
    %c10 = arith.constant 10 : index
    %c0_36 = arith.constant 0 : index
    %107 = vector.load %arg19[%c10, %c0_36] : memref<20x32xf32, #tpu.memory_space<vmem>>, vector<10x8xf32>
    tpu.vector_store %arg19[%c10, %c0_36], %106 {strides = array<i32>} : memref<20x32xf32, #tpu.memory_space<vmem>>, vector<10x8xf32>,
    %108 = vector.extract_strided_slice %88 {offsets = [0, 8], sizes = [10, 8], strides = [1, 1]} : vector<10x32xf32> to vector<10x8xf32>
    %109 = vector.extract_strided_slice %89 {offsets = [0, 8], sizes = [10, 8], strides = [1, 1]} : vector<10x32xf32> to vector<10x8xf32>
    %110 = vector.extract_strided_slice %90 {offsets = [0, 8], sizes = [10, 8], strides = [1, 1]} : vector<10x32xf32> to vector<10x8xf32>
    %cst_37 = arith.constant dense<0.000000e+00> : vector<10x10xf32>
    %111 = tpu.matmul %108, %109, %cst_37 {dimension_numbers = #tpu.dot_dimension_numbers<[1], [1], [0], [0], [0, 0, 1, 0], [], []>} : vector<10x8xf32>, vector<10x8xf32>, vector<10x10xf32> -> vector<10x10xf32>
    %112 = arith.addf %111, %16 : vector<10x10xf32>
    %cst_38 = arith.constant dense<0xFF800000> : vector<10xf32>
    %113 = vector.multi_reduction <maximumf>, %112, %cst_38 [1] : vector<10x10xf32> to vector<10xf32>
    %114 = vector.shape_cast %113 : vector<10xf32> to vector<10x1xf32>
    %115 = vector.broadcast %114 : vector<10x1xf32> to vector<10x10xf32>
    %116 = arith.subf %112, %115 : vector<10x10xf32>
    %117 = math.exp %116 : vector<10x10xf32>
    %cst_39 = arith.constant dense<0.000000e+00> : vector<10xf32>
    %118 = vector.multi_reduction <add>, %117, %cst_39 [1] : vector<10x10xf32> to vector<10xf32>
    %119 = vector.shape_cast %118 : vector<10xf32> to vector<10x1xf32>
    %120 = tpu.reciprocal %119 {approx = true} : vector<10x1xf32> -> vector<10x1xf32>
    %121 = vector.broadcast %120 : vector<10x1xf32> to vector<10x10xf32>
    %122 = arith.mulf %117, %121 : vector<10x10xf32>
    %cst_40 = arith.constant dense<0.000000e+00> : vector<10x8xf32>
    %123 = tpu.matmul %122, %110, %cst_40 {dimension_numbers = #tpu.dot_dimension_numbers<[1], [0], [0], [1], [0, 0, 1, 1], [], []>} : vector<10x10xf32>, vector<10x8xf32>, vector<10x8xf32> -> vector<10x8xf32>
    %c10_41 = arith.constant 10 : index
    %c8_42 = arith.constant 8 : index
    %124 = vector.load %arg19[%c10_41, %c8_42] : memref<20x32xf32, #tpu.memory_space<vmem>>, vector<10x8xf32>
    tpu.vector_store %arg19[%c10_41, %c8_42], %123 {strides = array<i32>} : memref<20x32xf32, #tpu.memory_space<vmem>>, vector<10x8xf32>,
    %125 = vector.extract_strided_slice %88 {offsets = [0, 16], sizes = [10, 8], strides = [1, 1]} : vector<10x32xf32> to vector<10x8xf32>
    %126 = vector.extract_strided_slice %89 {offsets = [0, 16], sizes = [10, 8], strides = [1, 1]} : vector<10x32xf32> to vector<10x8xf32>
    %127 = vector.extract_strided_slice %90 {offsets = [0, 16], sizes = [10, 8], strides = [1, 1]} : vector<10x32xf32> to vector<10x8xf32>
    %cst_43 = arith.constant dense<0.000000e+00> : vector<10x10xf32>
    %128 = tpu.matmul %125, %126, %cst_43 {dimension_numbers = #tpu.dot_dimension_numbers<[1], [1], [0], [0], [0, 0, 1, 0], [], []>} : vector<10x8xf32>, vector<10x8xf32>, vector<10x10xf32> -> vector<10x10xf32>
    %129 = arith.addf %128, %16 : vector<10x10xf32>
    %cst_44 = arith.constant dense<0xFF800000> : vector<10xf32>
    %130 = vector.multi_reduction <maximumf>, %129, %cst_44 [1] : vector<10x10xf32> to vector<10xf32>
    %131 = vector.shape_cast %130 : vector<10xf32> to vector<10x1xf32>
    %132 = vector.broadcast %131 : vector<10x1xf32> to vector<10x10xf32>
    %133 = arith.subf %129, %132 : vector<10x10xf32>
    %134 = math.exp %133 : vector<10x10xf32>
    %cst_45 = arith.constant dense<0.000000e+00> : vector<10xf32>
    %135 = vector.multi_reduction <add>, %134, %cst_45 [1] : vector<10x10xf32> to vector<10xf32>
    %136 = vector.shape_cast %135 : vector<10xf32> to vector<10x1xf32>
    %137 = tpu.reciprocal %136 {approx = true} : vector<10x1xf32> -> vector<10x1xf32>
    %138 = vector.broadcast %137 : vector<10x1xf32> to vector<10x10xf32>
    %139 = arith.mulf %134, %138 : vector<10x10xf32>
    %cst_46 = arith.constant dense<0.000000e+00> : vector<10x8xf32>
    %140 = tpu.matmul %139, %127, %cst_46 {dimension_numbers = #tpu.dot_dimension_numbers<[1], [0], [0], [1], [0, 0, 1, 1], [], []>} : vector<10x10xf32>, vector<10x8xf32>, vector<10x8xf32> -> vector<10x8xf32>
    %c10_47 = arith.constant 10 : index
    %c16_48 = arith.constant 16 : index
    %141 = vector.load %arg19[%c10_47, %c16_48] : memref<20x32xf32, #tpu.memory_space<vmem>>, vector<10x8xf32>
    tpu.vector_store %arg19[%c10_47, %c16_48], %140 {strides = array<i32>} : memref<20x32xf32, #tpu.memory_space<vmem>>, vector<10x8xf32>,
    %142 = vector.extract_strided_slice %88 {offsets = [0, 24], sizes = [10, 8], strides = [1, 1]} : vector<10x32xf32> to vector<10x8xf32>
    %143 = vector.extract_strided_slice %89 {offsets = [0, 24], sizes = [10, 8], strides = [1, 1]} : vector<10x32xf32> to vector<10x8xf32>
    %144 = vector.extract_strided_slice %90 {offsets = [0, 24], sizes = [10, 8], strides = [1, 1]} : vector<10x32xf32> to vector<10x8xf32>
    %cst_49 = arith.constant dense<0.000000e+00> : vector<10x10xf32>
    %145 = tpu.matmul %142, %143, %cst_49 {dimension_numbers = #tpu.dot_dimension_numbers<[1], [1], [0], [0], [0, 0, 1, 0], [], []>} : vector<10x8xf32>, vector<10x8xf32>, vector<10x10xf32> -> vector<10x10xf32>
    %146 = arith.addf %145, %16 : vector<10x10xf32>
    %cst_50 = arith.constant dense<0xFF800000> : vector<10xf32>
    %147 = vector.multi_reduction <maximumf>, %146, %cst_50 [1] : vector<10x10xf32> to vector<10xf32>
    %148 = vector.shape_cast %147 : vector<10xf32> to vector<10x1xf32>
    %149 = vector.broadcast %148 : vector<10x1xf32> to vector<10x10xf32>
    %150 = arith.subf %146, %149 : vector<10x10xf32>
    %151 = math.exp %150 : vector<10x10xf32>
    %cst_51 = arith.constant dense<0.000000e+00> : vector<10xf32>
    %152 = vector.multi_reduction <add>, %151, %cst_51 [1] : vector<10x10xf32> to vector<10xf32>
    %153 = vector.shape_cast %152 : vector<10xf32> to vector<10x1xf32>
    %154 = tpu.reciprocal %153 {approx = true} : vector<10x1xf32> -> vector<10x1xf32>
    %155 = vector.broadcast %154 : vector<10x1xf32> to vector<10x10xf32>
    %156 = arith.mulf %151, %155 : vector<10x10xf32>
    %cst_52 = arith.constant dense<0.000000e+00> : vector<10x8xf32>
    %157 = tpu.matmul %156, %144, %cst_52 {dimension_numbers = #tpu.dot_dimension_numbers<[1], [0], [0], [1], [0, 0, 1, 1], [], []>} : vector<10x10xf32>, vector<10x8xf32>, vector<10x8xf32> -> vector<10x8xf32>
    %c10_53 = arith.constant 10 : index
    %c24_54 = arith.constant 24 : index
    %158 = vector.load %arg19[%c10_53, %c24_54] : memref<20x32xf32, #tpu.memory_space<vmem>>, vector<10x8xf32>
    tpu.vector_store %arg19[%c10_53, %c24_54], %157 {strides = array<i32>} : memref<20x32xf32, #tpu.memory_space<vmem>>, vector<10x8xf32>,
    %c0_55 = arith.constant 0 : index
    %c0_56 = arith.constant 0 : index
    %159 = vector.load %arg19[%c0_55, %c0_56] : memref<20x32xf32, #tpu.memory_space<vmem>>, vector<20x32xf32>
    %c0_57 = arith.constant 0 : index
    %c0_58 = arith.constant 0 : index
    %c0_59 = arith.constant 0 : index
    %160 = vector.load %arg7[%c0_57, %c0_58, %c0_59] : memref<1x32x32xf32, #tpu.memory_space<vmem>>, vector<1x32x32xf32>
    %161 = vector.shape_cast %160 : vector<1x32x32xf32> to vector<32x32xf32>
    %cst_60 = arith.constant dense<0.000000e+00> : vector<20x32xf32>
    %162 = tpu.matmul %159, %161, %cst_60 {dimension_numbers = #tpu.dot_dimension_numbers<[1], [0], [0], [1], [0, 0, 1, 1], [], []>} : vector<20x32xf32>, vector<32x32xf32>, vector<20x32xf32> -> vector<20x32xf32>
    %c0_61 = arith.constant 0 : index
    %c0_62 = arith.constant 0 : index
    %c0_63 = arith.constant 0 : index
    %163 = vector.load %arg8[%c0_61, %c0_62, %c0_63] : memref<1x1x32xf32, #tpu.memory_space<vmem>>, vector<1x1x32xf32>
    %164 = vector.shape_cast %163 : vector<1x1x32xf32> to vector<1x32xf32>
    %165 = vector.broadcast %164 : vector<1x32xf32> to vector<20x32xf32>
    %166 = arith.addf %162, %165 : vector<20x32xf32>
    %167 = arith.addf %3, %166 : vector<20x32xf32>
    %cst_64 = arith.constant dense<0.000000e+00> : vector<20xf32>
    %168 = vector.multi_reduction <add>, %167, %cst_64 [1] : vector<20x32xf32> to vector<20xf32>
    %169 = vector.shape_cast %168 : vector<20xf32> to vector<20x1xf32>
    %cst_65 = arith.constant 3.200000e+01 : f32
    %170 = vector.broadcast %cst_65 : f32 to vector<20x1xf32>
    %171 = arith.divf %169, %170 : vector<20x1xf32>
    %172 = vector.broadcast %171 : vector<20x1xf32> to vector<20x32xf32>
    %173 = arith.subf %167, %172 : vector<20x32xf32>
    %174 = arith.mulf %173, %173 : vector<20x32xf32>
    %cst_66 = arith.constant dense<0.000000e+00> : vector<20xf32>
    %175 = vector.multi_reduction <add>, %174, %cst_66 [1] : vector<20x32xf32> to vector<20xf32>
    %176 = vector.shape_cast %175 : vector<20xf32> to vector<20x1xf32>
    %cst_67 = arith.constant 3.200000e+01 : f32
    %177 = vector.broadcast %cst_67 : f32 to vector<20x1xf32>
    %178 = arith.divf %176, %177 : vector<20x1xf32>
    %179 = vector.broadcast %171 : vector<20x1xf32> to vector<20x32xf32>
    %180 = arith.subf %167, %179 : vector<20x32xf32>
    %cst_68 = arith.constant 9.99999974E-6 : f32
    %181 = vector.broadcast %cst_68 : f32 to vector<20x1xf32>
    %182 = arith.addf %178, %181 : vector<20x1xf32>
    %183 = math.rsqrt %182 : vector<20x1xf32>
    %184 = vector.broadcast %183 : vector<20x1xf32> to vector<20x32xf32>
    %185 = arith.mulf %180, %184 : vector<20x32xf32>
    %c0_69 = arith.constant 0 : index
    %c0_70 = arith.constant 0 : index
    %c0_71 = arith.constant 0 : index
    %186 = vector.load %arg9[%c0_69, %c0_70, %c0_71] : memref<1x1x32xf32, #tpu.memory_space<vmem>>, vector<1x1x32xf32>
    %187 = vector.shape_cast %186 : vector<1x1x32xf32> to vector<1x32xf32>
    %188 = vector.broadcast %187 : vector<1x32xf32> to vector<20x32xf32>
    %189 = arith.mulf %185, %188 : vector<20x32xf32>
    %c0_72 = arith.constant 0 : index
    %c0_73 = arith.constant 0 : index
    %c0_74 = arith.constant 0 : index
    %190 = vector.load %arg10[%c0_72, %c0_73, %c0_74] : memref<1x1x32xf32, #tpu.memory_space<vmem>>, vector<1x1x32xf32>
    %191 = vector.shape_cast %190 : vector<1x1x32xf32> to vector<1x32xf32>
    %192 = vector.broadcast %191 : vector<1x32xf32> to vector<20x32xf32>
    %193 = arith.addf %189, %192 : vector<20x32xf32>
    %194 = arith.truncf %193 : vector<20x32xf32> to vector<20x32xbf16>
    %c0_75 = arith.constant 0 : index
    %c0_76 = arith.constant 0 : index
    %c0_77 = arith.constant 0 : index
    %195 = vector.load %arg13[%c0_75, %c0_76, %c0_77] : memref<1x32x2048xbf16, #tpu.memory_space<vmem>>, vector<1x32x2048xbf16>
    %196 = vector.shape_cast %195 : vector<1x32x2048xbf16> to vector<32x2048xbf16>
    %cst_78 = arith.constant dense<0.000000e+00> : vector<20x2048xf32>
    %197 = tpu.matmul %194, %196, %cst_78 {dimension_numbers = #tpu.dot_dimension_numbers<[1], [0], [0], [1], [0, 0, 1, 1], [], []>} : vector<20x32xbf16>, vector<32x2048xbf16>, vector<20x2048xf32> -> vector<20x2048xf32>
    %c0_79 = arith.constant 0 : index
    %c0_80 = arith.constant 0 : index
    %c0_81 = arith.constant 0 : index
    %198 = vector.load %arg14[%c0_79, %c0_80, %c0_81] : memref<1x1x2048xf32, #tpu.memory_space<vmem>>, vector<1x1x2048xf32>
    %199 = vector.shape_cast %198 : vector<1x1x2048xf32> to vector<1x2048xf32>
    %200 = vector.broadcast %199 : vector<1x2048xf32> to vector<20x2048xf32>
    %201 = arith.addf %197, %200 : vector<20x2048xf32>
    %cst_82 = arith.constant 0.000000e+00 : f32
    %202 = vector.broadcast %cst_82 : f32 to vector<20x2048xf32>
    %203 = arith.maximumf %201, %202 : vector<20x2048xf32>
    %204 = arith.truncf %203 : vector<20x2048xf32> to vector<20x2048xbf16>
    %c0_83 = arith.constant 0 : index
    %c0_84 = arith.constant 0 : index
    %c0_85 = arith.constant 0 : index
    %205 = vector.load %arg15[%c0_83, %c0_84, %c0_85] : memref<1x2048x32xbf16, #tpu.memory_space<vmem>>, vector<1x2048x32xbf16>
    %206 = vector.shape_cast %205 : vector<1x2048x32xbf16> to vector<2048x32xbf16>
    %cst_86 = arith.constant dense<0.000000e+00> : vector<20x32xf32>
    %207 = tpu.matmul %204, %206, %cst_86 {dimension_numbers = #tpu.dot_dimension_numbers<[1], [0], [0], [1], [0, 0, 1, 1], [], []>} : vector<20x2048xbf16>, vector<2048x32xbf16>, vector<20x32xf32> -> vector<20x32xf32>
    %c0_87 = arith.constant 0 : index
    %c0_88 = arith.constant 0 : index
    %c0_89 = arith.constant 0 : index
    %208 = vector.load %arg16[%c0_87, %c0_88, %c0_89] : memref<1x1x32xf32, #tpu.memory_space<vmem>>, vector<1x1x32xf32>
    %209 = vector.shape_cast %208 : vector<1x1x32xf32> to vector<1x32xf32>
    %210 = vector.broadcast %209 : vector<1x32xf32> to vector<20x32xf32>
    %211 = arith.addf %207, %210 : vector<20x32xf32>
    %212 = arith.addf %193, %211 : vector<20x32xf32>
    %cst_90 = arith.constant dense<0.000000e+00> : vector<20xf32>
    %213 = vector.multi_reduction <add>, %212, %cst_90 [1] : vector<20x32xf32> to vector<20xf32>
    %214 = vector.shape_cast %213 : vector<20xf32> to vector<20x1xf32>
    %cst_91 = arith.constant 3.200000e+01 : f32
    %215 = vector.broadcast %cst_91 : f32 to vector<20x1xf32>
    %216 = arith.divf %214, %215 : vector<20x1xf32>
    %217 = vector.broadcast %216 : vector<20x1xf32> to vector<20x32xf32>
    %218 = arith.subf %212, %217 : vector<20x32xf32>
    %219 = arith.mulf %218, %218 : vector<20x32xf32>
    %cst_92 = arith.constant dense<0.000000e+00> : vector<20xf32>
    %220 = vector.multi_reduction <add>, %219, %cst_92 [1] : vector<20x32xf32> to vector<20xf32>
    %221 = vector.shape_cast %220 : vector<20xf32> to vector<20x1xf32>
    %cst_93 = arith.constant 3.200000e+01 : f32
    %222 = vector.broadcast %cst_93 : f32 to vector<20x1xf32>
    %223 = arith.divf %221, %222 : vector<20x1xf32>
    %224 = vector.broadcast %216 : vector<20x1xf32> to vector<20x32xf32>
    %225 = arith.subf %212, %224 : vector<20x32xf32>
    %cst_94 = arith.constant 9.99999974E-6 : f32
    %226 = vector.broadcast %cst_94 : f32 to vector<20x1xf32>
    %227 = arith.addf %223, %226 : vector<20x1xf32>
    %228 = math.rsqrt %227 : vector<20x1xf32>
    %229 = vector.broadcast %228 : vector<20x1xf32> to vector<20x32xf32>
    %230 = arith.mulf %225, %229 : vector<20x32xf32>
    %c0_95 = arith.constant 0 : index
    %c0_96 = arith.constant 0 : index
    %c0_97 = arith.constant 0 : index
    %231 = vector.load %arg11[%c0_95, %c0_96, %c0_97] : memref<1x1x32xf32, #tpu.memory_space<vmem>>, vector<1x1x32xf32>
    %232 = vector.shape_cast %231 : vector<1x1x32xf32> to vector<1x32xf32>
    %233 = vector.broadcast %232 : vector<1x32xf32> to vector<20x32xf32>
    %234 = arith.mulf %230, %233 : vector<20x32xf32>
    %c0_98 = arith.constant 0 : index
    %c0_99 = arith.constant 0 : index
    %c0_100 = arith.constant 0 : index
    %235 = vector.load %arg12[%c0_98, %c0_99, %c0_100] : memref<1x1x32xf32, #tpu.memory_space<vmem>>, vector<1x1x32xf32>
    %236 = vector.shape_cast %235 : vector<1x1x32xf32> to vector<1x32xf32>
    %237 = vector.broadcast %236 : vector<1x32xf32> to vector<20x32xf32>
    %238 = arith.addf %234, %237 : vector<20x32xf32>
    %c0_101 = arith.constant 0 : index
    %c0_102 = arith.constant 0 : index
    %239 = vector.load %arg18[%c0_101, %c0_102] : memref<20x32xf32, #tpu.memory_space<vmem>>, vector<20x32xf32>
    tpu.vector_store %arg18[%c0_101, %c0_102], %238 {strides = array<i32>} : memref<20x32xf32, #tpu.memory_space<vmem>>, vector<20x32xf32>,
    %c0_103 = arith.constant 0 : index
    %c0_104 = arith.constant 0 : index
    %240 = vector.load %arg17[%c0_103, %c0_104] : memref<20x32xf32, #tpu.memory_space<vmem>>, vector<20x32xf32>
    tpu.vector_store %arg17[%c0_103, %c0_104], %238 {strides = array<i32>} : memref<20x32xf32, #tpu.memory_space<vmem>>, vector<20x32xf32>,
    return
  }
  func.func @transform_0(%arg0: i32) -> (i32, i32) {
    %c0_i32 = arith.constant 0 : i32
    %c0_i32_0 = arith.constant 0 : i32
    %c0_i32_1 = arith.constant 0 : i32
    return %c0_i32, %c0_i32_0 : i32, i32
  }
  func.func @transform_1(%arg0: i32) -> (i32, i32) {
    %c0_i32 = arith.constant 0 : i32
    %c0_i32_0 = arith.constant 0 : i32
    %c0_i32_1 = arith.constant 0 : i32
    return %c0_i32, %c0_i32_0 : i32, i32
  }
  func.func @transform_2(%arg0: i32) -> (i32, i32) {
    %c0_i32 = arith.constant 0 : i32
    %c0_i32_0 = arith.constant 0 : i32
    %c0_i32_1 = arith.constant 0 : i32
    return %c0_i32, %c0_i32_0 : i32, i32
  }
  func.func @transform_3(%arg0: i32) -> (i32, i32) {
    %c0_i32 = arith.constant 0 : i32
    %c0_i32_0 = arith.constant 0 : i32
    %c0_i32_1 = arith.constant 0 : i32
    return %c0_i32, %c0_i32_0 : i32, i32
  }
  func.func @transform_4(%arg0: i32) -> (i32, i32, i32) {
    %c0_i32 = arith.constant 0 : i32
    %c0_i32_0 = arith.constant 0 : i32
    %c0_i32_1 = arith.constant 0 : i32
    return %arg0, %c0_i32, %c0_i32_0 : i32, i32, i32
  }
  func.func @transform_5(%arg0: i32) -> (i32, i32, i32) {
    %c0_i32 = arith.constant 0 : i32
    %c0_i32_0 = arith.constant 0 : i32
    %c0_i32_1 = arith.constant 0 : i32
    return %arg0, %c0_i32, %c0_i32_0 : i32, i32, i32
  }
  func.func @transform_6(%arg0: i32) -> (i32, i32, i32) {
    %c0_i32 = arith.constant 0 : i32
    %c0_i32_0 = arith.constant 0 : i32
    %c0_i32_1 = arith.constant 0 : i32
    return %arg0, %c0_i32, %c0_i32_0 : i32, i32, i32
  }
  func.func @transform_7(%arg0: i32) -> (i32, i32, i32) {
    %c0_i32 = arith.constant 0 : i32
    %c0_i32_0 = arith.constant 0 : i32
    %c0_i32_1 = arith.constant 0 : i32
    return %arg0, %c0_i32, %c0_i32_0 : i32, i32, i32
  }
  func.func @transform_8(%arg0: i32) -> (i32, i32, i32) {
    %c0_i32 = arith.constant 0 : i32
    %c0_i32_0 = arith.constant 0 : i32
    %c0_i32_1 = arith.constant 0 : i32
    return %arg0, %c0_i32, %c0_i32_0 : i32, i32, i32
  }
  func.func @transform_9(%arg0: i32) -> (i32, i32, i32) {
    %c0_i32 = arith.constant 0 : i32
    %c0_i32_0 = arith.constant 0 : i32
    %c0_i32_1 = arith.constant 0 : i32
    return %arg0, %c0_i32, %c0_i32_0 : i32, i32, i32
  }
  func.func @transform_10(%arg0: i32) -> (i32, i32, i32) {
    %c0_i32 = arith.constant 0 : i32
    %c0_i32_0 = arith.constant 0 : i32
    %c0_i32_1 = arith.constant 0 : i32
    return %arg0, %c0_i32, %c0_i32_0 : i32, i32, i32
  }
  func.func @transform_11(%arg0: i32) -> (i32, i32, i32) {
    %c0_i32 = arith.constant 0 : i32
    %c0_i32_0 = arith.constant 0 : i32
    %c0_i32_1 = arith.constant 0 : i32
    return %arg0, %c0_i32, %c0_i32_0 : i32, i32, i32
  }
  func.func @transform_12(%arg0: i32) -> (i32, i32, i32) {
    %c0_i32 = arith.constant 0 : i32
    %c0_i32_0 = arith.constant 0 : i32
    %c0_i32_1 = arith.constant 0 : i32
    return %arg0, %c0_i32, %c0_i32_0 : i32, i32, i32
  }
  func.func @transform_13(%arg0: i32) -> (i32, i32, i32) {
    %c0_i32 = arith.constant 0 : i32
    %c0_i32_0 = arith.constant 0 : i32
    %c0_i32_1 = arith.constant 0 : i32
    return %arg0, %c0_i32, %c0_i32_0 : i32, i32, i32
  }
  func.func @transform_14(%arg0: i32) -> (i32, i32, i32) {
    %c0_i32 = arith.constant 0 : i32
    %c0_i32_0 = arith.constant 0 : i32
    %c0_i32_1 = arith.constant 0 : i32
    return %arg0, %c0_i32, %c0_i32_0 : i32, i32, i32
  }
  func.func @transform_15(%arg0: i32) -> (i32, i32, i32) {
    %c0_i32 = arith.constant 0 : i32
    %c0_i32_0 = arith.constant 0 : i32
    %c0_i32_1 = arith.constant 0 : i32
    return %arg0, %c0_i32, %c0_i32_0 : i32, i32, i32
  }
  func.func @transform_16(%arg0: i32) -> (i32, i32) {
    %c0_i32 = arith.constant 0 : i32
    %c0_i32_0 = arith.constant 0 : i32
    %c0_i32_1 = arith.constant 0 : i32
    return %c0_i32, %c0_i32_0 : i32, i32
  }
}

module attributes {stable_mosaic.version = 11 : i64} {
  func.func @_linear_kernel(%arg0: i32, %arg1: memref<2x320xf32, #tpu.memory_space<vmem>>, %arg2: memref<320x4xf32, #tpu.memory_space<vmem>>, %arg3: memref<1x4xf32, #tpu.memory_space<vmem>>, %arg4: memref<1x4xf32, #tpu.memory_space<vmem>>, %arg5: memref<2x4xf32, #tpu.memory_space<vmem>>) attributes {dimension_semantics = [#tpu.dimension_semantics<parallel>], iteration_bounds = array<i64: 1>, scalar_prefetch = 0 : i64, scratch_operands = 0 : i64, tpu.core_type = #tpu.core_type<tc>, window_params = [{transform_indices = @transform_0, window_bounds = array<i64: 2, 320>}, {pipeline_mode = #tpu.pipeline_mode<synchronous>, transform_indices = @transform_1, window_bounds = array<i64: 320, 4>}, {pipeline_mode = #tpu.pipeline_mode<synchronous>, transform_indices = @transform_2, window_bounds = array<i64: 1, 4>}, {pipeline_mode = #tpu.pipeline_mode<synchronous>, transform_indices = @transform_3, window_bounds = array<i64: 1, 4>}, {transform_indices = @transform_4, window_bounds = array<i64: 2, 4>}]} {
    %c0 = arith.constant 0 : index
    %c0_0 = arith.constant 0 : index
    %0 = vector.load %arg1[%c0, %c0_0] : memref<2x320xf32, #tpu.memory_space<vmem>>, vector<2x320xf32>
    %c0_1 = arith.constant 0 : index
    %c0_2 = arith.constant 0 : index
    %1 = vector.load %arg2[%c0_1, %c0_2] : memref<320x4xf32, #tpu.memory_space<vmem>>, vector<320x4xf32>
    %cst = arith.constant dense<0.000000e+00> : vector<2x4xf32>
    %2 = tpu.matmul %0, %1, %cst {dimension_numbers = #tpu.dot_dimension_numbers<[1], [0], [0], [1], [0, 0, 1, 1], [], []>} : vector<2x320xf32>, vector<320x4xf32>, vector<2x4xf32> -> vector<2x4xf32>
    %c0_3 = arith.constant 0 : index
    %c0_4 = arith.constant 0 : index
    %3 = vector.load %arg3[%c0_3, %c0_4] : memref<1x4xf32, #tpu.memory_space<vmem>>, vector<1x4xf32>
    %4 = vector.broadcast %3 : vector<1x4xf32> to vector<2x4xf32>
    %5 = arith.mulf %2, %4 : vector<2x4xf32>
    %c0_5 = arith.constant 0 : index
    %c0_6 = arith.constant 0 : index
    %6 = vector.load %arg4[%c0_5, %c0_6] : memref<1x4xf32, #tpu.memory_space<vmem>>, vector<1x4xf32>
    %7 = vector.broadcast %6 : vector<1x4xf32> to vector<2x4xf32>
    %8 = arith.addf %5, %7 : vector<2x4xf32>
    %c0_7 = arith.constant 0 : index
    %c0_8 = arith.constant 0 : index
    %9 = vector.load %arg5[%c0_7, %c0_8] : memref<2x4xf32, #tpu.memory_space<vmem>>, vector<2x4xf32>
    tpu.vector_store %arg5[%c0_7, %c0_8], %8 {strides = array<i32>} : memref<2x4xf32, #tpu.memory_space<vmem>>, vector<2x4xf32>,
    return
  }
  func.func @transform_0(%arg0: i32) -> (i32, i32) {
    %c0_i32 = arith.constant 0 : i32
    %c0_i32_0 = arith.constant 0 : i32
    return %arg0, %c0_i32 : i32, i32
  }
  func.func @transform_1(%arg0: i32) -> (i32, i32) {
    %c0_i32 = arith.constant 0 : i32
    %c0_i32_0 = arith.constant 0 : i32
    %c0_i32_1 = arith.constant 0 : i32
    return %c0_i32, %c0_i32_0 : i32, i32
  }
  func.func @transform_2(%arg0: i32) -> (i32, i32) {
    %c0_i32 = arith.constant 0 : i32
    %c0_i32_0 = arith.constant 0 : i32
    %c0_i32_1 = arith.constant 0 : i32
    return %c0_i32, %c0_i32_0 : i32, i32
  }
  func.func @transform_3(%arg0: i32) -> (i32, i32) {
    %c0_i32 = arith.constant 0 : i32
    %c0_i32_0 = arith.constant 0 : i32
    %c0_i32_1 = arith.constant 0 : i32
    return %c0_i32, %c0_i32_0 : i32, i32
  }
  func.func @transform_4(%arg0: i32) -> (i32, i32) {
    %c0_i32 = arith.constant 0 : i32
    %c0_i32_0 = arith.constant 0 : i32
    return %arg0, %c0_i32 : i32, i32
  }
}

</mosaic_0001>

<bundles_post_ra>
// kernel: transam_forward.5
= control target key start
LH: loop header
LB: loop body
LE: loop exit
PB: predicated region body
PF: predicated region fallthrough
CT: control target
= control target key end

     0   :  { %s1629_s15 = smov 0   ;;  %s1631_s16 = smov 0   ;;  %s2237_s0 = inlined_call_operand.vmem [shape: f32[3920,75], index: 0, kind: input, shape index: {}]   ;;  %s2238_s1 = inlined_call_operand.vmem [shape: f32[75,16], index: 1, kind: input, shape index: {}]   ;;  %s2239_s2 = inlined_call_operand.vmem [shape: f32[1,16], index: 2, kind: input, shape index: {}]   ;;  %s2240_s3 = inlined_call_operand.vmem [shape: f32[1,16], index: 3, kind: input, shape index: {}]   ;;  %s2241_s4 = inlined_call_operand.vmem [shape: f32[3920,16], index: 4, kind: output, shape index: {}]  }
   0x1   :  { %s1633_s17 = smov 0  }
   0x2 LB: > { %s1642_s18 = sadd.s32 4294967295, %s1570_s17   ;;  %s1644_s19 = sadd.s32 1, %s1570_s17   ;;  %s1570_s17 = sphi %s1633_s17, %s2250_s17   ;;  %s1566_s16 = sphi %s1631_s16, %s2249_s16   ;;  %s1562_s15 = sphi %s1629_s15, %s2248_s15  }
   0x3   : > { %s107_s20 = ssub.s32 %s1570_s17, %s1644_s19  ;;  %s110_s21 = sadd.s32 1, %s1566_s16 }
   0x4   : > { %p108_p0 = scmp.eq.s32.totalorder %s107_s20, 0  ;;  %p120_p1 = scmp.ne.s32.totalorder %s1566_s16, %s1562_s15 }
   0x5   : > { %p121_p2 = scmp.eq.s32.totalorder %s1642_s18, 7  ;;  %p1307_p3 = scmp.ge.s32.totalorder %s1570_s17, 1 }
   0x6   : > { %s1652_s22 = scalar_select %p108_p0, %s1566_s16, %s110_s21  }
   0x7   : > { %p1654_p4 = por %p121_p2, %p120_p1  ;;  %p171_p5 = scmp.lt.s32.totalorder %s1570_s17, 9 }
   0x9   : > { %p172_p6 = pnand %p1307_p3, %p171_p5 }
   0xa   : > { %s1665_s28 = sshll.u32 (!%p172_p6), %s1642_s18, 6  ;;  %s197_s7 = sand.u32 (!%p172_p6), 1, %s1562_s15  }
   0xb   : > { %175 = sbr.rel (%p172_p6) target bundleno = 360 (0x168), region = 36  ;;  %p205_p7 = scmp.lt.s32.totalorder (!%p172_p6), %s1665_s28, 489 }
   0xc   : > { %s1308_s10 = sshll.u32 (!%p172_p6), %s197_s7, 9 }
   0xd   : > { %s1843_s15 = scalar_lea.vmem (!%p172_p6), [#allocation2], %s1308_s10  }
  0x10   : > { %v292_v0 = vld [vmem:[%s2238_s1 + $0x48] sm:$0x7]  ;;  %vm486_vm0 = vcmask 1042432   ;;  %v291_v1 = vld [vmem:[%s2238_s1 + $0x40] sm:$0xff]  ;;  %v290_v2 = vld [vmem:[%s2238_s1 + $0x38] sm:$0xff]  ;;  %s206_s9 = scalar_select %p205_p7, %s1665_s28, 489 }
  0x11   : > { %1397 = vmatpush.msk.msra.mxu2 %vm486_vm0, %v292_v0  ;;  %1398 = vmatpush.msk.msra.mxu3 %vm486_vm0, %v292_v0  ;;  %v289_v3 = vld [vmem:[%s2238_s1 + $0x30] sm:$0xff]  ;;  %v288_v4 = vld [vmem:[%s2238_s1 + $0x28] sm:$0xff]  ;;  %v287_v5 = vld [vmem:[%s2238_s1 + $0x20] sm:$0xff]  ;;  %vm293_vm1 = vcmask 613376   ;;  %vm899_vm2 = vcmask 130048   ;;  %s972_s11 = ssub.s32 (%p1654_p4), 490, %s1665_s28 }
  0x12   : > { %1311 = vmatpush.msk.msra.mxu0 %vm486_vm0, %v292_v0  ;;  %1396 = vmatpush.msk.msra.mxu1 %vm486_vm0, %v292_v0  ;;  %v286_v6 = vld [vmem:[%s2238_s1 + $0x18] sm:$0xff]  ;;  %s1310_s14 = sshll.u32 %s206_s9, 3  ;;  %v285_v7 = vld [vmem:[%s2238_s1 + $0x10] sm:$0xff]  ;;  %v284_v8 = vld [vmem:[%s2238_s1 + $0x8] sm:$0xff]  ;;  %s1393_s12 = sshll.u32 (%p1654_p4), %s1642_s18, 9 }
  0x13   : > { %1400 = vmatpush.msra.mxu2 %v291_v1  ;;  %1401 = vmatpush.msra.mxu3 %v291_v1  ;;  %s1693_s27 = scalar_lea.vmem %s2237_s0, %s1310_s14  ;;  %v283_v9 = vld [vmem:[%s2238_s1] sm:$0xff]  ;;  %p973_p8 = scmp.lt.s32.totalorder (%p1654_p4), %s972_s11, 64 }
  0x14   : > { %497 = vmatpush.msra.mxu0 %v291_v1  ;;  %1399 = vmatpush.msra.mxu1 %v291_v1  ;;  %v251_v10 = vld [vmem:[%s1693_s27 + $0x100] sm:$0xff]  ;;  %v252_v14 = vld [vmem:[%s1693_s27 + $0x108] sm:$0xff]  ;;  %v253_v18 = vld [vmem:[%s1693_s27 + $0x110] sm:$0xff]  ;;  %s2102_s17 = scalar_lea.vmem (%p1654_p4), %s2241_s4, %s1393_s12  }
  0x15   : > { %1403 = vmatpush.msra.mxu2 %v290_v2  ;;  %1404 = vmatpush.msra.mxu3 %v290_v2  ;;  %v267_v11 = vld [vmem:[%s1693_s27 + $0x180] sm:$0xff]  ;;  %v268_v15 = vld [vmem:[%s1693_s27 + $0x188] sm:$0xff]  ;;  %v269_v19 = vld [vmem:[%s1693_s27 + $0x190] sm:$0xff] }
  0x16   : > { %498 = vmatpush.msra.mxu0 %v290_v2  ;;  %1402 = vmatpush.msra.mxu1 %v290_v2  ;;  %v219_v12 = vld [vmem:[%s1693_s27] sm:$0xff]  ;;  %v220_v16 = vld [vmem:[%s1693_s27 + $0x8] sm:$0xff]  ;;  %v221_v20 = vld [vmem:[%s1693_s27 + $0x10] sm:$0xff] }
  0x17   : > { %1406 = vmatpush.msra.mxu2 %v289_v3  ;;  %1407 = vmatpush.msra.mxu3 %v289_v3  ;;  %v235_v13 = vld [vmem:[%s1693_s27 + $0x80] sm:$0xff]  ;;  %v236_v17 = vld [vmem:[%s1693_s27 + $0x88] sm:$0xff]  ;;  %v237_v21 = vld [vmem:[%s1693_s27 + $0x90] sm:$0xff] }
  0x18   : > { %499 = vmatpush.msra.mxu0 %v289_v3  ;;  %1405 = vmatpush.msra.mxu1 %v289_v3  ;;  %v254_v22 = vld [vmem:[%s1693_s27 + $0x118] sm:$0xff]  ;;  %v255_v26 = vld [vmem:[%s1693_s27 + $0x120] sm:$0xff]  ;;  %v256_v30 = vld [vmem:[%s1693_s27 + $0x128] sm:$0xff] }
  0x19   : > { %1409 = vmatpush.msra.mxu2 %v288_v4  ;;  %1410 = vmatpush.msra.mxu3 %v288_v4  ;;  %v270_v23 = vld [vmem:[%s1693_s27 + $0x198] sm:$0xff]  ;;  %v271_v27 = vld [vmem:[%s1693_s27 + $0x1a0] sm:$0xff]  ;;  %v272_v31 = vld [vmem:[%s1693_s27 + $0x1a8] sm:$0xff] }
  0x1a   : > { %500 = vmatpush.msra.mxu0 %v288_v4  ;;  %1408 = vmatpush.msra.mxu1 %v288_v4  ;;  %v222_v24 = vld [vmem:[%s1693_s27 + $0x18] sm:$0xff]  ;;  %v223_v28 = vld [vmem:[%s1693_s27 + $0x20] sm:$0xff]  ;;  %v224_v32 = vld [vmem:[%s1693_s27 + $0x28] sm:$0xff] }
  0x1b   : > { %1412 = vmatpush.msra.mxu2 %v287_v5  ;;  %1413 = vmatpush.msra.mxu3 %v287_v5  ;;  %v238_v25 = vld [vmem:[%s1693_s27 + $0x98] sm:$0xff]  ;;  %v239_v29 = vld [vmem:[%s1693_s27 + $0xa0] sm:$0xff]  ;;  %v240_v33 = vld [vmem:[%s1693_s27 + $0xa8] sm:$0xff] }
  0x1c   : > { %501 = vmatpush.msra.mxu0 %v287_v5  ;;  %1411 = vmatpush.msra.mxu1 %v287_v5  ;;  %v257_v34 = vld [vmem:[%s1693_s27 + $0x130] sm:$0xff]  ;;  %v258_v38 = vld [vmem:[%s1693_s27 + $0x138] sm:$0xff]  ;;  %v259_v42 = vld [vmem:[%s1693_s27 + $0x140] sm:$0xff] }
  0x1d   : > { %1415 = vmatpush.msra.mxu2 %v286_v6  ;;  %1416 = vmatpush.msra.mxu3 %v286_v6  ;;  %v273_v35 = vld [vmem:[%s1693_s27 + $0x1b0] sm:$0xff]  ;;  %v274_v39 = vld [vmem:[%s1693_s27 + $0x1b8] sm:$0xff]  ;;  %v275_v43 = vld [vmem:[%s1693_s27 + $0x1c0] sm:$0xff] }
  0x1e   : > { %502 = vmatpush.msra.mxu0 %v286_v6  ;;  %1414 = vmatpush.msra.mxu1 %v286_v6  ;;  %v225_v36 = vld [vmem:[%s1693_s27 + $0x30] sm:$0xff]  ;;  %v226_v40 = vld [vmem:[%s1693_s27 + $0x38] sm:$0xff]  ;;  %v227_v44 = vld [vmem:[%s1693_s27 + $0x40] sm:$0xff] }
  0x1f   : > { %1418 = vmatpush.msra.mxu2 %v285_v7  ;;  %1419 = vmatpush.msra.mxu3 %v285_v7  ;;  %v241_v37 = vld [vmem:[%s1693_s27 + $0xb0] sm:$0xff]  ;;  %v242_v41 = vld [vmem:[%s1693_s27 + $0xb8] sm:$0xff]  ;;  %v243_v45 = vld [vmem:[%s1693_s27 + $0xc0] sm:$0xff] }
  0x20   : > { %503 = vmatpush.msra.mxu0 %v285_v7  ;;  %1417 = vmatpush.msra.mxu1 %v285_v7  ;;  %v260_v46 = vld [vmem:[%s1693_s27 + $0x148] sm:$0xff]  ;;  %v261_v50 = vld [vmem:[%s1693_s27 + $0x150] sm:$0xff]  ;;  %v262_v54 = vld [vmem:[%s1693_s27 + $0x158] sm:$0xff] }
  0x21   : > { %1421 = vmatpush.msra.mxu2 %v284_v8  ;;  %1422 = vmatpush.msra.mxu3 %v284_v8  ;;  %v276_v47 = vld [vmem:[%s1693_s27 + $0x1c8] sm:$0xff]  ;;  %v277_v51 = vld [vmem:[%s1693_s27 + $0x1d0] sm:$0xff]  ;;  %v278_v55 = vld [vmem:[%s1693_s27 + $0x1d8] sm:$0xff] }
  0x22   : > { %504 = vmatpush.msra.mxu0 %v284_v8  ;;  %1420 = vmatpush.msra.mxu1 %v284_v8  ;;  %v228_v48 = vld [vmem:[%s1693_s27 + $0x48] sm:$0xff]  ;;  %v229_v52 = vld [vmem:[%s1693_s27 + $0x50] sm:$0xff]  ;;  %v230_v56 = vld [vmem:[%s1693_s27 + $0x58] sm:$0xff] }
  0x23   : > { %1424 = vmatpush.msra.mxu2 %v283_v9  ;;  %1425 = vmatpush.msra.mxu3 %v283_v9  ;;  %v244_v49 = vld [vmem:[%s1693_s27 + $0xc8] sm:$0xff]  ;;  %v245_v53 = vld [vmem:[%s1693_s27 + $0xd0] sm:$0xff]  ;;  %v246_v57 = vld [vmem:[%s1693_s27 + $0xd8] sm:$0xff] }
  0x24   : > { %1344 = vmatmul.msk.f32.vlgmr.msra.gmra.mxu2 %vm293_vm1, %v251_v10  ;;  %1360 = vmatmul.msk.f32.vlgmr.msra.gmra.mxu3 %vm293_vm1, %v267_v11  ;;  %v263_v58 = vld [vmem:[%s1693_s27 + $0x160] sm:$0xff]  ;;  %v264_v62 = vld [vmem:[%s1693_s27 + $0x168] sm:$0xff]  ;;  %v265_v2 = vld [vmem:[%s1693_s27 + $0x170] sm:$0xff] }
  0x25   : > { %505 = vmatpush.msra.mxu0 %v283_v9  ;;  %1423 = vmatpush.msra.mxu1 %v283_v9  ;;  %v279_v59 = vld [vmem:[%s1693_s27 + $0x1e0] sm:$0xff]  ;;  %v280_v63 = vld [vmem:[%s1693_s27 + $0x1e8] sm:$0xff]  ;;  %v281_v3 = vld [vmem:[%s1693_s27 + $0x1f0] sm:$0xff] }
  0x26   : > { %1312 = vmatmul.msk.f32.vlgmr.msra.gmra.mxu0 %vm293_vm1, %v219_v12  ;;  %1328 = vmatmul.msk.f32.vlgmr.msra.gmra.mxu1 %vm293_vm1, %v235_v13  ;;  %v231_v60 = vld [vmem:[%s1693_s27 + $0x60] sm:$0xff]  ;;  %v232_v0 = vld [vmem:[%s1693_s27 + $0x68] sm:$0xff]  ;;  %v233_v4 = vld [vmem:[%s1693_s27 + $0x70] sm:$0xff] }
  0x27   : > { %v247_v61 = vld [vmem:[%s1693_s27 + $0xe0] sm:$0xff]  ;;  %v248_v1 = vld [vmem:[%s1693_s27 + $0xe8] sm:$0xff]  ;;  %v249_v5 = vld [vmem:[%s1693_s27 + $0xf0] sm:$0xff] }
  0x28   : > { %v266_v6 = vld [vmem:[%s1693_s27 + $0x178] sm:$0xff]  ;;  %v1829_v10 = vld [vmem:[%s2239_s2] ss:$0 sm:$0xff] }
  0x29   : > { %v282_v7 = vld [vmem:[%s1693_s27 + $0x1f8] sm:$0xff]  ;;  %v1835_v11 = vld [vmem:[%s2240_s3] ss:$0 sm:$0xff] }
  0x2a   : > { %v234_v8 = vld [vmem:[%s1693_s27 + $0x78] sm:$0xff] }
  0x2b   : > { %v250_v9 = vld [vmem:[%s1693_s27 + $0xf8] sm:$0xff] }
  0x2c   : > { %1345 = vmatmul.msk.f32.gmra.mxu2 %vm293_vm1, %v252_v14  ;;  %1361 = vmatmul.msk.f32.gmra.mxu3 %vm293_vm1, %v268_v15 }
  0x2e   : > { %1313 = vmatmul.msk.f32.gmra.mxu0 %vm293_vm1, %v220_v16  ;;  %1329 = vmatmul.msk.f32.gmra.mxu1 %vm293_vm1, %v236_v17 }
  0x34   : > { %1346 = vmatmul.msk.f32.gmra.mxu2 %vm293_vm1, %v253_v18  ;;  %1362 = vmatmul.msk.f32.gmra.mxu3 %vm293_vm1, %v269_v19 }
  0x36   : > { %1314 = vmatmul.msk.f32.gmra.mxu0 %vm293_vm1, %v221_v20  ;;  %1330 = vmatmul.msk.f32.gmra.mxu1 %vm293_vm1, %v237_v21 }
  0x3c   : > { %1347 = vmatmul.msk.f32.gmra.mxu2 %vm293_vm1, %v254_v22  ;;  %1363 = vmatmul.msk.f32.gmra.mxu3 %vm293_vm1, %v270_v23 }
  0x3e   : > { %1315 = vmatmul.msk.f32.gmra.mxu0 %vm293_vm1, %v222_v24  ;;  %1331 = vmatmul.msk.f32.gmra.mxu1 %vm293_vm1, %v238_v25 }
  0x44   : > { %1348 = vmatmul.msk.f32.gmra.mxu2 %vm293_vm1, %v255_v26  ;;  %1364 = vmatmul.msk.f32.gmra.mxu3 %vm293_vm1, %v271_v27 }
  0x46   : > { %1316 = vmatmul.msk.f32.gmra.mxu0 %vm293_vm1, %v223_v28  ;;  %1332 = vmatmul.msk.f32.gmra.mxu1 %vm293_vm1, %v239_v29 }
  0x4c   : > { %1349 = vmatmul.msk.f32.gmra.mxu2 %vm293_vm1, %v256_v30  ;;  %1365 = vmatmul.msk.f32.gmra.mxu3 %vm293_vm1, %v272_v31 }
  0x4e   : > { %1317 = vmatmul.msk.f32.gmra.mxu0 %vm293_vm1, %v224_v32  ;;  %1333 = vmatmul.msk.f32.gmra.mxu1 %vm293_vm1, %v240_v33 }
  0x54   : > { %1350 = vmatmul.msk.f32.gmra.mxu2 %vm293_vm1, %v257_v34  ;;  %1366 = vmatmul.msk.f32.gmra.mxu3 %vm293_vm1, %v273_v35 }
  0x56   : > { %1318 = vmatmul.msk.f32.gmra.mxu0 %vm293_vm1, %v225_v36  ;;  %1334 = vmatmul.msk.f32.gmra.mxu1 %vm293_vm1, %v241_v37 }
  0x5c   : > { %1351 = vmatmul.msk.f32.gmra.mxu2 %vm293_vm1, %v258_v38  ;;  %1367 = vmatmul.msk.f32.gmra.mxu3 %vm293_vm1, %v274_v39 }
  0x5e   : > { %1319 = vmatmul.msk.f32.gmra.mxu0 %vm293_vm1, %v226_v40  ;;  %1335 = vmatmul.msk.f32.gmra.mxu1 %vm293_vm1, %v242_v41 }
  0x64   : > { %1352 = vmatmul.msk.f32.gmra.mxu2 %vm293_vm1, %v259_v42  ;;  %1368 = vmatmul.msk.f32.gmra.mxu3 %vm293_vm1, %v275_v43 }
  0x66   : > { %1320 = vmatmul.msk.f32.gmra.mxu0 %vm293_vm1, %v227_v44  ;;  %1336 = vmatmul.msk.f32.gmra.mxu1 %vm293_vm1, %v243_v45 }
  0x6c   : > { %1353 = vmatmul.msk.f32.gmra.mxu2 %vm293_vm1, %v260_v46  ;;  %1369 = vmatmul.msk.f32.gmra.mxu3 %vm293_vm1, %v276_v47 }
  0x6e   : > { %1321 = vmatmul.msk.f32.gmra.mxu0 %vm293_vm1, %v228_v48  ;;  %1337 = vmatmul.msk.f32.gmra.mxu1 %vm293_vm1, %v244_v49 }
  0x74   : > { %1354 = vmatmul.msk.f32.gmra.mxu2 %vm293_vm1, %v261_v50  ;;  %1370 = vmatmul.msk.f32.gmra.mxu3 %vm293_vm1, %v277_v51 }
  0x76   : > { %1322 = vmatmul.msk.f32.gmra.mxu0 %vm293_vm1, %v229_v52  ;;  %1338 = vmatmul.msk.f32.gmra.mxu1 %vm293_vm1, %v245_v53 }
  0x7c   : > { %1355 = vmatmul.msk.f32.gmra.mxu2 %vm293_vm1, %v262_v54  ;;  %1371 = vmatmul.msk.f32.gmra.mxu3 %vm293_vm1, %v278_v55 }
  0x7e   : > { %1323 = vmatmul.msk.f32.gmra.mxu0 %vm293_vm1, %v230_v56  ;;  %1339 = vmatmul.msk.f32.gmra.mxu1 %vm293_vm1, %v246_v57 }
  0x84   : > { %1356 = vmatmul.msk.f32.gmra.mxu2 %vm293_vm1, %v263_v58  ;;  %1372 = vmatmul.msk.f32.gmra.mxu3 %vm293_vm1, %v279_v59 }
  0x86   : > { %1324 = vmatmul.msk.f32.gmra.mxu0 %vm293_vm1, %v231_v60  ;;  %1340 = vmatmul.msk.f32.gmra.mxu1 %vm293_vm1, %v247_v61 }
  0x8c   : > { %1357 = vmatmul.msk.f32.gmra.mxu2 %vm293_vm1, %v264_v62  ;;  %1373 = vmatmul.msk.f32.gmra.mxu3 %vm293_vm1, %v280_v63 }
  0x8e   : > { %1325 = vmatmul.msk.f32.gmra.mxu0 %vm293_vm1, %v232_v0  ;;  %1341 = vmatmul.msk.f32.gmra.mxu1 %vm293_vm1, %v248_v1 }
  0x94   : > { %1358 = vmatmul.msk.f32.gmra.mxu2 %vm293_vm1, %v265_v2  ;;  %1374 = vmatmul.msk.f32.gmra.mxu3 %vm293_vm1, %v281_v3 }
  0x96   : > { %1326 = vmatmul.msk.f32.gmra.mxu0 %vm293_vm1, %v233_v4  ;;  %1342 = vmatmul.msk.f32.gmra.mxu1 %vm293_vm1, %v249_v5 }
  0x9c   : > { %1359 = vmatmul.msk.f32.gmra.mxu2 %vm293_vm1, %v266_v6  ;;  %1375 = vmatmul.msk.f32.gmra.mxu3 %vm293_vm1, %v282_v7 }
  0x9e   : > { %1327 = vmatmul.msk.f32.gmra.mxu0 %vm293_vm1, %v234_v8  ;;  %1343 = vmatmul.msk.f32.gmra.mxu1 %vm293_vm1, %v250_v9 }
  0xa3   : > { %v507_v12 = vpop.f32.mrf.mxu0  ;;  %v555_v13 = vpop.f32.mrf.mxu1 }
  0xa4   : > { %v703_v14 = vmul.f32 %v1829_v10, %v507_v12  ;;  %v719_v15 = vmul.f32 %v1829_v10, %v555_v13 }
  0xa6   : > { %v771_v16 = vadd.f32 %v1835_v11, %v703_v14  ;;  %v787_v17 = vadd.f32 %v1835_v11, %v719_v15 }
  0xa7   : > { %v603_v18 = vpop.f32.mrf.mxu2  ;;  %v651_v19 = vpop.f32.mrf.mxu3 }
  0xa8   : > { %v835_v20 = vmax.f32 %v771_v16, 0.0  ;;  %v851_v21 = vmax.f32 %v787_v17, 0.0  ;;  %v735_v22 = vmul.f32 %v1829_v10, %v603_v18  ;;  %v751_v23 = vmul.f32 %v1829_v10, %v651_v19 }
  0xaa   : > { %900 = vst.msk [vmem:[%s1843_s15] sm:$0xff] %vm899_vm2, %v835_v20  ;;  %v803_v24 = vadd.f32 %v1835_v11, %v735_v22  ;;  %v819_v25 = vadd.f32 %v1835_v11, %v751_v23 }
  0xab   : > { %916 = vst.msk [vmem:[%s1843_s15 + $0x80] sm:$0xff] %vm899_vm2, %v851_v21  ;;  %v510_v26 = vpop.f32.mrf.mxu0  ;;  %v558_v27 = vpop.f32.mrf.mxu1 }
  0xac   : > { %v867_v28 = vmax.f32 %v803_v24, 0.0  ;;  %v883_v29 = vmax.f32 %v819_v25, 0.0  ;;  %v704_v30 = vmul.f32 %v1829_v10, %v510_v26  ;;  %v720_v31 = vmul.f32 %v1829_v10, %v558_v27 }
  0xae   : > { %932 = vst.msk [vmem:[%s1843_s15 + $0x100] sm:$0xff] %vm899_vm2, %v867_v28  ;;  %v772_v32 = vadd.f32 %v1835_v11, %v704_v30  ;;  %v788_v33 = vadd.f32 %v1835_v11, %v720_v31 }
  0xaf   : > { %948 = vst.msk [vmem:[%s1843_s15 + $0x180] sm:$0xff] %vm899_vm2, %v883_v29  ;;  %v606_v34 = vpop.f32.mrf.mxu2  ;;  %v654_v35 = vpop.f32.mrf.mxu3 }
  0xb0   : > { %v836_v36 = vmax.f32 %v772_v32, 0.0  ;;  %v852_v37 = vmax.f32 %v788_v33, 0.0  ;;  %v736_v38 = vmul.f32 %v1829_v10, %v606_v34  ;;  %v752_v39 = vmul.f32 %v1829_v10, %v654_v35 }
  0xb2   : > { %901 = vst.msk [vmem:[%s1843_s15 + $0x8] sm:$0xff] %vm899_vm2, %v836_v36  ;;  %v804_v40 = vadd.f32 %v1835_v11, %v736_v38  ;;  %v820_v41 = vadd.f32 %v1835_v11, %v752_v39 }
  0xb3   : > { %917 = vst.msk [vmem:[%s1843_s15 + $0x88] sm:$0xff] %vm899_vm2, %v852_v37  ;;  %v513_v42 = vpop.f32.mrf.mxu0  ;;  %v561_v43 = vpop.f32.mrf.mxu1 }
  0xb4   : > { %v868_v44 = vmax.f32 %v804_v40, 0.0  ;;  %v884_v45 = vmax.f32 %v820_v41, 0.0  ;;  %v705_v46 = vmul.f32 %v1829_v10, %v513_v42  ;;  %v721_v47 = vmul.f32 %v1829_v10, %v561_v43 }
  0xb6   : > { %933 = vst.msk [vmem:[%s1843_s15 + $0x108] sm:$0xff] %vm899_vm2, %v868_v44  ;;  %v773_v48 = vadd.f32 %v1835_v11, %v705_v46  ;;  %v789_v49 = vadd.f32 %v1835_v11, %v721_v47 }
  0xb7   : > { %949 = vst.msk [vmem:[%s1843_s15 + $0x188] sm:$0xff] %vm899_vm2, %v884_v45  ;;  %v609_v50 = vpop.f32.mrf.mxu2  ;;  %v657_v51 = vpop.f32.mrf.mxu3 }
  0xb8   : > { %v837_v52 = vmax.f32 %v773_v48, 0.0  ;;  %v853_v53 = vmax.f32 %v789_v49, 0.0  ;;  %v737_v54 = vmul.f32 %v1829_v10, %v609_v50  ;;  %v753_v55 = vmul.f32 %v1829_v10, %v657_v51 }
  0xba   : > { %902 = vst.msk [vmem:[%s1843_s15 + $0x10] sm:$0xff] %vm899_vm2, %v837_v52  ;;  %v805_v56 = vadd.f32 %v1835_v11, %v737_v54  ;;  %v821_v57 = vadd.f32 %v1835_v11, %v753_v55 }
  0xbb   : > { %918 = vst.msk [vmem:[%s1843_s15 + $0x90] sm:$0xff] %vm899_vm2, %v853_v53  ;;  %v516_v58 = vpop.f32.mrf.mxu0  ;;  %v564_v59 = vpop.f32.mrf.mxu1 }
  0xbc   : > { %v869_v60 = vmax.f32 %v805_v56, 0.0  ;;  %v885_v61 = vmax.f32 %v821_v57, 0.0  ;;  %v706_v62 = vmul.f32 %v1829_v10, %v516_v58  ;;  %v722_v63 = vmul.f32 %v1829_v10, %v564_v59 }
  0xbe   : > { %934 = vst.msk [vmem:[%s1843_s15 + $0x110] sm:$0xff] %vm899_vm2, %v869_v60  ;;  %v774_v0 = vadd.f32 %v1835_v11, %v706_v62  ;;  %v790_v1 = vadd.f32 %v1835_v11, %v722_v63 }
  0xbf   : > { %950 = vst.msk [vmem:[%s1843_s15 + $0x190] sm:$0xff] %vm899_vm2, %v885_v61  ;;  %v612_v2 = vpop.f32.mrf.mxu2  ;;  %v660_v3 = vpop.f32.mrf.mxu3 }
  0xc0   : > { %v838_v4 = vmax.f32 %v774_v0, 0.0  ;;  %v854_v5 = vmax.f32 %v790_v1, 0.0  ;;  %v738_v6 = vmul.f32 %v1829_v10, %v612_v2  ;;  %v754_v7 = vmul.f32 %v1829_v10, %v660_v3 }
  0xc2   : > { %903 = vst.msk [vmem:[%s1843_s15 + $0x18] sm:$0xff] %vm899_vm2, %v838_v4  ;;  %v806_v8 = vadd.f32 %v1835_v11, %v738_v6  ;;  %v822_v9 = vadd.f32 %v1835_v11, %v754_v7 }
  0xc3   : > { %919 = vst.msk [vmem:[%s1843_s15 + $0x98] sm:$0xff] %vm899_vm2, %v854_v5  ;;  %v519_v12 = vpop.f32.mrf.mxu0  ;;  %v567_v13 = vpop.f32.mrf.mxu1 }
  0xc4   : > { %v870_v14 = vmax.f32 %v806_v8, 0.0  ;;  %v886_v15 = vmax.f32 %v822_v9, 0.0  ;;  %v707_v16 = vmul.f32 %v1829_v10, %v519_v12  ;;  %v723_v17 = vmul.f32 %v1829_v10, %v567_v13 }
  0xc6   : > { %935 = vst.msk [vmem:[%s1843_s15 + $0x118] sm:$0xff] %vm899_vm2, %v870_v14  ;;  %v775_v18 = vadd.f32 %v1835_v11, %v707_v16  ;;  %v791_v19 = vadd.f32 %v1835_v11, %v723_v17 }
  0xc7   : > { %951 = vst.msk [vmem:[%s1843_s15 + $0x198] sm:$0xff] %vm899_vm2, %v886_v15  ;;  %v615_v20 = vpop.f32.mrf.mxu2  ;;  %v663_v21 = vpop.f32.mrf.mxu3 }
  0xc8   : > { %v839_v22 = vmax.f32 %v775_v18, 0.0  ;;  %v855_v23 = vmax.f32 %v791_v19, 0.0  ;;  %v739_v24 = vmul.f32 %v1829_v10, %v615_v20  ;;  %v755_v25 = vmul.f32 %v1829_v10, %v663_v21 }
  0xca   : > { %904 = vst.msk [vmem:[%s1843_s15 + $0x20] sm:$0xff] %vm899_vm2, %v839_v22  ;;  %v807_v26 = vadd.f32 %v1835_v11, %v739_v24  ;;  %v823_v27 = vadd.f32 %v1835_v11, %v755_v25 }
  0xcb   : > { %920 = vst.msk [vmem:[%s1843_s15 + $0xa0] sm:$0xff] %vm899_vm2, %v855_v23  ;;  %v522_v28 = vpop.f32.mrf.mxu0  ;;  %v570_v29 = vpop.f32.mrf.mxu1 }
  0xcc   : > { %v871_v30 = vmax.f32 %v807_v26, 0.0  ;;  %v887_v31 = vmax.f32 %v823_v27, 0.0  ;;  %v708_v32 = vmul.f32 %v1829_v10, %v522_v28  ;;  %v724_v33 = vmul.f32 %v1829_v10, %v570_v29 }
  0xce   : > { %936 = vst.msk [vmem:[%s1843_s15 + $0x120] sm:$0xff] %vm899_vm2, %v871_v30  ;;  %v776_v34 = vadd.f32 %v1835_v11, %v708_v32  ;;  %v792_v35 = vadd.f32 %v1835_v11, %v724_v33 }
  0xcf   : > { %952 = vst.msk [vmem:[%s1843_s15 + $0x1a0] sm:$0xff] %vm899_vm2, %v887_v31  ;;  %v618_v36 = vpop.f32.mrf.mxu2  ;;  %v666_v37 = vpop.f32.mrf.mxu3 }
  0xd0   : > { %v840_v38 = vmax.f32 %v776_v34, 0.0  ;;  %v856_v39 = vmax.f32 %v792_v35, 0.0  ;;  %v740_v40 = vmul.f32 %v1829_v10, %v618_v36  ;;  %v756_v41 = vmul.f32 %v1829_v10, %v666_v37 }
  0xd2   : > { %905 = vst.msk [vmem:[%s1843_s15 + $0x28] sm:$0xff] %vm899_vm2, %v840_v38  ;;  %v808_v42 = vadd.f32 %v1835_v11, %v740_v40  ;;  %v824_v43 = vadd.f32 %v1835_v11, %v756_v41 }
  0xd3   : > { %921 = vst.msk [vmem:[%s1843_s15 + $0xa8] sm:$0xff] %vm899_vm2, %v856_v39  ;;  %v525_v44 = vpop.f32.mrf.mxu0  ;;  %v573_v45 = vpop.f32.mrf.mxu1 }
  0xd4   : > { %v872_v46 = vmax.f32 %v808_v42, 0.0  ;;  %v888_v47 = vmax.f32 %v824_v43, 0.0  ;;  %v709_v48 = vmul.f32 %v1829_v10, %v525_v44  ;;  %v725_v49 = vmul.f32 %v1829_v10, %v573_v45 }
  0xd6   : > { %937 = vst.msk [vmem:[%s1843_s15 + $0x128] sm:$0xff] %vm899_vm2, %v872_v46  ;;  %v777_v50 = vadd.f32 %v1835_v11, %v709_v48  ;;  %v793_v51 = vadd.f32 %v1835_v11, %v725_v49 }
  0xd7   : > { %953 = vst.msk [vmem:[%s1843_s15 + $0x1a8] sm:$0xff] %vm899_vm2, %v888_v47  ;;  %v621_v52 = vpop.f32.mrf.mxu2  ;;  %v669_v53 = vpop.f32.mrf.mxu3 }
  0xd8   : > { %v841_v54 = vmax.f32 %v777_v50, 0.0  ;;  %v857_v55 = vmax.f32 %v793_v51, 0.0  ;;  %v741_v56 = vmul.f32 %v1829_v10, %v621_v52  ;;  %v757_v57 = vmul.f32 %v1829_v10, %v669_v53 }
  0xda   : > { %906 = vst.msk [vmem:[%s1843_s15 + $0x30] sm:$0xff] %vm899_vm2, %v841_v54  ;;  %v809_v58 = vadd.f32 %v1835_v11, %v741_v56  ;;  %v825_v59 = vadd.f32 %v1835_v11, %v757_v57 }
  0xdb   : > { %922 = vst.msk [vmem:[%s1843_s15 + $0xb0] sm:$0xff] %vm899_vm2, %v857_v55  ;;  %v528_v60 = vpop.f32.mrf.mxu0  ;;  %v576_v61 = vpop.f32.mrf.mxu1 }
  0xdc   : > { %v873_v62 = vmax.f32 %v809_v58, 0.0  ;;  %v889_v63 = vmax.f32 %v825_v59, 0.0  ;;  %v710_v0 = vmul.f32 %v1829_v10, %v528_v60  ;;  %v726_v1 = vmul.f32 %v1829_v10, %v576_v61 }
  0xde   : > { %938 = vst.msk [vmem:[%s1843_s15 + $0x130] sm:$0xff] %vm899_vm2, %v873_v62  ;;  %v778_v2 = vadd.f32 %v1835_v11, %v710_v0  ;;  %v794_v3 = vadd.f32 %v1835_v11, %v726_v1 }
  0xdf   : > { %954 = vst.msk [vmem:[%s1843_s15 + $0x1b0] sm:$0xff] %vm899_vm2, %v889_v63  ;;  %v624_v4 = vpop.f32.mrf.mxu2  ;;  %v672_v5 = vpop.f32.mrf.mxu3 }
  0xe0   : > { %v842_v6 = vmax.f32 %v778_v2, 0.0  ;;  %v858_v7 = vmax.f32 %v794_v3, 0.0  ;;  %v742_v8 = vmul.f32 %v1829_v10, %v624_v4  ;;  %v758_v9 = vmul.f32 %v1829_v10, %v672_v5 }
  0xe2   : > { %907 = vst.msk [vmem:[%s1843_s15 + $0x38] sm:$0xff] %vm899_vm2, %v842_v6  ;;  %v810_v12 = vadd.f32 %v1835_v11, %v742_v8  ;;  %v826_v13 = vadd.f32 %v1835_v11, %v758_v9 }
  0xe3   : > { %923 = vst.msk [vmem:[%s1843_s15 + $0xb8] sm:$0xff] %vm899_vm2, %v858_v7  ;;  %v531_v14 = vpop.f32.mrf.mxu0  ;;  %v579_v15 = vpop.f32.mrf.mxu1 }
  0xe4   : > { %v874_v16 = vmax.f32 %v810_v12, 0.0  ;;  %v890_v17 = vmax.f32 %v826_v13, 0.0  ;;  %v711_v18 = vmul.f32 %v1829_v10, %v531_v14  ;;  %v727_v19 = vmul.f32 %v1829_v10, %v579_v15 }
  0xe6   : > { %939 = vst.msk [vmem:[%s1843_s15 + $0x138] sm:$0xff] %vm899_vm2, %v874_v16  ;;  %v779_v20 = vadd.f32 %v1835_v11, %v711_v18  ;;  %v795_v21 = vadd.f32 %v1835_v11, %v727_v19 }
  0xe7   : > { %955 = vst.msk [vmem:[%s1843_s15 + $0x1b8] sm:$0xff] %vm899_vm2, %v890_v17  ;;  %v627_v22 = vpop.f32.mrf.mxu2  ;;  %v675_v23 = vpop.f32.mrf.mxu3 }
  0xe8   : > { %v843_v24 = vmax.f32 %v779_v20, 0.0  ;;  %v859_v25 = vmax.f32 %v795_v21, 0.0  ;;  %v743_v26 = vmul.f32 %v1829_v10, %v627_v22  ;;  %v759_v27 = vmul.f32 %v1829_v10, %v675_v23 }
  0xea   : > { %908 = vst.msk [vmem:[%s1843_s15 + $0x40] sm:$0xff] %vm899_vm2, %v843_v24  ;;  %v811_v28 = vadd.f32 %v1835_v11, %v743_v26  ;;  %v827_v29 = vadd.f32 %v1835_v11, %v759_v27 }
  0xeb   : > { %924 = vst.msk [vmem:[%s1843_s15 + $0xc0] sm:$0xff] %vm899_vm2, %v859_v25  ;;  %v534_v30 = vpop.f32.mrf.mxu0  ;;  %v582_v31 = vpop.f32.mrf.mxu1 }
  0xec   : > { %v875_v32 = vmax.f32 %v811_v28, 0.0  ;;  %v891_v33 = vmax.f32 %v827_v29, 0.0  ;;  %v712_v34 = vmul.f32 %v1829_v10, %v534_v30  ;;  %v728_v35 = vmul.f32 %v1829_v10, %v582_v31 }
  0xee   : > { %940 = vst.msk [vmem:[%s1843_s15 + $0x140] sm:$0xff] %vm899_vm2, %v875_v32  ;;  %v780_v36 = vadd.f32 %v1835_v11, %v712_v34  ;;  %v796_v37 = vadd.f32 %v1835_v11, %v728_v35 }
  0xef   : > { %956 = vst.msk [vmem:[%s1843_s15 + $0x1c0] sm:$0xff] %vm899_vm2, %v891_v33  ;;  %v630_v38 = vpop.f32.mrf.mxu2  ;;  %v678_v39 = vpop.f32.mrf.mxu3 }
  0xf0   : > { %v844_v40 = vmax.f32 %v780_v36, 0.0  ;;  %v860_v41 = vmax.f32 %v796_v37, 0.0  ;;  %v744_v42 = vmul.f32 %v1829_v10, %v630_v38  ;;  %v760_v43 = vmul.f32 %v1829_v10, %v678_v39 }
  0xf2   : > { %909 = vst.msk [vmem:[%s1843_s15 + $0x48] sm:$0xff] %vm899_vm2, %v844_v40  ;;  %v812_v44 = vadd.f32 %v1835_v11, %v744_v42  ;;  %v828_v45 = vadd.f32 %v1835_v11, %v760_v43 }
  0xf3   : > { %925 = vst.msk [vmem:[%s1843_s15 + $0xc8] sm:$0xff] %vm899_vm2, %v860_v41  ;;  %v537_v46 = vpop.f32.mrf.mxu0  ;;  %v585_v47 = vpop.f32.mrf.mxu1 }
  0xf4   : > { %v876_v48 = vmax.f32 %v812_v44, 0.0  ;;  %v892_v49 = vmax.f32 %v828_v45, 0.0  ;;  %v713_v50 = vmul.f32 %v1829_v10, %v537_v46  ;;  %v729_v51 = vmul.f32 %v1829_v10, %v585_v47 }
  0xf6   : > { %941 = vst.msk [vmem:[%s1843_s15 + $0x148] sm:$0xff] %vm899_vm2, %v876_v48  ;;  %v781_v52 = vadd.f32 %v1835_v11, %v713_v50  ;;  %v797_v53 = vadd.f32 %v1835_v11, %v729_v51 }
  0xf7   : > { %957 = vst.msk [vmem:[%s1843_s15 + $0x1c8] sm:$0xff] %vm899_vm2, %v892_v49  ;;  %v633_v54 = vpop.f32.mrf.mxu2  ;;  %v681_v55 = vpop.f32.mrf.mxu3 }
  0xf8   : > { %v845_v56 = vmax.f32 %v781_v52, 0.0  ;;  %v861_v57 = vmax.f32 %v797_v53, 0.0  ;;  %v745_v58 = vmul.f32 %v1829_v10, %v633_v54  ;;  %v761_v59 = vmul.f32 %v1829_v10, %v681_v55 }
  0xfa   : > { %910 = vst.msk [vmem:[%s1843_s15 + $0x50] sm:$0xff] %vm899_vm2, %v845_v56  ;;  %v813_v60 = vadd.f32 %v1835_v11, %v745_v58  ;;  %v829_v61 = vadd.f32 %v1835_v11, %v761_v59 }
  0xfb   : > { %926 = vst.msk [vmem:[%s1843_s15 + $0xd0] sm:$0xff] %vm899_vm2, %v861_v57  ;;  %v540_v62 = vpop.f32.mrf.mxu0  ;;  %v588_v63 = vpop.f32.mrf.mxu1 }
  0xfc   : > { %v877_v0 = vmax.f32 %v813_v60, 0.0  ;;  %v893_v1 = vmax.f32 %v829_v61, 0.0  ;;  %v714_v2 = vmul.f32 %v1829_v10, %v540_v62  ;;  %v730_v3 = vmul.f32 %v1829_v10, %v588_v63 }
  0xfe   : > { %942 = vst.msk [vmem:[%s1843_s15 + $0x150] sm:$0xff] %vm899_vm2, %v877_v0  ;;  %v782_v4 = vadd.f32 %v1835_v11, %v714_v2  ;;  %v798_v5 = vadd.f32 %v1835_v11, %v730_v3 }
  0xff   : > { %958 = vst.msk [vmem:[%s1843_s15 + $0x1d0] sm:$0xff] %vm899_vm2, %v893_v1  ;;  %v636_v6 = vpop.f32.mrf.mxu2  ;;  %v684_v7 = vpop.f32.mrf.mxu3 }
 0x100   : > { %v846_v8 = vmax.f32 %v782_v4, 0.0  ;;  %v862_v9 = vmax.f32 %v798_v5, 0.0  ;;  %v746_v12 = vmul.f32 %v1829_v10, %v636_v6  ;;  %v762_v13 = vmul.f32 %v1829_v10, %v684_v7 }
 0x102   : > { %911 = vst.msk [vmem:[%s1843_s15 + $0x58] sm:$0xff] %vm899_vm2, %v846_v8  ;;  %v814_v14 = vadd.f32 %v1835_v11, %v746_v12  ;;  %v830_v15 = vadd.f32 %v1835_v11, %v762_v13 }
 0x103   : > { %927 = vst.msk [vmem:[%s1843_s15 + $0xd8] sm:$0xff] %vm899_vm2, %v862_v9  ;;  %v543_v16 = vpop.f32.mrf.mxu0  ;;  %v591_v17 = vpop.f32.mrf.mxu1 }
 0x104   : > { %v878_v18 = vmax.f32 %v814_v14, 0.0  ;;  %v894_v19 = vmax.f32 %v830_v15, 0.0  ;;  %v715_v20 = vmul.f32 %v1829_v10, %v543_v16  ;;  %v731_v21 = vmul.f32 %v1829_v10, %v591_v17 }
 0x106   : > { %943 = vst.msk [vmem:[%s1843_s15 + $0x158] sm:$0xff] %vm899_vm2, %v878_v18  ;;  %v783_v22 = vadd.f32 %v1835_v11, %v715_v20  ;;  %v799_v23 = vadd.f32 %v1835_v11, %v731_v21 }
 0x107   : > { %959 = vst.msk [vmem:[%s1843_s15 + $0x1d8] sm:$0xff] %vm899_vm2, %v894_v19  ;;  %v639_v24 = vpop.f32.mrf.mxu2  ;;  %v687_v25 = vpop.f32.mrf.mxu3 }
 0x108   : > { %v847_v26 = vmax.f32 %v783_v22, 0.0  ;;  %v863_v27 = vmax.f32 %v799_v23, 0.0  ;;  %v747_v28 = vmul.f32 %v1829_v10, %v639_v24  ;;  %v763_v29 = vmul.f32 %v1829_v10, %v687_v25 }
 0x10a   : > { %912 = vst.msk [vmem:[%s1843_s15 + $0x60] sm:$0xff] %vm899_vm2, %v847_v26  ;;  %v815_v30 = vadd.f32 %v1835_v11, %v747_v28  ;;  %v831_v31 = vadd.f32 %v1835_v11, %v763_v29 }
 0x10b   : > { %928 = vst.msk [vmem:[%s1843_s15 + $0xe0] sm:$0xff] %vm899_vm2, %v863_v27  ;;  %v546_v32 = vpop.f32.mrf.mxu0  ;;  %v594_v33 = vpop.f32.mrf.mxu1 }
 0x10c   : > { %v879_v34 = vmax.f32 %v815_v30, 0.0  ;;  %v895_v35 = vmax.f32 %v831_v31, 0.0  ;;  %v716_v36 = vmul.f32 %v1829_v10, %v546_v32  ;;  %v732_v37 = vmul.f32 %v1829_v10, %v594_v33 }
 0x10e   : > { %944 = vst.msk [vmem:[%s1843_s15 + $0x160] sm:$0xff] %vm899_vm2, %v879_v34  ;;  %v784_v38 = vadd.f32 %v1835_v11, %v716_v36  ;;  %v800_v39 = vadd.f32 %v1835_v11, %v732_v37 }
 0x10f   : > { %960 = vst.msk [vmem:[%s1843_s15 + $0x1e0] sm:$0xff] %vm899_vm2, %v895_v35  ;;  %v642_v40 = vpop.f32.mrf.mxu2  ;;  %v690_v41 = vpop.f32.mrf.mxu3 }
 0x110   : > { %v848_v42 = vmax.f32 %v784_v38, 0.0  ;;  %v864_v43 = vmax.f32 %v800_v39, 0.0  ;;  %v748_v44 = vmul.f32 %v1829_v10, %v642_v40  ;;  %v764_v45 = vmul.f32 %v1829_v10, %v690_v41 }
 0x112   : > { %913 = vst.msk [vmem:[%s1843_s15 + $0x68] sm:$0xff] %vm899_vm2, %v848_v42  ;;  %v816_v46 = vadd.f32 %v1835_v11, %v748_v44  ;;  %v832_v47 = vadd.f32 %v1835_v11, %v764_v45 }
 0x113   : > { %929 = vst.msk [vmem:[%s1843_s15 + $0xe8] sm:$0xff] %vm899_vm2, %v864_v43  ;;  %v549_v48 = vpop.f32.mrf.mxu0  ;;  %v597_v49 = vpop.f32.mrf.mxu1 }
 0x114   : > { %v880_v50 = vmax.f32 %v816_v46, 0.0  ;;  %v896_v51 = vmax.f32 %v832_v47, 0.0  ;;  %v717_v52 = vmul.f32 %v1829_v10, %v549_v48  ;;  %v733_v53 = vmul.f32 %v1829_v10, %v597_v49 }
 0x116   : > { %945 = vst.msk [vmem:[%s1843_s15 + $0x168] sm:$0xff] %vm899_vm2, %v880_v50  ;;  %v785_v54 = vadd.f32 %v1835_v11, %v717_v52  ;;  %v801_v55 = vadd.f32 %v1835_v11, %v733_v53 }
 0x117   : > { %961 = vst.msk [vmem:[%s1843_s15 + $0x1e8] sm:$0xff] %vm899_vm2, %v896_v51  ;;  %v645_v56 = vpop.f32.mrf.mxu2  ;;  %v693_v57 = vpop.f32.mrf.mxu3 }
 0x118   : > { %v849_v58 = vmax.f32 %v785_v54, 0.0  ;;  %v865_v59 = vmax.f32 %v801_v55, 0.0  ;;  %v749_v60 = vmul.f32 %v1829_v10, %v645_v56  ;;  %v765_v61 = vmul.f32 %v1829_v10, %v693_v57 }
 0x11a   : > { %914 = vst.msk [vmem:[%s1843_s15 + $0x70] sm:$0xff] %vm899_vm2, %v849_v58  ;;  %v817_v62 = vadd.f32 %v1835_v11, %v749_v60  ;;  %v833_v63 = vadd.f32 %v1835_v11, %v765_v61 }
 0x11b   : > { %930 = vst.msk [vmem:[%s1843_s15 + $0xf0] sm:$0xff] %vm899_vm2, %v865_v59  ;;  %v552_v0 = vpop.f32.mrf.mxu0  ;;  %v600_v1 = vpop.f32.mrf.mxu1 }
 0x11c   : > { %v881_v2 = vmax.f32 %v817_v62, 0.0  ;;  %v897_v3 = vmax.f32 %v833_v63, 0.0  ;;  %v718_v4 = vmul.f32 %v1829_v10, %v552_v0  ;;  %v734_v5 = vmul.f32 %v1829_v10, %v600_v1 }
 0x11e   : > { %946 = vst.msk [vmem:[%s1843_s15 + $0x170] sm:$0xff] %vm899_vm2, %v881_v2  ;;  %v786_v6 = vadd.f32 %v1835_v11, %v718_v4  ;;  %v802_v7 = vadd.f32 %v1835_v11, %v734_v5 }
 0x11f   : > { %962 = vst.msk [vmem:[%s1843_s15 + $0x1f0] sm:$0xff] %vm899_vm2, %v897_v3  ;;  %v648_v8 = vpop.f32.mrf.mxu2  ;;  %v696_v9 = vpop.f32.mrf.mxu3 }
 0x120   : > { %v850_v12 = vmax.f32 %v786_v6, 0.0  ;;  %v866_v13 = vmax.f32 %v802_v7, 0.0  ;;  %v750_v14 = vmul.f32 %v1829_v10, %v648_v8  ;;  %v766_v15 = vmul.f32 %v1829_v10, %v696_v9 }
 0x122   : > { %915 = vst.msk [vmem:[%s1843_s15 + $0x78] sm:$0xff] %vm899_vm2, %v850_v12  ;;  %v818_v16 = vadd.f32 %v1835_v11, %v750_v14  ;;  %v834_v17 = vadd.f32 %v1835_v11, %v766_v15 }
 0x123   : > { %931 = vst.msk [vmem:[%s1843_s15 + $0xf8] sm:$0xff] %vm899_vm2, %v866_v13  ;;  %970 = sbr.rel (!%p1654_p4) target bundleno = 360 (0x168), region = 40 }
 0x124   : > { %v882_v18 = vmax.f32 %v818_v16, 0.0  ;;  %v898_v19 = vmax.f32 %v834_v17, 0.0 }
 0x126   : > { %947 = vst.msk [vmem:[%s1843_s15 + $0x178] sm:$0xff] %vm899_vm2, %v882_v18 }
 0x127   : > { %963 = vst.msk [vmem:[%s1843_s15 + $0x1f8] sm:$0xff] %vm899_vm2, %v898_v19 }
 0x128   : > { %s2252_s11 = smov (!%p973_p8, %s972_s11), 64 }
 0x129   : > { %s1378_s20 = sshll.u32 %s2252_s11, 3 }
 0x12a   : > { %p1381_p9 = scmp.eq.s32.totalorder %s1378_s20, 0 }
 0x12b   : > { %s2108_s21 = sshrl.u32 (!%p1381_p9), %s2252_s11, 5 }
 0x12c   : > { %981 = sbr.rel (%p1381_p9) target bundleno = 360 (0x168), region = 44  ;;  %p1382_p10 = scmp.le.s32.totalorder (!%p1381_p9), %s2108_s21, 0 }
 0x131   : > { %1260 = sbr.rel (%p1382_p10) target bundleno = 343 (0x157), region = 120  ;;  %s2243_s18 = smov (!%p1382_p10), %s2102_s17 }
 0x132   : > { %s2244_s23 = smov (!%p1382_p10), %s1843_s15  ;;  %s2117_s28 = smov (!%p1382_p10), 0  }
 0x133   : > { %s2119_s24 = smov (!%p1382_p10), 0  }
 0x136 LB: >> { %v1106_v10 = vld [vmem:[%s1578_s23] sm:$0xff]  ;;  %v1108_v11 = vld [vmem:[%s1578_s23 + $0x8] sm:$0xff]  ;;  %v1110_v20 = vld [vmem:[%s1578_s23 + $0x10] sm:$0xff]  ;;  %s1170_s25 = sadd.s32 1, %s1582_s28  ;;  %s1100_s24 = sadd.s32 1, %s1586_s24   ;;  %s1586_s24 = sphi %s2119_s24, %s1100_s24   ;;  %s1582_s28 = sphi %s2117_s28, %s2247_s28   ;;  %s1578_s23 = sphi %s2244_s23, %s2246_s23   ;;  %s1574_s18 = sphi %s2243_s18, %s2245_s18  }
 0x137   : >> { %1107 = vst [vmem:[%s1574_s18] sm:$0xff] %v1106_v10  ;;  %v1112_v21 = vld [vmem:[%s1578_s23 + $0x18] sm:$0xff]  ;;  %p1171_p11 = scmp.ge.s32.totalorder %s1170_s25, %s2108_s21  ;;  %v1114_v22 = vld [vmem:[%s1578_s23 + $0x20] sm:$0xff]  ;;  %v1116_v23 = vld [vmem:[%s1578_s23 + $0x28] sm:$0xff]  ;;  %p1099_p12 = scmp.ge.s32.totalorder %s1100_s24, %s2108_s21 }
 0x138   : >> { %1109 = vst [vmem:[%s1574_s18 + $0x8] sm:$0xff] %v1108_v11  ;;  %v1118_v24 = vld [vmem:[%s1578_s23 + $0x30] sm:$0xff]  ;;  %v1120_v25 = vld [vmem:[%s1578_s23 + $0x38] sm:$0xff]  ;;  %v1122_v26 = vld [vmem:[%s1578_s23 + $0x40] sm:$0xff] }
 0x139   : >> { %1111 = vst [vmem:[%s1574_s18 + $0x10] sm:$0xff] %v1110_v20  ;;  %s2254_s25 = smov (%p1171_p11, %s1170_s25), 0  ;;  %v1124_v27 = vld [vmem:[%s1578_s23 + $0x48] sm:$0xff]  ;;  %v1126_v28 = vld [vmem:[%s1578_s23 + $0x50] sm:$0xff]  ;;  %v1128_v29 = vld [vmem:[%s1578_s23 + $0x58] sm:$0xff] }
 0x13a   : >> { %1113 = vst [vmem:[%s1574_s18 + $0x18] sm:$0xff] %v1112_v21  ;;  %s1383_s26 = sshll.u32 %s2254_s25, 8  ;;  %v1130_v30 = vld [vmem:[%s1578_s23 + $0x60] sm:$0xff]  ;;  %v1132_v31 = vld [vmem:[%s1578_s23 + $0x68] sm:$0xff]  ;;  %v1134_v32 = vld [vmem:[%s1578_s23 + $0x70] sm:$0xff]  ;;  %s2247_s28 = smov %s2254_s25 }
 0x13b   : >> { %1115 = vst [vmem:[%s1574_s18 + $0x20] sm:$0xff] %v1114_v22  ;;  %s2151_s27 = scalar_lea.vmem %s1843_s15, %s1383_s26 [#allocation2]   ;;  %s2154_s29 = scalar_lea.vmem %s2102_s17, %s1383_s26   ;;  %v1136_v33 = vld [vmem:[%s1578_s23 + $0x78] sm:$0xff]  ;;  %v1138_v34 = vld [vmem:[%s1578_s23 + $0x80] sm:$0xff]  ;;  %v1140_v35 = vld [vmem:[%s1578_s23 + $0x88] sm:$0xff] }
 0x13c   : >> { %1117 = vst [vmem:[%s1574_s18 + $0x28] sm:$0xff] %v1116_v23  ;;  %v1142_v36 = vld [vmem:[%s1578_s23 + $0x90] sm:$0xff]  ;;  %v1144_v37 = vld [vmem:[%s1578_s23 + $0x98] sm:$0xff]  ;;  %v1146_v38 = vld [vmem:[%s1578_s23 + $0xa0] sm:$0xff] }
 0x13d   : >> { %1119 = vst [vmem:[%s1574_s18 + $0x30] sm:$0xff] %v1118_v24  ;;  %v1148_v39 = vld [vmem:[%s1578_s23 + $0xa8] sm:$0xff]  ;;  %v1150_v40 = vld [vmem:[%s1578_s23 + $0xb0] sm:$0xff]  ;;  %v1152_v41 = vld [vmem:[%s1578_s23 + $0xb8] sm:$0xff] }
 0x13e   : >> { %1121 = vst [vmem:[%s1574_s18 + $0x38] sm:$0xff] %v1120_v25  ;;  %v1154_v42 = vld [vmem:[%s1578_s23 + $0xc0] sm:$0xff]  ;;  %v1156_v43 = vld [vmem:[%s1578_s23 + $0xc8] sm:$0xff]  ;;  %v1158_v44 = vld [vmem:[%s1578_s23 + $0xd0] sm:$0xff] }
 0x13f   : >> { %1123 = vst [vmem:[%s1574_s18 + $0x40] sm:$0xff] %v1122_v26  ;;  %v1160_v45 = vld [vmem:[%s1578_s23 + $0xd8] sm:$0xff]  ;;  %v1162_v46 = vld [vmem:[%s1578_s23 + $0xe0] sm:$0xff]  ;;  %v1164_v47 = vld [vmem:[%s1578_s23 + $0xe8] sm:$0xff] }
 0x140   : >> { %1125 = vst [vmem:[%s1574_s18 + $0x48] sm:$0xff] %v1124_v27  ;;  %v1166_v48 = vld [vmem:[%s1578_s23 + $0xf0] sm:$0xff]  ;;  %v1168_v49 = vld [vmem:[%s1578_s23 + $0xf8] sm:$0xff]  ;;  %s2246_s23 = smov %s2151_s27 }
 0x141   : >> { %1127 = vst [vmem:[%s1574_s18 + $0x50] sm:$0xff] %v1126_v28 }
 0x142   : >> { %1129 = vst [vmem:[%s1574_s18 + $0x58] sm:$0xff] %v1128_v29 }
 0x143   : >> { %1131 = vst [vmem:[%s1574_s18 + $0x60] sm:$0xff] %v1130_v30 }
 0x144   : >> { %1133 = vst [vmem:[%s1574_s18 + $0x68] sm:$0xff] %v1132_v31 }
 0x145   : >> { %1135 = vst [vmem:[%s1574_s18 + $0x70] sm:$0xff] %v1134_v32 }
 0x146   : >> { %1137 = vst [vmem:[%s1574_s18 + $0x78] sm:$0xff] %v1136_v33 }
 0x147   : >> { %1139 = vst [vmem:[%s1574_s18 + $0x80] sm:$0xff] %v1138_v34 }
 0x148   : >> { %1141 = vst [vmem:[%s1574_s18 + $0x88] sm:$0xff] %v1140_v35 }
 0x149   : >> { %1143 = vst [vmem:[%s1574_s18 + $0x90] sm:$0xff] %v1142_v36 }
 0x14a   : >> { %1145 = vst [vmem:[%s1574_s18 + $0x98] sm:$0xff] %v1144_v37 }
 0x14b   : >> { %1147 = vst [vmem:[%s1574_s18 + $0xa0] sm:$0xff] %v1146_v38 }
 0x14c   : >> { %1149 = vst [vmem:[%s1574_s18 + $0xa8] sm:$0xff] %v1148_v39 }
 0x14d   : >> { %1151 = vst [vmem:[%s1574_s18 + $0xb0] sm:$0xff] %v1150_v40 }
 0x14e   : >> { %1153 = vst [vmem:[%s1574_s18 + $0xb8] sm:$0xff] %v1152_v41 }
 0x14f   : >> { %1155 = vst [vmem:[%s1574_s18 + $0xc0] sm:$0xff] %v1154_v42 }
 0x150   : >> { %1157 = vst [vmem:[%s1574_s18 + $0xc8] sm:$0xff] %v1156_v43 }
 0x151   : >> { %1159 = vst [vmem:[%s1574_s18 + $0xd0] sm:$0xff] %v1158_v44 }
 0x152   : >> { %1161 = vst [vmem:[%s1574_s18 + $0xd8] sm:$0xff] %v1160_v45  ;;  %1102 = sbr.rel (!%p1099_p12) target bundleno = 310 (0x136), region = 126 }
 0x153   : >> { %1163 = vst [vmem:[%s1574_s18 + $0xe0] sm:$0xff] %v1162_v46 }
 0x154   : >> { %1165 = vst [vmem:[%s1574_s18 + $0xe8] sm:$0xff] %v1164_v47 }
 0x155   : >> { %1167 = vst [vmem:[%s1574_s18 + $0xf0] sm:$0xff] %v1166_v48 }
 0x156   : >> { %1169 = vst [vmem:[%s1574_s18 + $0xf8] sm:$0xff] %v1168_v49  ;;  %s2245_s18 = smov %s2154_s29 }
 0x157 PF: > { %s2219_s30 = sand.u32 31, %s2252_s11   ;;  %s1394_s5 = sshll.u32 %s2108_s21, 8 }
 0x158   : > { %s1181_s6 = scalar_lea.vmem %s1843_s15, %s1394_s5 [#allocation2]   ;;  %s1183_s7 = scalar_lea.vmem %s2102_s17, %s1394_s5  }
 0x159   : > { %p1388_p13 = scmp.le.s32.totalorder %s2219_s30, 0 }
 0x15a   : > { %s1588_s8 = smov (!%p1388_p13), %s1183_s7   ;;  %s1592_s9 = smov (!%p1388_p13), %s1181_s6  }
 0x15b   : > { %1274 = sbr.rel (%p1388_p13) target bundleno = 360 (0x168), region = 131  ;;  %s1596_s10 = smov (!%p1388_p13), 0  }
 0x15c   : > { %s1600_s12 = smov (!%p1388_p13), 0  }
 0x160 LB: >> { %v1193_v50 = vld [vmem:[%s1594_s9] sm:$0xff]  ;;  %s1195_s11 = sadd.s32 1, %s1598_s10  ;;  %s1187_s12 = sadd.s32 1, %s1602_s12   ;;  %s1602_s12 = sphi %s1600_s12, %s1187_s12   ;;  %s1598_s10 = sphi %s1596_s10, %s1597_s10   ;;  %s1594_s9 = sphi %s1592_s9, %s1200_s9   ;;  %s1590_s8 = sphi %s1588_s8, %s1201_s8  }
 0x161   : >> { %1194 = vst [vmem:[%s1590_s8] sm:$0xff] %v1193_v50  ;;  %p1196_p0 = scmp.ge.s32.totalorder %s1195_s11, %s2219_s30  ;;  %p1186_p1 = scmp.ge.s32.totalorder %s1187_s12, %s2219_s30 }
 0x163   : >> { %s2256_s11 = smov (%p1196_p0, %s1195_s11), 0  ;;  %1189 = sbr.rel (!%p1186_p1) target bundleno = 352 (0x160), region = 137 }
 0x164   : >> { %s1389_s15 = sshll.u32 %s2256_s11, 3  ;;  %s1597_s10 = smov %s2256_s11  }
 0x165   : >> { %s1200_s9 = scalar_lea.vmem %s1181_s6, %s1389_s15 [#allocation2]   ;;  %s1201_s8 = scalar_lea.vmem %s1183_s7, %s1389_s15  }
 0x168 PF: > { %p11_p2 = scmp.ge.s32.totalorder %s1644_s19, 10   ;;  %s2248_s15 = smov %s1566_s16 }
 0x169   : > { %s2249_s16 = smov %s1652_s22  ;;  %s2250_s17 = smov %s1644_s19 }
 0x16a   :  { %13 = sbr.rel (!%p11_p2) target bundleno = 2 (0x2), region = 148 }

// kernel: transam_forward.6
= control target key start
LH: loop header
LB: loop body
LE: loop exit
PB: predicated region body
PF: predicated region fallthrough
CT: control target
= control target key end

     0   :  { %vm319_vm0 = vcmask 130048   ;;  %vm1530_vm1 = vcmask 261120   ;;  %vm1593_vm2 = vcmask 257024   ;;  %s3061_s1 = inlined_call_operand.vmem [shape: f32[400,32], index: 1, kind: input, shape index: {}]   ;;  %s3062_s0 = inlined_call_operand.vmem [shape: f32[500,400], index: 0, kind: input, shape index: {}]   ;;  %s3063_s2 = inlined_call_operand.vmem [shape: f32[1,32], index: 2, kind: input, shape index: {}]   ;;  %s3064_s3 = inlined_call_operand.vmem [shape: f32[1,32], index: 3, kind: input, shape index: {}]   ;;  %s3065_s4 = inlined_call_operand.vmem [shape: f32[500,32], index: 4, kind: output, shape index: {}]  }
   0x1   :  { %v316_v0 = vld [vmem:[%s3061_s1 + $0x178] sm:$0xff]  ;;  %v315_v1 = vld [vmem:[%s3061_s1 + $0x170] sm:$0xff]  ;;  %v314_v5 = vld [vmem:[%s3061_s1 + $0x168] sm:$0xff] }
   0x2   :  { %v284_v2 = vld [vmem:[%s3061_s1 + $0x78] sm:$0xff]  ;;  %921 = vmatpush.msra.mxu2 %v316_v0  ;;  %v283_v4 = vld [vmem:[%s3061_s1 + $0x70] sm:$0xff]  ;;  %v282_v7 = vld [vmem:[%s3061_s1 + $0x68] sm:$0xff] }
   0x3   :  { %509 = vmatpush.msra.mxu0 %v284_v2  ;;  %v300_v3 = vld [vmem:[%s3061_s1 + $0xf8] sm:$0xff]  ;;  %v299_v6 = vld [vmem:[%s3061_s1 + $0xf0] sm:$0xff]  ;;  %v298_v8 = vld [vmem:[%s3061_s1 + $0xe8] sm:$0xff] }
   0x4   :  { %715 = vmatpush.msra.mxu1 %v300_v3  ;;  %922 = vmatpush.msra.mxu2 %v315_v1  ;;  %v313_v9 = vld [vmem:[%s3061_s1 + $0x160] sm:$0xff]  ;;  %v312_v12 = vld [vmem:[%s3061_s1 + $0x158] sm:$0xff]  ;;  %v311_v15 = vld [vmem:[%s3061_s1 + $0x150] sm:$0xff] }
   0x5   :  { %510 = vmatpush.msra.mxu0 %v283_v4  ;;  %v281_v10 = vld [vmem:[%s3061_s1 + $0x60] sm:$0xff]  ;;  %v280_v13 = vld [vmem:[%s3061_s1 + $0x58] sm:$0xff]  ;;  %v279_v16 = vld [vmem:[%s3061_s1 + $0x50] sm:$0xff] }
   0x6   :  { %716 = vmatpush.msra.mxu1 %v299_v6  ;;  %923 = vmatpush.msra.mxu2 %v314_v5  ;;  %v297_v11 = vld [vmem:[%s3061_s1 + $0xe0] sm:$0xff]  ;;  %v296_v14 = vld [vmem:[%s3061_s1 + $0xd8] sm:$0xff]  ;;  %v295_v17 = vld [vmem:[%s3061_s1 + $0xd0] sm:$0xff] }
   0x7   :  { %511 = vmatpush.msra.mxu0 %v282_v7  ;;  %v310_v18 = vld [vmem:[%s3061_s1 + $0x148] sm:$0xff]  ;;  %v309_v21 = vld [vmem:[%s3061_s1 + $0x140] sm:$0xff]  ;;  %v308_v24 = vld [vmem:[%s3061_s1 + $0x138] sm:$0xff] }
   0x8   :  { %717 = vmatpush.msra.mxu1 %v298_v8  ;;  %924 = vmatpush.msra.mxu2 %v313_v9  ;;  %v278_v19 = vld [vmem:[%s3061_s1 + $0x48] sm:$0xff]  ;;  %v277_v22 = vld [vmem:[%s3061_s1 + $0x40] sm:$0xff]  ;;  %v276_v25 = vld [vmem:[%s3061_s1 + $0x38] sm:$0xff] }
   0x9   :  { %512 = vmatpush.msra.mxu0 %v281_v10  ;;  %v294_v20 = vld [vmem:[%s3061_s1 + $0xc8] sm:$0xff]  ;;  %v293_v23 = vld [vmem:[%s3061_s1 + $0xc0] sm:$0xff]  ;;  %v292_v27 = vld [vmem:[%s3061_s1 + $0xb8] sm:$0xff] }
   0xa   :  { %718 = vmatpush.msra.mxu1 %v297_v11  ;;  %925 = vmatpush.msra.mxu2 %v312_v12  ;;  %v318_v26 = vld [vmem:[%s3061_s1 + $0x188] sm:$0xff]  ;;  %v307_v28 = vld [vmem:[%s3061_s1 + $0x130] sm:$0xff]  ;;  %v317_v30 = vld [vmem:[%s3061_s1 + $0x180] sm:$0xff] }
   0xb   :  { %513 = vmatpush.msra.mxu0 %v280_v13  ;;  %v275_v29 = vld [vmem:[%s3061_s1 + $0x30] sm:$0xff]  ;;  %1141 = vmatpush.msra.mxu3 %v318_v26  ;;  %v20_v32 = vld [vmem:[%s3062_s0 + $0x18] sm:$0xff]  ;;  %v306_v33 = vld [vmem:[%s3061_s1 + $0x128] sm:$0xff] }
   0xc   :  { %719 = vmatpush.msra.mxu1 %v296_v14  ;;  %926 = vmatpush.msra.mxu2 %v311_v15  ;;  %v291_v31 = vld [vmem:[%s3061_s1 + $0xb0] sm:$0xff]  ;;  %v274_v34 = vld [vmem:[%s3061_s1 + $0x28] sm:$0xff]  ;;  %v305_v36 = vld [vmem:[%s3061_s1 + $0x120] sm:$0xff] }
   0xd   :  { %514 = vmatpush.msra.mxu0 %v279_v16  ;;  %1142 = vmatpush.msra.mxu3 %v317_v30  ;;  %v290_v35 = vld [vmem:[%s3061_s1 + $0xa8] sm:$0xff]  ;;  %v273_v37 = vld [vmem:[%s3061_s1 + $0x20] sm:$0xff]  ;;  %v304_v39 = vld [vmem:[%s3061_s1 + $0x118] sm:$0xff] }
   0xe   :  { %720 = vmatpush.msra.mxu1 %v295_v17  ;;  %927 = vmatpush.msra.mxu2 %v310_v18  ;;  %v289_v38 = vld [vmem:[%s3061_s1 + $0xa0] sm:$0xff]  ;;  %v272_v40 = vld [vmem:[%s3061_s1 + $0x18] sm:$0xff]  ;;  %v303_v42 = vld [vmem:[%s3061_s1 + $0x110] sm:$0xff] }
   0xf   :  { %515 = vmatpush.msra.mxu0 %v278_v19  ;;  %1599 = vmatmul.msk.f32.vlgmr.msra.gmra.mxu3 %vm319_vm0, %v20_v32  ;;  %v288_v41 = vld [vmem:[%s3061_s1 + $0x98] sm:$0xff]  ;;  %v271_v43 = vld [vmem:[%s3061_s1 + $0x10] sm:$0xff]  ;;  %v302_v46 = vld [vmem:[%s3061_s1 + $0x108] sm:$0xff] }
  0x10   :  { %721 = vmatpush.msra.mxu1 %v294_v20  ;;  %928 = vmatpush.msra.mxu2 %v309_v21  ;;  %v287_v44 = vld [vmem:[%s3061_s1 + $0x90] sm:$0xff]  ;;  %v24_v45 = vld [vmem:[%s3062_s0 + $0x38] sm:$0xff]  ;;  %v270_v47 = vld [vmem:[%s3061_s1 + $0x8] sm:$0xff] }
  0x11   :  { %516 = vmatpush.msra.mxu0 %v277_v22  ;;  %v286_v48 = vld [vmem:[%s3061_s1 + $0x88] sm:$0xff]  ;;  %v301_v49 = vld [vmem:[%s3061_s1 + $0x100] sm:$0xff]  ;;  %v19_v51 = vld [vmem:[%s3062_s0 + $0x10] sm:$0xff] }
  0x12   :  { %722 = vmatpush.msra.mxu1 %v293_v23  ;;  %929 = vmatpush.msra.mxu2 %v308_v24  ;;  %v269_v50 = vld [vmem:[%s3061_s1] sm:$0xff]  ;;  %v18_v54 = vld [vmem:[%s3062_s0 + $0x8] sm:$0xff]  ;;  %v28_v55 = vld [vmem:[%s3062_s0 + $0x58] sm:$0xff] }
  0x13   :  { %517 = vmatpush.msra.mxu0 %v276_v25  ;;  %v285_v52 = vld [vmem:[%s3061_s1 + $0x80] sm:$0xff]  ;;  %v23_v56 = vld [vmem:[%s3062_s0 + $0x30] sm:$0xff]  ;;  %v22_v58 = vld [vmem:[%s3062_s0 + $0x28] sm:$0xff] }
  0x14   :  { %723 = vmatpush.msra.mxu1 %v292_v27  ;;  %930 = vmatpush.msra.mxu2 %v307_v28  ;;  %v17_v53 = vld [vmem:[%s3062_s0] sm:$0xff]  ;;  %v32_v59 = vld [vmem:[%s3062_s0 + $0x78] sm:$0xff]  ;;  %v27_v60 = vld [vmem:[%s3062_s0 + $0x50] sm:$0xff] }
  0x15   :  { %518 = vmatpush.msra.mxu0 %v275_v29  ;;  %v21_v57 = vld [vmem:[%s3062_s0 + $0x20] sm:$0xff]  ;;  %v26_v62 = vld [vmem:[%s3062_s0 + $0x48] sm:$0xff]  ;;  %v36_v63 = vld [vmem:[%s3062_s0 + $0x98] sm:$0xff] }
  0x16   :  { %724 = vmatpush.msra.mxu1 %v291_v31  ;;  %931 = vmatpush.msra.mxu2 %v306_v33  ;;  %v25_v61 = vld [vmem:[%s3062_s0 + $0x40] sm:$0xff]  ;;  %v31_v0 = vld [vmem:[%s3062_s0 + $0x70] sm:$0xff]  ;;  %v30_v2 = vld [vmem:[%s3062_s0 + $0x68] sm:$0xff] }
  0x17   :  { %519 = vmatpush.msra.mxu0 %v274_v34  ;;  %1600 = vmatmul.msk.f32.gmra.mxu3 %vm319_vm0, %v24_v45  ;;  %v29_v1 = vld [vmem:[%s3062_s0 + $0x60] sm:$0xff]  ;;  %v40_v3 = vld [vmem:[%s3062_s0 + $0xb8] sm:$0xff]  ;;  %v35_v4 = vld [vmem:[%s3062_s0 + $0x90] sm:$0xff] }
  0x18   :  { %725 = vmatpush.msra.mxu1 %v290_v35  ;;  %932 = vmatpush.msra.mxu2 %v305_v36  ;;  %v33_v5 = vld [vmem:[%s3062_s0 + $0x80] sm:$0xff]  ;;  %v34_v6 = vld [vmem:[%s3062_s0 + $0x88] sm:$0xff]  ;;  %v44_v7 = vld [vmem:[%s3062_s0 + $0xd8] sm:$0xff] }
  0x19   :  { %520 = vmatpush.msra.mxu0 %v273_v37  ;;  %v39_v8 = vld [vmem:[%s3062_s0 + $0xb0] sm:$0xff]  ;;  %v37_v9 = vld [vmem:[%s3062_s0 + $0xa0] sm:$0xff]  ;;  %v38_v10 = vld [vmem:[%s3062_s0 + $0xa8] sm:$0xff] }
  0x1a   :  { %726 = vmatpush.msra.mxu1 %v289_v38  ;;  %933 = vmatpush.msra.mxu2 %v304_v39  ;;  %v48_v11 = vld [vmem:[%s3062_s0 + $0xf8] sm:$0xff]  ;;  %v43_v12 = vld [vmem:[%s3062_s0 + $0xd0] sm:$0xff]  ;;  %v41_v13 = vld [vmem:[%s3062_s0 + $0xc0] sm:$0xff] }
  0x1b   :  { %521 = vmatpush.msra.mxu0 %v272_v40  ;;  %v42_v14 = vld [vmem:[%s3062_s0 + $0xc8] sm:$0xff]  ;;  %v52_v15 = vld [vmem:[%s3062_s0 + $0x118] sm:$0xff]  ;;  %v47_v16 = vld [vmem:[%s3062_s0 + $0xf0] sm:$0xff] }
  0x1c   :  { %727 = vmatpush.msra.mxu1 %v288_v41  ;;  %934 = vmatpush.msra.mxu2 %v303_v42  ;;  %v45_v17 = vld [vmem:[%s3062_s0 + $0xe0] sm:$0xff]  ;;  %v46_v18 = vld [vmem:[%s3062_s0 + $0xe8] sm:$0xff]  ;;  %v56_v19 = vld [vmem:[%s3062_s0 + $0x138] sm:$0xff] }
  0x1d   :  { %522 = vmatpush.msra.mxu0 %v271_v43  ;;  %v51_v20 = vld [vmem:[%s3062_s0 + $0x110] sm:$0xff]  ;;  %v49_v21 = vld [vmem:[%s3062_s0 + $0x100] sm:$0xff]  ;;  %v50_v22 = vld [vmem:[%s3062_s0 + $0x108] sm:$0xff] }
  0x1e   :  { %728 = vmatpush.msra.mxu1 %v287_v44  ;;  %935 = vmatpush.msra.mxu2 %v302_v46  ;;  %v60_v23 = vld [vmem:[%s3062_s0 + $0x158] sm:$0xff]  ;;  %v55_v24 = vld [vmem:[%s3062_s0 + $0x130] sm:$0xff]  ;;  %v53_v25 = vld [vmem:[%s3062_s0 + $0x120] sm:$0xff] }
  0x1f   :  { %523 = vmatpush.msra.mxu0 %v270_v47  ;;  %1601 = vmatmul.msk.f32.gmra.mxu3 %vm319_vm0, %v28_v55  ;;  %v54_v26 = vld [vmem:[%s3062_s0 + $0x128] sm:$0xff]  ;;  %v64_v27 = vld [vmem:[%s3062_s0 + $0x178] sm:$0xff]  ;;  %v59_v28 = vld [vmem:[%s3062_s0 + $0x150] sm:$0xff] }
  0x20   :  { %729 = vmatpush.msra.mxu1 %v286_v48  ;;  %936 = vmatpush.msra.mxu2 %v301_v49  ;;  %v57_v29 = vld [vmem:[%s3062_s0 + $0x140] sm:$0xff]  ;;  %v58_v30 = vld [vmem:[%s3062_s0 + $0x148] sm:$0xff]  ;;  %v68_v31 = vld [vmem:[%s3062_s0 + $0x198] sm:$0xff] }
  0x21   :  { %524 = vmatpush.msra.mxu0 %v269_v50  ;;  %937 = vmatmul.f32.vlgmr.msra.gmra.mxu2 %v19_v51  ;;  %v63_v32 = vld [vmem:[%s3062_s0 + $0x170] sm:$0xff]  ;;  %v61_v33 = vld [vmem:[%s3062_s0 + $0x160] sm:$0xff]  ;;  %v62_v34 = vld [vmem:[%s3062_s0 + $0x168] sm:$0xff] }
  0x22   :  { %730 = vmatpush.msra.mxu1 %v285_v52  ;;  %525 = vmatmul.f32.vlgmr.msra.gmra.mxu0 %v17_v53  ;;  %v72_v35 = vld [vmem:[%s3062_s0 + $0x1b8] sm:$0xff]  ;;  %v67_v36 = vld [vmem:[%s3062_s0 + $0x190] sm:$0xff]  ;;  %v65_v37 = vld [vmem:[%s3062_s0 + $0x180] sm:$0xff] }
  0x23   :  { %731 = vmatmul.f32.vlgmr.msra.gmra.mxu1 %v18_v54  ;;  %v66_v38 = vld [vmem:[%s3062_s0 + $0x188] sm:$0xff]  ;;  %v76_v39 = vld [vmem:[%s3062_s0 + $0x1d8] sm:$0xff]  ;;  %v71_v40 = vld [vmem:[%s3062_s0 + $0x1b0] sm:$0xff] }
  0x24   :  { %v69_v41 = vld [vmem:[%s3062_s0 + $0x1a0] sm:$0xff]  ;;  %v70_v42 = vld [vmem:[%s3062_s0 + $0x1a8] sm:$0xff]  ;;  %v80_v43 = vld [vmem:[%s3062_s0 + $0x1f8] sm:$0xff] }
  0x25   :  { %v75_v44 = vld [vmem:[%s3062_s0 + $0x1d0] sm:$0xff]  ;;  %v73_v45 = vld [vmem:[%s3062_s0 + $0x1c0] sm:$0xff]  ;;  %v74_v46 = vld [vmem:[%s3062_s0 + $0x1c8] sm:$0xff] }
  0x26   :  { %v84_v47 = vld [vmem:[%s3062_s0 + $0x218] sm:$0xff]  ;;  %v79_v48 = vld [vmem:[%s3062_s0 + $0x1f0] sm:$0xff]  ;;  %v77_v49 = vld [vmem:[%s3062_s0 + $0x1e0] sm:$0xff] }
  0x27   :  { %1602 = vmatmul.msk.f32.gmra.mxu3 %vm319_vm0, %v32_v59  ;;  %v78_v50 = vld [vmem:[%s3062_s0 + $0x1e8] sm:$0xff]  ;;  %v88_v52 = vld [vmem:[%s3062_s0 + $0x238] sm:$0xff]  ;;  %v83_v53 = vld [vmem:[%s3062_s0 + $0x210] sm:$0xff] }
  0x29   :  { %940 = vmatmul.f32.gmra.mxu2 %v23_v56  ;;  %v81_v56 = vld [vmem:[%s3062_s0 + $0x200] sm:$0xff] }
  0x2a   :  { %528 = vmatmul.f32.gmra.mxu0 %v21_v57  ;;  %v82_v57 = vld [vmem:[%s3062_s0 + $0x208] sm:$0xff] }
  0x2b   :  { %734 = vmatmul.f32.gmra.mxu1 %v22_v58 }
  0x2f   :  { %1603 = vmatmul.msk.f32.gmra.mxu3 %vm319_vm0, %v36_v63  ;;  %v2074_v63 = vld [vmem:[%s3063_s2] ss:$0 sm:$0xff] }
  0x31   :  { %943 = vmatmul.f32.gmra.mxu2 %v27_v60  ;;  %v92_v60 = vld [vmem:[%s3062_s0 + $0x258] sm:$0xff] }
  0x32   :  { %531 = vmatmul.f32.gmra.mxu0 %v25_v61 }
  0x33   :  { %737 = vmatmul.f32.gmra.mxu1 %v26_v62 }
  0x37   :  { %1604 = vmatmul.msk.f32.gmra.mxu3 %vm319_vm0, %v40_v3 }
  0x39   :  { %946 = vmatmul.f32.gmra.mxu2 %v31_v0  ;;  %v87_v0 = vld [vmem:[%s3062_s0 + $0x230] sm:$0xff] }
  0x3a   :  { %534 = vmatmul.f32.gmra.mxu0 %v29_v1 }
  0x3b   :  { %740 = vmatmul.f32.gmra.mxu1 %v30_v2  ;;  %v2083_v2 = vld [vmem:[%s3064_s3] ss:$0 sm:$0xff] }
  0x3f   :  { %1605 = vmatmul.msk.f32.gmra.mxu3 %vm319_vm0, %v44_v7 }
  0x41   :  { %949 = vmatmul.f32.gmra.mxu2 %v35_v4 }
  0x42   :  { %537 = vmatmul.f32.gmra.mxu0 %v33_v5  ;;  %v85_v5 = vld [vmem:[%s3062_s0 + $0x220] sm:$0xff] }
  0x43   :  { %743 = vmatmul.f32.gmra.mxu1 %v34_v6  ;;  %v86_v6 = vld [vmem:[%s3062_s0 + $0x228] sm:$0xff] }
  0x47   :  { %1606 = vmatmul.msk.f32.gmra.mxu3 %vm319_vm0, %v48_v11 }
  0x49   :  { %952 = vmatmul.f32.gmra.mxu2 %v39_v8 }
  0x4a   :  { %540 = vmatmul.f32.gmra.mxu0 %v37_v9 }
  0x4b   :  { %746 = vmatmul.f32.gmra.mxu1 %v38_v10  ;;  %v96_v10 = vld [vmem:[%s3062_s0 + $0x278] sm:$0xff] }
  0x4f   :  { %1607 = vmatmul.msk.f32.gmra.mxu3 %vm319_vm0, %v52_v15  ;;  %v91_v15 = vld [vmem:[%s3062_s0 + $0x250] sm:$0xff] }
  0x51   :  { %955 = vmatmul.f32.gmra.mxu2 %v43_v12 }
  0x52   :  { %543 = vmatmul.f32.gmra.mxu0 %v41_v13 }
  0x53   :  { %749 = vmatmul.f32.gmra.mxu1 %v42_v14 }
  0x57   :  { %1608 = vmatmul.msk.f32.gmra.mxu3 %vm319_vm0, %v56_v19  ;;  %v89_v19 = vld [vmem:[%s3062_s0 + $0x240] sm:$0xff] }
  0x59   :  { %958 = vmatmul.f32.gmra.mxu2 %v47_v16 }
  0x5a   :  { %546 = vmatmul.f32.gmra.mxu0 %v45_v17 }
  0x5b   :  { %752 = vmatmul.f32.gmra.mxu1 %v46_v18 }
  0x5f   :  { %1609 = vmatmul.msk.f32.gmra.mxu3 %vm319_vm0, %v60_v23 }
  0x61   :  { %961 = vmatmul.f32.gmra.mxu2 %v51_v20  ;;  %v90_v20 = vld [vmem:[%s3062_s0 + $0x248] sm:$0xff] }
  0x62   :  { %549 = vmatmul.f32.gmra.mxu0 %v49_v21 }
  0x63   :  { %755 = vmatmul.f32.gmra.mxu1 %v50_v22 }
  0x67   :  { %1610 = vmatmul.msk.f32.gmra.mxu3 %vm319_vm0, %v64_v27 }
  0x69   :  { %964 = vmatmul.f32.gmra.mxu2 %v55_v24  ;;  %v100_v24 = vld [vmem:[%s3062_s0 + $0x298] sm:$0xff] }
  0x6a   :  { %552 = vmatmul.f32.gmra.mxu0 %v53_v25 }
  0x6b   :  { %758 = vmatmul.f32.gmra.mxu1 %v54_v26 }
  0x6f   :  { %1611 = vmatmul.msk.f32.gmra.mxu3 %vm319_vm0, %v68_v31 }
  0x71   :  { %967 = vmatmul.f32.gmra.mxu2 %v59_v28 }
  0x72   :  { %555 = vmatmul.f32.gmra.mxu0 %v57_v29  ;;  %v95_v29 = vld [vmem:[%s3062_s0 + $0x270] sm:$0xff] }
  0x73   :  { %761 = vmatmul.f32.gmra.mxu1 %v58_v30 }
  0x77   :  { %1612 = vmatmul.msk.f32.gmra.mxu3 %vm319_vm0, %v72_v35 }
  0x79   :  { %970 = vmatmul.f32.gmra.mxu2 %v63_v32 }
  0x7a   :  { %558 = vmatmul.f32.gmra.mxu0 %v61_v33  ;;  %v93_v33 = vld [vmem:[%s3062_s0 + $0x260] sm:$0xff] }
  0x7b   :  { %764 = vmatmul.f32.gmra.mxu1 %v62_v34  ;;  %v94_v34 = vld [vmem:[%s3062_s0 + $0x268] sm:$0xff] }
  0x7f   :  { %1613 = vmatmul.msk.f32.gmra.mxu3 %vm319_vm0, %v76_v39 }
  0x81   :  { %973 = vmatmul.f32.gmra.mxu2 %v67_v36 }
  0x82   :  { %561 = vmatmul.f32.gmra.mxu0 %v65_v37 }
  0x83   :  { %767 = vmatmul.f32.gmra.mxu1 %v66_v38  ;;  %v104_v38 = vld [vmem:[%s3062_s0 + $0x2b8] sm:$0xff] }
  0x87   :  { %1614 = vmatmul.msk.f32.gmra.mxu3 %vm319_vm0, %v80_v43  ;;  %v99_v43 = vld [vmem:[%s3062_s0 + $0x290] sm:$0xff] }
  0x89   :  { %976 = vmatmul.f32.gmra.mxu2 %v71_v40 }
  0x8a   :  { %564 = vmatmul.f32.gmra.mxu0 %v69_v41 }
  0x8b   :  { %770 = vmatmul.f32.gmra.mxu1 %v70_v42 }
  0x8f   :  { %1615 = vmatmul.msk.f32.gmra.mxu3 %vm319_vm0, %v84_v47  ;;  %v97_v47 = vld [vmem:[%s3062_s0 + $0x280] sm:$0xff] }
  0x91   :  { %979 = vmatmul.f32.gmra.mxu2 %v75_v44 }
  0x92   :  { %567 = vmatmul.f32.gmra.mxu0 %v73_v45  ;;  %v1144_v51 = vpop.f32.mrf.mxu3 }
  0x93   :  { %773 = vmatmul.f32.gmra.mxu1 %v74_v46 }
  0x97   :  { %1616 = vmatmul.msk.f32.gmra.mxu3 %vm319_vm0, %v88_v52  ;;  %v108_v52 = vld [vmem:[%s3062_s0 + $0x2d8] sm:$0xff] }
  0x99   :  { %982 = vmatmul.f32.gmra.mxu2 %v79_v48  ;;  %v98_v48 = vld [vmem:[%s3062_s0 + $0x288] sm:$0xff] }
  0x9a   :  { %570 = vmatmul.f32.gmra.mxu0 %v77_v49  ;;  %v1147_v58 = vpop.f32.mrf.mxu3 }
  0x9b   :  { %776 = vmatmul.f32.gmra.mxu1 %v78_v50 }
  0x9f   :  { %v526_v54 = vpop.f32.mrf.mxu0  ;;  %1617 = vmatmul.msk.f32.gmra.mxu3 %vm319_vm0, %v92_v60 }
  0xa0   :  { %v732_v55 = vpop.f32.mrf.mxu1 }
  0xa1   :  { %985 = vmatmul.f32.gmra.mxu2 %v83_v53  ;;  %v733_v59 = vadd.f32 %v732_v55, %v526_v54 }
  0xa2   :  { %573 = vmatmul.f32.gmra.mxu0 %v81_v56  ;;  %v1150_v7 = vpop.f32.mrf.mxu3 }
  0xa3   :  { %779 = vmatmul.f32.gmra.mxu1 %v82_v57  ;;  %v103_v57 = vld [vmem:[%s3062_s0 + $0x2b0] sm:$0xff] }
  0xa4   :  { %v938_v61 = vpop.f32.mrf.mxu2 }
  0xa5   :  { %v939_v62 = vadd.f32 %v938_v61, %v733_v59  ;;  %v101_v61 = vld [vmem:[%s3062_s0 + $0x2a0] sm:$0xff] }
  0xa7   :  { %v1145_v1 = vadd.f32 %v1144_v51, %v939_v62  ;;  %v529_v3 = vpop.f32.mrf.mxu0  ;;  %1618 = vmatmul.msk.f32.gmra.mxu3 %vm319_vm0, %v96_v10  ;;  %v102_v62 = vld [vmem:[%s3062_s0 + $0x2a8] sm:$0xff] }
  0xa8   :  { %v735_v4 = vpop.f32.mrf.mxu1 }
  0xa9   :  { %v1337_v8 = vmul.f32 %v2074_v63, %v1145_v1  ;;  %988 = vmatmul.f32.gmra.mxu2 %v87_v0  ;;  %v736_v9 = vadd.f32 %v735_v4, %v529_v3  ;;  %v112_v4 = vld [vmem:[%s3062_s0 + $0x2f8] sm:$0xff] }
  0xaa   :  { %576 = vmatmul.f32.gmra.mxu0 %v85_v5  ;;  %v1153_v21 = vpop.f32.mrf.mxu3 }
  0xab   :  { %782 = vmatmul.f32.gmra.mxu1 %v86_v6  ;;  %v1404_v11 = vadd.f32 %v2083_v2, %v1337_v8 }
  0xac   :  { %v941_v12 = vpop.f32.mrf.mxu2 }
  0xad   :  { %v1467_v13 = vmax.f32 %v1404_v11, 0.0  ;;  %v942_v14 = vadd.f32 %v941_v12, %v736_v9  ;;  %v107_v9 = vld [vmem:[%s3062_s0 + $0x2d0] sm:$0xff] }
  0xaf   :  { %1531 = vst.msk [vmem:[%s3065_s4] sm:$0xff] %vm1530_vm1, %v1467_v13  ;;  %v1148_v16 = vadd.f32 %v1147_v58, %v942_v14  ;;  %v532_v17 = vpop.f32.mrf.mxu0  ;;  %1619 = vmatmul.msk.f32.gmra.mxu3 %vm319_vm0, %v100_v24  ;;  %v105_v13 = vld [vmem:[%s3062_s0 + $0x2c0] sm:$0xff]  ;;  %v106_v14 = vld [vmem:[%s3062_s0 + $0x2c8] sm:$0xff] }
  0xb0   :  { %v738_v18 = vpop.f32.mrf.mxu1 }
  0xb1   :  { %v1338_v22 = vmul.f32 %v2074_v63, %v1148_v16  ;;  %991 = vmatmul.f32.gmra.mxu2 %v91_v15  ;;  %v739_v23 = vadd.f32 %v738_v18, %v532_v17  ;;  %v116_v18 = vld [vmem:[%s3062_s0 + $0x318] sm:$0xff] }
  0xb2   :  { %579 = vmatmul.f32.gmra.mxu0 %v89_v19  ;;  %v1156_v35 = vpop.f32.mrf.mxu3 }
  0xb3   :  { %785 = vmatmul.f32.gmra.mxu1 %v90_v20  ;;  %v1405_v25 = vadd.f32 %v2083_v2, %v1338_v22 }
  0xb4   :  { %v944_v26 = vpop.f32.mrf.mxu2 }
  0xb5   :  { %v1468_v27 = vmax.f32 %v1405_v25, 0.0  ;;  %v945_v28 = vadd.f32 %v944_v26, %v739_v23  ;;  %v111_v23 = vld [vmem:[%s3062_s0 + $0x2f0] sm:$0xff] }
  0xb7   :  { %1532 = vst.msk [vmem:[%s3065_s4 + $0x8] sm:$0xff] %vm1530_vm1, %v1468_v27  ;;  %v1151_v30 = vadd.f32 %v1150_v7, %v945_v28  ;;  %v535_v31 = vpop.f32.mrf.mxu0  ;;  %1620 = vmatmul.msk.f32.gmra.mxu3 %vm319_vm0, %v104_v38  ;;  %v109_v27 = vld [vmem:[%s3062_s0 + $0x2e0] sm:$0xff]  ;;  %v110_v28 = vld [vmem:[%s3062_s0 + $0x2e8] sm:$0xff] }
  0xb8   :  { %v741_v32 = vpop.f32.mrf.mxu1 }
  0xb9   :  { %v1339_v36 = vmul.f32 %v2074_v63, %v1151_v30  ;;  %994 = vmatmul.f32.gmra.mxu2 %v95_v29  ;;  %v742_v37 = vadd.f32 %v741_v32, %v535_v31  ;;  %v120_v32 = vld [vmem:[%s3062_s0 + $0x338] sm:$0xff] }
  0xba   :  { %582 = vmatmul.f32.gmra.mxu0 %v93_v33  ;;  %v1159_v49 = vpop.f32.mrf.mxu3 }
  0xbb   :  { %788 = vmatmul.f32.gmra.mxu1 %v94_v34  ;;  %v1406_v39 = vadd.f32 %v2083_v2, %v1339_v36 }
  0xbc   :  { %v947_v40 = vpop.f32.mrf.mxu2 }
  0xbd   :  { %v1469_v41 = vmax.f32 %v1406_v39, 0.0  ;;  %v948_v42 = vadd.f32 %v947_v40, %v742_v37  ;;  %v115_v37 = vld [vmem:[%s3062_s0 + $0x310] sm:$0xff] }
  0xbf   :  { %1533 = vst.msk [vmem:[%s3065_s4 + $0x10] sm:$0xff] %vm1530_vm1, %v1469_v41  ;;  %v1154_v44 = vadd.f32 %v1153_v21, %v948_v42  ;;  %v538_v45 = vpop.f32.mrf.mxu0  ;;  %1621 = vmatmul.msk.f32.gmra.mxu3 %vm319_vm0, %v108_v52  ;;  %v113_v41 = vld [vmem:[%s3062_s0 + $0x300] sm:$0xff]  ;;  %v114_v42 = vld [vmem:[%s3062_s0 + $0x308] sm:$0xff] }
  0xc0   :  { %v744_v46 = vpop.f32.mrf.mxu1 }
  0xc1   :  { %v1340_v50 = vmul.f32 %v2074_v63, %v1154_v44  ;;  %997 = vmatmul.f32.gmra.mxu2 %v99_v43  ;;  %v745_v51 = vadd.f32 %v744_v46, %v538_v45  ;;  %v124_v46 = vld [vmem:[%s3062_s0 + $0x358] sm:$0xff] }
  0xc2   :  { %585 = vmatmul.f32.gmra.mxu0 %v97_v47  ;;  %v1162_v0 = vpop.f32.mrf.mxu3 }
  0xc3   :  { %791 = vmatmul.f32.gmra.mxu1 %v98_v48  ;;  %v1407_v53 = vadd.f32 %v2083_v2, %v1340_v50 }
  0xc4   :  { %v950_v54 = vpop.f32.mrf.mxu2 }
  0xc5   :  { %v1470_v55 = vmax.f32 %v1407_v53, 0.0  ;;  %v951_v56 = vadd.f32 %v950_v54, %v745_v51  ;;  %v119_v51 = vld [vmem:[%s3062_s0 + $0x330] sm:$0xff] }
  0xc7   :  { %1534 = vst.msk [vmem:[%s3065_s4 + $0x18] sm:$0xff] %vm1530_vm1, %v1470_v55  ;;  %v1157_v58 = vadd.f32 %v1156_v35, %v951_v56  ;;  %v541_v59 = vpop.f32.mrf.mxu0  ;;  %1622 = vmatmul.msk.f32.gmra.mxu3 %vm319_vm0, %v112_v4  ;;  %v117_v55 = vld [vmem:[%s3062_s0 + $0x320] sm:$0xff]  ;;  %v118_v56 = vld [vmem:[%s3062_s0 + $0x328] sm:$0xff] }
  0xc8   :  { %v747_v60 = vpop.f32.mrf.mxu1 }
  0xc9   :  { %v1341_v1 = vmul.f32 %v2074_v63, %v1157_v58  ;;  %1000 = vmatmul.f32.gmra.mxu2 %v103_v57  ;;  %v748_v3 = vadd.f32 %v747_v60, %v541_v59  ;;  %v128_v60 = vld [vmem:[%s3062_s0 + $0x378] sm:$0xff] }
  0xca   :  { %588 = vmatmul.f32.gmra.mxu0 %v101_v61  ;;  %v1165_v15 = vpop.f32.mrf.mxu3 }
  0xcb   :  { %794 = vmatmul.f32.gmra.mxu1 %v102_v62  ;;  %v1408_v5 = vadd.f32 %v2083_v2, %v1341_v1 }
  0xcc   :  { %v953_v6 = vpop.f32.mrf.mxu2 }
  0xcd   :  { %v1471_v7 = vmax.f32 %v1408_v5, 0.0  ;;  %v954_v8 = vadd.f32 %v953_v6, %v748_v3  ;;  %v123_v3 = vld [vmem:[%s3062_s0 + $0x350] sm:$0xff] }
  0xcf   :  { %1535 = vst.msk [vmem:[%s3065_s4 + $0x20] sm:$0xff] %vm1530_vm1, %v1471_v7  ;;  %v1160_v10 = vadd.f32 %v1159_v49, %v954_v8  ;;  %v544_v11 = vpop.f32.mrf.mxu0  ;;  %1623 = vmatmul.msk.f32.gmra.mxu3 %vm319_vm0, %v116_v18  ;;  %v121_v7 = vld [vmem:[%s3062_s0 + $0x340] sm:$0xff]  ;;  %v122_v8 = vld [vmem:[%s3062_s0 + $0x348] sm:$0xff] }
  0xd0   :  { %v750_v12 = vpop.f32.mrf.mxu1 }
  0xd1   :  { %v1342_v16 = vmul.f32 %v2074_v63, %v1160_v10  ;;  %1003 = vmatmul.f32.gmra.mxu2 %v107_v9  ;;  %v751_v17 = vadd.f32 %v750_v12, %v544_v11  ;;  %v132_v12 = vld [vmem:[%s3062_s0 + $0x398] sm:$0xff] }
  0xd2   :  { %591 = vmatmul.f32.gmra.mxu0 %v105_v13  ;;  %v1168_v29 = vpop.f32.mrf.mxu3 }
  0xd3   :  { %797 = vmatmul.f32.gmra.mxu1 %v106_v14  ;;  %v1409_v19 = vadd.f32 %v2083_v2, %v1342_v16 }
  0xd4   :  { %v956_v20 = vpop.f32.mrf.mxu2 }
  0xd5   :  { %v1472_v21 = vmax.f32 %v1409_v19, 0.0  ;;  %v957_v22 = vadd.f32 %v956_v20, %v751_v17  ;;  %v127_v17 = vld [vmem:[%s3062_s0 + $0x370] sm:$0xff] }
  0xd7   :  { %1536 = vst.msk [vmem:[%s3065_s4 + $0x28] sm:$0xff] %vm1530_vm1, %v1472_v21  ;;  %v1163_v24 = vadd.f32 %v1162_v0, %v957_v22  ;;  %v547_v25 = vpop.f32.mrf.mxu0  ;;  %1624 = vmatmul.msk.f32.gmra.mxu3 %vm319_vm0, %v120_v32  ;;  %v125_v21 = vld [vmem:[%s3062_s0 + $0x360] sm:$0xff]  ;;  %v126_v22 = vld [vmem:[%s3062_s0 + $0x368] sm:$0xff] }
  0xd8   :  { %v753_v26 = vpop.f32.mrf.mxu1 }
  0xd9   :  { %v1343_v30 = vmul.f32 %v2074_v63, %v1163_v24  ;;  %1006 = vmatmul.f32.gmra.mxu2 %v111_v23  ;;  %v754_v31 = vadd.f32 %v753_v26, %v547_v25  ;;  %v136_v26 = vld [vmem:[%s3062_s0 + $0x3b8] sm:$0xff] }
  0xda   :  { %594 = vmatmul.f32.gmra.mxu0 %v109_v27  ;;  %v1171_v43 = vpop.f32.mrf.mxu3 }
  0xdb   :  { %800 = vmatmul.f32.gmra.mxu1 %v110_v28  ;;  %v1410_v33 = vadd.f32 %v2083_v2, %v1343_v30 }
  0xdc   :  { %v959_v34 = vpop.f32.mrf.mxu2 }
  0xdd   :  { %v1473_v35 = vmax.f32 %v1410_v33, 0.0  ;;  %v960_v36 = vadd.f32 %v959_v34, %v754_v31  ;;  %v131_v31 = vld [vmem:[%s3062_s0 + $0x390] sm:$0xff] }
  0xdf   :  { %1537 = vst.msk [vmem:[%s3065_s4 + $0x30] sm:$0xff] %vm1530_vm1, %v1473_v35  ;;  %v1166_v38 = vadd.f32 %v1165_v15, %v960_v36  ;;  %v550_v39 = vpop.f32.mrf.mxu0  ;;  %1625 = vmatmul.msk.f32.gmra.mxu3 %vm319_vm0, %v124_v46  ;;  %v129_v35 = vld [vmem:[%s3062_s0 + $0x380] sm:$0xff]  ;;  %v130_v36 = vld [vmem:[%s3062_s0 + $0x388] sm:$0xff] }
  0xe0   :  { %v756_v40 = vpop.f32.mrf.mxu1 }
  0xe1   :  { %v1344_v44 = vmul.f32 %v2074_v63, %v1166_v38  ;;  %1009 = vmatmul.f32.gmra.mxu2 %v115_v37  ;;  %v757_v45 = vadd.f32 %v756_v40, %v550_v39  ;;  %v140_v40 = vld [vmem:[%s3062_s0 + $0x3d8] sm:$0xff] }
  0xe2   :  { %597 = vmatmul.f32.gmra.mxu0 %v113_v41  ;;  %v1174_v57 = vpop.f32.mrf.mxu3 }
  0xe3   :  { %803 = vmatmul.f32.gmra.mxu1 %v114_v42  ;;  %v1411_v47 = vadd.f32 %v2083_v2, %v1344_v44 }
  0xe4   :  { %v962_v48 = vpop.f32.mrf.mxu2 }
  0xe5   :  { %v1474_v49 = vmax.f32 %v1411_v47, 0.0  ;;  %v963_v50 = vadd.f32 %v962_v48, %v757_v45  ;;  %v135_v45 = vld [vmem:[%s3062_s0 + $0x3b0] sm:$0xff] }
  0xe7   :  { %1538 = vst.msk [vmem:[%s3065_s4 + $0x38] sm:$0xff] %vm1530_vm1, %v1474_v49  ;;  %v1169_v52 = vadd.f32 %v1168_v29, %v963_v50  ;;  %v553_v53 = vpop.f32.mrf.mxu0  ;;  %1626 = vmatmul.msk.f32.gmra.mxu3 %vm319_vm0, %v128_v60  ;;  %v133_v49 = vld [vmem:[%s3062_s0 + $0x3a0] sm:$0xff]  ;;  %v134_v50 = vld [vmem:[%s3062_s0 + $0x3a8] sm:$0xff] }
  0xe8   :  { %v759_v54 = vpop.f32.mrf.mxu1 }
  0xe9   :  { %v1345_v58 = vmul.f32 %v2074_v63, %v1169_v52  ;;  %1012 = vmatmul.f32.gmra.mxu2 %v119_v51  ;;  %v760_v59 = vadd.f32 %v759_v54, %v553_v53  ;;  %v144_v54 = vld [vmem:[%s3062_s0 + $0x3f8] sm:$0xff] }
  0xea   :  { %600 = vmatmul.f32.gmra.mxu0 %v117_v55  ;;  %v1177_v9 = vpop.f32.mrf.mxu3 }
  0xeb   :  { %806 = vmatmul.f32.gmra.mxu1 %v118_v56  ;;  %v1412_v61 = vadd.f32 %v2083_v2, %v1345_v58 }
  0xec   :  { %v965_v62 = vpop.f32.mrf.mxu2 }
  0xed   :  { %v1475_v0 = vmax.f32 %v1412_v61, 0.0  ;;  %v966_v1 = vadd.f32 %v965_v62, %v760_v59  ;;  %v139_v59 = vld [vmem:[%s3062_s0 + $0x3d0] sm:$0xff] }
  0xef   :  { %1539 = vst.msk [vmem:[%s3065_s4 + $0x40] sm:$0xff] %vm1530_vm1, %v1475_v0  ;;  %v1172_v4 = vadd.f32 %v1171_v43, %v966_v1  ;;  %v556_v5 = vpop.f32.mrf.mxu0  ;;  %1627 = vmatmul.msk.f32.gmra.mxu3 %vm319_vm0, %v132_v12  ;;  %v137_v0 = vld [vmem:[%s3062_s0 + $0x3c0] sm:$0xff]  ;;  %v138_v1 = vld [vmem:[%s3062_s0 + $0x3c8] sm:$0xff] }
  0xf0   :  { %v762_v6 = vpop.f32.mrf.mxu1 }
  0xf1   :  { %v1346_v10 = vmul.f32 %v2074_v63, %v1172_v4  ;;  %1015 = vmatmul.f32.gmra.mxu2 %v123_v3  ;;  %v763_v11 = vadd.f32 %v762_v6, %v556_v5  ;;  %v148_v6 = vld [vmem:[%s3062_s0 + $0x418] sm:$0xff] }
  0xf2   :  { %603 = vmatmul.f32.gmra.mxu0 %v121_v7  ;;  %v1180_v23 = vpop.f32.mrf.mxu3 }
  0xf3   :  { %809 = vmatmul.f32.gmra.mxu1 %v122_v8  ;;  %v1413_v13 = vadd.f32 %v2083_v2, %v1346_v10 }
  0xf4   :  { %v968_v14 = vpop.f32.mrf.mxu2 }
  0xf5   :  { %v1476_v15 = vmax.f32 %v1413_v13, 0.0  ;;  %v969_v16 = vadd.f32 %v968_v14, %v763_v11  ;;  %v143_v11 = vld [vmem:[%s3062_s0 + $0x3f0] sm:$0xff] }
  0xf7   :  { %1540 = vst.msk [vmem:[%s3065_s4 + $0x48] sm:$0xff] %vm1530_vm1, %v1476_v15  ;;  %v1175_v18 = vadd.f32 %v1174_v57, %v969_v16  ;;  %v559_v19 = vpop.f32.mrf.mxu0  ;;  %1628 = vmatmul.msk.f32.gmra.mxu3 %vm319_vm0, %v136_v26  ;;  %v141_v15 = vld [vmem:[%s3062_s0 + $0x3e0] sm:$0xff]  ;;  %v142_v16 = vld [vmem:[%s3062_s0 + $0x3e8] sm:$0xff] }
  0xf8   :  { %v765_v20 = vpop.f32.mrf.mxu1 }
  0xf9   :  { %v1347_v24 = vmul.f32 %v2074_v63, %v1175_v18  ;;  %1018 = vmatmul.f32.gmra.mxu2 %v127_v17  ;;  %v766_v25 = vadd.f32 %v765_v20, %v559_v19  ;;  %v152_v20 = vld [vmem:[%s3062_s0 + $0x438] sm:$0xff] }
  0xfa   :  { %606 = vmatmul.f32.gmra.mxu0 %v125_v21  ;;  %v1183_v37 = vpop.f32.mrf.mxu3 }
  0xfb   :  { %812 = vmatmul.f32.gmra.mxu1 %v126_v22  ;;  %v1414_v27 = vadd.f32 %v2083_v2, %v1347_v24 }
  0xfc   :  { %v971_v28 = vpop.f32.mrf.mxu2 }
  0xfd   :  { %v1477_v29 = vmax.f32 %v1414_v27, 0.0  ;;  %v972_v30 = vadd.f32 %v971_v28, %v766_v25  ;;  %v147_v25 = vld [vmem:[%s3062_s0 + $0x410] sm:$0xff] }
  0xff   :  { %1541 = vst.msk [vmem:[%s3065_s4 + $0x50] sm:$0xff] %vm1530_vm1, %v1477_v29  ;;  %v1178_v32 = vadd.f32 %v1177_v9, %v972_v30  ;;  %v562_v33 = vpop.f32.mrf.mxu0  ;;  %1629 = vmatmul.msk.f32.gmra.mxu3 %vm319_vm0, %v140_v40  ;;  %v145_v29 = vld [vmem:[%s3062_s0 + $0x400] sm:$0xff]  ;;  %v146_v30 = vld [vmem:[%s3062_s0 + $0x408] sm:$0xff] }
 0x100   :  { %v768_v34 = vpop.f32.mrf.mxu1 }
 0x101   :  { %v1348_v38 = vmul.f32 %v2074_v63, %v1178_v32  ;;  %1021 = vmatmul.f32.gmra.mxu2 %v131_v31  ;;  %v769_v39 = vadd.f32 %v768_v34, %v562_v33  ;;  %v156_v34 = vld [vmem:[%s3062_s0 + $0x458] sm:$0xff] }
 0x102   :  { %609 = vmatmul.f32.gmra.mxu0 %v129_v35  ;;  %v1186_v51 = vpop.f32.mrf.mxu3 }
 0x103   :  { %815 = vmatmul.f32.gmra.mxu1 %v130_v36  ;;  %v1415_v41 = vadd.f32 %v2083_v2, %v1348_v38 }
 0x104   :  { %v974_v42 = vpop.f32.mrf.mxu2 }
 0x105   :  { %v1478_v43 = vmax.f32 %v1415_v41, 0.0  ;;  %v975_v44 = vadd.f32 %v974_v42, %v769_v39  ;;  %v151_v39 = vld [vmem:[%s3062_s0 + $0x430] sm:$0xff] }
 0x107   :  { %1542 = vst.msk [vmem:[%s3065_s4 + $0x58] sm:$0xff] %vm1530_vm1, %v1478_v43  ;;  %v1181_v46 = vadd.f32 %v1180_v23, %v975_v44  ;;  %v565_v47 = vpop.f32.mrf.mxu0  ;;  %1630 = vmatmul.msk.f32.gmra.mxu3 %vm319_vm0, %v144_v54  ;;  %v149_v43 = vld [vmem:[%s3062_s0 + $0x420] sm:$0xff]  ;;  %v150_v44 = vld [vmem:[%s3062_s0 + $0x428] sm:$0xff] }
 0x108   :  { %v771_v48 = vpop.f32.mrf.mxu1 }
 0x109   :  { %v1349_v52 = vmul.f32 %v2074_v63, %v1181_v46  ;;  %1024 = vmatmul.f32.gmra.mxu2 %v135_v45  ;;  %v772_v53 = vadd.f32 %v771_v48, %v565_v47  ;;  %v160_v48 = vld [vmem:[%s3062_s0 + $0x478] sm:$0xff] }
 0x10a   :  { %612 = vmatmul.f32.gmra.mxu0 %v133_v49  ;;  %v1189_v3 = vpop.f32.mrf.mxu3 }
 0x10b   :  { %818 = vmatmul.f32.gmra.mxu1 %v134_v50  ;;  %v1416_v55 = vadd.f32 %v2083_v2, %v1349_v52 }
 0x10c   :  { %v977_v56 = vpop.f32.mrf.mxu2 }
 0x10d   :  { %v1479_v57 = vmax.f32 %v1416_v55, 0.0  ;;  %v978_v58 = vadd.f32 %v977_v56, %v772_v53  ;;  %v155_v53 = vld [vmem:[%s3062_s0 + $0x450] sm:$0xff] }
 0x10f   :  { %1543 = vst.msk [vmem:[%s3065_s4 + $0x60] sm:$0xff] %vm1530_vm1, %v1479_v57  ;;  %v1184_v60 = vadd.f32 %v1183_v37, %v978_v58  ;;  %v568_v61 = vpop.f32.mrf.mxu0  ;;  %1631 = vmatmul.msk.f32.gmra.mxu3 %vm319_vm0, %v148_v6  ;;  %v153_v57 = vld [vmem:[%s3062_s0 + $0x440] sm:$0xff]  ;;  %v154_v58 = vld [vmem:[%s3062_s0 + $0x448] sm:$0xff] }
 0x110   :  { %v774_v62 = vpop.f32.mrf.mxu1 }
 0x111   :  { %v1350_v4 = vmul.f32 %v2074_v63, %v1184_v60  ;;  %1027 = vmatmul.f32.gmra.mxu2 %v139_v59  ;;  %v775_v5 = vadd.f32 %v774_v62, %v568_v61  ;;  %v164_v62 = vld [vmem:[%s3062_s0 + $0x498] sm:$0xff] }
 0x112   :  { %615 = vmatmul.f32.gmra.mxu0 %v137_v0  ;;  %v1192_v17 = vpop.f32.mrf.mxu3 }
 0x113   :  { %821 = vmatmul.f32.gmra.mxu1 %v138_v1  ;;  %v1417_v7 = vadd.f32 %v2083_v2, %v1350_v4 }
 0x114   :  { %v980_v8 = vpop.f32.mrf.mxu2 }
 0x115   :  { %v1480_v9 = vmax.f32 %v1417_v7, 0.0  ;;  %v981_v10 = vadd.f32 %v980_v8, %v775_v5  ;;  %v159_v5 = vld [vmem:[%s3062_s0 + $0x470] sm:$0xff] }
 0x117   :  { %1544 = vst.msk [vmem:[%s3065_s4 + $0x68] sm:$0xff] %vm1530_vm1, %v1480_v9  ;;  %v1187_v12 = vadd.f32 %v1186_v51, %v981_v10  ;;  %v571_v13 = vpop.f32.mrf.mxu0  ;;  %1632 = vmatmul.msk.f32.gmra.mxu3 %vm319_vm0, %v152_v20  ;;  %v157_v9 = vld [vmem:[%s3062_s0 + $0x460] sm:$0xff]  ;;  %v158_v10 = vld [vmem:[%s3062_s0 + $0x468] sm:$0xff] }
 0x118   :  { %v777_v14 = vpop.f32.mrf.mxu1 }
 0x119   :  { %v1351_v18 = vmul.f32 %v2074_v63, %v1187_v12  ;;  %1030 = vmatmul.f32.gmra.mxu2 %v143_v11  ;;  %v778_v19 = vadd.f32 %v777_v14, %v571_v13  ;;  %v168_v14 = vld [vmem:[%s3062_s0 + $0x4b8] sm:$0xff] }
 0x11a   :  { %618 = vmatmul.f32.gmra.mxu0 %v141_v15  ;;  %v1195_v31 = vpop.f32.mrf.mxu3 }
 0x11b   :  { %824 = vmatmul.f32.gmra.mxu1 %v142_v16  ;;  %v1418_v21 = vadd.f32 %v2083_v2, %v1351_v18 }
 0x11c   :  { %v983_v22 = vpop.f32.mrf.mxu2 }
 0x11d   :  { %v1481_v23 = vmax.f32 %v1418_v21, 0.0  ;;  %v984_v24 = vadd.f32 %v983_v22, %v778_v19  ;;  %v163_v19 = vld [vmem:[%s3062_s0 + $0x490] sm:$0xff] }
 0x11f   :  { %1545 = vst.msk [vmem:[%s3065_s4 + $0x70] sm:$0xff] %vm1530_vm1, %v1481_v23  ;;  %v1190_v26 = vadd.f32 %v1189_v3, %v984_v24  ;;  %v574_v27 = vpop.f32.mrf.mxu0  ;;  %1633 = vmatmul.msk.f32.gmra.mxu3 %vm319_vm0, %v156_v34  ;;  %v161_v23 = vld [vmem:[%s3062_s0 + $0x480] sm:$0xff]  ;;  %v162_v24 = vld [vmem:[%s3062_s0 + $0x488] sm:$0xff] }
 0x120   :  { %v780_v28 = vpop.f32.mrf.mxu1 }
 0x121   :  { %v1352_v32 = vmul.f32 %v2074_v63, %v1190_v26  ;;  %1033 = vmatmul.f32.gmra.mxu2 %v147_v25  ;;  %v781_v33 = vadd.f32 %v780_v28, %v574_v27  ;;  %v172_v28 = vld [vmem:[%s3062_s0 + $0x4d8] sm:$0xff] }
 0x122   :  { %621 = vmatmul.f32.gmra.mxu0 %v145_v29  ;;  %v1198_v45 = vpop.f32.mrf.mxu3 }
 0x123   :  { %827 = vmatmul.f32.gmra.mxu1 %v146_v30  ;;  %v1419_v35 = vadd.f32 %v2083_v2, %v1352_v32 }
 0x124   :  { %v986_v36 = vpop.f32.mrf.mxu2 }
 0x125   :  { %v1482_v37 = vmax.f32 %v1419_v35, 0.0  ;;  %v987_v38 = vadd.f32 %v986_v36, %v781_v33  ;;  %v167_v33 = vld [vmem:[%s3062_s0 + $0x4b0] sm:$0xff] }
 0x127   :  { %1546 = vst.msk [vmem:[%s3065_s4 + $0x78] sm:$0xff] %vm1530_vm1, %v1482_v37  ;;  %v1193_v40 = vadd.f32 %v1192_v17, %v987_v38  ;;  %v577_v41 = vpop.f32.mrf.mxu0  ;;  %1634 = vmatmul.msk.f32.gmra.mxu3 %vm319_vm0, %v160_v48  ;;  %v165_v37 = vld [vmem:[%s3062_s0 + $0x4a0] sm:$0xff]  ;;  %v166_v38 = vld [vmem:[%s3062_s0 + $0x4a8] sm:$0xff] }
 0x128   :  { %v783_v42 = vpop.f32.mrf.mxu1 }
 0x129   :  { %v1353_v46 = vmul.f32 %v2074_v63, %v1193_v40  ;;  %1036 = vmatmul.f32.gmra.mxu2 %v151_v39  ;;  %v784_v47 = vadd.f32 %v783_v42, %v577_v41  ;;  %v176_v42 = vld [vmem:[%s3062_s0 + $0x4f8] sm:$0xff] }
 0x12a   :  { %624 = vmatmul.f32.gmra.mxu0 %v149_v43  ;;  %v1201_v59 = vpop.f32.mrf.mxu3 }
 0x12b   :  { %830 = vmatmul.f32.gmra.mxu1 %v150_v44  ;;  %v1420_v49 = vadd.f32 %v2083_v2, %v1353_v46 }
 0x12c   :  { %v989_v50 = vpop.f32.mrf.mxu2 }
 0x12d   :  { %v1483_v51 = vmax.f32 %v1420_v49, 0.0  ;;  %v990_v52 = vadd.f32 %v989_v50, %v784_v47  ;;  %v171_v47 = vld [vmem:[%s3062_s0 + $0x4d0] sm:$0xff] }
 0x12f   :  { %1547 = vst.msk [vmem:[%s3065_s4 + $0x80] sm:$0xff] %vm1530_vm1, %v1483_v51  ;;  %v1196_v54 = vadd.f32 %v1195_v31, %v990_v52  ;;  %v580_v55 = vpop.f32.mrf.mxu0  ;;  %1635 = vmatmul.msk.f32.gmra.mxu3 %vm319_vm0, %v164_v62  ;;  %v169_v51 = vld [vmem:[%s3062_s0 + $0x4c0] sm:$0xff]  ;;  %v170_v52 = vld [vmem:[%s3062_s0 + $0x4c8] sm:$0xff] }
 0x130   :  { %v786_v56 = vpop.f32.mrf.mxu1 }
 0x131   :  { %v1354_v60 = vmul.f32 %v2074_v63, %v1196_v54  ;;  %1039 = vmatmul.f32.gmra.mxu2 %v155_v53  ;;  %v787_v61 = vadd.f32 %v786_v56, %v580_v55  ;;  %v180_v56 = vld [vmem:[%s3062_s0 + $0x518] sm:$0xff] }
 0x132   :  { %627 = vmatmul.f32.gmra.mxu0 %v153_v57  ;;  %v1204_v11 = vpop.f32.mrf.mxu3 }
 0x133   :  { %833 = vmatmul.f32.gmra.mxu1 %v154_v58  ;;  %v1421_v0 = vadd.f32 %v2083_v2, %v1354_v60 }
 0x134   :  { %v992_v1 = vpop.f32.mrf.mxu2 }
 0x135   :  { %v1484_v3 = vmax.f32 %v1421_v0, 0.0  ;;  %v993_v4 = vadd.f32 %v992_v1, %v787_v61  ;;  %v175_v61 = vld [vmem:[%s3062_s0 + $0x4f0] sm:$0xff] }
 0x137   :  { %1548 = vst.msk [vmem:[%s3065_s4 + $0x88] sm:$0xff] %vm1530_vm1, %v1484_v3  ;;  %v1199_v6 = vadd.f32 %v1198_v45, %v993_v4  ;;  %v583_v7 = vpop.f32.mrf.mxu0  ;;  %1636 = vmatmul.msk.f32.gmra.mxu3 %vm319_vm0, %v168_v14  ;;  %v173_v3 = vld [vmem:[%s3062_s0 + $0x4e0] sm:$0xff]  ;;  %v174_v4 = vld [vmem:[%s3062_s0 + $0x4e8] sm:$0xff] }
 0x138   :  { %v789_v8 = vpop.f32.mrf.mxu1 }
 0x139   :  { %v1355_v12 = vmul.f32 %v2074_v63, %v1199_v6  ;;  %1042 = vmatmul.f32.gmra.mxu2 %v159_v5  ;;  %v790_v13 = vadd.f32 %v789_v8, %v583_v7  ;;  %v184_v8 = vld [vmem:[%s3062_s0 + $0x538] sm:$0xff] }
 0x13a   :  { %630 = vmatmul.f32.gmra.mxu0 %v157_v9  ;;  %v1207_v25 = vpop.f32.mrf.mxu3 }
 0x13b   :  { %836 = vmatmul.f32.gmra.mxu1 %v158_v10  ;;  %v1422_v15 = vadd.f32 %v2083_v2, %v1355_v12 }
 0x13c   :  { %v995_v16 = vpop.f32.mrf.mxu2 }
 0x13d   :  { %v1485_v17 = vmax.f32 %v1422_v15, 0.0  ;;  %v996_v18 = vadd.f32 %v995_v16, %v790_v13  ;;  %v179_v13 = vld [vmem:[%s3062_s0 + $0x510] sm:$0xff] }
 0x13f   :  { %1549 = vst.msk [vmem:[%s3065_s4 + $0x90] sm:$0xff] %vm1530_vm1, %v1485_v17  ;;  %v1202_v20 = vadd.f32 %v1201_v59, %v996_v18  ;;  %v586_v21 = vpop.f32.mrf.mxu0  ;;  %1637 = vmatmul.msk.f32.gmra.mxu3 %vm319_vm0, %v172_v28  ;;  %v177_v17 = vld [vmem:[%s3062_s0 + $0x500] sm:$0xff]  ;;  %v178_v18 = vld [vmem:[%s3062_s0 + $0x508] sm:$0xff] }
 0x140   :  { %v792_v22 = vpop.f32.mrf.mxu1 }
 0x141   :  { %v1356_v26 = vmul.f32 %v2074_v63, %v1202_v20  ;;  %1045 = vmatmul.f32.gmra.mxu2 %v163_v19  ;;  %v793_v27 = vadd.f32 %v792_v22, %v586_v21  ;;  %v188_v22 = vld [vmem:[%s3062_s0 + $0x558] sm:$0xff] }
 0x142   :  { %633 = vmatmul.f32.gmra.mxu0 %v161_v23  ;;  %v1210_v39 = vpop.f32.mrf.mxu3 }
 0x143   :  { %839 = vmatmul.f32.gmra.mxu1 %v162_v24  ;;  %v1423_v29 = vadd.f32 %v2083_v2, %v1356_v26 }
 0x144   :  { %v998_v30 = vpop.f32.mrf.mxu2 }
 0x145   :  { %v1486_v31 = vmax.f32 %v1423_v29, 0.0  ;;  %v999_v32 = vadd.f32 %v998_v30, %v793_v27  ;;  %v183_v27 = vld [vmem:[%s3062_s0 + $0x530] sm:$0xff] }
 0x147   :  { %1550 = vst.msk [vmem:[%s3065_s4 + $0x98] sm:$0xff] %vm1530_vm1, %v1486_v31  ;;  %v1205_v34 = vadd.f32 %v1204_v11, %v999_v32  ;;  %v589_v35 = vpop.f32.mrf.mxu0  ;;  %1638 = vmatmul.msk.f32.gmra.mxu3 %vm319_vm0, %v176_v42  ;;  %v181_v31 = vld [vmem:[%s3062_s0 + $0x520] sm:$0xff]  ;;  %v182_v32 = vld [vmem:[%s3062_s0 + $0x528] sm:$0xff] }
 0x148   :  { %v795_v36 = vpop.f32.mrf.mxu1 }
 0x149   :  { %v1357_v40 = vmul.f32 %v2074_v63, %v1205_v34  ;;  %1048 = vmatmul.f32.gmra.mxu2 %v167_v33  ;;  %v796_v41 = vadd.f32 %v795_v36, %v589_v35  ;;  %v192_v36 = vld [vmem:[%s3062_s0 + $0x578] sm:$0xff] }
 0x14a   :  { %636 = vmatmul.f32.gmra.mxu0 %v165_v37  ;;  %v1213_v53 = vpop.f32.mrf.mxu3 }
 0x14b   :  { %842 = vmatmul.f32.gmra.mxu1 %v166_v38  ;;  %v1424_v43 = vadd.f32 %v2083_v2, %v1357_v40 }
 0x14c   :  { %v1001_v44 = vpop.f32.mrf.mxu2 }
 0x14d   :  { %v1487_v45 = vmax.f32 %v1424_v43, 0.0  ;;  %v1002_v46 = vadd.f32 %v1001_v44, %v796_v41  ;;  %v187_v41 = vld [vmem:[%s3062_s0 + $0x550] sm:$0xff] }
 0x14f   :  { %1551 = vst.msk [vmem:[%s3065_s4 + $0xa0] sm:$0xff] %vm1530_vm1, %v1487_v45  ;;  %v1208_v48 = vadd.f32 %v1207_v25, %v1002_v46  ;;  %v592_v49 = vpop.f32.mrf.mxu0  ;;  %1639 = vmatmul.msk.f32.gmra.mxu3 %vm319_vm0, %v180_v56  ;;  %v185_v45 = vld [vmem:[%s3062_s0 + $0x540] sm:$0xff]  ;;  %v186_v46 = vld [vmem:[%s3062_s0 + $0x548] sm:$0xff] }
 0x150   :  { %v798_v50 = vpop.f32.mrf.mxu1 }
 0x151   :  { %v1358_v54 = vmul.f32 %v2074_v63, %v1208_v48  ;;  %1051 = vmatmul.f32.gmra.mxu2 %v171_v47  ;;  %v799_v55 = vadd.f32 %v798_v50, %v592_v49  ;;  %v196_v50 = vld [vmem:[%s3062_s0 + $0x598] sm:$0xff] }
 0x152   :  { %639 = vmatmul.f32.gmra.mxu0 %v169_v51  ;;  %v1216_v5 = vpop.f32.mrf.mxu3 }
 0x153   :  { %845 = vmatmul.f32.gmra.mxu1 %v170_v52  ;;  %v1425_v57 = vadd.f32 %v2083_v2, %v1358_v54 }
 0x154   :  { %v1004_v58 = vpop.f32.mrf.mxu2 }
 0x155   :  { %v1488_v59 = vmax.f32 %v1425_v57, 0.0  ;;  %v1005_v60 = vadd.f32 %v1004_v58, %v799_v55  ;;  %v191_v55 = vld [vmem:[%s3062_s0 + $0x570] sm:$0xff] }
 0x157   :  { %1552 = vst.msk [vmem:[%s3065_s4 + $0xa8] sm:$0xff] %vm1530_vm1, %v1488_v59  ;;  %v1211_v62 = vadd.f32 %v1210_v39, %v1005_v60  ;;  %v595_v0 = vpop.f32.mrf.mxu0  ;;  %1640 = vmatmul.msk.f32.gmra.mxu3 %vm319_vm0, %v184_v8  ;;  %v189_v59 = vld [vmem:[%s3062_s0 + $0x560] sm:$0xff]  ;;  %v190_v60 = vld [vmem:[%s3062_s0 + $0x568] sm:$0xff] }
 0x158   :  { %v801_v1 = vpop.f32.mrf.mxu1 }
 0x159   :  { %v1359_v6 = vmul.f32 %v2074_v63, %v1211_v62  ;;  %1054 = vmatmul.f32.gmra.mxu2 %v175_v61  ;;  %v802_v7 = vadd.f32 %v801_v1, %v595_v0  ;;  %v200_v1 = vld [vmem:[%s3062_s0 + $0x5b8] sm:$0xff] }
 0x15a   :  { %642 = vmatmul.f32.gmra.mxu0 %v173_v3  ;;  %v1219_v19 = vpop.f32.mrf.mxu3 }
 0x15b   :  { %848 = vmatmul.f32.gmra.mxu1 %v174_v4  ;;  %v1426_v9 = vadd.f32 %v2083_v2, %v1359_v6 }
 0x15c   :  { %v1007_v10 = vpop.f32.mrf.mxu2 }
 0x15d   :  { %v1489_v11 = vmax.f32 %v1426_v9, 0.0  ;;  %v1008_v12 = vadd.f32 %v1007_v10, %v802_v7  ;;  %v195_v7 = vld [vmem:[%s3062_s0 + $0x590] sm:$0xff]  ;;  %v194_v10 = vld [vmem:[%s3062_s0 + $0x588] sm:$0xff] }
 0x15f   :  { %1553 = vst.msk [vmem:[%s3065_s4 + $0xb0] sm:$0xff] %vm1530_vm1, %v1489_v11  ;;  %v1214_v14 = vadd.f32 %v1213_v53, %v1008_v12  ;;  %v598_v15 = vpop.f32.mrf.mxu0  ;;  %1641 = vmatmul.msk.f32.gmra.mxu3 %vm319_vm0, %v188_v22  ;;  %v2607_v12 = vld [vmem:[%s3063_s2] ss:$0 sm:$0xff] }
 0x160   :  { %v804_v16 = vpop.f32.mrf.mxu1 }
 0x161   :  { %v1360_v20 = vmul.f32 %v2074_v63, %v1214_v14  ;;  %1057 = vmatmul.f32.gmra.mxu2 %v179_v13  ;;  %v805_v21 = vadd.f32 %v804_v16, %v598_v15  ;;  %v204_v15 = vld [vmem:[%s3062_s0 + $0x5d8] sm:$0xff]  ;;  %v2616_v16 = vld [vmem:[%s3064_s3] ss:$0 sm:$0xff] }
 0x162   :  { %645 = vmatmul.f32.gmra.mxu0 %v177_v17  ;;  %v1222_v33 = vpop.f32.mrf.mxu3 }
 0x163   :  { %851 = vmatmul.f32.gmra.mxu1 %v178_v18  ;;  %v1427_v23 = vadd.f32 %v2083_v2, %v1360_v20 }
 0x164   :  { %v1010_v24 = vpop.f32.mrf.mxu2 }
 0x165   :  { %v1490_v25 = vmax.f32 %v1427_v23, 0.0  ;;  %v1011_v26 = vadd.f32 %v1010_v24, %v805_v21  ;;  %v199_v21 = vld [vmem:[%s3062_s0 + $0x5b0] sm:$0xff] }
 0x167   :  { %1554 = vst.msk [vmem:[%s3065_s4 + $0xb8] sm:$0xff] %vm1530_vm1, %v1490_v25  ;;  %v1217_v28 = vadd.f32 %v1216_v5, %v1011_v26  ;;  %v601_v29 = vpop.f32.mrf.mxu0  ;;  %1642 = vmatmul.msk.f32.gmra.mxu3 %vm319_vm0, %v192_v36  ;;  %v197_v25 = vld [vmem:[%s3062_s0 + $0x5a0] sm:$0xff]  ;;  %v198_v26 = vld [vmem:[%s3062_s0 + $0x5a8] sm:$0xff] }
 0x168   :  { %v807_v30 = vpop.f32.mrf.mxu1 }
 0x169   :  { %v1361_v34 = vmul.f32 %v2074_v63, %v1217_v28  ;;  %1060 = vmatmul.f32.gmra.mxu2 %v183_v27  ;;  %v808_v35 = vadd.f32 %v807_v30, %v601_v29  ;;  %v208_v30 = vld [vmem:[%s3062_s0 + $0x5f8] sm:$0xff] }
 0x16a   :  { %648 = vmatmul.f32.gmra.mxu0 %v181_v31  ;;  %v1225_v47 = vpop.f32.mrf.mxu3 }
 0x16b   :  { %854 = vmatmul.f32.gmra.mxu1 %v182_v32  ;;  %v1428_v37 = vadd.f32 %v2083_v2, %v1361_v34 }
 0x16c   :  { %v1013_v38 = vpop.f32.mrf.mxu2 }
 0x16d   :  { %v1491_v39 = vmax.f32 %v1428_v37, 0.0  ;;  %v1014_v40 = vadd.f32 %v1013_v38, %v808_v35  ;;  %v203_v35 = vld [vmem:[%s3062_s0 + $0x5d0] sm:$0xff] }
 0x16f   :  { %1555 = vst.msk [vmem:[%s3065_s4 + $0xc0] sm:$0xff] %vm1530_vm1, %v1491_v39  ;;  %v1220_v42 = vadd.f32 %v1219_v19, %v1014_v40  ;;  %v604_v43 = vpop.f32.mrf.mxu0  ;;  %1643 = vmatmul.msk.f32.gmra.mxu3 %vm319_vm0, %v196_v50  ;;  %v201_v39 = vld [vmem:[%s3062_s0 + $0x5c0] sm:$0xff]  ;;  %v202_v40 = vld [vmem:[%s3062_s0 + $0x5c8] sm:$0xff] }
 0x170   :  { %v810_v44 = vpop.f32.mrf.mxu1 }
 0x171   :  { %v1362_v48 = vmul.f32 %v2074_v63, %v1220_v42  ;;  %1063 = vmatmul.f32.gmra.mxu2 %v187_v41  ;;  %v811_v49 = vadd.f32 %v810_v44, %v604_v43  ;;  %v212_v44 = vld [vmem:[%s3062_s0 + $0x618] sm:$0xff] }
 0x172   :  { %651 = vmatmul.f32.gmra.mxu0 %v185_v45  ;;  %v1228_v61 = vpop.f32.mrf.mxu3 }
 0x173   :  { %857 = vmatmul.f32.gmra.mxu1 %v186_v46  ;;  %v1429_v51 = vadd.f32 %v2083_v2, %v1362_v48 }
 0x174   :  { %v1016_v52 = vpop.f32.mrf.mxu2 }
 0x175   :  { %v1492_v53 = vmax.f32 %v1429_v51, 0.0  ;;  %v1017_v54 = vadd.f32 %v1016_v52, %v811_v49  ;;  %v207_v49 = vld [vmem:[%s3062_s0 + $0x5f0] sm:$0xff] }
 0x177   :  { %1556 = vst.msk [vmem:[%s3065_s4 + $0xc8] sm:$0xff] %vm1530_vm1, %v1492_v53  ;;  %v1223_v56 = vadd.f32 %v1222_v33, %v1017_v54  ;;  %v607_v57 = vpop.f32.mrf.mxu0  ;;  %1644 = vmatmul.msk.f32.gmra.mxu3 %vm319_vm0, %v200_v1  ;;  %v205_v53 = vld [vmem:[%s3062_s0 + $0x5e0] sm:$0xff]  ;;  %v206_v54 = vld [vmem:[%s3062_s0 + $0x5e8] sm:$0xff] }
 0x178   :  { %v813_v58 = vpop.f32.mrf.mxu1 }
 0x179   :  { %v1363_v62 = vmul.f32 %v2074_v63, %v1223_v56  ;;  %1066 = vmatmul.f32.gmra.mxu2 %v191_v55  ;;  %v814_v0 = vadd.f32 %v813_v58, %v607_v57  ;;  %v216_v58 = vld [vmem:[%s3062_s0 + $0x638] sm:$0xff] }
 0x17a   :  { %654 = vmatmul.f32.gmra.mxu0 %v189_v59  ;;  %v1231_v11 = vpop.f32.mrf.mxu3 }
 0x17b   :  { %860 = vmatmul.f32.gmra.mxu1 %v190_v60  ;;  %v1430_v3 = vadd.f32 %v2083_v2, %v1363_v62  ;;  %v193_v2 = vld [vmem:[%s3062_s0 + $0x580] sm:$0xff] }
 0x17c   :  { %v1019_v4 = vpop.f32.mrf.mxu2 }
 0x17d   :  { %v1493_v5 = vmax.f32 %v1430_v3, 0.0  ;;  %v1020_v6 = vadd.f32 %v1019_v4, %v814_v0  ;;  %v211_v0 = vld [vmem:[%s3062_s0 + $0x610] sm:$0xff] }
 0x17f   :  { %1557 = vst.msk [vmem:[%s3065_s4 + $0xd0] sm:$0xff] %vm1530_vm1, %v1493_v5  ;;  %v1226_v63 = vadd.f32 %v1225_v47, %v1020_v6  ;;  %v610_v8 = vpop.f32.mrf.mxu0  ;;  %1645 = vmatmul.msk.f32.gmra.mxu3 %vm319_vm0, %v204_v15  ;;  %v209_v5 = vld [vmem:[%s3062_s0 + $0x600] sm:$0xff]  ;;  %v210_v6 = vld [vmem:[%s3062_s0 + $0x608] sm:$0xff] }
 0x180   :  { %v816_v9 = vpop.f32.mrf.mxu1 }
 0x181   :  { %v1364_v13 = vmul.f32 %v2607_v12, %v1226_v63  ;;  %1069 = vmatmul.f32.gmra.mxu2 %v195_v7  ;;  %v817_v14 = vadd.f32 %v816_v9, %v610_v8  ;;  %v220_v9 = vld [vmem:[%s3062_s0 + $0x658] sm:$0xff] }
 0x182   :  { %657 = vmatmul.f32.gmra.mxu0 %v193_v2  ;;  %v1234_v27 = vpop.f32.mrf.mxu3 }
 0x183   :  { %863 = vmatmul.f32.gmra.mxu1 %v194_v10  ;;  %v1431_v17 = vadd.f32 %v2616_v16, %v1364_v13 }
 0x184   :  { %v1022_v18 = vpop.f32.mrf.mxu2 }
 0x185   :  { %v1494_v19 = vmax.f32 %v1431_v17, 0.0  ;;  %v1023_v20 = vadd.f32 %v1022_v18, %v817_v14  ;;  %v215_v14 = vld [vmem:[%s3062_s0 + $0x630] sm:$0xff] }
 0x187   :  { %1558 = vst.msk [vmem:[%s3065_s4 + $0xd8] sm:$0xff] %vm1530_vm1, %v1494_v19  ;;  %v1229_v22 = vadd.f32 %v1228_v61, %v1023_v20  ;;  %v613_v23 = vpop.f32.mrf.mxu0  ;;  %1646 = vmatmul.msk.f32.gmra.mxu3 %vm319_vm0, %v208_v30  ;;  %v213_v19 = vld [vmem:[%s3062_s0 + $0x620] sm:$0xff]  ;;  %v214_v20 = vld [vmem:[%s3062_s0 + $0x628] sm:$0xff] }
 0x188   :  { %v819_v24 = vpop.f32.mrf.mxu1 }
 0x189   :  { %v1365_v28 = vmul.f32 %v2607_v12, %v1229_v22  ;;  %1072 = vmatmul.f32.gmra.mxu2 %v199_v21  ;;  %v820_v29 = vadd.f32 %v819_v24, %v613_v23  ;;  %v224_v24 = vld [vmem:[%s3062_s0 + $0x678] sm:$0xff] }
 0x18a   :  { %660 = vmatmul.f32.gmra.mxu0 %v197_v25  ;;  %v1237_v41 = vpop.f32.mrf.mxu3 }
 0x18b   :  { %866 = vmatmul.f32.gmra.mxu1 %v198_v26  ;;  %v1432_v31 = vadd.f32 %v2616_v16, %v1365_v28 }
 0x18c   :  { %v1025_v32 = vpop.f32.mrf.mxu2 }
 0x18d   :  { %v1495_v33 = vmax.f32 %v1432_v31, 0.0  ;;  %v1026_v34 = vadd.f32 %v1025_v32, %v820_v29  ;;  %v219_v29 = vld [vmem:[%s3062_s0 + $0x650] sm:$0xff] }
 0x18f   :  { %1559 = vst.msk [vmem:[%s3065_s4 + $0xe0] sm:$0xff] %vm1530_vm1, %v1495_v33  ;;  %v1232_v36 = vadd.f32 %v1231_v11, %v1026_v34  ;;  %v616_v37 = vpop.f32.mrf.mxu0  ;;  %1647 = vmatmul.msk.f32.gmra.mxu3 %vm319_vm0, %v212_v44  ;;  %v217_v33 = vld [vmem:[%s3062_s0 + $0x640] sm:$0xff]  ;;  %v218_v34 = vld [vmem:[%s3062_s0 + $0x648] sm:$0xff] }
 0x190   :  { %v822_v38 = vpop.f32.mrf.mxu1 }
 0x191   :  { %v1366_v42 = vmul.f32 %v2607_v12, %v1232_v36  ;;  %1075 = vmatmul.f32.gmra.mxu2 %v203_v35  ;;  %v823_v43 = vadd.f32 %v822_v38, %v616_v37  ;;  %v228_v38 = vld [vmem:[%s3062_s0 + $0x698] sm:$0xff] }
 0x192   :  { %663 = vmatmul.f32.gmra.mxu0 %v201_v39  ;;  %v1240_v55 = vpop.f32.mrf.mxu3 }
 0x193   :  { %869 = vmatmul.f32.gmra.mxu1 %v202_v40  ;;  %v1433_v45 = vadd.f32 %v2616_v16, %v1366_v42 }
 0x194   :  { %v1028_v46 = vpop.f32.mrf.mxu2 }
 0x195   :  { %v1496_v47 = vmax.f32 %v1433_v45, 0.0  ;;  %v1029_v48 = vadd.f32 %v1028_v46, %v823_v43  ;;  %v223_v43 = vld [vmem:[%s3062_s0 + $0x670] sm:$0xff] }
 0x197   :  { %1560 = vst.msk [vmem:[%s3065_s4 + $0xe8] sm:$0xff] %vm1530_vm1, %v1496_v47  ;;  %v1235_v50 = vadd.f32 %v1234_v27, %v1029_v48  ;;  %v619_v51 = vpop.f32.mrf.mxu0  ;;  %1648 = vmatmul.msk.f32.gmra.mxu3 %vm319_vm0, %v216_v58  ;;  %v221_v47 = vld [vmem:[%s3062_s0 + $0x660] sm:$0xff]  ;;  %v222_v48 = vld [vmem:[%s3062_s0 + $0x668] sm:$0xff] }
 0x198   :  { %v825_v52 = vpop.f32.mrf.mxu1 }
 0x199   :  { %v1367_v56 = vmul.f32 %v2607_v12, %v1235_v50  ;;  %1078 = vmatmul.f32.gmra.mxu2 %v207_v49  ;;  %v826_v57 = vadd.f32 %v825_v52, %v619_v51  ;;  %v232_v52 = vld [vmem:[%s3062_s0 + $0x6b8] sm:$0xff] }
 0x19a   :  { %666 = vmatmul.f32.gmra.mxu0 %v205_v53  ;;  %v1243_v7 = vpop.f32.mrf.mxu3 }
 0x19b   :  { %872 = vmatmul.f32.gmra.mxu1 %v206_v54  ;;  %v1434_v59 = vadd.f32 %v2616_v16, %v1367_v56 }
 0x19c   :  { %v1031_v60 = vpop.f32.mrf.mxu2 }
 0x19d   :  { %v1497_v61 = vmax.f32 %v1434_v59, 0.0  ;;  %v1032_v62 = vadd.f32 %v1031_v60, %v826_v57  ;;  %v227_v57 = vld [vmem:[%s3062_s0 + $0x690] sm:$0xff] }
 0x19f   :  { %1561 = vst.msk [vmem:[%s3065_s4 + $0xf0] sm:$0xff] %vm1530_vm1, %v1497_v61  ;;  %v1238_v1 = vadd.f32 %v1237_v41, %v1032_v62  ;;  %v622_v3 = vpop.f32.mrf.mxu0  ;;  %1649 = vmatmul.msk.f32.gmra.mxu3 %vm319_vm0, %v220_v9  ;;  %v225_v61 = vld [vmem:[%s3062_s0 + $0x680] sm:$0xff]  ;;  %v226_v62 = vld [vmem:[%s3062_s0 + $0x688] sm:$0xff] }
 0x1a0   :  { %v828_v4 = vpop.f32.mrf.mxu1 }
 0x1a1   :  { %v1368_v63 = vmul.f32 %v2607_v12, %v1238_v1  ;;  %1081 = vmatmul.f32.gmra.mxu2 %v211_v0  ;;  %v829_v8 = vadd.f32 %v828_v4, %v622_v3  ;;  %v236_v4 = vld [vmem:[%s3062_s0 + $0x6d8] sm:$0xff] }
 0x1a2   :  { %669 = vmatmul.f32.gmra.mxu0 %v209_v5  ;;  %v1246_v21 = vpop.f32.mrf.mxu3 }
 0x1a3   :  { %875 = vmatmul.f32.gmra.mxu1 %v210_v6  ;;  %v1435_v2 = vadd.f32 %v2616_v16, %v1368_v63 }
 0x1a4   :  { %v1034_v10 = vpop.f32.mrf.mxu2 }
 0x1a5   :  { %v1498_v11 = vmax.f32 %v1435_v2, 0.0  ;;  %v1035_v13 = vadd.f32 %v1034_v10, %v829_v8  ;;  %v231_v8 = vld [vmem:[%s3062_s0 + $0x6b0] sm:$0xff] }
 0x1a7   :  { %1562 = vst.msk [vmem:[%s3065_s4 + $0xf8] sm:$0xff] %vm1530_vm1, %v1498_v11  ;;  %v1241_v15 = vadd.f32 %v1240_v55, %v1035_v13  ;;  %v625_v17 = vpop.f32.mrf.mxu0  ;;  %1650 = vmatmul.msk.f32.gmra.mxu3 %vm319_vm0, %v224_v24  ;;  %v229_v11 = vld [vmem:[%s3062_s0 + $0x6a0] sm:$0xff]  ;;  %v230_v13 = vld [vmem:[%s3062_s0 + $0x6a8] sm:$0xff] }
 0x1a8   :  { %v831_v18 = vpop.f32.mrf.mxu1 }
 0x1a9   :  { %v1369_v22 = vmul.f32 %v2607_v12, %v1241_v15  ;;  %1084 = vmatmul.f32.gmra.mxu2 %v215_v14  ;;  %v832_v23 = vadd.f32 %v831_v18, %v625_v17  ;;  %v240_v18 = vld [vmem:[%s3062_s0 + $0x6f8] sm:$0xff] }
 0x1aa   :  { %672 = vmatmul.f32.gmra.mxu0 %v213_v19  ;;  %v1249_v35 = vpop.f32.mrf.mxu3 }
 0x1ab   :  { %878 = vmatmul.f32.gmra.mxu1 %v214_v20  ;;  %v1436_v25 = vadd.f32 %v2616_v16, %v1369_v22 }
 0x1ac   :  { %v1037_v26 = vpop.f32.mrf.mxu2 }
 0x1ad   :  { %v1499_v27 = vmax.f32 %v1436_v25, 0.0  ;;  %v1038_v28 = vadd.f32 %v1037_v26, %v832_v23  ;;  %v235_v23 = vld [vmem:[%s3062_s0 + $0x6d0] sm:$0xff] }
 0x1af   :  { %1563 = vst.msk [vmem:[%s3065_s4 + $0x100] sm:$0xff] %vm1530_vm1, %v1499_v27  ;;  %v1244_v30 = vadd.f32 %v1243_v7, %v1038_v28  ;;  %v628_v31 = vpop.f32.mrf.mxu0  ;;  %1651 = vmatmul.msk.f32.gmra.mxu3 %vm319_vm0, %v228_v38  ;;  %v233_v27 = vld [vmem:[%s3062_s0 + $0x6c0] sm:$0xff]  ;;  %v234_v28 = vld [vmem:[%s3062_s0 + $0x6c8] sm:$0xff] }
 0x1b0   :  { %v834_v32 = vpop.f32.mrf.mxu1 }
 0x1b1   :  { %v1370_v36 = vmul.f32 %v2607_v12, %v1244_v30  ;;  %1087 = vmatmul.f32.gmra.mxu2 %v219_v29  ;;  %v835_v37 = vadd.f32 %v834_v32, %v628_v31  ;;  %v244_v32 = vld [vmem:[%s3062_s0 + $0x718] sm:$0xff] }
 0x1b2   :  { %675 = vmatmul.f32.gmra.mxu0 %v217_v33  ;;  %v1252_v49 = vpop.f32.mrf.mxu3 }
 0x1b3   :  { %881 = vmatmul.f32.gmra.mxu1 %v218_v34  ;;  %v1437_v39 = vadd.f32 %v2616_v16, %v1370_v36 }
 0x1b4   :  { %v1040_v40 = vpop.f32.mrf.mxu2 }
 0x1b5   :  { %v1500_v41 = vmax.f32 %v1437_v39, 0.0  ;;  %v1041_v42 = vadd.f32 %v1040_v40, %v835_v37  ;;  %v239_v37 = vld [vmem:[%s3062_s0 + $0x6f0] sm:$0xff] }
 0x1b7   :  { %1564 = vst.msk [vmem:[%s3065_s4 + $0x108] sm:$0xff] %vm1530_vm1, %v1500_v41  ;;  %v1247_v44 = vadd.f32 %v1246_v21, %v1041_v42  ;;  %v631_v45 = vpop.f32.mrf.mxu0  ;;  %1652 = vmatmul.msk.f32.gmra.mxu3 %vm319_vm0, %v232_v52  ;;  %v237_v41 = vld [vmem:[%s3062_s0 + $0x6e0] sm:$0xff]  ;;  %v238_v42 = vld [vmem:[%s3062_s0 + $0x6e8] sm:$0xff] }
 0x1b8   :  { %v837_v46 = vpop.f32.mrf.mxu1 }
 0x1b9   :  { %v1371_v50 = vmul.f32 %v2607_v12, %v1247_v44  ;;  %1090 = vmatmul.f32.gmra.mxu2 %v223_v43  ;;  %v838_v51 = vadd.f32 %v837_v46, %v631_v45  ;;  %v248_v46 = vld [vmem:[%s3062_s0 + $0x738] sm:$0xff] }
 0x1ba   :  { %678 = vmatmul.f32.gmra.mxu0 %v221_v47  ;;  %v1255_v0 = vpop.f32.mrf.mxu3 }
 0x1bb   :  { %884 = vmatmul.f32.gmra.mxu1 %v222_v48  ;;  %v1438_v53 = vadd.f32 %v2616_v16, %v1371_v50 }
 0x1bc   :  { %v1043_v54 = vpop.f32.mrf.mxu2 }
 0x1bd   :  { %v1501_v55 = vmax.f32 %v1438_v53, 0.0  ;;  %v1044_v56 = vadd.f32 %v1043_v54, %v838_v51  ;;  %v243_v51 = vld [vmem:[%s3062_s0 + $0x710] sm:$0xff] }
 0x1bf   :  { %1565 = vst.msk [vmem:[%s3065_s4 + $0x110] sm:$0xff] %vm1530_vm1, %v1501_v55  ;;  %v1250_v58 = vadd.f32 %v1249_v35, %v1044_v56  ;;  %v634_v59 = vpop.f32.mrf.mxu0  ;;  %1653 = vmatmul.msk.f32.gmra.mxu3 %vm319_vm0, %v236_v4  ;;  %v241_v55 = vld [vmem:[%s3062_s0 + $0x700] sm:$0xff]  ;;  %v242_v56 = vld [vmem:[%s3062_s0 + $0x708] sm:$0xff] }
 0x1c0   :  { %v840_v60 = vpop.f32.mrf.mxu1 }
 0x1c1   :  { %v1372_v1 = vmul.f32 %v2607_v12, %v1250_v58  ;;  %1093 = vmatmul.f32.gmra.mxu2 %v227_v57  ;;  %v841_v3 = vadd.f32 %v840_v60, %v634_v59  ;;  %v252_v60 = vld [vmem:[%s3062_s0 + $0x758] sm:$0xff] }
 0x1c2   :  { %681 = vmatmul.f32.gmra.mxu0 %v225_v61  ;;  %v1258_v14 = vpop.f32.mrf.mxu3 }
 0x1c3   :  { %887 = vmatmul.f32.gmra.mxu1 %v226_v62  ;;  %v1439_v5 = vadd.f32 %v2616_v16, %v1372_v1 }
 0x1c4   :  { %v1046_v6 = vpop.f32.mrf.mxu2 }
 0x1c5   :  { %v1502_v7 = vmax.f32 %v1439_v5, 0.0  ;;  %v1047_v63 = vadd.f32 %v1046_v6, %v841_v3  ;;  %v247_v3 = vld [vmem:[%s3062_s0 + $0x730] sm:$0xff] }
 0x1c7   :  { %1566 = vst.msk [vmem:[%s3065_s4 + $0x118] sm:$0xff] %vm1530_vm1, %v1502_v7  ;;  %v1253_v9 = vadd.f32 %v1252_v49, %v1047_v63  ;;  %v637_v2 = vpop.f32.mrf.mxu0  ;;  %1654 = vmatmul.msk.f32.gmra.mxu3 %vm319_vm0, %v240_v18  ;;  %v245_v7 = vld [vmem:[%s3062_s0 + $0x720] sm:$0xff]  ;;  %v246_v63 = vld [vmem:[%s3062_s0 + $0x728] sm:$0xff] }
 0x1c8   :  { %v843_v10 = vpop.f32.mrf.mxu1 }
 0x1c9   :  { %v1373_v15 = vmul.f32 %v2607_v12, %v1253_v9  ;;  %1096 = vmatmul.f32.gmra.mxu2 %v231_v8  ;;  %v844_v17 = vadd.f32 %v843_v10, %v637_v2  ;;  %v256_v10 = vld [vmem:[%s3062_s0 + $0x778] sm:$0xff] }
 0x1ca   :  { %684 = vmatmul.f32.gmra.mxu0 %v229_v11  ;;  %v1261_v29 = vpop.f32.mrf.mxu3 }
 0x1cb   :  { %890 = vmatmul.f32.gmra.mxu1 %v230_v13  ;;  %v1440_v19 = vadd.f32 %v2616_v16, %v1373_v15 }
 0x1cc   :  { %v1049_v20 = vpop.f32.mrf.mxu2 }
 0x1cd   :  { %v1503_v21 = vmax.f32 %v1440_v19, 0.0  ;;  %v1050_v22 = vadd.f32 %v1049_v20, %v844_v17  ;;  %v251_v17 = vld [vmem:[%s3062_s0 + $0x750] sm:$0xff] }
 0x1cf   :  { %1567 = vst.msk [vmem:[%s3065_s4 + $0x120] sm:$0xff] %vm1530_vm1, %v1503_v21  ;;  %v1256_v24 = vadd.f32 %v1255_v0, %v1050_v22  ;;  %v640_v25 = vpop.f32.mrf.mxu0  ;;  %1655 = vmatmul.msk.f32.gmra.mxu3 %vm319_vm0, %v244_v32  ;;  %v249_v21 = vld [vmem:[%s3062_s0 + $0x740] sm:$0xff]  ;;  %v250_v22 = vld [vmem:[%s3062_s0 + $0x748] sm:$0xff] }
 0x1d0   :  { %v846_v26 = vpop.f32.mrf.mxu1 }
 0x1d1   :  { %v1374_v30 = vmul.f32 %v2607_v12, %v1256_v24  ;;  %1099 = vmatmul.f32.gmra.mxu2 %v235_v23  ;;  %v847_v31 = vadd.f32 %v846_v26, %v640_v25  ;;  %v260_v26 = vld [vmem:[%s3062_s0 + $0x798] sm:$0xff] }
 0x1d2   :  { %687 = vmatmul.f32.gmra.mxu0 %v233_v27  ;;  %v1264_v43 = vpop.f32.mrf.mxu3 }
 0x1d3   :  { %893 = vmatmul.f32.gmra.mxu1 %v234_v28  ;;  %v1441_v33 = vadd.f32 %v2616_v16, %v1374_v30 }
 0x1d4   :  { %v1052_v34 = vpop.f32.mrf.mxu2 }
 0x1d5   :  { %v1504_v35 = vmax.f32 %v1441_v33, 0.0  ;;  %v1053_v36 = vadd.f32 %v1052_v34, %v847_v31  ;;  %v255_v31 = vld [vmem:[%s3062_s0 + $0x770] sm:$0xff] }
 0x1d7   :  { %1568 = vst.msk [vmem:[%s3065_s4 + $0x128] sm:$0xff] %vm1530_vm1, %v1504_v35  ;;  %v1259_v38 = vadd.f32 %v1258_v14, %v1053_v36  ;;  %v643_v39 = vpop.f32.mrf.mxu0  ;;  %1656 = vmatmul.msk.f32.gmra.mxu3 %vm319_vm0, %v248_v46  ;;  %v253_v35 = vld [vmem:[%s3062_s0 + $0x760] sm:$0xff]  ;;  %v254_v36 = vld [vmem:[%s3062_s0 + $0x768] sm:$0xff] }
 0x1d8   :  { %v849_v40 = vpop.f32.mrf.mxu1 }
 0x1d9   :  { %v1375_v44 = vmul.f32 %v2607_v12, %v1259_v38  ;;  %1102 = vmatmul.f32.gmra.mxu2 %v239_v37  ;;  %v850_v45 = vadd.f32 %v849_v40, %v643_v39  ;;  %v264_v40 = vld [vmem:[%s3062_s0 + $0x7b8] sm:$0xff] }
 0x1da   :  { %690 = vmatmul.f32.gmra.mxu0 %v237_v41  ;;  %v1267_v57 = vpop.f32.mrf.mxu3 }
 0x1db   :  { %896 = vmatmul.f32.gmra.mxu1 %v238_v42  ;;  %v1442_v47 = vadd.f32 %v2616_v16, %v1375_v44 }
 0x1dc   :  { %v1055_v48 = vpop.f32.mrf.mxu2 }
 0x1dd   :  { %v1505_v49 = vmax.f32 %v1442_v47, 0.0  ;;  %v1056_v50 = vadd.f32 %v1055_v48, %v850_v45  ;;  %v259_v45 = vld [vmem:[%s3062_s0 + $0x790] sm:$0xff] }
 0x1df   :  { %1569 = vst.msk [vmem:[%s3065_s4 + $0x130] sm:$0xff] %vm1530_vm1, %v1505_v49  ;;  %v1262_v52 = vadd.f32 %v1261_v29, %v1056_v50  ;;  %v646_v53 = vpop.f32.mrf.mxu0  ;;  %1657 = vmatmul.msk.f32.gmra.mxu3 %vm319_vm0, %v252_v60  ;;  %v257_v49 = vld [vmem:[%s3062_s0 + $0x780] sm:$0xff]  ;;  %v258_v50 = vld [vmem:[%s3062_s0 + $0x788] sm:$0xff] }
 0x1e0   :  { %v852_v54 = vpop.f32.mrf.mxu1 }
 0x1e1   :  { %v1376_v58 = vmul.f32 %v2607_v12, %v1262_v52  ;;  %1105 = vmatmul.f32.gmra.mxu2 %v243_v51  ;;  %v853_v59 = vadd.f32 %v852_v54, %v646_v53  ;;  %v268_v54 = vld [vmem:[%s3062_s0 + $0x7d8] sm:$0xf] }
 0x1e2   :  { %693 = vmatmul.f32.gmra.mxu0 %v241_v55  ;;  %v1270_v8 = vpop.f32.mrf.mxu3 }
 0x1e3   :  { %899 = vmatmul.f32.gmra.mxu1 %v242_v56  ;;  %v1443_v61 = vadd.f32 %v2616_v16, %v1376_v58 }
 0x1e4   :  { %v1058_v62 = vpop.f32.mrf.mxu2 }
 0x1e5   :  { %v1506_v0 = vmax.f32 %v1443_v61, 0.0  ;;  %v1059_v1 = vadd.f32 %v1058_v62, %v853_v59  ;;  %v263_v59 = vld [vmem:[%s3062_s0 + $0x7b0] sm:$0xff] }
 0x1e7   :  { %1570 = vst.msk [vmem:[%s3065_s4 + $0x138] sm:$0xff] %vm1530_vm1, %v1506_v0  ;;  %v1265_v4 = vadd.f32 %v1264_v43, %v1059_v1  ;;  %v649_v5 = vpop.f32.mrf.mxu0  ;;  %1658 = vmatmul.msk.f32.gmra.mxu3 %vm319_vm0, %v256_v10  ;;  %v261_v0 = vld [vmem:[%s3062_s0 + $0x7a0] sm:$0xff]  ;;  %v262_v1 = vld [vmem:[%s3062_s0 + $0x7a8] sm:$0xff] }
 0x1e8   :  { %v855_v6 = vpop.f32.mrf.mxu1 }
 0x1e9   :  { %v1377_v9 = vmul.f32 %v2607_v12, %v1265_v4  ;;  %1108 = vmatmul.f32.gmra.mxu2 %v247_v3  ;;  %v856_v2 = vadd.f32 %v855_v6, %v649_v5 }
 0x1ea   :  { %696 = vmatmul.f32.gmra.mxu0 %v245_v7  ;;  %v1273_v23 = vpop.f32.mrf.mxu3 }
 0x1eb   :  { %902 = vmatmul.f32.gmra.mxu1 %v246_v63  ;;  %v1444_v11 = vadd.f32 %v2616_v16, %v1377_v9  ;;  %v267_v9 = vld [vmem:[%s3062_s0 + $0x7d0] sm:$0xf] }
 0x1ec   :  { %v1061_v13 = vpop.f32.mrf.mxu2 }
 0x1ed   :  { %v1507_v14 = vmax.f32 %v1444_v11, 0.0  ;;  %v1062_v15 = vadd.f32 %v1061_v13, %v856_v2  ;;  %v265_v13 = vld [vmem:[%s3062_s0 + $0x7c0] sm:$0xf] }
 0x1ef   :  { %1571 = vst.msk [vmem:[%s3065_s4 + $0x140] sm:$0xff] %vm1530_vm1, %v1507_v14  ;;  %v1268_v18 = vadd.f32 %v1267_v57, %v1062_v15  ;;  %v652_v19 = vpop.f32.mrf.mxu0  ;;  %1659 = vmatmul.msk.f32.gmra.mxu3 %vm319_vm0, %v260_v26  ;;  %v266_v14 = vld [vmem:[%s3062_s0 + $0x7c8] sm:$0xf] }
 0x1f0   :  { %v858_v20 = vpop.f32.mrf.mxu1 }
 0x1f1   :  { %v1378_v24 = vmul.f32 %v2607_v12, %v1268_v18  ;;  %1111 = vmatmul.f32.gmra.mxu2 %v251_v17  ;;  %v859_v25 = vadd.f32 %v858_v20, %v652_v19 }
 0x1f2   :  { %699 = vmatmul.f32.gmra.mxu0 %v249_v21  ;;  %v1276_v37 = vpop.f32.mrf.mxu3 }
 0x1f3   :  { %905 = vmatmul.f32.gmra.mxu1 %v250_v22  ;;  %v1445_v27 = vadd.f32 %v2616_v16, %v1378_v24 }
 0x1f4   :  { %v1064_v28 = vpop.f32.mrf.mxu2 }
 0x1f5   :  { %v1508_v29 = vmax.f32 %v1445_v27, 0.0  ;;  %v1065_v30 = vadd.f32 %v1064_v28, %v859_v25 }
 0x1f7   :  { %1572 = vst.msk [vmem:[%s3065_s4 + $0x148] sm:$0xff] %vm1530_vm1, %v1508_v29  ;;  %v1271_v32 = vadd.f32 %v1270_v8, %v1065_v30  ;;  %v655_v33 = vpop.f32.mrf.mxu0  ;;  %1660 = vmatmul.msk.f32.gmra.mxu3 %vm319_vm0, %v264_v40 }
 0x1f8   :  { %v861_v34 = vpop.f32.mrf.mxu1 }
 0x1f9   :  { %v1379_v38 = vmul.f32 %v2607_v12, %v1271_v32  ;;  %1114 = vmatmul.f32.gmra.mxu2 %v255_v31  ;;  %v862_v39 = vadd.f32 %v861_v34, %v655_v33 }
 0x1fa   :  { %702 = vmatmul.f32.gmra.mxu0 %v253_v35  ;;  %v1279_v51 = vpop.f32.mrf.mxu3 }
 0x1fb   :  { %908 = vmatmul.f32.gmra.mxu1 %v254_v36  ;;  %v1446_v41 = vadd.f32 %v2616_v16, %v1379_v38 }
 0x1fc   :  { %v1067_v42 = vpop.f32.mrf.mxu2 }
 0x1fd   :  { %v1509_v43 = vmax.f32 %v1446_v41, 0.0  ;;  %v1068_v44 = vadd.f32 %v1067_v42, %v862_v39 }
 0x1ff   :  { %1573 = vst.msk [vmem:[%s3065_s4 + $0x150] sm:$0xff] %vm1530_vm1, %v1509_v43  ;;  %v1274_v46 = vadd.f32 %v1273_v23, %v1068_v44  ;;  %v658_v47 = vpop.f32.mrf.mxu0  ;;  %1661 = vmatmul.msk.f32.gmra.mxu3 %vm319_vm0, %v268_v54 }
 0x200   :  { %v864_v48 = vpop.f32.mrf.mxu1 }
 0x201   :  { %v1380_v52 = vmul.f32 %v2607_v12, %v1274_v46  ;;  %1117 = vmatmul.f32.gmra.mxu2 %v259_v45  ;;  %v865_v53 = vadd.f32 %v864_v48, %v658_v47 }
 0x202   :  { %705 = vmatmul.f32.gmra.mxu0 %v257_v49  ;;  %v1282_v3 = vpop.f32.mrf.mxu3 }
 0x203   :  { %911 = vmatmul.f32.gmra.mxu1 %v258_v50  ;;  %v1447_v55 = vadd.f32 %v2616_v16, %v1380_v52 }
 0x204   :  { %v1070_v56 = vpop.f32.mrf.mxu2 }
 0x205   :  { %v1510_v57 = vmax.f32 %v1447_v55, 0.0  ;;  %v1071_v58 = vadd.f32 %v1070_v56, %v865_v53 }
 0x207   :  { %1574 = vst.msk [vmem:[%s3065_s4 + $0x158] sm:$0xff] %vm1530_vm1, %v1510_v57  ;;  %v1277_v60 = vadd.f32 %v1276_v37, %v1071_v58  ;;  %v661_v61 = vpop.f32.mrf.mxu0 }
 0x208   :  { %v867_v62 = vpop.f32.mrf.mxu1 }
 0x209   :  { %v1381_v4 = vmul.f32 %v2607_v12, %v1277_v60  ;;  %1120 = vmatmul.f32.gmra.mxu2 %v263_v59  ;;  %v868_v5 = vadd.f32 %v867_v62, %v661_v61 }
 0x20a   :  { %708 = vmatmul.f32.gmra.mxu0 %v261_v0  ;;  %v1285_v15 = vpop.f32.mrf.mxu3 }
 0x20b   :  { %914 = vmatmul.f32.gmra.mxu1 %v262_v1  ;;  %v1448_v6 = vadd.f32 %v2616_v16, %v1381_v4 }
 0x20c   :  { %v1073_v7 = vpop.f32.mrf.mxu2 }
 0x20d   :  { %v1511_v63 = vmax.f32 %v1448_v6, 0.0  ;;  %v1074_v8 = vadd.f32 %v1073_v7, %v868_v5 }
 0x20f   :  { %1575 = vst.msk [vmem:[%s3065_s4 + $0x160] sm:$0xff] %vm1530_vm1, %v1511_v63  ;;  %v1280_v2 = vadd.f32 %v1279_v51, %v1074_v8  ;;  %v664_v10 = vpop.f32.mrf.mxu0 }
 0x210   :  { %v870_v11 = vpop.f32.mrf.mxu1 }
 0x211   :  { %v1382_v17 = vmul.f32 %v2607_v12, %v1280_v2  ;;  %1123 = vmatmul.f32.gmra.mxu2 %v267_v9  ;;  %v871_v18 = vadd.f32 %v870_v11, %v664_v10 }
 0x212   :  { %711 = vmatmul.f32.gmra.mxu0 %v265_v13  ;;  %v1288_v26 = vpop.f32.mrf.mxu3 }
 0x213   :  { %917 = vmatmul.f32.gmra.mxu1 %v266_v14  ;;  %v1449_v19 = vadd.f32 %v2616_v16, %v1382_v17 }
 0x214   :  { %v1076_v20 = vpop.f32.mrf.mxu2 }
 0x215   :  { %v1512_v21 = vmax.f32 %v1449_v19, 0.0  ;;  %v1077_v22 = vadd.f32 %v1076_v20, %v871_v18 }
 0x217   :  { %1576 = vst.msk [vmem:[%s3065_s4 + $0x168] sm:$0xff] %vm1530_vm1, %v1512_v21  ;;  %v1283_v23 = vadd.f32 %v1282_v3, %v1077_v22  ;;  %v667_v24 = vpop.f32.mrf.mxu0 }
 0x218   :  { %v873_v25 = vpop.f32.mrf.mxu1 }
 0x219   :  { %v1383_v27 = vmul.f32 %v2607_v12, %v1283_v23  ;;  %v874_v28 = vadd.f32 %v873_v25, %v667_v24 }
 0x21a   :  { %v1291_v36 = vpop.f32.mrf.mxu3 }
 0x21b   :  { %v1450_v29 = vadd.f32 %v2616_v16, %v1383_v27 }
 0x21c   :  { %v1079_v30 = vpop.f32.mrf.mxu2 }
 0x21d   :  { %v1513_v31 = vmax.f32 %v1450_v29, 0.0  ;;  %v1080_v32 = vadd.f32 %v1079_v30, %v874_v28 }
 0x21f   :  { %1577 = vst.msk [vmem:[%s3065_s4 + $0x170] sm:$0xff] %vm1530_vm1, %v1513_v31  ;;  %v1286_v33 = vadd.f32 %v1285_v15, %v1080_v32  ;;  %v670_v34 = vpop.f32.mrf.mxu0 }
 0x220   :  { %v876_v35 = vpop.f32.mrf.mxu1 }
 0x221   :  { %v1384_v37 = vmul.f32 %v2607_v12, %v1286_v33  ;;  %v877_v38 = vadd.f32 %v876_v35, %v670_v34 }
 0x222   :  { %v1294_v46 = vpop.f32.mrf.mxu3 }
 0x223   :  { %v1451_v39 = vadd.f32 %v2616_v16, %v1384_v37 }
 0x224   :  { %v1082_v40 = vpop.f32.mrf.mxu2 }
 0x225   :  { %v1514_v41 = vmax.f32 %v1451_v39, 0.0  ;;  %v1083_v42 = vadd.f32 %v1082_v40, %v877_v38 }
 0x227   :  { %1578 = vst.msk [vmem:[%s3065_s4 + $0x178] sm:$0xff] %vm1530_vm1, %v1514_v41  ;;  %v1289_v43 = vadd.f32 %v1288_v26, %v1083_v42  ;;  %v673_v44 = vpop.f32.mrf.mxu0 }
 0x228   :  { %v879_v45 = vpop.f32.mrf.mxu1 }
 0x229   :  { %v1385_v47 = vmul.f32 %v2607_v12, %v1289_v43  ;;  %v880_v48 = vadd.f32 %v879_v45, %v673_v44 }
 0x22a   :  { %v1297_v56 = vpop.f32.mrf.mxu3 }
 0x22b   :  { %v1452_v49 = vadd.f32 %v2616_v16, %v1385_v47 }
 0x22c   :  { %v1085_v50 = vpop.f32.mrf.mxu2 }
 0x22d   :  { %v1515_v51 = vmax.f32 %v1452_v49, 0.0  ;;  %v1086_v52 = vadd.f32 %v1085_v50, %v880_v48 }
 0x22f   :  { %1579 = vst.msk [vmem:[%s3065_s4 + $0x180] sm:$0xff] %vm1530_vm1, %v1515_v51  ;;  %v1292_v53 = vadd.f32 %v1291_v36, %v1086_v52  ;;  %v676_v54 = vpop.f32.mrf.mxu0 }
 0x230   :  { %v882_v55 = vpop.f32.mrf.mxu1 }
 0x231   :  { %v1386_v57 = vmul.f32 %v2607_v12, %v1292_v53  ;;  %v883_v58 = vadd.f32 %v882_v55, %v676_v54 }
 0x232   :  { %v1300_v4 = vpop.f32.mrf.mxu3 }
 0x233   :  { %v1453_v59 = vadd.f32 %v2616_v16, %v1386_v57 }
 0x234   :  { %v1088_v60 = vpop.f32.mrf.mxu2 }
 0x235   :  { %v1516_v61 = vmax.f32 %v1453_v59, 0.0  ;;  %v1089_v62 = vadd.f32 %v1088_v60, %v883_v58 }
 0x237   :  { %1580 = vst.msk [vmem:[%s3065_s4 + $0x188] sm:$0xff] %vm1530_vm1, %v1516_v61  ;;  %v1295_v0 = vadd.f32 %v1294_v46, %v1089_v62  ;;  %v679_v1 = vpop.f32.mrf.mxu0 }
 0x238   :  { %v885_v3 = vpop.f32.mrf.mxu1 }
 0x239   :  { %v1387_v5 = vmul.f32 %v2607_v12, %v1295_v0  ;;  %v886_v6 = vadd.f32 %v885_v3, %v679_v1 }
 0x23a   :  { %v1303_v13 = vpop.f32.mrf.mxu3 }
 0x23b   :  { %v1454_v7 = vadd.f32 %v2616_v16, %v1387_v5 }
 0x23c   :  { %v1091_v63 = vpop.f32.mrf.mxu2 }
 0x23d   :  { %v1517_v8 = vmax.f32 %v1454_v7, 0.0  ;;  %v1092_v9 = vadd.f32 %v1091_v63, %v886_v6 }
 0x23f   :  { %1581 = vst.msk [vmem:[%s3065_s4 + $0x190] sm:$0xff] %vm1530_vm1, %v1517_v8  ;;  %v1298_v2 = vadd.f32 %v1297_v56, %v1092_v9  ;;  %v682_v10 = vpop.f32.mrf.mxu0 }
 0x240   :  { %v888_v11 = vpop.f32.mrf.mxu1 }
 0x241   :  { %v1388_v14 = vmul.f32 %v2607_v12, %v1298_v2  ;;  %v889_v15 = vadd.f32 %v888_v11, %v682_v10 }
 0x242   :  { %v1306_v24 = vpop.f32.mrf.mxu3 }
 0x243   :  { %v1455_v17 = vadd.f32 %v2616_v16, %v1388_v14 }
 0x244   :  { %v1094_v18 = vpop.f32.mrf.mxu2 }
 0x245   :  { %v1518_v19 = vmax.f32 %v1455_v17, 0.0  ;;  %v1095_v20 = vadd.f32 %v1094_v18, %v889_v15 }
 0x247   :  { %1582 = vst.msk [vmem:[%s3065_s4 + $0x198] sm:$0xff] %vm1530_vm1, %v1518_v19  ;;  %v1301_v21 = vadd.f32 %v1300_v4, %v1095_v20  ;;  %v685_v22 = vpop.f32.mrf.mxu0 }
 0x248   :  { %v891_v23 = vpop.f32.mrf.mxu1 }
 0x249   :  { %v1389_v25 = vmul.f32 %v2607_v12, %v1301_v21  ;;  %v892_v26 = vadd.f32 %v891_v23, %v685_v22 }
 0x24a   :  { %v1309_v34 = vpop.f32.mrf.mxu3 }
 0x24b   :  { %v1456_v27 = vadd.f32 %v2616_v16, %v1389_v25 }
 0x24c   :  { %v1097_v28 = vpop.f32.mrf.mxu2 }
 0x24d   :  { %v1519_v29 = vmax.f32 %v1456_v27, 0.0  ;;  %v1098_v30 = vadd.f32 %v1097_v28, %v892_v26 }
 0x24f   :  { %1583 = vst.msk [vmem:[%s3065_s4 + $0x1a0] sm:$0xff] %vm1530_vm1, %v1519_v29  ;;  %v1304_v31 = vadd.f32 %v1303_v13, %v1098_v30  ;;  %v688_v32 = vpop.f32.mrf.mxu0 }
 0x250   :  { %v894_v33 = vpop.f32.mrf.mxu1 }
 0x251   :  { %v1390_v35 = vmul.f32 %v2607_v12, %v1304_v31  ;;  %v895_v36 = vadd.f32 %v894_v33, %v688_v32 }
 0x252   :  { %v1312_v44 = vpop.f32.mrf.mxu3 }
 0x253   :  { %v1457_v37 = vadd.f32 %v2616_v16, %v1390_v35 }
 0x254   :  { %v1100_v38 = vpop.f32.mrf.mxu2 }
 0x255   :  { %v1520_v39 = vmax.f32 %v1457_v37, 0.0  ;;  %v1101_v40 = vadd.f32 %v1100_v38, %v895_v36 }
 0x257   :  { %1584 = vst.msk [vmem:[%s3065_s4 + $0x1a8] sm:$0xff] %vm1530_vm1, %v1520_v39  ;;  %v1307_v41 = vadd.f32 %v1306_v24, %v1101_v40  ;;  %v691_v42 = vpop.f32.mrf.mxu0 }
 0x258   :  { %v897_v43 = vpop.f32.mrf.mxu1 }
 0x259   :  { %v1391_v45 = vmul.f32 %v2607_v12, %v1307_v41  ;;  %v898_v46 = vadd.f32 %v897_v43, %v691_v42 }
 0x25a   :  { %v1315_v56 = vpop.f32.mrf.mxu3 }
 0x25b   :  { %v1458_v47 = vadd.f32 %v2616_v16, %v1391_v45 }
 0x25c   :  { %v1103_v48 = vpop.f32.mrf.mxu2 }
 0x25d   :  { %v1521_v49 = vmax.f32 %v1458_v47, 0.0  ;;  %v1104_v50 = vadd.f32 %v1103_v48, %v898_v46 }
 0x25f   :  { %1585 = vst.msk [vmem:[%s3065_s4 + $0x1b0] sm:$0xff] %vm1530_vm1, %v1521_v49  ;;  %v1310_v51 = vadd.f32 %v1309_v34, %v1104_v50  ;;  %v694_v52 = vpop.f32.mrf.mxu0 }
 0x260   :  { %v900_v53 = vpop.f32.mrf.mxu1 }
 0x261   :  { %v1392_v54 = vmul.f32 %v2607_v12, %v1310_v51  ;;  %v901_v55 = vadd.f32 %v900_v53, %v694_v52  ;;  %v1666_v51 = vld [vmem:[%s3063_s2] ss:$0 sm:$0xff] }
 0x262   :  { %v1318_v6 = vpop.f32.mrf.mxu3 }
 0x263   :  { %v1459_v57 = vadd.f32 %v2616_v16, %v1392_v54 }
 0x264   :  { %v1106_v58 = vpop.f32.mrf.mxu2 }
 0x265   :  { %v1522_v59 = vmax.f32 %v1459_v57, 0.0  ;;  %v1107_v60 = vadd.f32 %v1106_v58, %v901_v55 }
 0x267   :  { %1586 = vst.msk [vmem:[%s3065_s4 + $0x1b8] sm:$0xff] %vm1530_vm1, %v1522_v59  ;;  %v1313_v61 = vadd.f32 %v1312_v44, %v1107_v60  ;;  %v697_v62 = vpop.f32.mrf.mxu0 }
 0x268   :  { %v903_v0 = vpop.f32.mrf.mxu1 }
 0x269   :  { %v1393_v1 = vmul.f32 %v2607_v12, %v1313_v61  ;;  %v904_v3 = vadd.f32 %v903_v0, %v697_v62 }
 0x26a   :  { %v1321_v18 = vpop.f32.mrf.mxu3 }
 0x26b   :  { %v1460_v4 = vadd.f32 %v2616_v16, %v1393_v1 }
 0x26c   :  { %v1109_v5 = vpop.f32.mrf.mxu2 }
 0x26d   :  { %v1523_v7 = vmax.f32 %v1460_v4, 0.0  ;;  %v1110_v63 = vadd.f32 %v1109_v5, %v904_v3 }
 0x26f   :  { %1587 = vst.msk [vmem:[%s3065_s4 + $0x1c0] sm:$0xff] %vm1530_vm1, %v1523_v7  ;;  %v1316_v8 = vadd.f32 %v1315_v56, %v1110_v63  ;;  %v700_v9 = vpop.f32.mrf.mxu0 }
 0x270   :  { %v906_v2 = vpop.f32.mrf.mxu1 }
 0x271   :  { %v1394_v10 = vmul.f32 %v2607_v12, %v1316_v8  ;;  %v907_v11 = vadd.f32 %v906_v2, %v700_v9 }
 0x272   :  { %v1324_v31 = vpop.f32.mrf.mxu3 }
 0x273   :  { %v1461_v13 = vadd.f32 %v2616_v16, %v1394_v10 }
 0x274   :  { %v1112_v14 = vpop.f32.mrf.mxu2 }
 0x275   :  { %v1524_v15 = vmax.f32 %v1461_v13, 0.0  ;;  %v1113_v17 = vadd.f32 %v1112_v14, %v907_v11 }
 0x277   :  { %1588 = vst.msk [vmem:[%s3065_s4 + $0x1c8] sm:$0xff] %vm1530_vm1, %v1524_v15  ;;  %v1319_v19 = vadd.f32 %v1318_v6, %v1113_v17  ;;  %v703_v20 = vpop.f32.mrf.mxu0 }
 0x278   :  { %v909_v21 = vpop.f32.mrf.mxu1 }
 0x279   :  { %v1395_v22 = vmul.f32 %v2607_v12, %v1319_v19  ;;  %v910_v23 = vadd.f32 %v909_v21, %v703_v20 }
 0x27a   :  { %v1327_v43 = vpop.f32.mrf.mxu3 }
 0x27b   :  { %v1462_v24 = vadd.f32 %v2616_v16, %v1395_v22 }
 0x27c   :  { %v1115_v25 = vpop.f32.mrf.mxu2 }
 0x27d   :  { %v1525_v26 = vmax.f32 %v1462_v24, 0.0  ;;  %v1116_v27 = vadd.f32 %v1115_v25, %v910_v23 }
 0x27f   :  { %1589 = vst.msk [vmem:[%s3065_s4 + $0x1d0] sm:$0xff] %vm1530_vm1, %v1525_v26  ;;  %v1322_v28 = vadd.f32 %v1321_v18, %v1116_v27  ;;  %v706_v29 = vpop.f32.mrf.mxu0 }
 0x280   :  { %v912_v30 = vpop.f32.mrf.mxu1 }
 0x281   :  { %v1396_v32 = vmul.f32 %v2607_v12, %v1322_v28  ;;  %v913_v33 = vadd.f32 %v912_v30, %v706_v29 }
 0x282   :  { %v1330_v55 = vpop.f32.mrf.mxu3 }
 0x283   :  { %v1463_v34 = vadd.f32 %v2616_v16, %v1396_v32 }
 0x284   :  { %v1118_v35 = vpop.f32.mrf.mxu2 }
 0x285   :  { %v1526_v36 = vmax.f32 %v1463_v34, 0.0  ;;  %v1119_v37 = vadd.f32 %v1118_v35, %v913_v33 }
 0x287   :  { %1590 = vst.msk [vmem:[%s3065_s4 + $0x1d8] sm:$0xff] %vm1530_vm1, %v1526_v36  ;;  %v1325_v38 = vadd.f32 %v1324_v31, %v1119_v37  ;;  %v709_v39 = vpop.f32.mrf.mxu0 }
 0x288   :  { %v915_v40 = vpop.f32.mrf.mxu1 }
 0x289   :  { %v1397_v41 = vmul.f32 %v2607_v12, %v1325_v38  ;;  %v916_v42 = vadd.f32 %v915_v40, %v709_v39 }
 0x28b   :  { %v1464_v44 = vadd.f32 %v2616_v16, %v1397_v41  ;;  %v1667_v16 = vld [vmem:[%s3064_s3] ss:$0 sm:$0xff] }
 0x28c   :  { %v1121_v45 = vpop.f32.mrf.mxu2 }
 0x28d   :  { %v1527_v46 = vmax.f32 %v1464_v44, 0.0  ;;  %v1122_v47 = vadd.f32 %v1121_v45, %v916_v42 }
 0x28f   :  { %1591 = vst.msk [vmem:[%s3065_s4 + $0x1e0] sm:$0xff] %vm1530_vm1, %v1527_v46  ;;  %v1328_v48 = vadd.f32 %v1327_v43, %v1122_v47  ;;  %v712_v49 = vpop.f32.mrf.mxu0 }
 0x290   :  { %v918_v50 = vpop.f32.mrf.mxu1 }
 0x291   :  { %v1398_v12 = vmul.f32 %v1666_v51, %v1328_v48  ;;  %v919_v52 = vadd.f32 %v918_v50, %v712_v49 }
 0x293   :  { %v1465_v53 = vadd.f32 %v1667_v16, %v1398_v12 }
 0x294   :  { %v1124_v54 = vpop.f32.mrf.mxu2 }
 0x295   :  { %v1528_v56 = vmax.f32 %v1465_v53, 0.0  ;;  %v1125_v57 = vadd.f32 %v1124_v54, %v919_v52 }
 0x297   :  { %1592 = vst.msk [vmem:[%s3065_s4 + $0x1e8] sm:$0xff] %vm1530_vm1, %v1528_v56  ;;  %v1331_v58 = vadd.f32 %v1330_v55, %v1125_v57 }
 0x299   :  { %v1399_v59 = vmul.f32 %v1666_v51, %v1331_v58 }
 0x29b   :  { %v1466_v60 = vadd.f32 %v1667_v16, %v1399_v59 }
 0x29d   :  { %v1529_v61 = vmax.f32 %v1466_v60, 0.0 }
 0x29f   :  { %1594 = vst.msk [vmem:[%s3065_s4 + $0x1f0] sm:$0xf] %vm1593_vm2, %v1529_v61 }

// kernel: transam_forward.7
= control target key start
LH: loop header
LB: loop body
LE: loop exit
PB: predicated region body
PF: predicated region fallthrough
CT: control target
= control target key end

     0   :  { %vm138_vm0 = vcmask 261120   ;;  %vm349_vm1 = vcmask 257024   ;;  %s784_s1 = inlined_call_operand.vmem [shape: f32[800,32], index: 1, kind: input, shape index: {}]   ;;  %s785_s0 = inlined_call_operand.vmem [shape: f32[20,800], index: 0, kind: input, shape index: {}]   ;;  %s786_s2 = inlined_call_operand.vmem [shape: f32[1,32], index: 2, kind: input, shape index: {}]   ;;  %s787_s3 = inlined_call_operand.vmem [shape: f32[1,32], index: 3, kind: input, shape index: {}]   ;;  %s788_s4 = inlined_call_operand.vmem [shape: f32[20,32], index: 4, kind: output, shape index: {}]  }
   0x1   :  { %v53_v0 = vld [vmem:[%s784_s1 + $0x78] sm:$0xff]  ;;  %v52_v3 = vld [vmem:[%s784_s1 + $0x70] sm:$0xff]  ;;  %v51_v7 = vld [vmem:[%s784_s1 + $0x68] sm:$0xff] }
   0x2   :  { %v69_v1 = vld [vmem:[%s784_s1 + $0xf8] sm:$0xff]  ;;  %148 = vmatpush.msra.mxu0 %v53_v0  ;;  %v68_v4 = vld [vmem:[%s784_s1 + $0xf0] sm:$0xff]  ;;  %v67_v8 = vld [vmem:[%s784_s1 + $0xe8] sm:$0xff] }
   0x3   :  { %v101_v2 = vld [vmem:[%s784_s1 + $0x1f8] sm:$0xff]  ;;  %174 = vmatpush.msra.mxu1 %v69_v1  ;;  %v100_v5 = vld [vmem:[%s784_s1 + $0x1f0] sm:$0xff]  ;;  %v99_v9 = vld [vmem:[%s784_s1 + $0x1e8] sm:$0xff] }
   0x4   :  { %226 = vmatpush.msra.mxu3 %v101_v2  ;;  %v85_v6 = vld [vmem:[%s784_s1 + $0x178] sm:$0xff]  ;;  %149 = vmatpush.msra.mxu0 %v52_v3  ;;  %v84_v10 = vld [vmem:[%s784_s1 + $0x170] sm:$0xff]  ;;  %v50_v11 = vld [vmem:[%s784_s1 + $0x60] sm:$0xff] }
   0x5   :  { %175 = vmatpush.msra.mxu1 %v68_v4  ;;  %200 = vmatpush.msra.mxu2 %v85_v6  ;;  %v66_v12 = vld [vmem:[%s784_s1 + $0xe0] sm:$0xff]  ;;  %v83_v14 = vld [vmem:[%s784_s1 + $0x168] sm:$0xff]  ;;  %v49_v15 = vld [vmem:[%s784_s1 + $0x58] sm:$0xff] }
   0x6   :  { %227 = vmatpush.msra.mxu3 %v100_v5  ;;  %150 = vmatpush.msra.mxu0 %v51_v7  ;;  %v98_v13 = vld [vmem:[%s784_s1 + $0x1e0] sm:$0xff]  ;;  %v65_v16 = vld [vmem:[%s784_s1 + $0xd8] sm:$0xff]  ;;  %v48_v19 = vld [vmem:[%s784_s1 + $0x50] sm:$0xff] }
   0x7   :  { %176 = vmatpush.msra.mxu1 %v67_v8  ;;  %201 = vmatpush.msra.mxu2 %v84_v10  ;;  %v97_v17 = vld [vmem:[%s784_s1 + $0x1d8] sm:$0xff]  ;;  %v82_v18 = vld [vmem:[%s784_s1 + $0x160] sm:$0xff]  ;;  %v64_v20 = vld [vmem:[%s784_s1 + $0xd0] sm:$0xff] }
   0x8   :  { %228 = vmatpush.msra.mxu3 %v99_v9  ;;  %151 = vmatpush.msra.mxu0 %v50_v11  ;;  %v96_v21 = vld [vmem:[%s784_s1 + $0x1d0] sm:$0xff]  ;;  %v81_v22 = vld [vmem:[%s784_s1 + $0x158] sm:$0xff]  ;;  %v47_v23 = vld [vmem:[%s784_s1 + $0x48] sm:$0xff] }
   0x9   :  { %177 = vmatpush.msra.mxu1 %v66_v12  ;;  %202 = vmatpush.msra.mxu2 %v83_v14  ;;  %v63_v24 = vld [vmem:[%s784_s1 + $0xc8] sm:$0xff]  ;;  %v80_v26 = vld [vmem:[%s784_s1 + $0x150] sm:$0xff]  ;;  %v46_v27 = vld [vmem:[%s784_s1 + $0x40] sm:$0xff] }
   0xa   :  { %229 = vmatpush.msra.mxu3 %v98_v13  ;;  %152 = vmatpush.msra.mxu0 %v49_v15  ;;  %v95_v25 = vld [vmem:[%s784_s1 + $0x1c8] sm:$0xff]  ;;  %v62_v28 = vld [vmem:[%s784_s1 + $0xc0] sm:$0xff]  ;;  %v45_v31 = vld [vmem:[%s784_s1 + $0x38] sm:$0xff] }
   0xb   :  { %178 = vmatpush.msra.mxu1 %v65_v16  ;;  %203 = vmatpush.msra.mxu2 %v82_v18  ;;  %v94_v29 = vld [vmem:[%s784_s1 + $0x1c0] sm:$0xff]  ;;  %v79_v30 = vld [vmem:[%s784_s1 + $0x148] sm:$0xff]  ;;  %v61_v32 = vld [vmem:[%s784_s1 + $0xb8] sm:$0xff] }
   0xc   :  { %230 = vmatpush.msra.mxu3 %v97_v17  ;;  %153 = vmatpush.msra.mxu0 %v48_v19  ;;  %v93_v33 = vld [vmem:[%s784_s1 + $0x1b8] sm:$0xff]  ;;  %v78_v34 = vld [vmem:[%s784_s1 + $0x140] sm:$0xff]  ;;  %v44_v35 = vld [vmem:[%s784_s1 + $0x30] sm:$0xff] }
   0xd   :  { %179 = vmatpush.msra.mxu1 %v64_v20  ;;  %204 = vmatpush.msra.mxu2 %v81_v22  ;;  %v60_v36 = vld [vmem:[%s784_s1 + $0xb0] sm:$0xff]  ;;  %v77_v38 = vld [vmem:[%s784_s1 + $0x138] sm:$0xff]  ;;  %v43_v39 = vld [vmem:[%s784_s1 + $0x28] sm:$0xff] }
   0xe   :  { %231 = vmatpush.msra.mxu3 %v96_v21  ;;  %154 = vmatpush.msra.mxu0 %v47_v23  ;;  %v92_v37 = vld [vmem:[%s784_s1 + $0x1b0] sm:$0xff]  ;;  %v59_v40 = vld [vmem:[%s784_s1 + $0xa8] sm:$0xff]  ;;  %v42_v43 = vld [vmem:[%s784_s1 + $0x20] sm:$0xff] }
   0xf   :  { %180 = vmatpush.msra.mxu1 %v63_v24  ;;  %205 = vmatpush.msra.mxu2 %v80_v26  ;;  %v91_v41 = vld [vmem:[%s784_s1 + $0x1a8] sm:$0xff]  ;;  %v76_v42 = vld [vmem:[%s784_s1 + $0x130] sm:$0xff]  ;;  %v58_v44 = vld [vmem:[%s784_s1 + $0xa0] sm:$0xff] }
  0x10   :  { %232 = vmatpush.msra.mxu3 %v95_v25  ;;  %155 = vmatpush.msra.mxu0 %v46_v27  ;;  %v90_v45 = vld [vmem:[%s784_s1 + $0x1a0] sm:$0xff]  ;;  %v75_v46 = vld [vmem:[%s784_s1 + $0x128] sm:$0xff]  ;;  %v41_v47 = vld [vmem:[%s784_s1 + $0x18] sm:$0xff] }
  0x11   :  { %181 = vmatpush.msra.mxu1 %v62_v28  ;;  %206 = vmatpush.msra.mxu2 %v79_v30  ;;  %v57_v48 = vld [vmem:[%s784_s1 + $0x98] sm:$0xff]  ;;  %v74_v50 = vld [vmem:[%s784_s1 + $0x120] sm:$0xff]  ;;  %v40_v51 = vld [vmem:[%s784_s1 + $0x10] sm:$0xff] }
  0x12   :  { %233 = vmatpush.msra.mxu3 %v94_v29  ;;  %156 = vmatpush.msra.mxu0 %v45_v31  ;;  %v89_v49 = vld [vmem:[%s784_s1 + $0x198] sm:$0xff]  ;;  %v56_v52 = vld [vmem:[%s784_s1 + $0x90] sm:$0xff]  ;;  %v39_v55 = vld [vmem:[%s784_s1 + $0x8] sm:$0xff] }
  0x13   :  { %182 = vmatpush.msra.mxu1 %v61_v32  ;;  %207 = vmatpush.msra.mxu2 %v78_v34  ;;  %v88_v53 = vld [vmem:[%s784_s1 + $0x190] sm:$0xff]  ;;  %v73_v54 = vld [vmem:[%s784_s1 + $0x118] sm:$0xff]  ;;  %v55_v56 = vld [vmem:[%s784_s1 + $0x88] sm:$0xff] }
  0x14   :  { %234 = vmatpush.msra.mxu3 %v93_v33  ;;  %157 = vmatpush.msra.mxu0 %v44_v35  ;;  %v87_v57 = vld [vmem:[%s784_s1 + $0x188] sm:$0xff]  ;;  %v72_v58 = vld [vmem:[%s784_s1 + $0x110] sm:$0xff]  ;;  %v38_v59 = vld [vmem:[%s784_s1] sm:$0xff] }
  0x15   :  { %183 = vmatpush.msra.mxu1 %v60_v36  ;;  %208 = vmatpush.msra.mxu2 %v77_v38  ;;  %v54_v60 = vld [vmem:[%s784_s1 + $0x80] sm:$0xff]  ;;  %v71_v62 = vld [vmem:[%s784_s1 + $0x108] sm:$0xff]  ;;  %v117_v63 = vld [vmem:[%s784_s1 + $0x278] sm:$0xff] }
  0x16   :  { %235 = vmatpush.msra.mxu3 %v92_v37  ;;  %158 = vmatpush.msra.mxu0 %v43_v39  ;;  %v86_v61 = vld [vmem:[%s784_s1 + $0x180] sm:$0xff]  ;;  %v133_v0 = vld [vmem:[%s784_s1 + $0x2f8] sm:$0xff]  ;;  %v116_v2 = vld [vmem:[%s784_s1 + $0x270] sm:$0xff] }
  0x17   :  { %184 = vmatpush.msra.mxu1 %v59_v40  ;;  %209 = vmatpush.msra.mxu2 %v76_v42  ;;  %v70_v1 = vld [vmem:[%s784_s1 + $0x100] sm:$0xff]  ;;  %v132_v3 = vld [vmem:[%s784_s1 + $0x2f0] sm:$0xff]  ;;  %v137_v5 = vld [vmem:[%s784_s1 + $0x318] sm:$0xff] }
  0x18   :  { %236 = vmatpush.msra.mxu3 %v91_v41  ;;  %159 = vmatpush.msra.mxu0 %v42_v43  ;;  %v19_v4 = vld [vmem:[%s785_s0 + $0x10] sm:$0xff]  ;;  %v115_v6 = vld [vmem:[%s784_s1 + $0x268] sm:$0xff]  ;;  %v20_v8 = vld [vmem:[%s785_s0 + $0x18] sm:$0xff] }
  0x19   :  { %185 = vmatpush.msra.mxu1 %v58_v44  ;;  %210 = vmatpush.msra.mxu2 %v75_v46  ;;  %v131_v7 = vld [vmem:[%s784_s1 + $0x2e8] sm:$0xff]  ;;  %v114_v9 = vld [vmem:[%s784_s1 + $0x260] sm:$0xff]  ;;  %v113_v13 = vld [vmem:[%s784_s1 + $0x258] sm:$0xff] }
  0x1a   :  { %237 = vmatpush.msra.mxu3 %v90_v45  ;;  %160 = vmatpush.msra.mxu0 %v41_v47  ;;  %v130_v10 = vld [vmem:[%s784_s1 + $0x2e0] sm:$0xff]  ;;  %v18_v12 = vld [vmem:[%s785_s0 + $0x8] sm:$0xff]  ;;  %v129_v14 = vld [vmem:[%s784_s1 + $0x2d8] sm:$0xff] }
  0x1b   :  { %186 = vmatpush.msra.mxu1 %v57_v48  ;;  %211 = vmatpush.msra.mxu2 %v74_v50  ;;  %v17_v11 = vld [vmem:[%s785_s0] sm:$0xff]  ;;  %v136_v15 = vld [vmem:[%s784_s1 + $0x310] sm:$0xff]  ;;  %v26_v18 = vld [vmem:[%s785_s0 + $0x48] sm:$0xff] }
  0x1c   :  { %238 = vmatpush.msra.mxu3 %v89_v49  ;;  %161 = vmatpush.msra.mxu0 %v40_v51  ;;  %v112_v16 = vld [vmem:[%s784_s1 + $0x250] sm:$0xff]  ;;  %v111_v19 = vld [vmem:[%s784_s1 + $0x248] sm:$0xff]  ;;  %v110_v22 = vld [vmem:[%s784_s1 + $0x240] sm:$0xff] }
  0x1d   :  { %187 = vmatpush.msra.mxu1 %v56_v52  ;;  %212 = vmatpush.msra.mxu2 %v73_v54  ;;  %v128_v17 = vld [vmem:[%s784_s1 + $0x2d0] sm:$0xff]  ;;  %v127_v20 = vld [vmem:[%s784_s1 + $0x2c8] sm:$0xff]  ;;  %v126_v23 = vld [vmem:[%s784_s1 + $0x2c0] sm:$0xff] }
  0x1e   :  { %239 = vmatpush.msra.mxu3 %v88_v53  ;;  %162 = vmatpush.msra.mxu0 %v39_v55  ;;  %v27_v21 = vld [vmem:[%s785_s0 + $0x50] sm:$0xff]  ;;  %v24_v24 = vld [vmem:[%s785_s0 + $0x38] sm:$0xff]  ;;  %v25_v25 = vld [vmem:[%s785_s0 + $0x40] sm:$0xff] }
  0x1f   :  { %188 = vmatpush.msra.mxu1 %v55_v56  ;;  %213 = vmatpush.msra.mxu2 %v72_v58  ;;  %v135_v26 = vld [vmem:[%s784_s1 + $0x308] sm:$0xff]  ;;  %v109_v27 = vld [vmem:[%s784_s1 + $0x238] sm:$0xff]  ;;  %v134_v29 = vld [vmem:[%s784_s1 + $0x300] sm:$0xff] }
  0x20   :  { %240 = vmatpush.msra.mxu3 %v87_v57  ;;  %163 = vmatpush.msra.mxu0 %v38_v59  ;;  %v125_v28 = vld [vmem:[%s784_s1 + $0x2b8] sm:$0xff]  ;;  %v108_v30 = vld [vmem:[%s784_s1 + $0x230] sm:$0xff]  ;;  %v33_v32 = vld [vmem:[%s785_s0 + $0x80] sm:$0xf] }
  0x21   :  { %189 = vmatpush.msra.mxu1 %v54_v60  ;;  %214 = vmatpush.msra.mxu2 %v71_v62  ;;  %v124_v31 = vld [vmem:[%s784_s1 + $0x2b0] sm:$0xff]  ;;  %v107_v33 = vld [vmem:[%s784_s1 + $0x228] sm:$0xff]  ;;  %v106_v36 = vld [vmem:[%s784_s1 + $0x220] sm:$0xff] }
  0x22   :  { %241 = vmatpush.msra.mxu3 %v86_v61  ;;  %252 = vmatpush.msrb.mxu0 %v117_v63  ;;  %v123_v34 = vld [vmem:[%s784_s1 + $0x2a8] sm:$0xff]  ;;  %v122_v37 = vld [vmem:[%s784_s1 + $0x2a0] sm:$0xff]  ;;  %v31_v38 = vld [vmem:[%s785_s0 + $0x70] sm:$0xf] }
  0x23   :  { %278 = vmatpush.msrb.mxu1 %v133_v0  ;;  %215 = vmatpush.msra.mxu2 %v70_v1  ;;  %v34_v35 = vld [vmem:[%s785_s0 + $0x88] sm:$0xf]  ;;  %v32_v39 = vld [vmem:[%s785_s0 + $0x78] sm:$0xf]  ;;  %v104_v42 = vld [vmem:[%s784_s1 + $0x210] sm:$0xff] }
  0x24   :  { %358 = vmatpush.msrb.mxu3 %v117_v63  ;;  %253 = vmatpush.msrb.mxu0 %v116_v2  ;;  %v105_v40 = vld [vmem:[%s784_s1 + $0x218] sm:$0xff]  ;;  %v120_v43 = vld [vmem:[%s784_s1 + $0x290] sm:$0xff]  ;;  %v103_v45 = vld [vmem:[%s784_s1 + $0x208] sm:$0xff] }
  0x25   :  { %279 = vmatpush.msrb.mxu1 %v132_v3  ;;  %216 = vmatmul.f32.vlgmr.msra.gmra.mxu2 %v19_v4  ;;  %v121_v41 = vld [vmem:[%s784_s1 + $0x298] sm:$0xff]  ;;  %v23_v44 = vld [vmem:[%s785_s0 + $0x30] sm:$0xff]  ;;  %v119_v46 = vld [vmem:[%s784_s1 + $0x288] sm:$0xff] }
  0x26   :  { %359 = vmatpush.msrb.mxu3 %v116_v2  ;;  %316 = vmatpush.msrb.mxu2 %v137_v5  ;;  %v102_v47 = vld [vmem:[%s784_s1 + $0x200] sm:$0xff]  ;;  %v28_v50 = vld [vmem:[%s785_s0 + $0x58] sm:$0xff]  ;;  %v22_v51 = vld [vmem:[%s785_s0 + $0x28] sm:$0xff] }
  0x27   :  { %254 = vmatpush.msrb.mxu0 %v115_v6  ;;  %280 = vmatpush.msrb.mxu1 %v131_v7  ;;  %v118_v48 = vld [vmem:[%s784_s1 + $0x280] sm:$0xff]  ;;  %v30_v52 = vld [vmem:[%s785_s0 + $0x68] sm:$0xff]  ;;  %v35_v53 = vld [vmem:[%s785_s0 + $0x90] sm:$0xf] }
  0x28   :  { %360 = vmatpush.msrb.mxu3 %v115_v6  ;;  %164 = vmatmul.f32.vlgmr.msra.gmra.mxu0 %v17_v11  ;;  %v21_v49 = vld [vmem:[%s785_s0 + $0x20] sm:$0xff]  ;;  %v36_v56 = vld [vmem:[%s785_s0 + $0x98] sm:$0xf] }
  0x29   :  { %242 = vmatmul.f32.vlgmr.msra.gmra.mxu3 %v20_v8  ;;  %255 = vmatpush.msrb.mxu0 %v114_v9  ;;  %v29_v54 = vld [vmem:[%s785_s0 + $0x60] sm:$0xff] }
  0x2a   :  { %361 = vmatpush.msrb.mxu3 %v114_v9  ;;  %281 = vmatpush.msrb.mxu1 %v130_v10  ;;  %v37_v55 = vld [vmem:[%s785_s0 + $0xa0] sm:$0xf] }
  0x2b   :  { %190 = vmatmul.f32.vlgmr.msra.gmra.mxu1 %v18_v12  ;;  %256 = vmatpush.msrb.mxu0 %v113_v13 }
  0x2c   :  { %362 = vmatpush.msrb.mxu3 %v113_v13  ;;  %282 = vmatpush.msrb.mxu1 %v129_v14 }
  0x2d   :  { %317 = vmatpush.msrb.mxu2 %v136_v15  ;;  %257 = vmatpush.msrb.mxu0 %v112_v16  ;;  %v374_v15 = vld [vmem:[%s786_s2] ss:$0 sm:$0xff] }
  0x2e   :  { %363 = vmatpush.msrb.mxu3 %v112_v16  ;;  %283 = vmatpush.msrb.mxu1 %v128_v17 }
  0x2f   :  { %219 = vmatmul.f32.gmra.mxu2 %v26_v18  ;;  %258 = vmatpush.msrb.mxu0 %v111_v19 }
  0x30   :  { %364 = vmatpush.msrb.mxu3 %v111_v19  ;;  %284 = vmatpush.msrb.mxu1 %v127_v20  ;;  %v375_v19 = vld [vmem:[%s787_s3] ss:$0 sm:$0xff] }
  0x31   :  { %245 = vmatmul.f32.gmra.mxu3 %v27_v21  ;;  %259 = vmatpush.msrb.mxu0 %v110_v22 }
  0x32   :  { %365 = vmatpush.msrb.mxu3 %v110_v22  ;;  %285 = vmatpush.msrb.mxu1 %v126_v23 }
  0x33   :  { %167 = vmatmul.f32.gmra.mxu0 %v24_v24  ;;  %193 = vmatmul.f32.gmra.mxu1 %v25_v25 }
  0x34   :  { %318 = vmatpush.msrb.mxu2 %v135_v26  ;;  %260 = vmatpush.msrb.mxu0 %v109_v27 }
  0x35   :  { %366 = vmatpush.msrb.mxu3 %v109_v27  ;;  %286 = vmatpush.msrb.mxu1 %v125_v28 }
  0x36   :  { %319 = vmatpush.msrb.mxu2 %v134_v29  ;;  %261 = vmatpush.msrb.mxu0 %v108_v30 }
  0x37   :  { %367 = vmatpush.msrb.mxu3 %v108_v30  ;;  %287 = vmatpush.msrb.mxu1 %v124_v31 }
  0x38   :  { %222 = vmatmul.f32.gmra.mxu2 %v33_v32  ;;  %262 = vmatpush.msrb.mxu0 %v107_v33 }
  0x39   :  { %368 = vmatpush.msrb.mxu3 %v107_v33  ;;  %288 = vmatpush.msrb.mxu1 %v123_v34 }
  0x3a   :  { %248 = vmatmul.f32.gmra.mxu3 %v34_v35  ;;  %263 = vmatpush.msrb.mxu0 %v106_v36 }
  0x3b   :  { %369 = vmatpush.msrb.mxu3 %v106_v36  ;;  %289 = vmatpush.msrb.mxu1 %v122_v37 }
  0x3c   :  { %170 = vmatmul.f32.gmra.mxu0 %v31_v38  ;;  %196 = vmatmul.f32.gmra.mxu1 %v32_v39 }
  0x3d   :  { %264 = vmatpush.msrb.mxu0 %v105_v40  ;;  %370 = vmatpush.msrb.mxu3 %v105_v40 }
  0x3e   :  { %290 = vmatpush.msrb.mxu1 %v121_v41 }
  0x3f   :  { %265 = vmatpush.msrb.mxu0 %v104_v42  ;;  %371 = vmatpush.msrb.mxu3 %v104_v42 }
  0x40   :  { %291 = vmatpush.msrb.mxu1 %v120_v43  ;;  %355 = vmatmul.msk.f32.vlgmr.msrb.gmra.mxu2 %vm138_vm0, %v23_v44 }
  0x41   :  { %266 = vmatpush.msrb.mxu0 %v103_v45  ;;  %372 = vmatpush.msrb.mxu3 %v103_v45 }
  0x42   :  { %292 = vmatpush.msrb.mxu1 %v119_v46 }
  0x43   :  { %267 = vmatpush.msrb.mxu0 %v102_v47  ;;  %373 = vmatpush.msrb.mxu3 %v102_v47 }
  0x44   :  { %293 = vmatpush.msrb.mxu1 %v118_v48  ;;  %268 = vmatmul.f32.vlgmr.msrb.gmra.mxu0 %v21_v49 }
  0x45   :  { %271 = vmatmul.f32.vlgmr.msrb.gmra.mxu3 %v28_v50  ;;  %294 = vmatmul.f32.vlgmr.msrb.gmra.mxu1 %v22_v51 }
  0x48   :  { %356 = vmatmul.msk.f32.gmra.mxu2 %vm138_vm0, %v30_v52 }
  0x4d   :  { %274 = vmatmul.f32.gmra.mxu3 %v35_v53  ;;  %297 = vmatmul.f32.gmra.mxu1 %v29_v54 }
  0x50   :  { %357 = vmatmul.msk.f32.gmra.mxu2 %vm138_vm0, %v37_v55 }
  0x55   :  { %300 = vmatmul.f32.gmra.mxu1 %v36_v56 }
  0xa5   :  { %v165_v57 = vpop.f32.mrf.mxu0 }
  0xa8   :  { %v191_v58 = vpop.f32.mrf.mxu1  ;;  %v217_v59 = vpop.f32.mrf.mxu2 }
  0xa9   :  { %v192_v1 = vadd.f32 %v191_v58, %v165_v57 }
  0xab   :  { %v218_v5 = vadd.f32 %v217_v59, %v192_v1 }
  0xac   :  { %v243_v60 = vpop.f32.mrf.mxu3 }
  0xad   :  { %v244_v8 = vadd.f32 %v243_v60, %v218_v5 }
  0xb0   :  { %v168_v61 = vpop.f32.mrf.mxu0  ;;  %v194_v62 = vpop.f32.mrf.mxu1 }
  0xb1   :  { %v195_v6 = vadd.f32 %v194_v62, %v168_v61 }
  0xb2   :  { %v220_v63 = vpop.f32.mrf.mxu2 }
  0xb3   :  { %v221_v10 = vadd.f32 %v220_v63, %v195_v6 }
  0xb4   :  { %v246_v0 = vpop.f32.mrf.mxu3 }
  0xb5   :  { %v247_v16 = vadd.f32 %v246_v0, %v221_v10 }
  0xb9   :  { %v171_v2 = vpop.f32.mrf.mxu0  ;;  %v197_v3 = vpop.f32.mrf.mxu1 }
  0xba   :  { %v198_v17 = vadd.f32 %v197_v3, %v171_v2 }
  0xbb   :  { %v223_v4 = vpop.f32.mrf.mxu2 }
  0xbc   :  { %v224_v23 = vadd.f32 %v223_v4, %v198_v17 }
  0xbd   :  { %v249_v7 = vpop.f32.mrf.mxu3 }
  0xbe   :  { %v250_v30 = vadd.f32 %v249_v7, %v224_v23 }
  0xc1   :  { %v269_v9 = vpop.f32.mrf.mxu0 }
  0xc2   :  { %v270_v11 = vadd.f32 %v269_v9, %v244_v8  ;;  %v295_v12 = vpop.f32.mrf.mxu1 }
  0xc3   :  { %v321_v13 = vpop.f32.mrf.mxu2 }
  0xc4   :  { %v296_v14 = vadd.f32 %v295_v12, %v270_v11 }
  0xc6   :  { %v322_v18 = vadd.f32 %v321_v13, %v296_v14 }
  0xc8   :  { %v272_v20 = vpop.f32.mrf.mxu3  ;;  %v334_v21 = vmul.f32 %v374_v15, %v322_v18 }
  0xc9   :  { %v273_v22 = vadd.f32 %v272_v20, %v247_v16 }
  0xca   :  { %v341_v24 = vadd.f32 %v375_v19, %v334_v21  ;;  %v298_v25 = vpop.f32.mrf.mxu1 }
  0xcb   :  { %v299_v26 = vadd.f32 %v298_v25, %v273_v22  ;;  %v324_v27 = vpop.f32.mrf.mxu2 }
  0xcc   :  { %v344_v28 = vmax.f32 %v341_v24, 0.0 }
  0xcd   :  { %v325_v29 = vadd.f32 %v324_v27, %v299_v26 }
  0xce   :  { %347 = vst.msk [vmem:[%s788_s4] sm:$0xff] %vm138_vm0, %v344_v28 }
  0xcf   :  { %v335_v31 = vmul.f32 %v374_v15, %v325_v29 }
  0xd0   :  { %v275_v32 = vpop.f32.mrf.mxu3 }
  0xd1   :  { %v276_v33 = vadd.f32 %v275_v32, %v250_v30  ;;  %v342_v34 = vadd.f32 %v375_v19, %v335_v31 }
  0xd2   :  { %v301_v35 = vpop.f32.mrf.mxu1 }
  0xd3   :  { %v345_v36 = vmax.f32 %v342_v34, 0.0  ;;  %v302_v37 = vadd.f32 %v301_v35, %v276_v33  ;;  %v327_v38 = vpop.f32.mrf.mxu2 }
  0xd5   :  { %348 = vst.msk [vmem:[%s788_s4 + $0x8] sm:$0xff] %vm138_vm0, %v345_v36  ;;  %v328_v39 = vadd.f32 %v327_v38, %v302_v37 }
  0xd7   :  { %v336_v40 = vmul.f32 %v374_v15, %v328_v39 }
  0xd9   :  { %v343_v41 = vadd.f32 %v375_v19, %v336_v40 }
  0xdb   :  { %v346_v42 = vmax.f32 %v343_v41, 0.0 }
  0xdd   :  { %350 = vst.msk [vmem:[%s788_s4 + $0x10] sm:$0xf] %vm349_vm1, %v346_v42 }

// kernel: transam_forward.9
= control target key start
LH: loop header
LB: loop body
LE: loop exit
PB: predicated region body
PF: predicated region fallthrough
CT: control target
= control target key end

     0   :  { %s345_s0 = inlined_call_operand.vmem [shape: f32[2,320], index: 0, kind: input, shape index: {}]   ;;  %s346_s1 = inlined_call_operand.vmem [shape: f32[320,4], index: 1, kind: input, shape index: {}]   ;;  %s347_s2 = inlined_call_operand.vmem [shape: f32[1,4], index: 2, kind: input, shape index: {}]   ;;  %s348_s3 = inlined_call_operand.vmem [shape: f32[1,4], index: 3, kind: input, shape index: {}]   ;;  %s349_s4 = inlined_call_operand.hbm [shape: f32[2,4], index: 4, kind: output, shape index: {}]  }
   0x1   :  { %v34_v0 = vld [vmem:[%s346_s1 + $0x78] sm:$0xff]  ;;  %v33_v2 = vld [vmem:[%s346_s1 + $0x70] sm:$0xff]  ;;  %v32_v4 = vld [vmem:[%s346_s1 + $0x68] sm:$0xff] }
   0x2   :  { %v50_v1 = vld [vmem:[%s346_s1 + $0xf8] sm:$0xff]  ;;  %69 = vmatpush.msra.mxu0 %v34_v0  ;;  %v49_v3 = vld [vmem:[%s346_s1 + $0xf0] sm:$0xff]  ;;  %v48_v5 = vld [vmem:[%s346_s1 + $0xe8] sm:$0xff] }
   0x3   :  { %89 = vmatpush.msra.mxu1 %v50_v1  ;;  %v31_v6 = vld [vmem:[%s346_s1 + $0x60] sm:$0xff]  ;;  %v58_v8 = vld [vmem:[%s346_s1 + $0x138] sm:$0xff]  ;;  %v57_v9 = vld [vmem:[%s346_s1 + $0x130] sm:$0xff] }
   0x4   :  { %70 = vmatpush.msra.mxu0 %v33_v2  ;;  %v47_v7 = vld [vmem:[%s346_s1 + $0xe0] sm:$0xff]  ;;  %v30_v10 = vld [vmem:[%s346_s1 + $0x58] sm:$0xff]  ;;  %117 = vmatpush.msra.mxu2 %v58_v8  ;;  %v56_v12 = vld [vmem:[%s346_s1 + $0x128] sm:$0xff] }
   0x5   :  { %90 = vmatpush.msra.mxu1 %v49_v3  ;;  %v46_v11 = vld [vmem:[%s346_s1 + $0xd8] sm:$0xff]  ;;  %v29_v13 = vld [vmem:[%s346_s1 + $0x50] sm:$0xff]  ;;  %v55_v15 = vld [vmem:[%s346_s1 + $0x120] sm:$0xff] }
   0x6   :  { %71 = vmatpush.msra.mxu0 %v32_v4  ;;  %v45_v14 = vld [vmem:[%s346_s1 + $0xd0] sm:$0xff]  ;;  %118 = vmatpush.msra.mxu2 %v57_v9  ;;  %v28_v16 = vld [vmem:[%s346_s1 + $0x48] sm:$0xff]  ;;  %v54_v18 = vld [vmem:[%s346_s1 + $0x118] sm:$0xff] }
   0x7   :  { %91 = vmatpush.msra.mxu1 %v48_v5  ;;  %v44_v17 = vld [vmem:[%s346_s1 + $0xc8] sm:$0xff]  ;;  %v27_v19 = vld [vmem:[%s346_s1 + $0x40] sm:$0xff]  ;;  %v26_v22 = vld [vmem:[%s346_s1 + $0x38] sm:$0xff] }
   0x8   :  { %72 = vmatpush.msra.mxu0 %v31_v6  ;;  %119 = vmatpush.msra.mxu2 %v56_v12  ;;  %v43_v20 = vld [vmem:[%s346_s1 + $0xc0] sm:$0xff]  ;;  %v53_v23 = vld [vmem:[%s346_s1 + $0x110] sm:$0xff]  ;;  %v42_v24 = vld [vmem:[%s346_s1 + $0xb8] sm:$0xff] }
   0x9   :  { %92 = vmatpush.msra.mxu1 %v47_v7  ;;  %v18_v21 = vld [vmem:[%s345_s0] sm:$0x3f] }
   0xa   :  { %73 = vmatpush.msra.mxu0 %v30_v10  ;;  %120 = vmatpush.msra.mxu2 %v55_v15  ;;  %60 = vst [vmem:[#allocation1] ss:$4 sm:$0xff] %v18_v21 }
   0xb   :  { %93 = vmatpush.msra.mxu1 %v46_v11 }
   0xc   :  { %74 = vmatpush.msra.mxu0 %v29_v13  ;;  %121 = vmatpush.msra.mxu2 %v54_v18 }
   0xd   :  { %94 = vmatpush.msra.mxu1 %v45_v14 }
   0xe   :  { %75 = vmatpush.msra.mxu0 %v28_v16 }
   0xf   :  { %95 = vmatpush.msra.mxu1 %v44_v17 }
  0x10   :  { %9 = vsyncpa [#allocation3], 0  ;;  %76 = vmatpush.msra.mxu0 %v27_v19  ;;  %v52_v25 = vld [vmem:[%s346_s1 + $0x108] sm:$0xff]  ;;  %v25_v26 = vld [vmem:[%s346_s1 + $0x30] sm:$0xff]  ;;  %122 = vmatpush.msra.mxu2 %v53_v23  ;;  %vm66_vm0 = vcmask 523264   ;;  %s148_s24 = sshll.u32 %s349_s4, 4  ;;  %s149_s24 = int_to_ptr.hbm [resolvable:$true] %s148_s24 }
  0x11   :  { %96 = vmatpush.msra.mxu1 %v43_v20  ;;  %v41_v27 = vld [vmem:[%s346_s1 + $0xb0] sm:$0xff]  ;;  %v51_v28 = vld [vmem:[%s346_s1 + $0x100] sm:$0xff]  ;;  %v24_v29 = vld [vmem:[%s346_s1 + $0x28] sm:$0xff]  ;;  %vm139_vm1 = vcmask 25600  }
  0x12   :  { %77 = vmatpush.msra.mxu0 %v26_v22  ;;  %v40_v30 = vld [vmem:[%s346_s1 + $0xa8] sm:$0xff]  ;;  %123 = vmatpush.msra.mxu2 %v52_v25  ;;  %v23_v31 = vld [vmem:[%s346_s1 + $0x20] sm:$0xff]  ;;  %v63_v33 = vld.sshfl [vmem:[#allocation1 + $0x10] sm:$0xff pattern:$0x73625140] }
  0x13   :  { %97 = vmatpush.msra.mxu1 %v42_v24  ;;  %v39_v32 = vld [vmem:[%s346_s1 + $0xa0] sm:$0xff]  ;;  %v22_v34 = vld [vmem:[%s346_s1 + $0x18] sm:$0xff]  ;;  %v21_v36 = vld [vmem:[%s346_s1 + $0x10] sm:$0xff] }
  0x14   :  { %78 = vmatpush.msra.mxu0 %v25_v26  ;;  %124 = vmatpush.msra.mxu2 %v51_v28  ;;  %v38_v35 = vld [vmem:[%s346_s1 + $0x98] sm:$0xff]  ;;  %v37_v37 = vld [vmem:[%s346_s1 + $0x90] sm:$0xff]  ;;  %v20_v38 = vld [vmem:[%s346_s1 + $0x8] sm:$0xff] }
  0x15   :  { %98 = vmatpush.msra.mxu1 %v41_v27  ;;  %157 = vmatmul.msk.f32.vlgmr.msra.gmra.mxu2 %vm66_vm0, %v63_v33  ;;  %v36_v39 = vld [vmem:[%s346_s1 + $0x88] sm:$0xff]  ;;  %v19_v40 = vld [vmem:[%s346_s1] sm:$0xff] }
  0x16   :  { %79 = vmatpush.msra.mxu0 %v24_v29  ;;  %v35_v41 = vld [vmem:[%s346_s1 + $0x80] sm:$0xff]  ;;  %v62_v43 = vld.sshfl [vmem:[#allocation1 + $0x8] sm:$0xff pattern:$0x73625140]  ;;  %s187_s1 = smov [#allocation2]  }
  0x17   :  { %99 = vmatpush.msra.mxu1 %v40_v30  ;;  %v61_v42 = vld.sshfl [vmem:[#allocation1] sm:$0xff pattern:$0x73625140]  ;;  %s146_s21 = sshll.u32 %s187_s1, 4  ;;  %s147_s21 = int_to_ptr.vmem [resolvable:$true] %s146_s21 }
  0x18   :  { %80 = vmatpush.msra.mxu0 %v23_v31  ;;  %v159_v48 = vld [vmem:[%s347_s2] ss:$0 sm:$0xff] }
  0x19   :  { %100 = vmatpush.msra.mxu1 %v39_v32  ;;  %v160_v50 = vld [vmem:[%s348_s3] ss:$0 sm:$0xff] }
  0x1a   :  { %81 = vmatpush.msra.mxu0 %v22_v34 }
  0x1b   :  { %101 = vmatpush.msra.mxu1 %v38_v35 }
  0x1c   :  { %82 = vmatpush.msra.mxu0 %v21_v36 }
  0x1d   :  { %102 = vmatpush.msra.mxu1 %v37_v37 }
  0x1e   :  { %83 = vmatpush.msra.mxu0 %v20_v38 }
  0x1f   :  { %103 = vmatpush.msra.mxu1 %v36_v39 }
  0x20   :  { %84 = vmatpush.msra.mxu0 %v19_v40 }
  0x21   :  { %104 = vmatpush.msra.mxu1 %v35_v41  ;;  %85 = vmatmul.f32.vlgmr.msra.gmra.mxu0 %v61_v42 }
  0x22   :  { %105 = vmatmul.f32.vlgmr.msra.gmra.mxu1 %v62_v43 }
  0x98   :  { %v126_v44 = vpop.f32.mrf.mxu2 }
  0x9e   :  { %v86_v45 = vpop.f32.mrf.mxu0 }
  0x9f   :  { %v106_v46 = vpop.f32.mrf.mxu1 }
  0xa0   :  { %v107_v47 = vadd.f32 %v106_v46, %v86_v45 }
  0xa2   :  { %v127_v49 = vadd.f32 %v126_v44, %v107_v47 }
  0xa4   :  { %v133_v51 = vmul.f32 %v159_v48, %v127_v49 }
  0xa6   :  { %v138_v52 = vadd.f32 %v160_v50, %v133_v51 }
  0xa8   :  { %140 = vst.msk [vmem:[#allocation2] sm:$0x3] %vm139_vm1, %v138_v52 }
  0xa9   :  { %151 = dma.vmem_to_hbm [thread:$0]  %s147_s21, 32, %s149_s24, [#allocation3]  }
  0xaa   :  { %185 = dma.done.wait [#allocation3], 32  }
  0xab   :  { %186 = vsyncadd [#allocation3], 4294967264 }
  0xac   :  { %156 = vsyncpa [#allocation3], 1 }

// kernel: transam_forward.8
= control target key start
LH: loop header
LB: loop body
LE: loop exit
PB: predicated region body
PF: predicated region fallthrough
CT: control target
= control target key end

     0   :  { %s5086_s21 = smov 0   ;;  %s5980_s0 = inlined_call_operand.vmem [shape: f32[20,32], index: 0, kind: input, shape index: {}]   ;;  %s5981_s1 = inlined_call_operand.vmem [shape: f32[32,32], index: 1, kind: input, shape index: {}]   ;;  %s5982_s2 = inlined_call_operand.vmem [shape: f32[1,32], index: 2, kind: input, shape index: {}]   ;;  %s5983_s3 = inlined_call_operand.vmem [shape: f32[10,10], index: 3, kind: input, shape index: {}]   ;;  %s5984_s4 = inlined_call_operand.vmem [shape: f32[4,32,96], index: 4, kind: input, shape index: {}]   ;;  %s5985_s5 = inlined_call_operand.vmem [shape: f32[4,1,96], index: 5, kind: input, shape index: {}]   ;;  %s5986_s6 = inlined_call_operand.vmem [shape: f32[4,32,32], index: 6, kind: input, shape index: {}]   ;;  %s5987_s7 = inlined_call_operand.vmem [shape: f32[4,1,32], index: 7, kind: input, shape index: {}]   ;;  %s5988_s8 = inlined_call_operand.vmem [shape: f32[4,1,32], index: 8, kind: input, shape index: {}]   ;;  %s5989_s9 = inlined_call_operand.vmem [shape: f32[4,1,32], index: 9, kind: input, shape index: {}]   ;;  %s5990_s10 = inlined_call_operand.vmem [shape: f32[4,1,32], index: 10, kind: input, shape index: {}]   ;;  %s5991_s11 = inlined_call_operand.vmem [shape: f32[4,1,32], index: 11, kind: input, shape index: {}]   ;;  %s5992_s12 = inlined_call_operand.vmem [shape: bf16[4,32,2048], index: 12, kind: input, shape index: {}]   ;;  %s5993_s13 = inlined_call_operand.vmem [shape: f32[4,1,2048], index: 13, kind: input, shape index: {}]   ;;  %s5994_s14 = inlined_call_operand.vmem [shape: bf16[4,2048,32], index: 14, kind: input, shape index: {}]   ;;  %s5995_s15 = inlined_call_operand.vmem [shape: f32[4,1,32], index: 15, kind: input, shape index: {}]   ;;  %s5996_s16 = inlined_call_operand.vmem [shape: f32[20,32], index: 16, kind: output, shape index: {}]  }
   0x1   :  { %6001 = sst [smem:[#allocation5_spill]] %s5980_s0 }
   0x2   :  { %6002 = sst [smem:[#allocation6_spill]] %s5982_s2 }
   0x3   :  { %6003 = sst [smem:[#allocation7_spill]] %s5983_s3 }
   0x4   :  { %6004 = sst [smem:[#allocation8_spill]] %s5984_s4 }
   0x5   :  { %6005 = sst [smem:[#allocation9_spill]] %s5985_s5 }
   0x6   :  { %6006 = sst [smem:[#allocation10_spill]] %s5986_s6 }
   0x7   :  { %6007 = sst [smem:[#allocation11_spill]] %s5996_s16 }
   0x8 LB: > { %6008 = sst [smem:[#allocation4_spill]] %s4984_s21  ;;  %s3931_s22 = sadd.s32 4294967295, %s4984_s21   ;;  %s4984_s21 = sphi %s5086_s21, %s26_s21  }
   0x9   : > { %p3934_p0 = scmp.ge.s32.totalorder %s4984_s21, 1  ;;  %p552_p1 = scmp.lt.s32.totalorder %s4984_s21, 5 }
   0xb   : > { %p553_p2 = pnand %p3934_p0, %p552_p1 }
   0xc   : > { %p637_p3 = scmp.lt.s32.totalorder (!%p553_p2), %s3931_s22, 3  ;;  %s6010_s4 = sld [smem:[#allocation8_spill]] (!%p553_p2) }
   0xd   : > { %556 = sbr.rel (%p553_p2) target bundleno = 2272 (0x8e0), region = 84  ;;  %s6011_s6 = sld [smem:[#allocation10_spill]] (!%p553_p2) }
   0xe   : > { %p3944_p4 = scmp.ne.s32.totalorder (!%p553_p2), %s3931_s22, 0 }
  0x12   : > { %s5094_s23 = scalar_select %p637_p3, %s3931_s22, 3 }
  0x13   : > { %s6012_s5 = sld [smem:[#allocation5_spill]] (!%p3944_p4) }
  0x14   : > { %s4684_s24 = sshll.u32 %s5094_s23, 5  ;;  %s652_s21 = scalar_lea.vmem %s5987_s7, %s5094_s23 }
  0x15   : > { %s5104_s30 = scalar_lea.vmem %s6010_s4, %s4684_s24  ;;  %s5109_s18 = scalar_lea.vmem %s6011_s6, %s4684_s24 }
  0x16   : > { %s661_s4 = scalar_lea.vmem %s5990_s10, %s5094_s23  ;;  %s4686_s17 = sshll.u32 %s5094_s23, 8 }
  0x17   : > { %s5135_s20 = scalar_lea.vmem %s5992_s12, %s4686_s17  ;;  %s3941_s3 = sshll.u32 %s5094_s23, 4 }
  0x18   : > { %s5141_s25 = scalar_lea.vmem %s5993_s13, %s3941_s3  ;;  %s4687_s26 = sshll.u32 %s5094_s23, 10 }
  0x19   : > { %s5147_s29 = scalar_lea.vmem %s5994_s14, %s4687_s26  ;;  %s681_s24 = scalar_lea.vmem %s5995_s15, %s5094_s23 }
  0x1a   : > { %686 = sbr.rel (%p3944_p4) target bundleno = 174 (0xae), region = 88  ;;  %s6013_s27 = sld [smem:[#allocation6_spill]] (!%p3944_p4) }
  0x1f   : > { %v693_v0 = vld [vmem:[%s5981_s1 + $0x18] sm:$0xff]  ;;  %v692_v1 = vld [vmem:[%s5981_s1 + $0x10] sm:$0xff]  ;;  %v691_v2 = vld [vmem:[%s5981_s1 + $0x8] sm:$0xff]  ;;  %vm698_vm0 = vcmask 261120   ;;  %vm736_vm1 = vcmask 257024  }
  0x20   : > { %4849 = vmatpush.msra.mxu2 %v693_v0  ;;  %720 = vmatpush.msra.mxu0 %v693_v0  ;;  %v690_v3 = vld [vmem:[%s5981_s1] sm:$0xff]  ;;  %v689_v4 = vld [vmem:[%s6012_s5 + $0x10] sm:$0xf]  ;;  %v688_v6 = vld [vmem:[%s6012_s5 + $0x8] sm:$0xff] }
  0x21   : > { %4848 = vmatpush.msra.mxu1 %v693_v0  ;;  %v687_v5 = vld [vmem:[%s6012_s5] sm:$0xff] }
  0x22   : > { %4851 = vmatpush.msra.mxu2 %v692_v1  ;;  %721 = vmatpush.msra.mxu0 %v692_v1  ;;  %v4879_v7 = vld [vmem:[%s6013_s27] ss:$0 sm:$0xff] }
  0x23   : > { %4850 = vmatpush.msra.mxu1 %v692_v1 }
  0x24   : > { %4853 = vmatpush.msra.mxu2 %v691_v2  ;;  %722 = vmatpush.msra.mxu0 %v691_v2 }
  0x25   : > { %4852 = vmatpush.msra.mxu1 %v691_v2 }
  0x26   : > { %4855 = vmatpush.msra.mxu2 %v690_v3  ;;  %723 = vmatpush.msra.mxu0 %v690_v3 }
  0x27   : > { %3947 = vmatmul.msk.f32.vlgmr.msra.gmra.mxu2 %vm698_vm0, %v689_v4  ;;  %4854 = vmatpush.msra.mxu1 %v690_v3 }
  0x28   : > { %3945 = vmatmul.msk.f32.vlgmr.msra.gmra.mxu0 %vm698_vm0, %v687_v5  ;;  %3946 = vmatmul.msk.f32.vlgmr.msra.gmra.mxu1 %vm698_vm0, %v688_v6 }
  0xa5   : > { %v725_v8 = vpop.f32.mrf.mxu0  ;;  %v728_v9 = vpop.f32.mrf.mxu1 }
  0xa6   : > { %v726_v10 = vadd.f32 %v4879_v7, %v725_v8  ;;  %v729_v11 = vadd.f32 %v4879_v7, %v728_v9 }
  0xa8   : > { %734 = vst.msk [vmem:[#allocation2] sm:$0xff] %vm698_vm0, %v726_v10 }
  0xa9   : > { %735 = vst.msk [vmem:[#allocation2 + $0x8] sm:$0xff] %vm698_vm0, %v729_v11 }
  0xaa   : > { %v731_v12 = vpop.f32.mrf.mxu2 }
  0xab   : > { %v732_v13 = vadd.f32 %v4879_v7, %v731_v12 }
  0xad   : > { %737 = vst.msk [vmem:[#allocation2 + $0x10] sm:$0xf] %vm736_vm1, %v732_v13 }
  0xae PF: > { %v744_v14 = vld [vmem:[%s5104_s30 + $0x18] sm:$0xff]  ;;  %v743_v15 = vld [vmem:[%s5104_s30 + $0x10] sm:$0xff]  ;;  %v742_v16 = vld [vmem:[%s5104_s30 + $0x8] sm:$0xff]  ;;  %vm749_vm2 = vcmask 261120   ;;  %s6014_s26 = sld [smem:[#allocation9_spill]]  ;;  %s4987_s0 = smov 88  }
  0xaf   : > { %771 = vmatpush.msra.mxu0 %v744_v14  ;;  %v741_v17 = vld [vmem:[%s5104_s30] sm:$0xff]  ;;  %s4986_s30 = smov 120   ;;  %s4988_s6 = smov 96   ;;  %vm1222_vm3 = vcmask 1045504   ;;  %vm796_vm4 = vcmask 64512   ;;  %vm865_vm5 = vcmask 1041408  }
  0xb0   : > { %v738_v18 = vld [vmem:[#allocation2] sm:$0xff]  ;;  %v739_v19 = vld [vmem:[#allocation2 + $0x8] sm:$0xff]  ;;  %s4989_s17 = smov 80   ;;  %s4990_s19 = smov 72   ;;  %vm830_vm6 = vcmask 80896   ;;  %vm834_vm7 = vcmask 74752  }
  0xb1   : > { %772 = vmatpush.msra.mxu0 %v743_v15  ;;  %s4991_s2 = smov 104   ;;  %s4992_s3 = smov 112   ;;  %vm892_vm8 = vcmask 58368   ;;  %vm999_vm9 = vcmask 130112   ;;  %vm1108_vm10 = vcmask 195712   ;;  %vm1001_vm11 = vcmask 123968  }
  0xb2   : > { %s4993_s27 = smov 48   ;;  %s4994_s16 = smov 64   ;;  %vm1110_vm12 = vcmask 189568   ;;  %vm1219_vm13 = vcmask 255168   ;;  %vm1217_vm14 = vcmask 261312   ;;  %vm1701_vm15 = vcmask 257024  }
  0xb3   : > { %773 = vmatpush.msra.mxu0 %v742_v16  ;;  %s4995_s22 = smov 40  }
  0xb4   : > { %v740_v20 = vld [vmem:[#allocation2 + $0x10] sm:$0xf]  ;;  %s6015_s28 = scalar_lea.vmem %s6014_s26, %s5094_s23  ;;  %s4996_s26 = smov 56  }
  0xb5   : > { %774 = vmatpush.msra.mxu0 %v741_v17  ;;  %v4890_v21 = vld [vmem:[%s6015_s28] ss:$0 sm:$0xff] }
  0xb6   : > { %3948 = vmatmul.msk.f32.vlgmr.msra.gmra.mxu0 %vm749_vm2, %v738_v18 }
  0xbe   : > { %3949 = vmatmul.msk.f32.gmra.mxu0 %vm749_vm2, %v739_v19 }
  0xc6   : > { %3950 = vmatmul.msk.f32.gmra.mxu0 %vm749_vm2, %v740_v20 }
 0x133   : > { %v776_v22 = vpop.f32.mrf.mxu0 }
 0x134   : > { %v5194_v23 = vadd.f32 %v4890_v21, %v776_v22 }
 0x136   : > { %v5197_v24 = vmul.f32 0.35355338, %v5194_v23 }
 0x138   : > { %894 = vrot.lane.b32.xlu2 %v5197_v24, %s4986_s30 }
 0x13b   : > { %v779_v25 = vpop.f32.mrf.mxu0 }
 0x13c   : > { %v780_v26 = vadd.f32 %v4890_v21, %v779_v25 }
 0x13e   : > { %900 = vrot.lane.b32.xlu1 %v780_v26, %s4987_s0  ;;  %794 = vrot.lane.b32.xlu0 %v780_v26, %s4988_s6  ;;  %v5201_v27 = vmul.f32 0.35355338, %v780_v26  ;;  %v1227_v31 = vrot.slane %v780_v26, 2 }
 0x140   : > { %896 = vrot.lane.b32.xlu2 %v5201_v27, %s4986_s30  ;;  %v1223_v35 = vrot.slane %v5201_v27, 2 }
 0x143   : > { %v782_v28 = vpop.f32.mrf.mxu0 }
 0x144   : > { %v783_v29 = vadd.f32 %v4890_v21, %v782_v28 }
 0x146   : > { %898 = vrot.lane.b32.xlu1 %v5194_v23, %s4987_s0  ;;  %792 = vrot.lane.b32.xlu0 %v5194_v23, %s4988_s6  ;;  %v5212_v30 = vrot.slane %v783_v29, 2  ;;  %v787_v33 = vmul.f32 0.35355338, %v783_v29 }
 0x148   : > { %1007 = vrot.lane.b32.xlu2 %v5194_v23, %s4989_s17  ;;  %v5221_v32 = vsel %vm1222_vm3, %v1227_v31, %v5212_v30  ;;  %v5228_v34 = vrot.slane %v787_v33, 2 }
 0x149   : > { %v4880_v37 = vpack.i.bf16 %v5221_v32, %v5194_v23 }
 0x14a   : > { %v5232_v36 = vsel %vm1222_vm3, %v1223_v35, %v5228_v34 }
 0x14e   : > { %1118 = vrot.lane.b32.xlu1 %v780_v26, %s4990_s19  ;;  %1009 = vrot.lane.b32.xlu0 %v780_v26, %s4989_s17 }
 0x150   : > { %1112 = vrot.lane.b32.xlu2 %v5197_v24, %s4991_s2 }
 0x156   : > { %1116 = vrot.lane.b32.xlu0 %v5194_v23, %s4990_s19  ;;  %1003 = vrot.lane.b32.xlu1 %v5197_v24, %s4992_s3 }
 0x158   : > { %1232 = vrot.lane.b32.xlu2 %v5212_v30, %s4988_s6 }
 0x15e   : > { %1005 = vrot.lane.b32.xlu0 %v5201_v27, %s4992_s3  ;;  %1114 = vrot.lane.b32.xlu1 %v5201_v27, %s4991_s2 }
 0x160   : > { %1329 = vrot.lane.b32.xlu2 %v5221_v32, %s4987_s0 }
 0x166   : > { %1331 = vrot.lane.b32.xlu0 %v5212_v30, %s4987_s0  ;;  %1230 = vrot.lane.b32.xlu1 %v5221_v32, %s4988_s6  ;;  %s6016_s0 = sld [smem:[#allocation7_spill]] }
 0x168   : > { %1438 = vrot.lane.b32.xlu2 %v5212_v30, %s4989_s17 }
 0x16c   : > { %v788_v10 = vld [vmem:[%s6016_s0] sm:$0xff]  ;;  %v789_v18 = vld [vmem:[%s6016_s0 + $0x8] sm:$0x3] }
 0x16e   : > { %1325 = vrot.lane.b32.xlu0 %v5232_v36, %s4986_s30  ;;  %1327 = vrot.lane.b32.xlu1 %v5228_v34, %s4986_s30  ;;  %s6020_s30 = scalar_lea.vmem %s5989_s9, %s5094_s23 }
 0x170   : > { %1543 = vrot.lane.b32.xlu2 %v5221_v32, %s4990_s19 }
 0x176   : > { %1545 = vrot.lane.b32.xlu0 %v5212_v30, %s4990_s19  ;;  %1436 = vrot.lane.b32.xlu1 %v5221_v32, %s4989_s17  ;;  %s4997_s19 = smov 16  }
 0x178   : > { %1434 = vrot.lane.b32.xlu2 %v5228_v34, %s4992_s3 }
 0x17e   : > { %1432 = vrot.lane.b32.xlu0 %v5232_v36, %s4992_s3  ;;  %1539 = vrot.lane.b32.xlu1 %v5232_v36, %s4991_s2  ;;  %s4999_s3 = smov 24  }
 0x180   : > { %1066 = vrot.lane.b32.xlu2 %v780_v26, %s4993_s27 }
 0x186   : > { %1541 = vrot.lane.b32.xlu0 %v5228_v34, %s4991_s2  ;;  %856 = vrot.lane.b32.xlu1 %v780_v26, %s4994_s16  ;;  %s4998_s2 = smov 8  }
 0x18e   : > { %4881 = vrot.lane.b32.xlu0 %v4880_v37, %s4994_s16  ;;  %1175 = vrot.lane.b32.xlu1 %v780_v26, %s4995_s22 }
 0x192   : > { %v895_v38 = vpop.permute.xlu2 %894 }
 0x196   : > { %957 = vrot.lane.b32.xlu0 %v780_v26, %s4996_s26 }
 0x19a   : > { %v897_v39 = vpop.permute.xlu2 %896 }
 0x19e   : > { %4886 = vrot.lane.b32.xlu0 %v4880_v37, %s4996_s26 }
 0x1a2   : > { %v1008_v40 = vpop.permute.xlu2 %1007 }
 0x1aa   : > { %v1113_v41 = vpop.permute.xlu2 %1112 }
 0x1b0   : > { %v901_v42 = vpop.permute.xlu1 %900  ;;  %v795_v43 = vpop.permute.xlu0 %794 }
 0x1b1   : > { %3951 = vmatpush.xpose.msk.msra.mxu3 %vm796_vm4, %v795_v43 }
 0x1b2   : > { %v1233_v44 = vpop.permute.xlu2 %1232 }
 0x1b8   : > { %v899_v45 = vpop.permute.xlu1 %898  ;;  %v793_v46 = vpop.permute.xlu0 %792 }
 0x1b9   : > { %3952 = vmatpush.xpose.msk.msra.mxu3 %vm796_vm4, %v793_v46 }
 0x1ba   : > { %v1330_v47 = vpop.permute.xlu2 %1329 }
 0x1bc   : > { %3953 = vmatmul.msk.f32.vlgmr.msra.gmra.mxu3 %vm796_vm4, %v5197_v24 }
 0x1bd   : > { %3958 = vmatpush.xpose.msk.msrb.mxu3 %vm796_vm4, %v901_v42 }
 0x1c0   : > { %v1119_v48 = vpop.permute.xlu1 %1118  ;;  %v1010_v49 = vpop.permute.xlu0 %1009 }
 0x1c1   : > { %3959 = vmatpush.xpose.msk.msrb.mxu3 %vm796_vm4, %v899_v45  ;;  %3965 = vmatpush.xpose.msk.msra.mxu1 %vm796_vm4, %v1010_v49 }
 0x1c2   : > { %3972 = vmatpush.xpose.msk.msrb.mxu0 %vm796_vm4, %v1119_v48  ;;  %v1439_v50 = vpop.permute.xlu2 %1438 }
 0x1c4   : > { %3954 = vmatmul.msk.f32.gmra.mxu3 %vm796_vm4, %v5201_v27 }
 0x1c5   : > { %3966 = vmatpush.xpose.msk.msra.mxu1 %vm796_vm4, %v1008_v40 }
 0x1c8   : > { %v1117_v51 = vpop.permute.xlu0 %1116  ;;  %v1004_v52 = vpop.permute.xlu1 %1003 }
 0x1c9   : > { %3979 = vmatpush.xpose.msk.msrb.mxu1 %vm796_vm4, %v1233_v44  ;;  %3973 = vmatpush.xpose.msk.msrb.mxu0 %vm796_vm4, %v1117_v51 }
 0x1ca   : > { %3967 = vmatmul.msk.f32.vlgmr.msra.gmra.mxu1 %vm796_vm4, %v1004_v52  ;;  %v1544_v53 = vpop.permute.xlu2 %1543 }
 0x1cc   : > { %3960 = vmatmul.msk.f32.vlgmr.msrb.gmra.mxu3 %vm796_vm4, %v895_v38  ;;  %3974 = vmatmul.msk.f32.vlgmr.msrb.gmra.mxu0 %vm796_vm4, %v1113_v41 }
 0x1d0   : > { %v1006_v54 = vpop.permute.xlu0 %1005  ;;  %v1115_v55 = vpop.permute.xlu1 %1114 }
 0x1d2   : > { %3968 = vmatmul.msk.f32.gmra.mxu1 %vm796_vm4, %v1006_v54  ;;  %v1435_v56 = vpop.permute.xlu2 %1434 }
 0x1d4   : > { %3961 = vmatmul.msk.f32.gmra.mxu3 %vm796_vm4, %v897_v39  ;;  %3975 = vmatmul.msk.f32.gmra.mxu0 %vm796_vm4, %v1115_v55 }
 0x1d8   : > { %v1332_v57 = vpop.permute.xlu0 %1331  ;;  %v1231_v58 = vpop.permute.xlu1 %1230 }
 0x1d9   : > { %3980 = vmatpush.xpose.msk.msrb.mxu1 %vm796_vm4, %v1231_v58  ;;  %3986 = vmatpush.xpose.msk.msra.mxu0 %vm796_vm4, %v1332_v57 }
 0x1da   : > { %v1067_v59 = vpop.permute.xlu2 %1066 }
 0x1db   : > { %3969 = vmatpush.msk.msra.mxu3 %vm865_vm5, %v1067_v59 }
 0x1dc   : > { %3981 = vmatmul.msk.f32.vlgmr.msrb.gmra.mxu1 %vm796_vm4, %v5232_v36 }
 0x1dd   : > { %3993 = vmatpush.xpose.msk.msra.mxu1 %vm796_vm4, %v1439_v50  ;;  %3987 = vmatpush.xpose.msk.msra.mxu0 %vm796_vm4, %v1330_v47 }
 0x1e0   : > { %v1326_v60 = vpop.permute.xlu0 %1325  ;;  %v1328_v61 = vpop.permute.xlu1 %1327 }
 0x1e1   : > { %3988 = vmatmul.msk.f32.vlgmr.msra.gmra.mxu0 %vm796_vm4, %v1326_v60 }
 0x1e4   : > { %3982 = vmatmul.msk.f32.gmra.mxu1 %vm796_vm4, %v5228_v34 }
 0x1e8   : > { %v1546_v62 = vpop.permute.xlu0 %1545  ;;  %v1437_v63 = vpop.permute.xlu1 %1436 }
 0x1e9   : > { %3989 = vmatmul.msk.f32.gmra.mxu0 %vm796_vm4, %v1328_v61  ;;  %3994 = vmatpush.xpose.msk.msra.mxu1 %vm796_vm4, %v1437_v63 }
 0x1ea   : > { %4000 = vmatpush.xpose.msk.msrb.mxu0 %vm796_vm4, %v1546_v62 }
 0x1ee   : > { %4001 = vmatpush.xpose.msk.msrb.mxu0 %vm796_vm4, %v1544_v53 }
 0x1f0   : > { %v1433_v0 = vpop.permute.xlu0 %1432  ;;  %v1540_v1 = vpop.permute.xlu1 %1539 }
 0x1f1   : > { %3995 = vmatmul.msk.f32.vlgmr.msra.gmra.mxu1 %vm796_vm4, %v1433_v0  ;;  %4002 = vmatmul.msk.f32.vlgmr.msrb.gmra.mxu0 %vm796_vm4, %v1540_v1 }
 0x1f8   : > { %v1542_v2 = vpop.permute.xlu0 %1541  ;;  %v857_v3 = vpop.permute.xlu1 %856 }
 0x1f9   : > { %3955 = vmatpush.msk.msra.mxu2 %vm865_vm5, %v857_v3  ;;  %3996 = vmatmul.msk.f32.gmra.mxu1 %vm796_vm4, %v1435_v56 }
 0x1fa   : > { %4003 = vmatmul.msk.f32.gmra.mxu0 %vm796_vm4, %v1542_v2 }
 0x200   : > { %v5294_v4 = vpop.permute.xlu0 %4881 }
 0x201   : > { %v4883_v5 = vunpack.i.l.bf16 %v5294_v4 }
 0x203   : > { %883 = vmatpush.msra.mxu2 %v4883_v5 }
 0x208   : > { %v958_v6 = vpop.permute.xlu0 %957 }
 0x209   : > { %3962 = vmatpush.msk.msrb.mxu2 %vm865_vm5, %v958_v6 }
 0x210   : > { %v5298_v7 = vpop.permute.xlu0 %4886 }
 0x211   : > { %v4888_v8 = vunpack.i.l.bf16 %v5298_v7 }
 0x213   : > { %983 = vmatpush.msrb.mxu2 %v4888_v8 }
 0x23f   : > { %v824_v9 = vpop.f32.mrf.mxu3 }
 0x240   : > { %v5312_v17 = vadd.f32 %v824_v9, %v788_v10 }
 0x242   : > { %v831_v25 = vsel %vm830_vm6, %v5312_v17, -inf }
 0x247   : > { %v1036_v11 = vpop.f32.mrf.mxu1  ;;  %v827_v19 = vpop.f32.mrf.mxu3 }
 0x248   : > { %v5304_v12 = vadd.f32 %v1036_v11, %v788_v10  ;;  %v5319_v22 = vadd.f32 %v827_v19, %v789_v18 }
 0x249   : > { %v1145_v13 = vpop.f32.mrf.mxu0 }
 0x24a   : > { %v1042_v14 = vsel %vm830_vm6, %v5304_v12, -inf  ;;  %v5308_v15 = vadd.f32 %v1145_v13, %v788_v10  ;;  %v835_v27 = vsel %vm834_vm7, %v5319_v22, -inf }
 0x24b   : > { %1043 = vmax.xlane.f32.xlu1 %v1042_v14 }
 0x24c   : > { %v1151_v16 = vsel %vm830_vm6, %v5308_v15, -inf }
 0x24d   : > { %1152 = vmax.xlane.f32.xlu2 %v1151_v16 }
 0x24f   : > { %v1039_v20 = vpop.f32.mrf.mxu1  ;;  %v927_v34 = vpop.f32.mrf.mxu3 }
 0x250   : > { %v5317_v21 = vadd.f32 %v1039_v20, %v789_v18  ;;  %v5343_v42 = vadd.f32 %v927_v34, %v788_v10 }
 0x251   : > { %v1148_v26 = vpop.f32.mrf.mxu0 }
 0x252   : > { %v1045_v24 = vsel %vm834_vm7, %v5317_v21, -inf  ;;  %v5327_v28 = vadd.f32 %v1148_v26, %v789_v18  ;;  %v933_v45 = vsel %vm830_vm6, %v5343_v42, -inf }
 0x253   : > { %1046 = vmax.xlane.f32.xlu0 %v1045_v24  ;;  %832 = vmax.xlane.f32.xlu1 %v831_v25 }
 0x254   : > { %v1154_v31 = vsel %vm834_vm7, %v5327_v28, -inf }
 0x255   : > { %836 = vmax.xlane.f32.xlu2 %v835_v27 }
 0x257   : > { %v930_v43 = vpop.f32.mrf.mxu3 }
 0x258   : > { %v5345_v44 = vadd.f32 %v930_v43, %v789_v18 }
 0x259   : > { %v1259_v29 = vpop.f32.mrf.mxu1 }
 0x25a   : > { %v5331_v33 = vadd.f32 %v1259_v29, %v788_v10  ;;  %v936_v47 = vsel %vm834_vm7, %v5345_v44, -inf }
 0x25b   : > { %1155 = vmax.xlane.f32.xlu1 %v1154_v31 }
 0x25c   : > { %v1265_v35 = vsel %vm830_vm6, %v5331_v33, -inf }
 0x25d   : > { %1266 = vmax.xlane.f32.xlu2 %v1265_v35 }
 0x25e   : > { %v1358_v36 = vpop.f32.mrf.mxu0 }
 0x25f   : > { %v5335_v37 = vadd.f32 %v1358_v36, %v788_v10 }
 0x261   : > { %v1262_v38 = vpop.f32.mrf.mxu1  ;;  %v1364_v39 = vsel %vm830_vm6, %v5335_v37, -inf }
 0x262   : > { %v5339_v40 = vadd.f32 %v1262_v38, %v789_v18  ;;  %1365 = vmax.xlane.f32.xlu0 %v1364_v39 }
 0x264   : > { %v1268_v41 = vsel %vm834_vm7, %v5339_v40, -inf }
 0x265   : > { %1269 = vmax.xlane.f32.xlu2 %v1268_v41 }
 0x266   : > { %v1361_v46 = vpop.f32.mrf.mxu0 }
 0x267   : > { %v5367_v57 = vadd.f32 %v1361_v46, %v789_v18 }
 0x269   : > { %v1367_v58 = vsel %vm834_vm7, %v5367_v57, -inf }
 0x26a   : > { %934 = vmax.xlane.f32.xlu0 %v933_v45 }
 0x26d   : > { %937 = vmax.xlane.f32.xlu2 %v936_v47 }
 0x26e   : > { %v1465_v48 = vpop.f32.mrf.mxu1  ;;  %v1572_v51 = vpop.f32.mrf.mxu0 }
 0x26f   : > { %v5351_v49 = vadd.f32 %v1465_v48, %v788_v10  ;;  %v5357_v52 = vadd.f32 %v1572_v51, %v788_v10 }
 0x271   : > { %v1471_v50 = vsel %vm830_vm6, %v5351_v49, -inf  ;;  %v1578_v53 = vsel %vm830_vm6, %v5357_v52, -inf }
 0x274   : > { %1173 = vrot.lane.b32.xlu1 %v5194_v23, %s4995_s22 }
 0x275   : > { %1472 = vmax.xlane.f32.xlu2 %v1471_v50 }
 0x276   : > { %v1468_v54 = vpop.f32.mrf.mxu1 }
 0x277   : > { %v5363_v55 = vadd.f32 %v1468_v54, %v789_v18  ;;  %v1575_v59 = vpop.f32.mrf.mxu0 }
 0x278   : > { %v5371_v60 = vadd.f32 %v1575_v59, %v789_v18 }
 0x279   : > { %v1474_v56 = vsel %vm834_vm7, %v5363_v55, -inf }
 0x27a   : > { %v1581_v61 = vsel %vm834_vm7, %v5371_v60, -inf }
 0x27d   : > { %1579 = vmax.xlane.f32.xlu2 %v1578_v53 }
 0x27e   : > { %1064 = vrot.lane.b32.xlu0 %v5194_v23, %s4993_s27  ;;  %v5375_v23 = vpop.permute.xlu1 %1175 }
 0x285   : > { %1475 = vmax.xlane.f32.xlu2 %v1474_v56 }
 0x2a8   : > { %1368 = vmax.xlane.f32.xlu0 %v1367_v58 }
 0x2b0   : > { %1582 = vmax.xlane.f32.xlu0 %v1581_v61 }
 0x2be   : > { %v1044_v62 = vpop.xlane.xlu1 %1043 }
 0x2bf   : > { %v1048_v63 = vsub.f32 %v5304_v12, %v1044_v62 }
 0x2c0   : > { %v1153_v1 = vpop.xlane.xlu2 %1152 }
 0x2c1   : > { %v1050_v0 = vmul.f32 1.442695, %v1048_v63  ;;  %v1157_v2 = vsub.f32 %v5308_v15, %v1153_v1 }
 0x2c3   : > { %4897 = vpow2.f32 %v1050_v0  ;;  %v1159_v3 = vmul.f32 1.442695, %v1157_v2 }
 0x2c5   : > { %4899 = vpow2.f32 %v1159_v3 }
 0x2c6   : > { %v833_v5 = vpop.xlane.xlu1 %832  ;;  %v1047_v6 = vpop.xlane.xlu0 %1046 }
 0x2c7   : > { %v838_v8 = vsub.f32 %v5312_v17, %v833_v5  ;;  %v1049_v13 = vsub.f32 %v5317_v21, %v1047_v6 }
 0x2c8   : > { %v837_v11 = vpop.xlane.xlu2 %836 }
 0x2c9   : > { %v5380_v9 = vpop.eup %4897  ;;  %v840_v10 = vmul.f32 1.442695, %v838_v8  ;;  %v1052_v14 = vmul.f32 1.442695, %v1049_v13  ;;  %v839_v17 = vsub.f32 %v5319_v22, %v837_v11 }
 0x2ca   : > { %v1054_v12 = vsel %vm830_vm6, %v5380_v9, 0.0 }
 0x2cb   : > { %1055 = vadd.xlane.f32.xlu2 %v1054_v12  ;;  %4901 = vpow2.f32 %v840_v10  ;;  %v5385_v16 = vpop.eup %4899 }
 0x2cc   : > { %4903 = vpow2.f32 %v1052_v14  ;;  %v1163_v25 = vsel %vm830_vm6, %v5385_v16, 0.0 }
 0x2ce   : > { %v1156_v15 = vpop.xlane.xlu1 %1155 }
 0x2cf   : > { %v1158_v18 = vsub.f32 %v5327_v28, %v1156_v15  ;;  %v842_v28 = vmul.f32 1.442695, %v839_v17 }
 0x2d0   : > { %v1267_v20 = vpop.xlane.xlu2 %1266 }
 0x2d1   : > { %v1161_v19 = vmul.f32 1.442695, %v1158_v18  ;;  %v5389_v24 = vpop.eup %4901  ;;  %v1271_v21 = vsub.f32 %v5331_v33, %v1267_v20 }
 0x2d2   : > { %v844_v26 = vsel %vm830_vm6, %v5389_v24, 0.0  ;;  %v5397_v31 = vpop.eup %4903 }
 0x2d3   : > { %4905 = vpow2.f32 %v1161_v19  ;;  %1164 = vadd.xlane.f32.xlu2 %v1163_v25  ;;  %v1273_v27 = vmul.f32 1.442695, %v1271_v21  ;;  %845 = vadd.xlane.f32.xlu1 %v844_v26  ;;  %v1057_v39 = vsel %vm834_vm7, %v5397_v31, 0.0 }
 0x2d5   : > { %4907 = vpow2.f32 %v1273_v27  ;;  %v1366_v22 = vpop.xlane.xlu0 %1365 }
 0x2d6   : > { %v1370_v29 = vsub.f32 %v5335_v37, %v1366_v22  ;;  %4909 = vpow2.f32 %v842_v28 }
 0x2d8   : > { %v1372_v33 = vmul.f32 1.442695, %v1370_v29  ;;  %v1270_v35 = vpop.xlane.xlu2 %1269 }
 0x2d9   : > { %v5399_v34 = vpop.eup %4905  ;;  %v1272_v36 = vsub.f32 %v5339_v40, %v1270_v35 }
 0x2da   : > { %v1166_v38 = vsel %vm834_vm7, %v5399_v34, 0.0  ;;  %4911 = vpow2.f32 %v1372_v33 }
 0x2db   : > { %1167 = vadd.xlane.f32.xlu2 %v1166_v38  ;;  %v5406_v41 = vpop.eup %4907  ;;  %v1275_v37 = vmul.f32 1.442695, %v1272_v36  ;;  %1058 = vadd.xlane.f32.xlu1 %v1057_v39 }
 0x2dc   : > { %v1277_v43 = vsel %vm830_vm6, %v5406_v41, 0.0  ;;  %v5410_v46 = vpop.eup %4909 }
 0x2dd   : > { %4913 = vpow2.f32 %v1275_v37  ;;  %v935_v45 = vpop.xlane.xlu0 %934  ;;  %1278 = vadd.xlane.f32.xlu0 %v1277_v43  ;;  %v847_v54 = vsel %vm834_vm7, %v5410_v46, 0.0 }
 0x2de   : > { %v939_v40 = vsub.f32 %v5343_v42, %v935_v45 }
 0x2e0   : > { %v5413_v47 = vpop.eup %4911  ;;  %v941_v48 = vmul.f32 1.442695, %v939_v40  ;;  %v938_v50 = vpop.xlane.xlu2 %937 }
 0x2e1   : > { %v940_v51 = vsub.f32 %v5345_v44, %v938_v50  ;;  %v1376_v53 = vsel %vm830_vm6, %v5413_v47, 0.0 }
 0x2e2   : > { %4915 = vpow2.f32 %v941_v48 }
 0x2e3   : > { %848 = vadd.xlane.f32.xlu2 %v847_v54  ;;  %v5420_v56 = vpop.eup %4913  ;;  %v943_v58 = vmul.f32 1.442695, %v940_v51  ;;  %1377 = vadd.xlane.f32.xlu1 %v1376_v53 }
 0x2e4   : > { %v1280_v42 = vsel %vm834_vm7, %v5420_v56, 0.0 }
 0x2e5   : > { %4917 = vpow2.f32 %v943_v58  ;;  %1281 = vadd.xlane.f32.xlu0 %v1280_v42  ;;  %v4884_v58 = vunpack.i.h.bf16 %v5294_v4 }
 0x2e6   : > { %v1174_v26 = vpop.permute.xlu1 %1173 }
 0x2e8   : > { %v5424_v59 = vpop.eup %4915  ;;  %v1473_v44 = vpop.xlane.xlu2 %1472 }
 0x2e9   : > { %v1477_v61 = vsub.f32 %v5351_v49, %v1473_v44  ;;  %v945_v62 = vsel %vm830_vm6, %v5424_v59, 0.0 }
 0x2eb   : > { %v5429_v63 = vpop.eup %4917  ;;  %v1479_v0 = vmul.f32 1.442695, %v1477_v61  ;;  %946 = vadd.xlane.f32.xlu1 %v945_v62 }
 0x2ec   : > { %v948_v1 = vsel %vm834_vm7, %v5429_v63, 0.0 }
 0x2ed   : > { %4919 = vpow2.f32 %v1479_v0  ;;  %949 = vadd.xlane.f32.xlu2 %v948_v1  ;;  %v4889_v1 = vunpack.i.h.bf16 %v5298_v7 }
 0x2f0   : > { %v1065_v2 = vpop.permute.xlu0 %1064  ;;  %v1580_v3 = vpop.xlane.xlu2 %1579 }
 0x2f1   : > { %v1584_v5 = vsub.f32 %v5357_v52, %v1580_v3  ;;  %1092 = vmatpush.msra.mxu3 %v1065_v2 }
 0x2f3   : > { %v5434_v6 = vpop.eup %4919  ;;  %v1586_v49 = vmul.f32 1.442695, %v1584_v5 }
 0x2f4   : > { %v1483_v8 = vsel %vm830_vm6, %v5434_v6, 0.0 }
 0x2f5   : > { %4921 = vpow2.f32 %v1586_v49  ;;  %1484 = vadd.xlane.f32.xlu0 %v1483_v8 }
 0x2f8   : > { %v1476_v18 = vpop.xlane.xlu2 %1475 }
 0x2f9   : > { %v1478_v19 = vsub.f32 %v5363_v55, %v1476_v18 }
 0x2fb   : > { %v5438_v10 = vpop.eup %4921 }
 0x2fc   : > { %v1590_v11 = vsel %vm830_vm6, %v5438_v10, 0.0 }
 0x2fd   : > { %1591 = vadd.xlane.f32.xlu0 %v1590_v11 }
 0x304   : > { %1388 = vrot.lane.b32.xlu1 %v5212_v30, %s4996_s26 }
 0x305   : > { %1289 = vrot.lane.b32.xlu2 %v5212_v30, %s4994_s16 }
 0x30c   : > { %1602 = vrot.lane.b32.xlu1 %v5212_v30, %s4995_s22 }
 0x311   : > { %1495 = vrot.lane.b32.xlu0 %v5212_v30, %s4993_s27  ;;  %v1481_v30 = vmul.f32 1.442695, %v1478_v19 }
 0x314   : > { %1493 = vrot.lane.b32.xlu1 %v5221_v32, %s4993_s27 }
 0x31b   : > { %v1369_v52 = vpop.xlane.xlu0 %1368 }
 0x31c   : > { %v1371_v13 = vsub.f32 %v5367_v57, %v1369_v52  ;;  %1600 = vrot.lane.b32.xlu1 %v5221_v32, %s4995_s22  ;;  %s6019_s22 = scalar_lea.vmem %s5988_s8, %s5094_s23 }
 0x31e   : > { %v1374_v12 = vmul.f32 1.442695, %v1371_v13 }
 0x320   : > { %4923 = vpow2.f32 %v1374_v12 }
 0x323   : > { %v1583_v14 = vpop.xlane.xlu0 %1582 }
 0x324   : > { %v1585_v15 = vsub.f32 %v5371_v60, %v1583_v14 }
 0x326   : > { %v1588_v17 = vmul.f32 1.442695, %v1585_v15  ;;  %v5457_v20 = vpop.eup %4923 }
 0x327   : > { %v1379_v21 = vsel %vm834_vm7, %v5457_v20, 0.0 }
 0x328   : > { %4925 = vpow2.f32 %v1588_v17 }
 0x329   : > { %4927 = vpow2.f32 %v1481_v30 }
 0x32e   : > { %1380 = vadd.xlane.f32.xlu2 %v1379_v21  ;;  %v5461_v57 = vpop.eup %4925 }
 0x32f   : > { %v1593_v32 = vsel %vm834_vm7, %v5461_v57, 0.0  ;;  %v5465_v60 = vpop.eup %4927 }
 0x330   : > { %v1486_v55 = vsel %vm834_vm7, %v5465_v60, 0.0 }
 0x336   : > { %1594 = vadd.xlane.f32.xlu2 %v1593_v32 }
 0x33b   : > { %1487 = vadd.xlane.f32.xlu0 %v1486_v55 }
 0x33e   : > { %v1056_v25 = vpop.xlane.xlu2 %1055 }
 0x33f   : > { %4929 = vrcp.f32 %v1056_v25 }
 0x345   : > { %v4930_v27 = vpop.eup %4929 }
 0x346   : > { %v1062_v28 = vmul.f32 %v4930_v27, %v5380_v9  ;;  %v1165_v22 = vpop.xlane.xlu2 %1164  ;;  %v846_v29 = vpop.xlane.xlu1 %845 }
 0x347   : > { %4931 = vrcp.f32 %v846_v29 }
 0x348   : > { %3970 = vmatmul.msk.f32.vlgmr.msra.gmra.mxu3 %vm830_vm6, %v1062_v28 }
 0x34d   : > { %v4932_v33 = vpop.eup %4931 }
 0x34e   : > { %v1168_v35 = vpop.xlane.xlu2 %1167  ;;  %v1059_v36 = vpop.xlane.xlu1 %1058  ;;  %v852_v38 = vmul.f32 %v4932_v33, %v5389_v24 }
 0x34f   : > { %4933 = vrcp.f32 %v1059_v36 }
 0x350   : > { %3956 = vmatmul.msk.f32.vlgmr.msra.gmra.mxu2 %vm830_vm6, %v852_v38  ;;  %v1279_v40 = vpop.xlane.xlu0 %1278  ;;  %v1652_v38 = vld [vmem:[%s5109_s18 + $0x18] sm:$0xff] }
 0x351   : > { %3976 = vmatpush.msk.msra.mxu2 %vm865_vm5, %v5375_v23  ;;  %1678 = vmatpush.msrb.mxu1 %v1652_v38  ;;  %v4078_v38 = vld [vmem:[%s5135_s20 + $0xc0] sm:$0xf0] }
 0x353   : > { %1201 = vmatpush.msra.mxu2 %v1174_v26 }
 0x355   : > { %v4934_v39 = vpop.eup %4933 }
 0x356   : > { %v849_v37 = vpop.xlane.xlu2 %848  ;;  %v1378_v9 = vpop.xlane.xlu1 %1377  ;;  %v1063_v43 = vmul.f32 %v4934_v39, %v5397_v31  ;;  %v1651_v39 = vld [vmem:[%s5109_s18 + $0x10] sm:$0xff] }
 0x357   : > { %4935 = vrcp.f32 %v849_v37  ;;  %v1650_v37 = vld [vmem:[%s5109_s18 + $0x8] sm:$0xff]  ;;  %1679 = vmatpush.msrb.mxu1 %v1651_v39 }
 0x358   : > { %3971 = vmatmul.msk.f32.gmra.mxu3 %vm830_vm6, %v1063_v43  ;;  %v1282_v51 = vpop.xlane.xlu0 %1281  ;;  %v4084_v39 = vld [vmem:[%s5135_s20 + $0x88] sm:$0xf] }
 0x359   : > { %1680 = vmatpush.msrb.mxu1 %v1650_v37  ;;  %v4713_v37 = vld [vmem:[%s5135_s20 + $0xc4] sm:$0xf0] }
 0x35d   : > { %v4936_v45 = vpop.eup %4935 }
 0x35e   : > { %v853_v48 = vmul.f32 %v4936_v45, %v5410_v46  ;;  %v947_v24 = vpop.xlane.xlu1 %946 }
 0x35f   : > { %4937 = vrcp.f32 %v947_v24 }
 0x360   : > { %3957 = vmatmul.msk.f32.gmra.mxu2 %vm830_vm6, %v853_v48  ;;  %v950_v50 = vpop.xlane.xlu2 %949  ;;  %4939 = vrcp.f32 %v1279_v40 }
 0x361   : > { %4941 = vrcp.f32 %v950_v50 }
 0x362   : > { %4943 = vrcp.f32 %v1282_v51 }
 0x363   : > { %4945 = vrcp.f32 %v1165_v22 }
 0x364   : > { %4947 = vrcp.f32 %v1168_v35 }
 0x365   : > { %v4938_v23 = vpop.eup %4937  ;;  %4949 = vrcp.f32 %v1378_v9  ;;  %v1649_v9 = vld [vmem:[%s5109_s18] sm:$0xff] }
 0x366   : > { %v953_v53 = vmul.f32 %v4938_v23, %v5424_v59  ;;  %v4940_v54 = vpop.eup %4939  ;;  %1681 = vmatpush.msrb.mxu1 %v1649_v9 }
 0x367   : > { %v1285_v46 = vmul.f32 %v4940_v54, %v5406_v41  ;;  %v4942_v42 = vpop.eup %4941 }
 0x368   : > { %3963 = vmatmul.msk.f32.vlgmr.msrb.gmra.mxu2 %vm830_vm6, %v953_v53  ;;  %v1290_v31 = vpop.permute.xlu2 %1289  ;;  %v954_v44 = vmul.f32 %v4942_v42, %v5429_v63  ;;  %v4944_v61 = vpop.eup %4943 }
 0x369   : > { %3983 = vmatpush.msk.msrb.mxu3 %vm865_vm5, %v1290_v31  ;;  %v1485_v59 = vpop.xlane.xlu0 %1484  ;;  %v1286_v62 = vmul.f32 %v4944_v61, %v5420_v56  ;;  %v4946_v0 = vpop.eup %4945  ;;  %v4891_v61 = vld [vmem:[%s652_s21] ss:$0 sm:$0xff] }
 0x36a   : > { %v1171_v4 = vmul.f32 %v4946_v0, %v5385_v16  ;;  %v4948_v63 = vpop.eup %4947  ;;  %4951 = vrcp.f32 %v1485_v59  ;;  %v4975_v0 = vld [vmem:[#allocation2] sm:$0xff] }
 0x36b   : > { %1315 = vmatpush.msrb.mxu3 %v4884_v58  ;;  %v1172_v56 = vmul.f32 %v4948_v63, %v5399_v34  ;;  %v4950_v16 = vpop.eup %4949 }
 0x36c   : > { %3984 = vmatmul.msk.f32.vlgmr.msrb.gmra.mxu3 %vm830_vm6, %v1285_v46  ;;  %v1384_v7 = vmul.f32 %v4950_v16, %v5413_v47 }
 0x370   : > { %3964 = vmatmul.msk.f32.gmra.mxu2 %vm830_vm6, %v954_v44  ;;  %v4952_v5 = vpop.eup %4951 }
 0x371   : > { %v1592_v2 = vpop.xlane.xlu0 %1591  ;;  %v1491_v8 = vmul.f32 %v4952_v5, %v5434_v6 }
 0x374   : > { %3985 = vmatmul.msk.f32.gmra.mxu3 %vm830_vm6, %v1286_v62 }
 0x376   : > { %v1389_v41 = vpop.permute.xlu1 %1388 }
 0x377   : > { %3990 = vmatpush.msk.msrb.mxu2 %vm865_vm5, %v1389_v41 }
 0x378   : > { %3977 = vmatmul.msk.f32.vlgmr.msra.gmra.mxu2 %vm830_vm6, %v1171_v4 }
 0x379   : > { %1414 = vmatpush.msrb.mxu2 %v4889_v1 }
 0x37e   : > { %v1603_v3 = vpop.permute.xlu1 %1602 }
 0x37f   : > { %4004 = vmatpush.msk.msra.mxu2 %vm865_vm5, %v1603_v3 }
 0x380   : > { %3978 = vmatmul.msk.f32.gmra.mxu2 %vm830_vm6, %v1172_v56 }
 0x383   : > { %v1496_v49 = vpop.permute.xlu0 %1495 }
 0x384   : > { %3997 = vmatpush.msk.msra.mxu3 %vm865_vm5, %v1496_v49  ;;  %v4977_v49 = vld [vmem:[#allocation2 + $0x10] sm:$0xf] }
 0x386   : > { %v1494_v11 = vpop.permute.xlu1 %1493 }
 0x387   : > { %1521 = vmatpush.msra.mxu3 %v1494_v11  ;;  %v5000_v11 = vmov 32.0  }
 0x388   : > { %3991 = vmatmul.msk.f32.vlgmr.msrb.gmra.mxu2 %vm830_vm6, %v1384_v7  ;;  %3998 = vmatmul.msk.f32.vlgmr.msra.gmra.mxu3 %vm830_vm6, %v1491_v8 }
 0x38e   : > { %v1601_v34 = vpop.permute.xlu1 %1600 }
 0x38f   : > { %1628 = vmatpush.msra.mxu2 %v1601_v34 }
 0x3a1   : > { %v1381_v52 = vpop.xlane.xlu2 %1380 }
 0x3a2   : > { %4953 = vrcp.f32 %v1381_v52 }
 0x3a3   : > { %4955 = vrcp.f32 %v1592_v2  ;;  %v4976_v2 = vld [vmem:[#allocation2 + $0x8] sm:$0xff] }
 0x3a8   : > { %v4954_v13 = vpop.eup %4953 }
 0x3a9   : > { %v1385_v12 = vmul.f32 %v4954_v13, %v5457_v20  ;;  %v1595_v14 = vpop.xlane.xlu2 %1594  ;;  %v4956_v47 = vpop.eup %4955 }
 0x3aa   : > { %v1598_v6 = vmul.f32 %v4956_v47, %v5438_v10 }
 0x3ab   : > { %3992 = vmatmul.msk.f32.gmra.mxu2 %vm830_vm6, %v1385_v12 }
 0x3ae   : > { %v1488_v15 = vpop.xlane.xlu0 %1487 }
 0x3af   : > { %4957 = vrcp.f32 %v1488_v15 }
 0x3b0   : > { %4959 = vrcp.f32 %v1595_v14 }
 0x3b1   : > { %4961 = vrcp.f32 %v5000_v11 }
 0x3b3   : > { %4005 = vmatmul.msk.f32.vlgmr.msra.gmra.mxu2 %vm830_vm6, %v1598_v6 }
 0x3b5   : > { %v4958_v18 = vpop.eup %4957 }
 0x3b6   : > { %v4960_v17 = vpop.eup %4959  ;;  %v1492_v19 = vmul.f32 %v4958_v18, %v5465_v60 }
 0x3b7   : > { %v1599_v30 = vmul.f32 %v4960_v17, %v5461_v57  ;;  %v4962_v34 = vpop.eup %4961 }
 0x3b8   : > { %3999 = vmatmul.msk.f32.gmra.mxu3 %vm830_vm6, %v1492_v19  ;;  %v1706_v52 = vmul.f32 32.0, %v4962_v34  ;;  %vm1710_vm0 = vweird.f32 %v4962_v34 }
 0x3ba   : > { %v1707_v13 = vsub.f32 1.0, %v1706_v52 }
 0x3bb   : > { %4006 = vmatmul.msk.f32.gmra.mxu2 %vm830_vm6, %v1599_v30 }
 0x3bc   : > { %v1708_v12 = vmul.f32 %v4962_v34, %v1707_v13  ;;  %v4046_v13 = vld [vmem:[%s5135_s20 + $0x60] sm:$0xf0] }
 0x3be   : > { %v1709_v14 = vadd.f32 %v4962_v34, %v1708_v12 }
 0x3c0   : > { %v5540_v47 = vsel %vm1710_vm0, %v4962_v34, %v1709_v14 }
 0x3cb   : > { %v1094_v20 = vpop.f32.mrf.mxu3 }
 0x3cc   : > { %1102 = vrot.lane.b32.xlu2 %v1094_v20, %s4997_s19 }
 0x3d3   : > { %v885_v21 = vpop.f32.mrf.mxu2 }
 0x3d4   : > { %891 = vst.msk [vmem:[#allocation3] sm:$0xff] %vm796_vm4, %v885_v21 }
 0x3db   : > { %v1097_v10 = vpop.f32.mrf.mxu3 }
 0x3dc   : > { %1104 = vrot.lane.b32.xlu2 %v1097_v10, %s4997_s19 }
 0x3e3   : > { %v888_v32 = vpop.f32.mrf.mxu2 }
 0x3e4   : > { %893 = vst.msk [vmem:[#allocation3 + $0x8] sm:$0x3] %vm892_vm8, %v888_v32 }
 0x3eb   : > { %v985_v60 = vpop.f32.mrf.mxu2 }
 0x3ec   : > { %993 = vrot.lane.b32.xlu1 %v985_v60, %s4998_s2 }
 0x3ef   : > { %v1317_v55 = vpop.f32.mrf.mxu3 }
 0x3f0   : > { %1323 = vst.msk [vmem:[#allocation3 + $0xa] sm:$0xff] %vm796_vm4, %v1317_v55 }
 0x3f3   : > { %v988_v57 = vpop.f32.mrf.mxu2 }
 0x3f4   : > { %995 = vrot.lane.b32.xlu1 %v988_v57, %s4998_s2 }
 0x3f7   : > { %v1320_v25 = vpop.f32.mrf.mxu3 }
 0x3f8   : > { %1324 = vst.msk [vmem:[#allocation3 + $0x12] sm:$0x3] %vm892_vm8, %v1320_v25 }
 0x3fb   : > { %v1203_v26 = vpop.f32.mrf.mxu2 }
 0x3fc   : > { %1211 = vrot.lane.b32.xlu1 %v1203_v26, %s4999_s3 }
 0x403   : > { %v1206_v27 = vpop.f32.mrf.mxu2 }
 0x404   : > { %1213 = vrot.lane.b32.xlu2 %v1206_v27, %s4999_s3 }
 0x40b   : > { %v1416_v28 = vpop.f32.mrf.mxu2  ;;  %v1523_v22 = vpop.f32.mrf.mxu3 }
 0x40c   : > { %1424 = vrot.lane.b32.xlu1 %v1416_v28, %s4998_s2 }
 0x414   : > { %1531 = vrot.lane.b32.xlu1 %v1523_v22, %s4997_s19 }
 0x426   : > { %v1103_v43 = vpop.permute.xlu2 %1102 }
 0x42e   : > { %v1419_v29 = vpop.f32.mrf.mxu2 }
 0x42f   : > { %1426 = vrot.lane.b32.xlu1 %v1419_v29, %s4998_s2  ;;  %v4076_v29 = vld [vmem:[%s5135_s20 + $0x80] sm:$0xf] }
 0x436   : > { %v1630_v33 = vpop.f32.mrf.mxu2  ;;  %v1105_v40 = vpop.permute.xlu2 %1104 }
 0x437   : > { %1638 = vrot.lane.b32.xlu0 %v1630_v33, %s4999_s3  ;;  %v4712_v33 = vld [vmem:[%s5135_s20 + $0xbc] sm:$0xf0] }
 0x43b   : > { %v1526_v35 = vpop.f32.mrf.mxu3 }
 0x43c   : > { %1533 = vrot.lane.b32.xlu2 %v1526_v35, %s4997_s19  ;;  %v4704_v35 = vld [vmem:[%s5135_s20 + $0x84] sm:$0xf]  ;;  %s6021_s19 = scalar_lea.vmem %s5991_s11, %s5094_s23 }
 0x43e   : > { %v1633_v36 = vpop.f32.mrf.mxu2 }
 0x43f   : > { %1640 = vrot.lane.b32.xlu1 %v1633_v36, %s4999_s3  ;;  %v4077_v36 = vor.u32 %v4712_v33, %v4076_v29  ;;  %v4690_v29 = vld [vmem:[%s5135_s20 + $0x14] sm:$0xf]  ;;  %s6022_s3 = sld [smem:[#allocation11_spill]] }
 0x440   : > { %v4030_v33 = vld [vmem:[%s5135_s20 + $0x50] sm:$0xf0] }
 0x441   : > { %2025 = vmatpush.bf16.msrb.mxu3 %v4077_v36 }
 0x45e   : > { %v994_v45 = vpop.permute.xlu1 %993  ;;  %v1214_v24 = vpop.permute.xlu2 %1213 }
 0x45f   : > { %1000 = vst.msk [vmem:[#allocation3] sm:$0xff] %vm999_vm9, %v994_v45  ;;  %v4085_v45 = vor.u32 %v4713_v37, %v4084_v39  ;;  %v4036_v39 = vld [vmem:[%s5135_s20 + $0x18] sm:$0xf] }
 0x460   : > { %1109 = vst.msk [vmem:[#allocation3] sm:$0xff] %vm1108_vm10, %v1103_v43  ;;  %v4081_v43 = vor.u32 %v4704_v35, %v4078_v38  ;;  %v4699_v37 = vld [vmem:[%s5135_s20 + $0x54] sm:$0xf0] }
 0x461   : > { %2061 = vmatpush.bf16.msrb.mxu2 %v4085_v45  ;;  %v4038_v45 = vld [vmem:[%s5135_s20 + $0x58] sm:$0xf0] }
 0x462   : > { %2043 = vmatpush.bf16.msra.mxu0 %v4081_v43  ;;  %v4033_v43 = vor.u32 %v4690_v29, %v4030_v33 }
 0x466   : > { %v996_v48 = vpop.permute.xlu1 %995 }
 0x467   : > { %1002 = vst.msk [vmem:[#allocation3 + $0x8] sm:$0x3] %vm1001_vm11, %v996_v48  ;;  %v4086_v48 = vld [vmem:[%s5135_s20 + $0xc8] sm:$0xf0] }
 0x468   : > { %1111 = vst.msk [vmem:[#allocation3 + $0x8] sm:$0x3] %vm1110_vm12, %v1105_v40  ;;  %v4705_v40 = vld [vmem:[%s5135_s20 + $0x8c] sm:$0xf] }
 0x469   : > { %1220 = vst.msk [vmem:[#allocation3 + $0x8] sm:$0x3] %vm1219_vm13, %v1214_v24  ;;  %v4089_v24 = vor.u32 %v4705_v40, %v4086_v48 }
 0x46b   : > { %2079 = vmatpush.bf16.msra.mxu1 %v4089_v24 }
 0x46e   : > { %v1212_v50 = vpop.permute.xlu1 %1211 }
 0x46f   : > { %1218 = vst.msk [vmem:[#allocation3] sm:$0xff] %vm1217_vm14, %v1212_v50  ;;  %v4012_v50 = vld [vmem:[%s5135_s20] sm:$0xf] }
 0x476   : > { %v1646_v23 = vld [vmem:[#allocation3] sm:$0xff] }
 0x477   : > { %4007 = vmatmul.msk.f32.vlgmr.msrb.gmra.mxu1 %vm749_vm2, %v1646_v23  ;;  %v4696_v23 = vld [vmem:[%s5135_s20 + $0x3c] sm:$0xf0] }
 0x47e   : > { %v1425_v51 = vpop.permute.xlu1 %1424 }
 0x47f   : > { %1430 = vst.msk [vmem:[#allocation3 + $0xa] sm:$0xff] %vm999_vm9, %v1425_v51  ;;  %v4688_v51 = vld [vmem:[%s5135_s20 + $0x4] sm:$0xf] }
 0x486   : > { %v1532_v53 = vpop.permute.xlu1 %1531 }
 0x487   : > { %1537 = vst.msk [vmem:[#allocation3 + $0xa] sm:$0xff] %vm1108_vm10, %v1532_v53 }
 0x496   : > { %v1534_v31 = vpop.permute.xlu2 %1533 }
 0x4a1   : > { %v1427_v54 = vpop.permute.xlu1 %1426 }
 0x4a2   : > { %1431 = vst.msk [vmem:[#allocation3 + $0x12] sm:$0x3] %vm1001_vm11, %v1427_v54  ;;  %v4013_v54 = vor.u32 %v4696_v23, %v4012_v50  ;;  %v4893_v50 = vld [vmem:[%s6020_s30] ss:$0 sm:$0xff] }
 0x4a3   : > { %1538 = vst.msk [vmem:[#allocation3 + $0x12] sm:$0x3] %vm1110_vm12, %v1534_v31  ;;  %v4014_v31 = vld [vmem:[%s5135_s20 + $0x40] sm:$0xf0] }
 0x4a4   : > { %2026 = vmatpush.bf16.msrb.mxu3 %v4013_v54 }
 0x4a9   : > { %v1639_v58 = vpop.permute.xlu0 %1638 }
 0x4aa   : > { %1644 = vst.msk [vmem:[#allocation3 + $0xa] sm:$0xff] %vm1217_vm14, %v1639_v58  ;;  %v4020_v58 = vld [vmem:[%s5135_s20 + $0x8] sm:$0xf] }
 0x4b1   : > { %v1641_v46 = vpop.permute.xlu1 %1640  ;;  %v1647_v42 = vld [vmem:[#allocation3 + $0x8] sm:$0xff] }
 0x4b2   : > { %1645 = vst.msk [vmem:[#allocation3 + $0x12] sm:$0x3] %vm1219_vm13, %v1641_v46  ;;  %4008 = vmatmul.msk.f32.gmra.mxu1 %vm749_vm2, %v1647_v42  ;;  %v4697_v46 = vld [vmem:[%s5135_s20 + $0x44] sm:$0xf0]  ;;  %v4017_v42 = vor.u32 %v4688_v51, %v4014_v31 }
 0x4b4   : > { %2044 = vmatpush.bf16.msra.mxu0 %v4017_v42 }
 0x4b9   : > { %v1648_v44 = vld [vmem:[#allocation3 + $0x10] sm:$0xf] }
 0x4ba   : > { %4009 = vmatmul.msk.f32.gmra.mxu1 %vm749_vm2, %v1648_v44  ;;  %v4021_v44 = vor.u32 %v4697_v46, %v4020_v58 }
 0x4bc   : > { %2062 = vmatpush.bf16.msrb.mxu2 %v4021_v44 }
 0x4f4   : > { %v1683_v59 = vpop.f32.mrf.mxu1 }
 0x4f5   : > { %v1684_v62 = vadd.f32 %v4891_v61, %v1683_v59  ;;  %v4022_v59 = vld [vmem:[%s5135_s20 + $0x48] sm:$0xf0] }
 0x4f7   : > { %v1692_v4 = vadd.f32 %v4975_v0, %v1684_v62 }
 0x4f9   : > { %v1695_v41 = vsel %vm749_vm2, %v1692_v4, 0.0 }
 0x4fa   : > { %1696 = vadd.xlane.f32.xlu2 %v1695_v41 }
 0x52f   : > { %v1686_v1 = vpop.f32.mrf.mxu1 }
 0x530   : > { %v1687_v63 = vadd.f32 %v4891_v61, %v1686_v1 }
 0x532   : > { %v1693_v3 = vadd.f32 %v4976_v2, %v1687_v63  ;;  %v4092_v2 = vld [vmem:[%s5135_s20 + $0x90] sm:$0xf] }
 0x534   : > { %v1698_v56 = vsel %vm749_vm2, %v1693_v3, 0.0 }
 0x535   : > { %1699 = vadd.xlane.f32.xlu0 %v1698_v56 }
 0x537   : > { %v1689_v16 = vpop.f32.mrf.mxu1 }
 0x538   : > { %v1690_v5 = vadd.f32 %v4891_v61, %v1689_v16  ;;  %v4689_v61 = vld [vmem:[%s5135_s20 + $0xc] sm:$0xf] }
 0x539   : > { %v4025_v62 = vor.u32 %v4689_v61, %v4022_v59  ;;  %v4108_v61 = vld [vmem:[%s5135_s20 + $0xa0] sm:$0xf] }
 0x53a   : > { %v1694_v7 = vadd.f32 %v4977_v49, %v1690_v5  ;;  %v4716_v59 = vld [vmem:[%s5135_s20 + $0xdc] sm:$0xf0] }
 0x53b   : > { %2080 = vmatpush.bf16.msra.mxu1 %v4025_v62 }
 0x53c   : > { %v1702_v8 = vsel %vm1701_vm15, %v1694_v7, 0.0 }
 0x53d   : > { %1703 = vadd.xlane.f32.xlu1 %v1702_v8 }
 0x56d   : > { %v1697_v15 = vpop.xlane.xlu2 %1696 }
 0x56e   : > { %v1712_v6 = vmul.f32 %v5540_v47, %v1697_v15  ;;  %v4100_v15 = vld [vmem:[%s5135_s20 + $0x98] sm:$0xf] }
 0x570   : > { %v5543_v18 = vsub.f32 %v1692_v4, %v1712_v6  ;;  %v4715_v6 = vld [vmem:[%s5135_s20 + $0xd4] sm:$0xf0] }
 0x572   : > { %v1718_v17 = vmul.f32 %v5543_v18, %v5543_v18 }
 0x574   : > { %v1721_v19 = vsel %vm749_vm2, %v1718_v17, 0.0  ;;  %v4892_v17 = vld [vmem:[%s6019_s22] ss:$0 sm:$0xff] }
 0x575   : > { %1722 = vadd.xlane.f32.xlu2 %v1721_v19  ;;  %v4101_v19 = vor.u32 %v4715_v6, %v4100_v15 }
 0x577   : > { %2133 = vmatpush.bf16.msra.mxu2 %v4101_v19  ;;  %v4054_v19 = vld [vmem:[%s5135_s20 + $0x68] sm:$0xf0] }
 0x5a8   : > { %v1700_v30 = vpop.xlane.xlu0 %1699 }
 0x5a9   : > { %v1713_v20 = vmul.f32 %v5540_v47, %v1700_v30  ;;  %v4706_v30 = vld [vmem:[%s5135_s20 + $0x94] sm:$0xf] }
 0x5ab   : > { %v5549_v21 = vsub.f32 %v1693_v3, %v1713_v20  ;;  %v4714_v3 = vld [vmem:[%s5135_s20 + $0xcc] sm:$0xf0]  ;;  %v4094_v20 = vld [vmem:[%s5135_s20 + $0xd0] sm:$0xf0] }
 0x5ac   : > { %v4093_v56 = vor.u32 %v4714_v3, %v4092_v2  ;;  %v4708_v2 = vld [vmem:[%s5135_s20 + $0xa4] sm:$0xf] }
 0x5ad   : > { %v1719_v10 = vmul.f32 %v5549_v21, %v5549_v21 }
 0x5ae   : > { %2097 = vmatpush.bf16.msra.mxu3 %v4093_v56  ;;  %v4110_v56 = vld [vmem:[%s5135_s20 + $0xe0] sm:$0xf0] }
 0x5af   : > { %v1724_v32 = vsel %vm749_vm2, %v1719_v10, 0.0  ;;  %v4707_v10 = vld [vmem:[%s5135_s20 + $0x9c] sm:$0xf] }
 0x5b0   : > { %1725 = vadd.xlane.f32.xlu0 %v1724_v32  ;;  %v1704_v60 = vpop.xlane.xlu1 %1703 }
 0x5b1   : > { %v1714_v55 = vmul.f32 %v5540_v47, %v1704_v60  ;;  %v4097_v60 = vor.u32 %v4706_v30, %v4094_v20  ;;  %v4124_v20 = vld [vmem:[%s5135_s20 + $0xb0] sm:$0xf] }
 0x5b3   : > { %v5555_v57 = vsub.f32 %v1694_v7, %v1714_v55  ;;  %v4102_v55 = vld [vmem:[%s5135_s20 + $0xd8] sm:$0xf0]  ;;  %2115 = vmatpush.bf16.msrb.mxu0 %v4097_v60  ;;  %v4132_v60 = vld [vmem:[%s5135_s20 + $0xb8] sm:$0xf] }
 0x5b5   : > { %v1720_v25 = vmul.f32 %v5555_v57, %v5555_v57 }
 0x5b7   : > { %v1727_v26 = vsel %vm1701_vm15, %v1720_v25, 0.0  ;;  %v4028_v25 = vld [vmem:[%s5135_s20 + $0x10] sm:$0xf]  ;;  %2116 = vmatpush.bf16.msrb.mxu0 %v4033_v43  ;;  %v4703_v43 = vld [vmem:[%s5135_s20 + $0x74] sm:$0xf0] }
 0x5b8   : > { %1728 = vadd.xlane.f32.xlu1 %v1727_v26 }
 0x5e8   : > { %v1723_v27 = vpop.xlane.xlu2 %1722 }
 0x5e9   : > { %v1730_v28 = vmul.f32 %v1723_v27, %v5540_v47 }
 0x5eb   : > { %v1733_v22 = vadd.f32 1e-05, %v1730_v28  ;;  %v4105_v28 = vor.u32 %v4707_v10, %v4102_v55  ;;  %v4718_v10 = vld [vmem:[%s5135_s20 + $0xec] sm:$0xf0]  ;;  %v4719_v55 = vld [vmem:[%s5135_s20 + $0xf4] sm:$0xf0] }
 0x5ed   : > { %4963 = vrsqrt.f32 %v1733_v22  ;;  %vm1742_vm3 = vweird.f32 %v1733_v22  ;;  %2151 = vmatpush.bf16.msrb.mxu1 %v4105_v28  ;;  %v4711_v28 = vld [vmem:[%s5135_s20 + $0xbc] sm:$0xf] }
 0x5f3   : > { %v5567_v9 = vpop.eup %4963 }
 0x5f4   : > { %v1737_v53 = vmul.f32 %v5567_v9, %v1733_v22  ;;  %vm1743_vm1 = vweird.f32 %v5567_v9  ;;  %v4698_v22 = vld [vmem:[%s5135_s20 + $0x4c] sm:$0xf0] }
 0x5f5   : > { %vm5587_vm4 = vmor %vm1742_vm3, %vm1743_vm1  ;;  %v4029_v38 = vor.u32 %v4698_v22, %v4028_v25  ;;  %v4710_v25 = vld [vmem:[%s5135_s20 + $0xb4] sm:$0xf]  ;;  %v4134_v22 = vld [vmem:[%s5135_s20 + $0xf8] sm:$0xf0] }
 0x5f6   : > { %v1738_v0 = vmul.f32 %v5567_v9, %v1737_v53  ;;  %v4137_v33 = vor.u32 %v4711_v28, %v4134_v22  ;;  %v4757_v28 = vld [vmem:[%s5147_s29 + $0x128] sm:$0xff] }
 0x5f7   : > { %2098 = vmatpush.bf16.msra.mxu3 %v4029_v38  ;;  %v4694_v38 = vld [vmem:[%s5135_s20 + $0x34] sm:$0xf]  ;;  %v4773_v22 = vld [vmem:[%s5147_s29 + $0x1a8] sm:$0xff] }
 0x5f8   : > { %v1739_v63 = vmul.f32 0.5, %v1738_v0  ;;  %v4109_v0 = vor.u32 %v4716_v59, %v4108_v61  ;;  %v4726_v61 = vld [vmem:[%s5147_s29 + $0x30] sm:$0xff] }
 0x5f9   : > { %v4742_v59 = vld [vmem:[%s5147_s29 + $0xb0] sm:$0xff] }
 0x5fa   : > { %v1740_v16 = vsub.f32 1.5, %v1739_v63  ;;  %v4717_v63 = vld [vmem:[%s5135_s20 + $0xe4] sm:$0xf0] }
 0x5fc   : > { %v1741_v11 = vmul.f32 %v5567_v9, %v1740_v16  ;;  %v4709_v16 = vld [vmem:[%s5135_s20 + $0xac] sm:$0xf] }
 0x5fe   : > { %v1745_v12 = vsel %vm5587_vm4, %v5567_v9, %v1741_v11  ;;  %v4691_v9 = vld [vmem:[%s5135_s20 + $0x1c] sm:$0xf]  ;;  %v4700_v11 = vld [vmem:[%s5135_s20 + $0x5c] sm:$0xf0] }
 0x5ff   : > { %v1766_v27 = vmul.f32 %v1745_v12, %v5543_v18  ;;  %v4037_v18 = vor.u32 %v4699_v37, %v4036_v39  ;;  %v4041_v24 = vor.u32 %v4691_v9, %v4038_v45  ;;  %v4052_v12 = vld [vmem:[%s5135_s20 + $0x28] sm:$0xf]  ;;  %v4062_v37 = vld [vmem:[%s5135_s20 + $0x70] sm:$0xf0]  ;;  %v4068_v9 = vld [vmem:[%s5135_s20 + $0x38] sm:$0xf] }
 0x600   : > { %v4069_v45 = vor.u32 %v4703_v43, %v4068_v9 }
 0x601   : > { %v1773_v23 = vmul.f32 %v4892_v17, %v1766_v27  ;;  %2134 = vmatpush.bf16.msra.mxu2 %v4037_v18  ;;  %2152 = vmatpush.bf16.msrb.mxu1 %v4041_v24  ;;  %v4126_v27 = vld [vmem:[%s5135_s20 + $0xf0] sm:$0xf0]  ;;  %v4065_v18 = vor.u32 %v4694_v38, %v4062_v37  ;;  %v4772_v37 = vld [vmem:[%s5147_s29 + $0x1a0] sm:$0xff] }
 0x602   : > { %v4129_v29 = vor.u32 %v4710_v25, %v4126_v27  ;;  %v4774_v25 = vld [vmem:[%s5147_s29 + $0x1b0] sm:$0xff]  ;;  %v4780_v27 = vld [vmem:[%s5147_s29 + $0x1e0] sm:$0xff] }
 0x603   : > { %v5621_v58 = vadd.f32 %v4893_v50, %v1773_v23  ;;  %v4751_v23 = vld [vmem:[%s5147_s29 + $0xf8] sm:$0xff] }
 0x623   : > { %v1726_v4 = vpop.xlane.xlu0 %1725 }
 0x624   : > { %v1731_v41 = vmul.f32 %v1726_v4, %v5540_v47 }
 0x626   : > { %v1734_v1 = vadd.f32 1e-05, %v1731_v41 }
 0x628   : > { %4965 = vrsqrt.f32 %v1734_v1  ;;  %vm1752_vm6 = vweird.f32 %v1734_v1 }
 0x62b   : > { %v1729_v5 = vpop.xlane.xlu1 %1728 }
 0x62c   : > { %v1732_v49 = vmul.f32 %v1729_v5, %v5540_v47  ;;  %v4118_v5 = vld [vmem:[%s5135_s20 + $0xe8] sm:$0xf0] }
 0x62e   : > { %v4966_v7 = vpop.eup %4965  ;;  %v1735_v8 = vadd.f32 1e-05, %v1732_v49  ;;  %v4113_v49 = vor.u32 %v4708_v2, %v4110_v56  ;;  %v4747_v2 = vld [vmem:[%s5147_s29 + $0xd8] sm:$0xff]  ;;  %v4740_v56 = vld [vmem:[%s5147_s29 + $0xa0] sm:$0xff] }
 0x62f   : > { %v1747_v34 = vmul.f32 %v4966_v7, %v1734_v1  ;;  %vm1753_vm5 = vweird.f32 %v4966_v7 }
 0x630   : > { %4967 = vrsqrt.f32 %v1735_v8  ;;  %vm1754_vm7 = vmor %vm1752_vm6, %vm1753_vm5  ;;  %vm1762_vm9 = vweird.f32 %v1735_v8 }
 0x631   : > { %v1748_v52 = vmul.f32 %v4966_v7, %v1747_v34  ;;  %v4692_v34 = vld [vmem:[%s5135_s20 + $0x24] sm:$0xf] }
 0x632   : > { %v4049_v15 = vor.u32 %v4692_v34, %v4046_v13  ;;  %v4738_v34 = vld [vmem:[%s5147_s29 + $0x90] sm:$0xff]  ;;  %v4744_v13 = vld [vmem:[%s5147_s29 + $0xc0] sm:$0xff] }
 0x633   : > { %v1749_v14 = vmul.f32 0.5, %v1748_v52 }
 0x635   : > { %v1750_v32 = vsub.f32 1.5, %v1749_v14  ;;  %v4701_v14 = vld [vmem:[%s5135_s20 + $0x64] sm:$0xf0] }
 0x636   : > { %v4968_v26 = vpop.eup %4967  ;;  %v4053_v6 = vor.u32 %v4701_v14, %v4052_v12  ;;  %v4721_v12 = vld [vmem:[%s5147_s29 + $0x8] sm:$0xff] }
 0x637   : > { %v1751_v35 = vmul.f32 %v4966_v7, %v1750_v32  ;;  %v1757_v36 = vmul.f32 %v4968_v26, %v1735_v8  ;;  %vm1763_vm8 = vweird.f32 %v4968_v26  ;;  %v4044_v8 = vld [vmem:[%s5135_s20 + $0x20] sm:$0xf]  ;;  %v4125_v32 = vor.u32 %v4718_v10, %v4124_v20  ;;  %v4737_v14 = vld [vmem:[%s5147_s29 + $0x88] sm:$0xff]  ;;  %v4782_v20 = vld [vmem:[%s5147_s29 + $0x1f0] sm:$0xff] }
 0x638   : > { %vm1764_vm10 = vmor %vm1762_vm9, %vm1763_vm8  ;;  %v4045_v52 = vor.u32 %v4700_v11, %v4044_v8  ;;  %v4729_v8 = vld [vmem:[%s5147_s29 + $0x48] sm:$0xff]  ;;  %v4759_v10 = vld [vmem:[%s5147_s29 + $0x138] sm:$0xff] }
 0x639   : > { %v1755_v40 = vsel %vm1754_vm7, %v4966_v7, %v1751_v35  ;;  %v1758_v48 = vmul.f32 %v4968_v26, %v1757_v36  ;;  %v4121_v7 = vor.u32 %v4709_v16, %v4118_v5  ;;  %v4060_v35 = vld [vmem:[%s5135_s20 + $0x30] sm:$0xf]  ;;  %v4745_v11 = vld [vmem:[%s5147_s29 + $0xc8] sm:$0xff] }
 0x63a   : > { %v1767_v51 = vmul.f32 %v1755_v40, %v5549_v21  ;;  %v4702_v36 = vld [vmem:[%s5135_s20 + $0x6c] sm:$0xf0]  ;;  %v4695_v40 = vld [vmem:[%s5135_s20 + $0x3c] sm:$0xf] }
 0x63b   : > { %v1759_v53 = vmul.f32 0.5, %v1758_v48  ;;  %v4061_v39 = vor.u32 %v4702_v36, %v4060_v35  ;;  %v4070_v48 = vld [vmem:[%s5135_s20 + $0x78] sm:$0xf0]  ;;  %v4730_v16 = vld [vmem:[%s5147_s29 + $0x50] sm:$0xff] }
 0x63c   : > { %v1774_v54 = vmul.f32 %v4892_v17, %v1767_v51  ;;  %v4073_v24 = vor.u32 %v4695_v40, %v4070_v48  ;;  %v4734_v51 = vld [vmem:[%s5147_s29 + $0x70] sm:$0xff]  ;;  %v4763_v35 = vld [vmem:[%s5147_s29 + $0x158] sm:$0xff] }
 0x63d   : > { %v1760_v31 = vsub.f32 1.5, %v1759_v53  ;;  %v4750_v53 = vld [vmem:[%s5147_s29 + $0xf0] sm:$0xff]  ;;  %v4779_v36 = vld [vmem:[%s5147_s29 + $0x1d8] sm:$0xff] }
 0x63e   : > { %v5623_v46 = vadd.f32 %v4893_v50, %v1774_v54  ;;  %v4727_v54 = vld [vmem:[%s5147_s29 + $0x38] sm:$0xff]  ;;  %v4746_v5 = vld [vmem:[%s5147_s29 + $0xd0] sm:$0xff] }
 0x63f   : > { %v1761_v42 = vmul.f32 %v4968_v26, %v1760_v31  ;;  %v4743_v31 = vld [vmem:[%s5147_s29 + $0xb8] sm:$0xff] }
 0x640   : > { %v5627_v44 = vpack.c.bf16 %v5623_v46, %v5621_v58  ;;  %v4755_v48 = vld [vmem:[%s5147_s29 + $0x118] sm:$0xff] }
 0x641   : > { %v1765_v21 = vsel %vm1764_vm10, %v4968_v26, %v1761_v42  ;;  %v4133_v26 = vor.u32 %v4719_v55, %v4132_v60  ;;  %v4733_v42 = vld [vmem:[%s5147_s29 + $0x68] sm:$0xff] }
 0x642   : > { %4138 = vmatmul.msk.bf16.vlgmr.msrb.gmra.mxu3 %vm749_vm2, %v5627_v44  ;;  %4140 = vmatmul.msk.bf16.vlgmr.msra.gmra.mxu0 %vm749_vm2, %v5627_v44  ;;  %v1768_v62 = vmul.f32 %v1765_v21, %v5555_v57  ;;  %v4116_v57 = vld [vmem:[%s5135_s20 + $0xa8] sm:$0xf] }
 0x643   : > { %4142 = vmatmul.msk.bf16.vlgmr.msrb.gmra.mxu2 %vm749_vm2, %v5627_v44  ;;  %4144 = vmatmul.msk.bf16.vlgmr.msra.gmra.mxu1 %vm749_vm2, %v5627_v44  ;;  %v4117_v3 = vor.u32 %v4717_v63, %v4116_v57  ;;  %v4749_v21 = vld [vmem:[%s5147_s29 + $0xe8] sm:$0xff]  ;;  %v4731_v63 = vld [vmem:[%s5147_s29 + $0x58] sm:$0xff] }
 0x644   : > { %2169 = vmatpush.bf16.msrb.mxu3 %v4109_v0  ;;  %v1775_v4 = vmul.f32 %v4892_v17, %v1768_v62  ;;  %2187 = vmatpush.bf16.msra.mxu0 %v4113_v49  ;;  %v4693_v17 = vld [vmem:[%s5135_s20 + $0x2c] sm:$0xf]  ;;  %v4732_v62 = vld [vmem:[%s5147_s29 + $0x60] sm:$0xff]  ;;  %v4723_v49 = vld [vmem:[%s5147_s29 + $0x18] sm:$0xff] }
 0x645   : > { %2205 = vmatpush.bf16.msrb.mxu2 %v4117_v3  ;;  %2223 = vmatpush.bf16.msra.mxu1 %v4121_v7  ;;  %v4057_v30 = vor.u32 %v4693_v17, %v4054_v19  ;;  %v4748_v0 = vld [vmem:[%s5147_s29 + $0xe0] sm:$0xff]  ;;  %v4741_v57 = vld [vmem:[%s5147_s29 + $0xa8] sm:$0xff]  ;;  %v4739_v7 = vld [vmem:[%s5147_s29 + $0x98] sm:$0xff] }
 0x646   : > { %v5640_v41 = vadd.f32 %v4893_v50, %v1775_v4  ;;  %v4735_v50 = vld [vmem:[%s5147_s29 + $0x78] sm:$0xff]  ;;  %v4725_v4 = vld [vmem:[%s5147_s29 + $0x28] sm:$0xff]  ;;  %v4724_v3 = vld [vmem:[%s5147_s29 + $0x20] sm:$0xff] }
 0x647   : > { %v4720_v17 = vld [vmem:[%s5147_s29] sm:$0xff]  ;;  %v4765_v60 = vld [vmem:[%s5147_s29 + $0x168] sm:$0xff] }
 0x648   : > { %v5644_v1 = vpack.c.bf16 %v5640_v41, %v5640_v41  ;;  %2170 = vmatpush.bf16.msrb.mxu3 %v4045_v52  ;;  %2188 = vmatpush.bf16.msra.mxu0 %v4049_v15  ;;  %v4728_v52 = vld [vmem:[%s5147_s29 + $0x40] sm:$0xff]  ;;  %v4767_v15 = vld [vmem:[%s5147_s29 + $0x178] sm:$0xff]  ;;  %v4781_v55 = vld [vmem:[%s5147_s29 + $0x1e8] sm:$0xff] }
 0x649   : > { %2206 = vmatpush.bf16.msrb.mxu2 %v4053_v6  ;;  %2224 = vmatpush.bf16.msra.mxu1 %v4057_v30  ;;  %v4783_v6 = vld [vmem:[%s5147_s29 + $0x1f8] sm:$0xff]  ;;  %v4736_v19 = vld [vmem:[%s5147_s29 + $0x80] sm:$0xff]  ;;  %v4766_v30 = vld [vmem:[%s5147_s29 + $0x170] sm:$0xff] }
 0x652   : > { %4139 = vmatmul.msk.bf16.gmra.mxu3 %vm749_vm2, %v5644_v1  ;;  %4141 = vmatmul.msk.bf16.gmra.mxu0 %vm749_vm2, %v5644_v1 }
 0x653   : > { %4143 = vmatmul.msk.bf16.gmra.mxu2 %vm749_vm2, %v5644_v1  ;;  %4145 = vmatmul.msk.bf16.gmra.mxu1 %vm749_vm2, %v5644_v1 }
 0x662   : > { %4146 = vmatmul.msk.bf16.vlgmr.msra.gmra.mxu3 %vm749_vm2, %v5627_v44  ;;  %4148 = vmatmul.msk.bf16.vlgmr.msrb.gmra.mxu0 %vm749_vm2, %v5627_v44 }
 0x663   : > { %4150 = vmatmul.msk.bf16.vlgmr.msra.gmra.mxu2 %vm749_vm2, %v5627_v44  ;;  %4152 = vmatmul.msk.bf16.vlgmr.msrb.gmra.mxu1 %vm749_vm2, %v5627_v44 }
 0x664   : > { %2241 = vmatpush.bf16.msra.mxu3 %v4125_v32  ;;  %2277 = vmatpush.bf16.msra.mxu2 %v4133_v26  ;;  %v4775_v32 = vld [vmem:[%s5147_s29 + $0x1b8] sm:$0xff]  ;;  %v4764_v26 = vld [vmem:[%s5147_s29 + $0x160] sm:$0xff] }
 0x665   : > { %2259 = vmatpush.bf16.msrb.mxu0 %v4129_v29  ;;  %2295 = vmatpush.bf16.msrb.mxu1 %v4137_v33  ;;  %v5779_v29 = vld [vmem:[%s5141_s25] sm:$0xff] }
 0x666   : > { %v5786_v9 = vperm.slane %v5779_v29, 1  ;;  %v5789_v43 = vperm.slane %v5779_v29, 3 }
 0x668   : > { %2242 = vmatpush.bf16.msra.mxu3 %v4061_v39  ;;  %2278 = vmatpush.bf16.msra.mxu2 %v4069_v45  ;;  %v4756_v39 = vld [vmem:[%s5147_s29 + $0x120] sm:$0xff]  ;;  %v4778_v45 = vld [vmem:[%s5147_s29 + $0x1d0] sm:$0xff] }
 0x669   : > { %2260 = vmatpush.bf16.msrb.mxu0 %v4065_v18  ;;  %2296 = vmatpush.bf16.msrb.mxu1 %v4073_v24  ;;  %v4762_v18 = vld [vmem:[%s5147_s29 + $0x150] sm:$0xff]  ;;  %v4771_v24 = vld [vmem:[%s5147_s29 + $0x198] sm:$0xff] }
 0x672   : > { %4147 = vmatmul.msk.bf16.gmra.mxu3 %vm749_vm2, %v5644_v1  ;;  %4149 = vmatmul.msk.bf16.gmra.mxu0 %vm749_vm2, %v5644_v1 }
 0x673   : > { %4151 = vmatmul.msk.bf16.gmra.mxu2 %vm749_vm2, %v5644_v1  ;;  %4153 = vmatmul.msk.bf16.gmra.mxu1 %vm749_vm2, %v5644_v1 }
 0x682   : > { %4154 = vmatmul.msk.bf16.vlgmr.msrb.gmra.mxu3 %vm749_vm2, %v5627_v44  ;;  %4156 = vmatmul.msk.bf16.vlgmr.msra.gmra.mxu0 %vm749_vm2, %v5627_v44 }
 0x683   : > { %4158 = vmatmul.msk.bf16.vlgmr.msrb.gmra.mxu2 %vm749_vm2, %v5627_v44  ;;  %4160 = vmatmul.msk.bf16.vlgmr.msra.gmra.mxu1 %vm749_vm2, %v5627_v44 }
 0x684   : > { %3433 = vmatpush.bf16.msra.mxu0 %v4735_v50  ;;  %3469 = vmatpush.bf16.msra.mxu1 %v4751_v23 }
 0x685   : > { %3415 = vmatpush.bf16.msrb.mxu3 %v4727_v54  ;;  %3451 = vmatpush.bf16.msrb.mxu2 %v4743_v31  ;;  %v4761_v54 = vld [vmem:[%s5147_s29 + $0x148] sm:$0xff] }
 0x686   : > { %v4777_v31 = vld [vmem:[%s5147_s29 + $0x1c8] sm:$0xff] }
 0x688   : > { %3434 = vmatpush.bf16.msra.mxu0 %v4734_v51  ;;  %3470 = vmatpush.bf16.msra.mxu1 %v4750_v53 }
 0x689   : > { %3416 = vmatpush.bf16.msrb.mxu3 %v4726_v61  ;;  %3452 = vmatpush.bf16.msrb.mxu2 %v4742_v59  ;;  %v5804_v59 = vperm.slane %v5779_v29, 2 }
 0x68c   : > { %3435 = vmatpush.bf16.msra.mxu0 %v4733_v42  ;;  %3471 = vmatpush.bf16.msra.mxu1 %v4749_v21  ;;  %v5800_v42 = vperm.slane %v5779_v29, 0 }
 0x68d   : > { %3417 = vmatpush.bf16.msrb.mxu3 %v4725_v4  ;;  %3453 = vmatpush.bf16.msrb.mxu2 %v4741_v57  ;;  %v4770_v4 = vld [vmem:[%s5147_s29 + $0x190] sm:$0xff] }
 0x690   : > { %3436 = vmatpush.bf16.msra.mxu0 %v4732_v62  ;;  %3472 = vmatpush.bf16.msra.mxu1 %v4748_v0  ;;  %v4754_v0 = vld [vmem:[%s5147_s29 + $0x110] sm:$0xff] }
 0x691   : > { %3418 = vmatpush.bf16.msrb.mxu3 %v4724_v3  ;;  %3454 = vmatpush.bf16.msrb.mxu2 %v4740_v56  ;;  %v4760_v56 = vld [vmem:[%s5147_s29 + $0x140] sm:$0xff] }
 0x692   : > { %4155 = vmatmul.msk.bf16.gmra.mxu3 %vm749_vm2, %v5644_v1  ;;  %4157 = vmatmul.msk.bf16.gmra.mxu0 %vm749_vm2, %v5644_v1 }
 0x693   : > { %4159 = vmatmul.msk.bf16.gmra.mxu2 %vm749_vm2, %v5644_v1  ;;  %4161 = vmatmul.msk.bf16.gmra.mxu1 %vm749_vm2, %v5644_v1 }
 0x694   : > { %3437 = vmatpush.bf16.msra.mxu0 %v4731_v63  ;;  %3473 = vmatpush.bf16.msra.mxu1 %v4747_v2 }
 0x695   : > { %3419 = vmatpush.bf16.msrb.mxu3 %v4723_v49  ;;  %3455 = vmatpush.bf16.msrb.mxu2 %v4739_v7 }
 0x698   : > { %3438 = vmatpush.bf16.msra.mxu0 %v4730_v16  ;;  %3474 = vmatpush.bf16.msra.mxu1 %v4746_v5  ;;  %v4776_v16 = vld [vmem:[%s5147_s29 + $0x1c0] sm:$0xff] }
 0x699   : > { %3456 = vmatpush.bf16.msrb.mxu2 %v4738_v34  ;;  %v4769_v34 = vld [vmem:[%s5147_s29 + $0x188] sm:$0xff] }
 0x69c   : > { %3439 = vmatpush.bf16.msra.mxu0 %v4729_v8  ;;  %3475 = vmatpush.bf16.msra.mxu1 %v4745_v11 }
 0x69d   : > { %3457 = vmatpush.bf16.msrb.mxu2 %v4737_v14 }
 0x6a0   : > { %3440 = vmatpush.bf16.msra.mxu0 %v4728_v52  ;;  %3476 = vmatpush.bf16.msra.mxu1 %v4744_v13 }
 0x6a1   : > { %3458 = vmatpush.bf16.msrb.mxu2 %v4736_v19 }
 0x6a2   : > { %4162 = vmatmul.msk.bf16.vlgmr.msra.gmra.mxu3 %vm749_vm2, %v5627_v44  ;;  %4164 = vmatmul.msk.bf16.vlgmr.msrb.gmra.mxu0 %vm749_vm2, %v5627_v44 }
 0x6a3   : > { %4166 = vmatmul.msk.bf16.vlgmr.msra.gmra.mxu2 %vm749_vm2, %v5627_v44  ;;  %4168 = vmatmul.msk.bf16.vlgmr.msrb.gmra.mxu1 %vm749_vm2, %v5627_v44  ;;  %v4722_v44 = vld [vmem:[%s5147_s29 + $0x10] sm:$0xff] }
 0x6a4   : > { %3420 = vmatpush.bf16.msrb.mxu3 %v4722_v44  ;;  %3505 = vmatpush.bf16.msrb.mxu0 %v4767_v15  ;;  %v4753_v44 = vld [vmem:[%s5147_s29 + $0x108] sm:$0xff]  ;;  %v4799_v15 = vld [vmem:[%s5147_s29 + $0x278] sm:$0xff] }
 0x6a5   : > { %3541 = vmatpush.bf16.msrb.mxu1 %v4783_v6  ;;  %3523 = vmatpush.bf16.msra.mxu2 %v4775_v32  ;;  %v4815_v6 = vld [vmem:[%s5147_s29 + $0x2f8] sm:$0xff]  ;;  %v4752_v32 = vld [vmem:[%s5147_s29 + $0x100] sm:$0xff] }
 0x6a8   : > { %3421 = vmatpush.bf16.msrb.mxu3 %v4721_v12  ;;  %3506 = vmatpush.bf16.msrb.mxu0 %v4766_v30 }
 0x6a9   : > { %3542 = vmatpush.bf16.msrb.mxu1 %v4782_v20  ;;  %3524 = vmatpush.bf16.msra.mxu2 %v4774_v25  ;;  %v4798_v25 = vld [vmem:[%s5147_s29 + $0x270] sm:$0xff] }
 0x6ac   : > { %3422 = vmatpush.bf16.msrb.mxu3 %v4720_v17  ;;  %3507 = vmatpush.bf16.msrb.mxu0 %v4765_v60  ;;  %v4768_v60 = vld [vmem:[%s5147_s29 + $0x180] sm:$0xff] }
 0x6ad   : > { %3543 = vmatpush.bf16.msrb.mxu1 %v4781_v55  ;;  %3525 = vmatpush.bf16.msra.mxu2 %v4773_v22 }
 0x6b0   : > { %3487 = vmatpush.bf16.msra.mxu3 %v4759_v10  ;;  %3508 = vmatpush.bf16.msrb.mxu0 %v4764_v26  ;;  %v4814_v26 = vld [vmem:[%s5147_s29 + $0x2f0] sm:$0xff] }
 0x6b1   : > { %3544 = vmatpush.bf16.msrb.mxu1 %v4780_v27  ;;  %3526 = vmatpush.bf16.msra.mxu2 %v4772_v37  ;;  %v4813_v37 = vld [vmem:[%s5147_s29 + $0x2e8] sm:$0xff] }
 0x6b2   : > { %4163 = vmatmul.msk.bf16.gmra.mxu3 %vm749_vm2, %v5644_v1  ;;  %4165 = vmatmul.msk.bf16.gmra.mxu0 %vm749_vm2, %v5644_v1 }
 0x6b3   : > { %4167 = vmatmul.msk.bf16.gmra.mxu2 %vm749_vm2, %v5644_v1  ;;  %4169 = vmatmul.msk.bf16.gmra.mxu1 %vm749_vm2, %v5644_v1  ;;  %v4758_v1 = vld [vmem:[%s5147_s29 + $0x130] sm:$0xff] }
 0x6b4   : > { %3488 = vmatpush.bf16.msra.mxu3 %v4758_v1  ;;  %3509 = vmatpush.bf16.msrb.mxu0 %v4763_v35  ;;  %v4807_v35 = vld [vmem:[%s5147_s29 + $0x2b8] sm:$0xff] }
 0x6b5   : > { %3545 = vmatpush.bf16.msrb.mxu1 %v4779_v36  ;;  %3527 = vmatpush.bf16.msra.mxu2 %v4771_v24 }
 0x6b8   : > { %3489 = vmatpush.bf16.msra.mxu3 %v4757_v28  ;;  %3510 = vmatpush.bf16.msrb.mxu0 %v4762_v18 }
 0x6b9   : > { %3546 = vmatpush.bf16.msrb.mxu1 %v4778_v45  ;;  %3528 = vmatpush.bf16.msra.mxu2 %v4770_v4  ;;  %v4790_v45 = vld [vmem:[%s5147_s29 + $0x230] sm:$0xff]  ;;  %v4811_v4 = vld [vmem:[%s5147_s29 + $0x2d8] sm:$0xff] }
 0x6bc   : > { %3490 = vmatpush.bf16.msra.mxu3 %v4756_v39  ;;  %3511 = vmatpush.bf16.msrb.mxu0 %v4761_v54  ;;  %v4797_v39 = vld [vmem:[%s5147_s29 + $0x268] sm:$0xff] }
 0x6bd   : > { %3547 = vmatpush.bf16.msrb.mxu1 %v4777_v31  ;;  %3529 = vmatpush.bf16.msra.mxu2 %v4769_v34  ;;  %v4789_v31 = vld [vmem:[%s5147_s29 + $0x228] sm:$0xff] }
 0x6bf   : > { %v2046_v33 = vpop.f32.mrf.mxu0 }
 0x6c0   : > { %v2082_v38 = vpop.f32.mrf.mxu1  ;;  %v2047_v50 = vadd.f32 %v2046_v33, %v5786_v9  ;;  %3491 = vmatpush.bf16.msra.mxu3 %v4755_v48  ;;  %3512 = vmatpush.bf16.msrb.mxu0 %v4760_v56  ;;  %v4791_v33 = vld [vmem:[%s5147_s29 + $0x238] sm:$0xff]  ;;  %v5842_v56 = vperm.slane %v5779_v29, 5 }
 0x6c1   : > { %v2083_v51 = vadd.f32 %v2082_v38, %v5789_v43  ;;  %3548 = vmatpush.bf16.msrb.mxu1 %v4776_v16  ;;  %3530 = vmatpush.bf16.msra.mxu2 %v4768_v60 }
 0x6c2   : > { %v2308_v57 = vmax.f32 %v2047_v50, 0.0  ;;  %v4796_v50 = vld [vmem:[%s5147_s29 + $0x260] sm:$0xff] }
 0x6c3   : > { %v2310_v2 = vmax.f32 %v2083_v51, 0.0 }
 0x6c4   : > { %3492 = vmatpush.bf16.msra.mxu3 %v4754_v0  ;;  %v4795_v0 = vld [vmem:[%s5147_s29 + $0x258] sm:$0xff] }
 0x6c5   : > { %v2028_v40 = vpop.f32.mrf.mxu3 }
 0x6c6   : > { %v2064_v23 = vpop.f32.mrf.mxu2  ;;  %v2029_v5 = vadd.f32 %v2028_v40, %v5800_v42  ;;  %v4806_v40 = vld [vmem:[%s5147_s29 + $0x2b0] sm:$0xff] }
 0x6c7   : > { %v2048_v53 = vpop.f32.mrf.mxu0  ;;  %v2065_v7 = vadd.f32 %v2064_v23, %v5804_v59  ;;  %v4812_v23 = vld [vmem:[%s5147_s29 + $0x2e0] sm:$0xff] }
 0x6c8   : > { %v2049_v21 = vadd.f32 %v2048_v53, %v5786_v9  ;;  %v2084_v61 = vpop.f32.mrf.mxu1  ;;  %3493 = vmatpush.bf16.msra.mxu3 %v4753_v44  ;;  %v2307_v17 = vmax.f32 %v2029_v5, 0.0  ;;  %v5845_v5 = vperm.slane %v5779_v29, 7  ;;  %v4803_v44 = vld [vmem:[%s5147_s29 + $0x298] sm:$0xff] }
 0x6c9   : > { %v2085_v62 = vadd.f32 %v2084_v61, %v5789_v43  ;;  %v2309_v20 = vmax.f32 %v2065_v7, 0.0  ;;  %v4810_v7 = vld [vmem:[%s5147_s29 + $0x2d0] sm:$0xff] }
 0x6ca   : > { %v2324_v63 = vmax.f32 %v2049_v21, 0.0  ;;  %v4805_v21 = vld [vmem:[%s5147_s29 + $0x2a8] sm:$0xff] }
 0x6cb   : > { %v2326_v3 = vmax.f32 %v2085_v62, 0.0 }
 0x6cc   : > { %v2356_v49 = vpack.c.bf16 %v2324_v63, %v2308_v57  ;;  %3494 = vmatpush.bf16.msra.mxu3 %v4752_v32  ;;  %v4788_v63 = vld [vmem:[%s5147_s29 + $0x220] sm:$0xff]  ;;  %v4802_v32 = vld [vmem:[%s5147_s29 + $0x290] sm:$0xff] }
 0x6cd   : > { %v2358_v8 = vpack.c.bf16 %v2326_v3, %v2310_v2  ;;  %v2030_v11 = vpop.f32.mrf.mxu3  ;;  %v4804_v2 = vld [vmem:[%s5147_s29 + $0x2a0] sm:$0xff] }
 0x6ce   : > { %v2031_v52 = vadd.f32 %v2030_v11, %v5800_v42  ;;  %v2066_v13 = vpop.f32.mrf.mxu2  ;;  %3441 = vmatmul.bf16.vlgmr.msra.gmra.mxu0 %v2356_v49  ;;  %v4794_v49 = vld [vmem:[%s5147_s29 + $0x250] sm:$0xff]  ;;  %v4787_v11 = vld [vmem:[%s5147_s29 + $0x218] sm:$0xff] }
 0x6cf   : > { %v2067_v12 = vadd.f32 %v2066_v13, %v5804_v59  ;;  %3477 = vmatmul.bf16.vlgmr.msra.gmra.mxu1 %v2358_v8  ;;  %v2051_v14 = vpop.f32.mrf.mxu0  ;;  %3577 = vmatpush.bf16.msra.mxu0 %v4799_v15  ;;  %v4809_v15 = vld [vmem:[%s5147_s29 + $0x2c8] sm:$0xff] }
 0x6d0   : > { %v2323_v19 = vmax.f32 %v2031_v52, 0.0  ;;  %v2087_v30 = vpop.f32.mrf.mxu1  ;;  %3613 = vmatpush.bf16.msra.mxu1 %v4815_v6  ;;  %v2052_v27 = vadd.f32 %v2051_v14, %v5786_v9  ;;  %v4793_v14 = vld [vmem:[%s5147_s29 + $0x248] sm:$0xff]  ;;  %v5856_v6 = vperm.slane %v5779_v29, 4 }
 0x6d1   : > { %v2325_v10 = vmax.f32 %v2067_v12, 0.0  ;;  %v2088_v28 = vadd.f32 %v2087_v30, %v5789_v43  ;;  %v5860_v30 = vperm.slane %v5779_v29, 6 }
 0x6d2   : > { %v2355_v55 = vpack.c.bf16 %v2323_v19, %v2307_v17  ;;  %v2340_v9 = vmax.f32 %v2052_v27, 0.0  ;;  %v4808_v27 = vld [vmem:[%s5147_s29 + $0x2c0] sm:$0xff] }
 0x6d3   : > { %v2357_v1 = vpack.c.bf16 %v2325_v10, %v2309_v20  ;;  %3578 = vmatpush.bf16.msra.mxu0 %v4798_v25  ;;  %v2342_v43 = vmax.f32 %v2088_v28, 0.0  ;;  %v4786_v10 = vld [vmem:[%s5147_s29 + $0x210] sm:$0xff] }
 0x6d4   : > { %3423 = vmatmul.bf16.vlgmr.msrb.gmra.mxu3 %v2355_v55  ;;  %3614 = vmatpush.bf16.msra.mxu1 %v4814_v26  ;;  %v2372_v51 = vpack.c.bf16 %v2340_v9, %v2340_v9  ;;  %v4792_v26 = vld [vmem:[%s5147_s29 + $0x240] sm:$0xff] }
 0x6d5   : > { %3459 = vmatmul.bf16.vlgmr.msrb.gmra.mxu2 %v2357_v1  ;;  %v2033_v22 = vpop.f32.mrf.mxu3  ;;  %3559 = vmatpush.bf16.msrb.mxu3 %v4791_v33  ;;  %v2374_v53 = vpack.c.bf16 %v2342_v43, %v2342_v43  ;;  %v4831_v43 = vld [vmem:[%s5147_s29 + $0x378] sm:$0xff] }
 0x6d6   : > { %v2069_v36 = vpop.f32.mrf.mxu2  ;;  %3595 = vmatpush.bf16.msrb.mxu2 %v4807_v35  ;;  %v2034_v48 = vadd.f32 %v2033_v22, %v5800_v42 }
 0x6d7   : > { %v2053_v38 = vpop.f32.mrf.mxu0  ;;  %3579 = vmatpush.bf16.msra.mxu0 %v4797_v39  ;;  %v2070_v24 = vadd.f32 %v2069_v36, %v5804_v59  ;;  %v4785_v36 = vld [vmem:[%s5147_s29 + $0x208] sm:$0xff] }
 0x6d8   : > { %v2089_v18 = vpop.f32.mrf.mxu1  ;;  %3615 = vmatpush.bf16.msra.mxu1 %v4813_v37  ;;  %v2339_v61 = vmax.f32 %v2034_v48, 0.0  ;;  %v4801_v38 = vld [vmem:[%s5147_s29 + $0x288] sm:$0xff] }
 0x6d9   : > { %3560 = vmatpush.bf16.msrb.mxu3 %v4790_v45  ;;  %v2341_v42 = vmax.f32 %v2070_v24, 0.0  ;;  %v4847_v45 = vld [vmem:[%s5147_s29 + $0x3f8] sm:$0xff] }
 0x6da   : > { %3596 = vmatpush.bf16.msrb.mxu2 %v4806_v40  ;;  %v2371_v3 = vpack.c.bf16 %v2339_v61, %v2339_v61  ;;  %v4846_v61 = vld [vmem:[%s5147_s29 + $0x3f0] sm:$0xff] }
 0x6db   : > { %3580 = vmatpush.bf16.msra.mxu0 %v4796_v50  ;;  %v2373_v16 = vpack.c.bf16 %v2341_v42, %v2341_v42 }
 0x6dc   : > { %3616 = vmatpush.bf16.msra.mxu1 %v4812_v23 }
 0x6dd   : > { %v2035_v54 = vpop.f32.mrf.mxu3  ;;  %3561 = vmatpush.bf16.msrb.mxu3 %v4789_v31 }
 0x6de   : > { %v2071_v62 = vpop.f32.mrf.mxu2  ;;  %3446 = vmatmul.bf16.gmra.mxu0 %v2372_v51  ;;  %3597 = vmatpush.bf16.msrb.mxu2 %v4805_v21  ;;  %v4784_v51 = vld [vmem:[%s5147_s29 + $0x200] sm:$0xff]  ;;  %v4830_v21 = vld [vmem:[%s5147_s29 + $0x370] sm:$0xff] }
 0x6df   : > { %3482 = vmatmul.bf16.gmra.mxu1 %v2374_v53  ;;  %v2118_v59 = vpop.f32.mrf.mxu0  ;;  %3581 = vmatpush.bf16.msra.mxu0 %v4795_v0  ;;  %v4800_v53 = vld [vmem:[%s5147_s29 + $0x280] sm:$0xff]  ;;  %v4823_v0 = vld [vmem:[%s5147_s29 + $0x338] sm:$0xff] }
 0x6e0   : > { %v2154_v57 = vpop.f32.mrf.mxu1  ;;  %3617 = vmatpush.bf16.msra.mxu1 %v4811_v4  ;;  %v2119_v34 = vadd.f32 %v2118_v59, %v5842_v56  ;;  %v4839_v4 = vld [vmem:[%s5147_s29 + $0x3b8] sm:$0xff] }
 0x6e1   : > { %3562 = vmatpush.bf16.msrb.mxu3 %v4788_v63  ;;  %v2155_v13 = vadd.f32 %v2154_v57, %v5845_v5 }
 0x6e2   : > { %3598 = vmatpush.bf16.msrb.mxu2 %v4804_v2  ;;  %v2312_v60 = vmax.f32 %v2119_v34, 0.0  ;;  %v4829_v2 = vld [vmem:[%s5147_s29 + $0x368] sm:$0xff]  ;;  %v4844_v34 = vld [vmem:[%s5147_s29 + $0x3e0] sm:$0xff] }
 0x6e3   : > { %3582 = vmatpush.bf16.msra.mxu0 %v4794_v49  ;;  %v2314_v1 = vmax.f32 %v2155_v13, 0.0  ;;  %v4822_v49 = vld [vmem:[%s5147_s29 + $0x330] sm:$0xff] }
 0x6e4   : > { %3428 = vmatmul.bf16.gmra.mxu3 %v2371_v3  ;;  %3618 = vmatpush.bf16.msra.mxu1 %v4810_v7  ;;  %v4845_v3 = vld [vmem:[%s5147_s29 + $0x3e8] sm:$0xff]  ;;  %v4838_v7 = vld [vmem:[%s5147_s29 + $0x3b0] sm:$0xff] }
 0x6e5   : > { %3464 = vmatmul.bf16.gmra.mxu2 %v2373_v16  ;;  %v2100_v8 = vpop.f32.mrf.mxu3  ;;  %3563 = vmatpush.bf16.msrb.mxu3 %v4787_v11 }
 0x6e6   : > { %v2136_v52 = vpop.f32.mrf.mxu2  ;;  %3599 = vmatpush.bf16.msrb.mxu2 %v4803_v44  ;;  %v2101_v28 = vadd.f32 %v2100_v8, %v5856_v6  ;;  %v4828_v44 = vld [vmem:[%s5147_s29 + $0x360] sm:$0xff] }
 0x6e7   : > { %v2120_v12 = vpop.f32.mrf.mxu0  ;;  %3583 = vmatpush.bf16.msra.mxu0 %v4793_v14  ;;  %v2137_v29 = vadd.f32 %v2136_v52, %v5860_v30  ;;  %v4821_v14 = vld [vmem:[%s5147_s29 + $0x328] sm:$0xff] }
 0x6e8   : > { %v2121_v17 = vadd.f32 %v2120_v12, %v5842_v56  ;;  %v2156_v19 = vpop.f32.mrf.mxu1  ;;  %3619 = vmatpush.bf16.msra.mxu1 %v4809_v15  ;;  %v2311_v40 = vmax.f32 %v2101_v28, 0.0  ;;  %v4837_v15 = vld [vmem:[%s5147_s29 + $0x3a8] sm:$0xff] }
 0x6e9   : > { %v2157_v20 = vadd.f32 %v2156_v19, %v5845_v5  ;;  %3564 = vmatpush.bf16.msrb.mxu3 %v4786_v10  ;;  %v2313_v50 = vmax.f32 %v2137_v29, 0.0  ;;  %v4827_v10 = vld [vmem:[%s5147_s29 + $0x358] sm:$0xff]  ;;  %v4842_v29 = vld [vmem:[%s5147_s29 + $0x3d0] sm:$0xff] }
 0x6ea   : > { %v2328_v55 = vmax.f32 %v2121_v17, 0.0  ;;  %3600 = vmatpush.bf16.msrb.mxu2 %v4802_v32  ;;  %v4843_v32 = vld [vmem:[%s5147_s29 + $0x3d8] sm:$0xff] }
 0x6eb   : > { %v2330_v25 = vmax.f32 %v2157_v20, 0.0  ;;  %3584 = vmatpush.bf16.msra.mxu0 %v4792_v26 }
 0x6ec   : > { %v2360_v22 = vpack.c.bf16 %v2328_v55, %v2312_v60  ;;  %3620 = vmatpush.bf16.msra.mxu1 %v4808_v27  ;;  %v4820_v55 = vld [vmem:[%s5147_s29 + $0x320] sm:$0xff] }
 0x6ed   : > { %v2362_v33 = vpack.c.bf16 %v2330_v25, %v2314_v1  ;;  %v2102_v35 = vpop.f32.mrf.mxu3  ;;  %3565 = vmatpush.bf16.msrb.mxu3 %v4785_v36  ;;  %v4836_v1 = vld [vmem:[%s5147_s29 + $0x3a0] sm:$0xff]  ;;  %v4835_v36 = vld [vmem:[%s5147_s29 + $0x398] sm:$0xff] }
 0x6ee   : > { %v2103_v39 = vadd.f32 %v2102_v35, %v5856_v6  ;;  %v2138_v37 = vpop.f32.mrf.mxu2  ;;  %3513 = vmatmul.bf16.vlgmr.msrb.gmra.mxu0 %v2360_v22  ;;  %3601 = vmatpush.bf16.msrb.mxu2 %v4801_v38  ;;  %v4826_v22 = vld [vmem:[%s5147_s29 + $0x350] sm:$0xff]  ;;  %v4819_v35 = vld [vmem:[%s5147_s29 + $0x318] sm:$0xff] }
 0x6ef   : > { %v2139_v9 = vadd.f32 %v2138_v37, %v5860_v30  ;;  %3549 = vmatmul.bf16.vlgmr.msrb.gmra.mxu1 %v2362_v33  ;;  %v2123_v18 = vpop.f32.mrf.mxu0  ;;  %3649 = vmatpush.bf16.msrb.mxu0 %v4831_v43  ;;  %v4841_v43 = vld [vmem:[%s5147_s29 + $0x3c8] sm:$0xff] }
 0x6f0   : > { %v2327_v48 = vmax.f32 %v2103_v39, 0.0  ;;  %v2159_v24 = vpop.f32.mrf.mxu1  ;;  %3685 = vmatpush.bf16.msrb.mxu1 %v4847_v45  ;;  %v2124_v62 = vadd.f32 %v2123_v18, %v5842_v56  ;;  %v4825_v18 = vld [vmem:[%s5147_s29 + $0x348] sm:$0xff] }
 0x6f1   : > { %v2329_v23 = vmax.f32 %v2139_v9, 0.0  ;;  %3566 = vmatpush.bf16.msrb.mxu3 %v4784_v51  ;;  %v2160_v42 = vadd.f32 %v2159_v24, %v5845_v5  ;;  %v4834_v51 = vld [vmem:[%s5147_s29 + $0x390] sm:$0xff] }
 0x6f2   : > { %v2359_v54 = vpack.c.bf16 %v2327_v48, %v2311_v40  ;;  %3602 = vmatpush.bf16.msrb.mxu2 %v4800_v53  ;;  %v2344_v56 = vmax.f32 %v2124_v62, 0.0  ;;  %v4840_v62 = vld [vmem:[%s5147_s29 + $0x3c0] sm:$0xff] }
 0x6f3   : > { %v2361_v31 = vpack.c.bf16 %v2329_v23, %v2313_v50  ;;  %3650 = vmatpush.bf16.msrb.mxu0 %v4830_v21  ;;  %v2346_v5 = vmax.f32 %v2160_v42, 0.0  ;;  %v4818_v23 = vld [vmem:[%s5147_s29 + $0x310] sm:$0xff] }
 0x6f4   : > { %3495 = vmatmul.bf16.vlgmr.msra.gmra.mxu3 %v2359_v54  ;;  %3686 = vmatpush.bf16.msrb.mxu1 %v4846_v61  ;;  %v2376_v52 = vpack.c.bf16 %v2344_v56, %v2344_v56  ;;  %v4824_v61 = vld [vmem:[%s5147_s29 + $0x340] sm:$0xff] }
 0x6f5   : > { %3531 = vmatmul.bf16.vlgmr.msra.gmra.mxu2 %v2361_v31  ;;  %v2105_v59 = vpop.f32.mrf.mxu3  ;;  %3631 = vmatpush.bf16.msra.mxu3 %v4823_v0  ;;  %v2378_v13 = vpack.c.bf16 %v2346_v5, %v2346_v5 }
 0x6f6   : > { %v2141_v57 = vpop.f32.mrf.mxu2  ;;  %3667 = vmatpush.bf16.msra.mxu2 %v4839_v4  ;;  %v2106_v8 = vadd.f32 %v2105_v59, %v5856_v6 }
 0x6f7   : > { %v2125_v63 = vpop.f32.mrf.mxu0  ;;  %3651 = vmatpush.bf16.msrb.mxu0 %v4829_v2  ;;  %v2142_v11 = vadd.f32 %v2141_v57, %v5860_v30  ;;  %v5894_v30 = vld [vmem:[%s5141_s25 + $0x8] sm:$0xff] }
 0x6f8   : > { %v2161_v16 = vpop.f32.mrf.mxu1  ;;  %3687 = vmatpush.bf16.msrb.mxu1 %v4845_v3  ;;  %v2343_v17 = vmax.f32 %v2106_v8, 0.0  ;;  %v5901_v26 = vperm.slane %v5894_v30, 1  ;;  %v5904_v28 = vperm.slane %v5894_v30, 3  ;;  %v1829_v45 = vperm.slane %v5894_v30, 0  ;;  %v4817_v63 = vld [vmem:[%s5147_s29 + $0x308] sm:$0xff] }
 0x6f9   : > { %3632 = vmatpush.bf16.msra.mxu3 %v4822_v49  ;;  %v2345_v19 = vmax.f32 %v2142_v11, 0.0  ;;  %v1831_v24 = vperm.slane %v5894_v30, 2  ;;  %v4833_v2 = vld [vmem:[%s5147_s29 + $0x388] sm:$0xff] }
 0x6fa   : > { %3668 = vmatpush.bf16.msra.mxu2 %v4838_v7  ;;  %v2375_v25 = vpack.c.bf16 %v2343_v17, %v2343_v17 }
 0x6fb   : > { %3652 = vmatpush.bf16.msrb.mxu0 %v4828_v44  ;;  %v2377_v27 = vpack.c.bf16 %v2345_v19, %v2345_v19 }
 0x6fc   : > { %3688 = vmatpush.bf16.msrb.mxu1 %v4844_v34  ;;  %v4816_v34 = vld [vmem:[%s5147_s29 + $0x300] sm:$0xff] }
 0x6fd   : > { %v2107_v12 = vpop.f32.mrf.mxu3  ;;  %3633 = vmatpush.bf16.msra.mxu3 %v4821_v14 }
 0x6fe   : > { %v2143_v6 = vpop.f32.mrf.mxu2  ;;  %3518 = vmatmul.bf16.gmra.mxu0 %v2376_v52  ;;  %3669 = vmatpush.bf16.msra.mxu2 %v4837_v15  ;;  %v4832_v52 = vld [vmem:[%s5147_s29 + $0x380] sm:$0xff] }
 0x6ff   : > { %3554 = vmatmul.bf16.gmra.mxu1 %v2378_v13  ;;  %v2190_v20 = vpop.f32.mrf.mxu0  ;;  %3653 = vmatpush.bf16.msrb.mxu0 %v4827_v10 }
 0x700   : > { %v2226_v60 = vpop.f32.mrf.mxu1  ;;  %3689 = vmatpush.bf16.msrb.mxu1 %v4843_v32  ;;  %v2191_v38 = vadd.f32 %v2190_v20, %v5901_v26 }
 0x701   : > { %3634 = vmatpush.bf16.msra.mxu3 %v4820_v55  ;;  %v2227_v37 = vadd.f32 %v2226_v60, %v5904_v28 }
 0x702   : > { %3670 = vmatpush.bf16.msra.mxu2 %v4836_v1  ;;  %v2316_v53 = vmax.f32 %v2191_v38, 0.0 }
 0x703   : > { %3654 = vmatpush.bf16.msrb.mxu0 %v4826_v22  ;;  %v2318_v31 = vmax.f32 %v2227_v37, 0.0 }
 0x704   : > { %3500 = vmatmul.bf16.gmra.mxu3 %v2375_v25  ;;  %3690 = vmatpush.bf16.msrb.mxu1 %v4842_v29 }
 0x705   : > { %3536 = vmatmul.bf16.gmra.mxu2 %v2377_v27  ;;  %v2172_v33 = vpop.f32.mrf.mxu3  ;;  %3635 = vmatpush.bf16.msra.mxu3 %v4819_v35 }
 0x706   : > { %v2208_v39 = vpop.f32.mrf.mxu2  ;;  %3671 = vmatpush.bf16.msra.mxu2 %v4835_v36  ;;  %v2173_v42 = vadd.f32 %v2172_v33, %v1829_v45  ;;  %v1834_v36 = vperm.slane %v5894_v30, 5 }
 0x707   : > { %v2192_v9 = vpop.f32.mrf.mxu0  ;;  %3655 = vmatpush.bf16.msrb.mxu0 %v4825_v18  ;;  %v2209_v0 = vadd.f32 %v2208_v39, %v1831_v24  ;;  %v1836_v39 = vperm.slane %v5894_v30, 7 }
 0x708   : > { %v2193_v40 = vadd.f32 %v2192_v9, %v5901_v26  ;;  %v2228_v48 = vpop.f32.mrf.mxu1  ;;  %3691 = vmatpush.bf16.msrb.mxu1 %v4841_v43  ;;  %v2315_v49 = vmax.f32 %v2173_v42, 0.0 }
 0x709   : > { %v2229_v50 = vadd.f32 %v2228_v48, %v5904_v28  ;;  %3636 = vmatpush.bf16.msra.mxu3 %v4818_v23  ;;  %v2317_v11 = vmax.f32 %v2209_v0, 0.0 }
 0x70a   : > { %v2332_v54 = vmax.f32 %v2193_v40, 0.0  ;;  %3672 = vmatpush.bf16.msra.mxu2 %v4834_v51  ;;  %v1833_v40 = vperm.slane %v5894_v30, 4 }
 0x70b   : > { %v2334_v21 = vmax.f32 %v2229_v50, 0.0  ;;  %3656 = vmatpush.bf16.msrb.mxu0 %v4824_v61  ;;  %v1835_v50 = vperm.slane %v5894_v30, 6 }
 0x70c   : > { %v2364_v59 = vpack.c.bf16 %v2332_v54, %v2316_v53  ;;  %3692 = vmatpush.bf16.msrb.mxu1 %v4840_v62 }
 0x70d   : > { %v2366_v4 = vpack.c.bf16 %v2334_v21, %v2318_v31  ;;  %v2174_v57 = vpop.f32.mrf.mxu3  ;;  %3637 = vmatpush.bf16.msra.mxu3 %v4817_v63 }
 0x70e   : > { %v2175_v3 = vadd.f32 %v2174_v57, %v1829_v45  ;;  %v2210_v56 = vpop.f32.mrf.mxu2  ;;  %3585 = vmatmul.bf16.vlgmr.msra.gmra.mxu0 %v2364_v59  ;;  %3673 = vmatpush.bf16.msra.mxu2 %v4833_v2 }
 0x70f   : > { %v2211_v16 = vadd.f32 %v2210_v56, %v1831_v24  ;;  %3621 = vmatmul.bf16.vlgmr.msra.gmra.mxu1 %v2366_v4  ;;  %v2195_v5 = vpop.f32.mrf.mxu0 }
 0x710   : > { %v2331_v7 = vmax.f32 %v2175_v3, 0.0  ;;  %v2231_v8 = vpop.f32.mrf.mxu1  ;;  %v2196_v14 = vadd.f32 %v2195_v5, %v5901_v26 }
 0x711   : > { %v2333_v44 = vmax.f32 %v2211_v16, 0.0  ;;  %3638 = vmatpush.bf16.msra.mxu3 %v4816_v34  ;;  %v2232_v15 = vadd.f32 %v2231_v8, %v5904_v28 }
 0x712   : > { %v2363_v13 = vpack.c.bf16 %v2331_v7, %v2315_v49  ;;  %3674 = vmatpush.bf16.msra.mxu2 %v4832_v52  ;;  %v2348_v20 = vmax.f32 %v2196_v14, 0.0 }
 0x713   : > { %v2365_v12 = vpack.c.bf16 %v2333_v44, %v2317_v11  ;;  %v2350_v32 = vmax.f32 %v2232_v15, 0.0 }
 0x714   : > { %3567 = vmatmul.bf16.vlgmr.msrb.gmra.mxu3 %v2363_v13  ;;  %v2380_v1 = vpack.c.bf16 %v2348_v20, %v2348_v20 }
 0x715   : > { %3603 = vmatmul.bf16.vlgmr.msrb.gmra.mxu2 %v2365_v12  ;;  %v2177_v17 = vpop.f32.mrf.mxu3  ;;  %v2382_v25 = vpack.c.bf16 %v2350_v32, %v2350_v32 }
 0x716   : > { %v2213_v6 = vpop.f32.mrf.mxu2  ;;  %v2178_v60 = vadd.f32 %v2177_v17, %v1829_v45 }
 0x717   : > { %v2197_v19 = vpop.f32.mrf.mxu0  ;;  %v2214_v55 = vadd.f32 %v2213_v6, %v1831_v24 }
 0x718   : > { %v2233_v10 = vpop.f32.mrf.mxu1  ;;  %v2347_v22 = vmax.f32 %v2178_v60, 0.0 }
 0x719   : > { %v2349_v26 = vmax.f32 %v2214_v55, 0.0 }
 0x71a   : > { %v2379_v28 = vpack.c.bf16 %v2347_v22, %v2347_v22 }
 0x71b   : > { %v2381_v38 = vpack.c.bf16 %v2349_v26, %v2349_v26 }
 0x71d   : > { %v2179_v27 = vpop.f32.mrf.mxu3 }
 0x71e   : > { %v2215_v29 = vpop.f32.mrf.mxu2  ;;  %3590 = vmatmul.bf16.gmra.mxu0 %v2380_v1 }
 0x71f   : > { %3626 = vmatmul.bf16.gmra.mxu1 %v2382_v25  ;;  %v2262_v33 = vpop.f32.mrf.mxu0  ;;  %v4894_v29 = vld [vmem:[%s681_s24] ss:$0 sm:$0xff] }
 0x720   : > { %v2298_v35 = vpop.f32.mrf.mxu1  ;;  %v2263_v9 = vadd.f32 %v2262_v33, %v1834_v36 }
 0x721   : > { %v2299_v43 = vadd.f32 %v2298_v35, %v1836_v39 }
 0x722   : > { %v2320_v51 = vmax.f32 %v2263_v9, 0.0 }
 0x723   : > { %v2322_v54 = vmax.f32 %v2299_v43, 0.0 }
 0x724   : > { %3572 = vmatmul.bf16.gmra.mxu3 %v2379_v28 }
 0x725   : > { %3608 = vmatmul.bf16.gmra.mxu2 %v2381_v38  ;;  %v2244_v37 = vpop.f32.mrf.mxu3 }
 0x726   : > { %v2280_v18 = vpop.f32.mrf.mxu2  ;;  %v2245_v21 = vadd.f32 %v2244_v37, %v1833_v40 }
 0x727   : > { %v2264_v45 = vpop.f32.mrf.mxu0  ;;  %v2281_v62 = vadd.f32 %v2280_v18, %v1835_v50 }
 0x728   : > { %v2265_v48 = vadd.f32 %v2264_v45, %v1834_v36  ;;  %v2300_v24 = vpop.f32.mrf.mxu1  ;;  %v2319_v2 = vmax.f32 %v2245_v21, 0.0 }
 0x729   : > { %v2301_v23 = vadd.f32 %v2300_v24, %v1836_v39  ;;  %v2321_v30 = vmax.f32 %v2281_v62, 0.0 }
 0x72a   : > { %v2336_v53 = vmax.f32 %v2265_v48, 0.0 }
 0x72b   : > { %v2338_v31 = vmax.f32 %v2301_v23, 0.0 }
 0x72c   : > { %v2368_v61 = vpack.c.bf16 %v2336_v53, %v2320_v51 }
 0x72d   : > { %v2370_v42 = vpack.c.bf16 %v2338_v31, %v2322_v54  ;;  %v2246_v59 = vpop.f32.mrf.mxu3 }
 0x72e   : > { %v2247_v0 = vadd.f32 %v2246_v59, %v1833_v40  ;;  %v2282_v4 = vpop.f32.mrf.mxu2  ;;  %3657 = vmatmul.bf16.vlgmr.msrb.gmra.mxu0 %v2368_v61 }
 0x72f   : > { %v2283_v57 = vadd.f32 %v2282_v4, %v1835_v50  ;;  %3693 = vmatmul.bf16.vlgmr.msrb.gmra.mxu1 %v2370_v42  ;;  %v2267_v63 = vpop.f32.mrf.mxu0 }
 0x730   : > { %v2335_v3 = vmax.f32 %v2247_v0, 0.0  ;;  %v2303_v56 = vpop.f32.mrf.mxu1  ;;  %v2268_v7 = vadd.f32 %v2267_v63, %v1834_v36 }
 0x731   : > { %v2337_v16 = vmax.f32 %v2283_v57, 0.0  ;;  %v2304_v8 = vadd.f32 %v2303_v56, %v1836_v39 }
 0x732   : > { %v2367_v5 = vpack.c.bf16 %v2335_v3, %v2319_v2  ;;  %v2352_v52 = vmax.f32 %v2268_v7, 0.0 }
 0x733   : > { %v2369_v49 = vpack.c.bf16 %v2337_v16, %v2321_v30  ;;  %v2354_v12 = vmax.f32 %v2304_v8, 0.0 }
 0x734   : > { %3639 = vmatmul.bf16.vlgmr.msra.gmra.mxu3 %v2367_v5  ;;  %v2384_v17 = vpack.c.bf16 %v2352_v52, %v2352_v52 }
 0x735   : > { %3675 = vmatmul.bf16.vlgmr.msra.gmra.mxu2 %v2369_v49  ;;  %v2249_v11 = vpop.f32.mrf.mxu3  ;;  %v2386_v6 = vpack.c.bf16 %v2354_v12, %v2354_v12 }
 0x736   : > { %v2285_v44 = vpop.f32.mrf.mxu2  ;;  %v2250_v14 = vadd.f32 %v2249_v11, %v1833_v40 }
 0x737   : > { %v2269_v34 = vpop.f32.mrf.mxu0  ;;  %v2286_v15 = vadd.f32 %v2285_v44, %v1835_v50 }
 0x738   : > { %v2305_v13 = vpop.f32.mrf.mxu1  ;;  %v2351_v20 = vmax.f32 %v2250_v14, 0.0 }
 0x739   : > { %v2353_v32 = vmax.f32 %v2286_v15, 0.0 }
 0x73a   : > { %v2383_v60 = vpack.c.bf16 %v2351_v20, %v2351_v20 }
 0x73b   : > { %v2385_v55 = vpack.c.bf16 %v2353_v32, %v2353_v32 }
 0x73d   : > { %v2251_v19 = vpop.f32.mrf.mxu3 }
 0x73e   : > { %v2287_v10 = vpop.f32.mrf.mxu2  ;;  %3662 = vmatmul.bf16.gmra.mxu0 %v2384_v17 }
 0x73f   : > { %3698 = vmatmul.bf16.gmra.mxu1 %v2386_v6 }
 0x744   : > { %3644 = vmatmul.bf16.gmra.mxu3 %v2383_v60 }
 0x745   : > { %3680 = vmatmul.bf16.gmra.mxu2 %v2385_v55 }
 0x74b   : > { %v3442_v1 = vpop.f32.mrf.mxu0 }
 0x74c   : > { %v3478_v25 = vpop.f32.mrf.mxu1 }
 0x753   : > { %v3444_v27 = vpop.f32.mrf.mxu0 }
 0x754   : > { %v3480_v22 = vpop.f32.mrf.mxu1 }
 0x757   : > { %v3424_v26 = vpop.f32.mrf.mxu3 }
 0x758   : > { %v3425_v33 = vadd.f32 %v4894_v29, %v3424_v26  ;;  %v3460_v35 = vpop.f32.mrf.mxu2 }
 0x75a   : > { %v3443_v28 = vadd.f32 %v3442_v1, %v3425_v33 }
 0x75b   : > { %v3447_v36 = vpop.f32.mrf.mxu0 }
 0x75c   : > { %v3461_v38 = vadd.f32 %v3460_v35, %v3443_v28  ;;  %v3483_v39 = vpop.f32.mrf.mxu1 }
 0x75e   : > { %v3479_v37 = vadd.f32 %v3478_v25, %v3461_v38 }
 0x75f   : > { %v3426_v9 = vpop.f32.mrf.mxu3 }
 0x760   : > { %v3427_v18 = vadd.f32 %v4894_v29, %v3426_v9  ;;  %v3462_v43 = vpop.f32.mrf.mxu2 }
 0x762   : > { %v3445_v45 = vadd.f32 %v3444_v27, %v3427_v18 }
 0x763   : > { %v3449_v40 = vpop.f32.mrf.mxu0 }
 0x764   : > { %v3463_v48 = vadd.f32 %v3462_v43, %v3445_v45  ;;  %v3485_v24 = vpop.f32.mrf.mxu1 }
 0x766   : > { %v3481_v50 = vadd.f32 %v3480_v22, %v3463_v48 }
 0x767   : > { %v3429_v23 = vpop.f32.mrf.mxu3 }
 0x768   : > { %v3430_v51 = vadd.f32 %v4894_v29, %v3429_v23  ;;  %v3465_v53 = vpop.f32.mrf.mxu2 }
 0x76a   : > { %v3448_v54 = vadd.f32 %v3447_v36, %v3430_v51 }
 0x76b   : > { %v3514_v31 = vpop.f32.mrf.mxu0 }
 0x76c   : > { %v3466_v21 = vadd.f32 %v3465_v53, %v3448_v54  ;;  %v3550_v61 = vpop.f32.mrf.mxu1 }
 0x76e   : > { %v3484_v62 = vadd.f32 %v3483_v39, %v3466_v21 }
 0x76f   : > { %v3431_v42 = vpop.f32.mrf.mxu3 }
 0x770   : > { %v3467_v59 = vpop.f32.mrf.mxu2 }
 0x773   : > { %v3516_v0 = vpop.f32.mrf.mxu0 }
 0x774   : > { %v3552_v4 = vpop.f32.mrf.mxu1 }
 0x777   : > { %v3496_v57 = vpop.f32.mrf.mxu3 }
 0x778   : > { %v3497_v63 = vadd.f32 %v3496_v57, %v3479_v37  ;;  %v3532_v2 = vpop.f32.mrf.mxu2 }
 0x77a   : > { %v3515_v3 = vadd.f32 %v3514_v31, %v3497_v63 }
 0x77b   : > { %v3519_v56 = vpop.f32.mrf.mxu0 }
 0x77c   : > { %v3533_v30 = vadd.f32 %v3532_v2, %v3515_v3  ;;  %v3555_v16 = vpop.f32.mrf.mxu1 }
 0x77e   : > { %v3551_v5 = vadd.f32 %v3550_v61, %v3533_v30 }
 0x77f   : > { %v3498_v49 = vpop.f32.mrf.mxu3 }
 0x780   : > { %v3499_v7 = vadd.f32 %v3498_v49, %v3481_v50  ;;  %v3534_v8 = vpop.f32.mrf.mxu2 }
 0x782   : > { %v3517_v11 = vadd.f32 %v3516_v0, %v3499_v7 }
 0x783   : > { %v3521_v44 = vpop.f32.mrf.mxu0 }
 0x784   : > { %v3535_v34 = vadd.f32 %v3534_v8, %v3517_v11  ;;  %v3557_v52 = vpop.f32.mrf.mxu1 }
 0x786   : > { %v3553_v13 = vadd.f32 %v3552_v4, %v3535_v34 }
 0x787   : > { %v3501_v12 = vpop.f32.mrf.mxu3 }
 0x788   : > { %v3502_v14 = vadd.f32 %v3501_v12, %v3484_v62  ;;  %v3537_v15 = vpop.f32.mrf.mxu2 }
 0x78a   : > { %v3520_v17 = vadd.f32 %v3519_v56, %v3502_v14 }
 0x78b   : > { %v3586_v6 = vpop.f32.mrf.mxu0 }
 0x78c   : > { %v3538_v19 = vadd.f32 %v3537_v15, %v3520_v17  ;;  %v3622_v20 = vpop.f32.mrf.mxu1 }
 0x78e   : > { %v3556_v10 = vadd.f32 %v3555_v16, %v3538_v19 }
 0x78f   : > { %v3503_v32 = vpop.f32.mrf.mxu3 }
 0x790   : > { %v3539_v60 = vpop.f32.mrf.mxu2 }
 0x793   : > { %v3588_v55 = vpop.f32.mrf.mxu0 }
 0x794   : > { %v3624_v1 = vpop.f32.mrf.mxu1 }
 0x797   : > { %v3568_v25 = vpop.f32.mrf.mxu3 }
 0x798   : > { %v3604_v27 = vpop.f32.mrf.mxu2  ;;  %v3569_v39 = vadd.f32 %v3568_v25, %v3551_v5 }
 0x79a   : > { %v3587_v18 = vadd.f32 %v3586_v6, %v3569_v39 }
 0x79b   : > { %v3591_v22 = vpop.f32.mrf.mxu0 }
 0x79c   : > { %v3627_v29 = vpop.f32.mrf.mxu1  ;;  %v3605_v40 = vadd.f32 %v3604_v27, %v3587_v18 }
 0x79e   : > { %v3623_v51 = vadd.f32 %v3622_v20, %v3605_v40 }
 0x79f   : > { %v3570_v26 = vpop.f32.mrf.mxu3 }
 0x7a0   : > { %v3606_v33 = vpop.f32.mrf.mxu2  ;;  %v3571_v48 = vadd.f32 %v3570_v26, %v3553_v13 }
 0x7a2   : > { %v3589_v23 = vadd.f32 %v3588_v55, %v3571_v48 }
 0x7a3   : > { %v3593_v35 = vpop.f32.mrf.mxu0 }
 0x7a4   : > { %v3629_v28 = vpop.f32.mrf.mxu1  ;;  %v3607_v21 = vadd.f32 %v3606_v33, %v3589_v23 }
 0x7a6   : > { %v3625_v63 = vadd.f32 %v3624_v1, %v3607_v21 }
 0x7a7   : > { %v3573_v36 = vpop.f32.mrf.mxu3 }
 0x7a8   : > { %v3609_v38 = vpop.f32.mrf.mxu2  ;;  %v3574_v61 = vadd.f32 %v3573_v36, %v3556_v10 }
 0x7aa   : > { %v3592_v4 = vadd.f32 %v3591_v22, %v3574_v61 }
 0x7ab   : > { %v3658_v37 = vpop.f32.mrf.mxu0 }
 0x7ac   : > { %v3694_v9 = vpop.f32.mrf.mxu1  ;;  %v3610_v16 = vadd.f32 %v3609_v38, %v3592_v4 }
 0x7ae   : > { %v3628_v34 = vadd.f32 %v3627_v29, %v3610_v16 }
 0x7af   : > { %v3575_v43 = vpop.f32.mrf.mxu3 }
 0x7b0   : > { %v3611_v45 = vpop.f32.mrf.mxu2 }
 0x7b3   : > { %v3660_v24 = vpop.f32.mrf.mxu0 }
 0x7b4   : > { %v3696_v50 = vpop.f32.mrf.mxu1 }
 0x7b7   : > { %v3640_v53 = vpop.f32.mrf.mxu3 }
 0x7b8   : > { %v3641_v54 = vadd.f32 %v3640_v53, %v3623_v51  ;;  %v3676_v31 = vpop.f32.mrf.mxu2 }
 0x7ba   : > { %v3659_v62 = vadd.f32 %v3658_v37, %v3641_v54 }
 0x7bb   : > { %v3663_v42 = vpop.f32.mrf.mxu0 }
 0x7bc   : > { %v3677_v59 = vadd.f32 %v3676_v31, %v3659_v62  ;;  %v3699_v0 = vpop.f32.mrf.mxu1  ;;  %v4895_v62 = vld [vmem:[%s661_s4] ss:$0 sm:$0xff] }
 0x7be   : > { %v3695_v57 = vadd.f32 %v3694_v9, %v3677_v59 }
 0x7bf   : > { %v3642_v2 = vpop.f32.mrf.mxu3 }
 0x7c0   : > { %v3643_v3 = vadd.f32 %v3642_v2, %v3625_v63  ;;  %v3678_v56 = vpop.f32.mrf.mxu2  ;;  %v3703_v30 = vadd.f32 %v3695_v57, %v5621_v58 }
 0x7c2   : > { %v3661_v5 = vadd.f32 %v3660_v24, %v3643_v3  ;;  %v3706_v49 = vsel %vm749_vm2, %v3703_v30, 0.0 }
 0x7c3   : > { %v3665_v7 = vpop.f32.mrf.mxu0  ;;  %3707 = vadd.xlane.f32.xlu2 %v3706_v49 }
 0x7c4   : > { %v3679_v8 = vadd.f32 %v3678_v56, %v3661_v5  ;;  %v3701_v11 = vpop.f32.mrf.mxu1 }
 0x7c6   : > { %v3697_v44 = vadd.f32 %v3696_v50, %v3679_v8 }
 0x7c7   : > { %v3645_v52 = vpop.f32.mrf.mxu3 }
 0x7c8   : > { %v3646_v13 = vadd.f32 %v3645_v52, %v3628_v34  ;;  %v3681_v12 = vpop.f32.mrf.mxu2  ;;  %v3704_v14 = vadd.f32 %v3697_v44, %v5623_v46 }
 0x7ca   : > { %v3664_v15 = vadd.f32 %v3663_v42, %v3646_v13  ;;  %v3709_v17 = vsel %vm749_vm2, %v3704_v14, 0.0 }
 0x7cb   : > { %3710 = vadd.xlane.f32.xlu0 %v3709_v17 }
 0x7cc   : > { %v3682_v58 = vadd.f32 %v3681_v12, %v3664_v15 }
 0x7ce   : > { %v3700_v6 = vadd.f32 %v3699_v0, %v3682_v58 }
 0x7cf   : > { %v3647_v19 = vpop.f32.mrf.mxu3 }
 0x7d0   : > { %v3683_v20 = vpop.f32.mrf.mxu2  ;;  %v3705_v10 = vadd.f32 %v3700_v6, %v5640_v41 }
 0x7d2   : > { %v3712_v32 = vsel %vm1701_vm15, %v3705_v10, 0.0 }
 0x7d3   : > { %3713 = vadd.xlane.f32.xlu1 %v3712_v32 }
 0x836   : > { %v3708_v60 = vpop.xlane.xlu2 %3707 }
 0x837   : > { %v3715_v55 = vmul.f32 %v3708_v60, %v5540_v47 }
 0x839   : > { %v3718_v1 = vsub.f32 %v3703_v30, %v3715_v55 }
 0x83b   : > { %v3721_v25 = vmul.f32 %v3718_v1, %v3718_v1 }
 0x83d   : > { %v3724_v46 = vsel %vm749_vm2, %v3721_v25, 0.0 }
 0x83e   : > { %v3711_v27 = vpop.xlane.xlu0 %3710  ;;  %3725 = vadd.xlane.f32.xlu2 %v3724_v46 }
 0x83f   : > { %v3716_v22 = vmul.f32 %v3711_v27, %v5540_v47 }
 0x841   : > { %v3719_v29 = vsub.f32 %v3704_v14, %v3716_v22 }
 0x843   : > { %v3722_v26 = vmul.f32 %v3719_v29, %v3719_v29 }
 0x845   : > { %v3727_v33 = vsel %vm749_vm2, %v3722_v26, 0.0 }
 0x846   : > { %3728 = vadd.xlane.f32.xlu0 %v3727_v33  ;;  %v3714_v41 = vpop.xlane.xlu1 %3713 }
 0x847   : > { %v3717_v35 = vmul.f32 %v3714_v41, %v5540_v47 }
 0x849   : > { %v3720_v28 = vsub.f32 %v3705_v10, %v3717_v35 }
 0x84b   : > { %v3723_v36 = vmul.f32 %v3720_v28, %v3720_v28 }
 0x84d   : > { %v3730_v38 = vsel %vm1701_vm15, %v3723_v36, 0.0 }
 0x84e   : > { %3731 = vadd.xlane.f32.xlu1 %v3730_v38 }
 0x8b1   : > { %v3726_v39 = vpop.xlane.xlu2 %3725 }
 0x8b2   : > { %v3733_v37 = vmul.f32 %v3726_v39, %v5540_v47 }
 0x8b4   : > { %v3736_v9 = vadd.f32 1e-05, %v3733_v37 }
 0x8b6   : > { %4969 = vrsqrt.f32 %v3736_v9  ;;  %vm3745_vm12 = vweird.f32 %v3736_v9 }
 0x8b9   : > { %v3729_v18 = vpop.xlane.xlu0 %3728 }
 0x8ba   : > { %v3734_v43 = vmul.f32 %v3729_v18, %v5540_v47 }
 0x8bc   : > { %v4970_v45 = vpop.eup %4969  ;;  %v3737_v40 = vadd.f32 1e-05, %v3734_v43 }
 0x8bd   : > { %v3740_v48 = vmul.f32 %v4970_v45, %v3736_v9  ;;  %vm3746_vm11 = vweird.f32 %v4970_v45 }
 0x8be   : > { %4971 = vrsqrt.f32 %v3737_v40  ;;  %vm3747_vm13 = vmor %vm3745_vm12, %vm3746_vm11  ;;  %vm3755_vm0 = vweird.f32 %v3737_v40 }
 0x8bf   : > { %v3741_v24 = vmul.f32 %v4970_v45, %v3740_v48 }
 0x8c1   : > { %v3742_v50 = vmul.f32 0.5, %v3741_v24  ;;  %v3732_v23 = vpop.xlane.xlu1 %3731 }
 0x8c2   : > { %v3735_v51 = vmul.f32 %v3732_v23, %v5540_v47  ;;  %v4896_v47 = vld [vmem:[%s6021_s19] ss:$0 sm:$0xff] }
 0x8c3   : > { %v3743_v53 = vsub.f32 1.5, %v3742_v50 }
 0x8c4   : > { %v4972_v54 = vpop.eup %4971  ;;  %v3738_v31 = vadd.f32 1e-05, %v3735_v51 }
 0x8c5   : > { %v3744_v21 = vmul.f32 %v4970_v45, %v3743_v53  ;;  %v3750_v61 = vmul.f32 %v4972_v54, %v3737_v40  ;;  %vm3756_vm14 = vweird.f32 %v4972_v54 }
 0x8c6   : > { %4973 = vrsqrt.f32 %v3738_v31  ;;  %vm3757_vm1 = vmor %vm3755_vm0, %vm3756_vm14  ;;  %vm3765_vm4 = vweird.f32 %v3738_v31 }
 0x8c7   : > { %v3748_v42 = vsel %vm3747_vm13, %v4970_v45, %v3744_v21  ;;  %v3751_v59 = vmul.f32 %v4972_v54, %v3750_v61 }
 0x8c8   : > { %v3769_v0 = vmul.f32 %v3748_v42, %v3718_v1 }
 0x8c9   : > { %v3752_v4 = vmul.f32 0.5, %v3751_v59 }
 0x8ca   : > { %v3776_v57 = vmul.f32 %v4895_v62, %v3769_v0 }
 0x8cb   : > { %v3753_v63 = vsub.f32 1.5, %v3752_v4 }
 0x8cc   : > { %v4974_v2 = vpop.eup %4973  ;;  %v3783_v3 = vadd.f32 %v4896_v47, %v3776_v57 }
 0x8cd   : > { %v3754_v56 = vmul.f32 %v4972_v54, %v3753_v63  ;;  %v3760_v30 = vmul.f32 %v4974_v2, %v3738_v31  ;;  %vm3766_vm3 = vweird.f32 %v4974_v2 }
 0x8ce   : > { %3786 = vst.msk [vmem:[#allocation2] sm:$0xff] %vm749_vm2, %v3783_v3  ;;  %vm3767_vm5 = vmor %vm3765_vm4, %vm3766_vm3 }
 0x8cf   : > { %3789 = vst.msk [vmem:[%s6022_s3] sm:$0xff] %vm749_vm2, %v3783_v3  ;;  %v3758_v16 = vsel %vm3757_vm1, %v4972_v54, %v3754_v56  ;;  %v3761_v5 = vmul.f32 %v4974_v2, %v3760_v30 }
 0x8d0   : > { %v3770_v49 = vmul.f32 %v3758_v16, %v3719_v29 }
 0x8d1   : > { %v3762_v7 = vmul.f32 0.5, %v3761_v5 }
 0x8d2   : > { %v3777_v8 = vmul.f32 %v4895_v62, %v3770_v49 }
 0x8d3   : > { %v3763_v11 = vsub.f32 1.5, %v3762_v7 }
 0x8d4   : > { %v3784_v44 = vadd.f32 %v4896_v47, %v3777_v8 }
 0x8d5   : > { %v3764_v34 = vmul.f32 %v4974_v2, %v3763_v11 }
 0x8d6   : > { %3787 = vst.msk [vmem:[#allocation2 + $0x8] sm:$0xff] %vm749_vm2, %v3784_v44 }
 0x8d7   : > { %3790 = vst.msk [vmem:[%s6022_s3 + $0x8] sm:$0xff] %vm749_vm2, %v3784_v44  ;;  %v3768_v52 = vsel %vm3767_vm5, %v4974_v2, %v3764_v34 }
 0x8d8   : > { %v3771_v13 = vmul.f32 %v3768_v52, %v3720_v28 }
 0x8da   : > { %v3778_v12 = vmul.f32 %v4895_v62, %v3771_v13 }
 0x8dc   : > { %v3785_v14 = vadd.f32 %v4896_v47, %v3778_v12 }
 0x8de   : > { %3788 = vst.msk [vmem:[#allocation2 + $0x10] sm:$0xf] %vm1701_vm15, %v3785_v14 }
 0x8df   : > { %3791 = vst.msk [vmem:[%s6022_s3 + $0x10] sm:$0xf] %vm1701_vm15, %v3785_v14 }
 0x8e0 PF: > { %s6023_s16 = sld [smem:[#allocation4_spill]] }
 0x8e6   : > { %s26_s21 = sadd.s32 1, %s6023_s16  }
 0x8e7   : > { %p23_p5 = scmp.ge.s32.totalorder %s26_s21, 6  }
 0x8e9   :  { %25 = sbr.rel (!%p23_p5) target bundleno = 8 (0x8), region = 147 }

</bundles_post_ra>
